<compile_context>
chip_gen: v7x
topology: tpu7x:2x2x1
jax: 0.10.0
libtpu: 0.0.40
codegen_flags: <defaults>
</compile_context>

<pallas_src>
import functools

import jax
import jax.numpy as jnp
from jax.experimental import pallas as pl
from jax.experimental.pallas import tpu as pltpu


# ---------------------------------------------------------------------------
# Generation-specific fc1 tiling.
# ---------------------------------------------------------------------------
def fc1_config():
    try:
        kind = jax.devices()[0].device_kind.lower()
    except Exception:
        kind = ""
    buffered = hasattr(pl, "Buffered")
    if "v7" in kind or "7x" in kind:
        # 2 TCs / 64 MiB VMEM per core: keep >=2 parallel N blocks so both
        # cores each stream half of W1; 14 MiB tiles, 3-deep ~ 42 MiB/core.
        return dict(tn=2048, tk=1792, buffered=buffered)
    if "v6" in kind or "v5e" in kind or "v5 lite" in kind or "v5lite" in kind:
        # Single TC, 128 MiB VMEM: full-N tiles -> fully contiguous 16 KiB HBM
        # rows even without re-layout, and only 14 grid steps; 28 MiB tiles.
        return dict(tn=4096, tk=1792, buffered=buffered)
    # Unknown / older part: conservative 7 MiB tiles.
    return dict(tn=1024, tk=1792, buffered=buffered)


# ---------------------------------------------------------------------------
# fc1: relu(x @ W1 + b1); output block doubles as the K-reduction accumulator.
# ---------------------------------------------------------------------------
def _linear_relu_kernel(x_ref, w_ref, b_ref, o_ref):
    """One (N-tile, K-tile) grid step of relu(x @ W + b).

    x_ref : (M, K)   full activations, resident in VMEM across all steps
    w_ref : (tk, tn) one pre-blocked, HBM-contiguous W1 tile (hot stream)
    b_ref : (1, tn)  bias slab
    o_ref : (M, tn)  resident across the K axis -> used as the accumulator
    """
    k = pl.program_id(1)
    tk = w_ref.shape[0]

    @pl.when(k == 0)
    def _():
        o_ref[...] = jnp.zeros_like(o_ref)

    start = pl.multiple_of(k * tk, 128)      # aligned lane offset into x
    x_blk = x_ref[:, pl.ds(start, tk)]
    o_ref[...] += jnp.dot(x_blk, w_ref[...], preferred_element_type=jnp.float32)

    @pl.when(k == pl.num_programs(1) - 1)
    def _():
        o_ref[...] = jnp.maximum(o_ref[...] + b_ref[...], 0.0)


def linear_relu_blocked(x, w_blocked, b, *, buffered):
    """relu(x @ W + b) with W pre-blocked as (Kb, Nb, tk, tn)."""
    M, K = x.shape
    Kb, Nb, tk, tn = w_blocked.shape
    N = Nb * tn
    assert Kb * tk == K and b.shape == (1, N)

    # Weight spec: each (tk, tn) tile is one contiguous chunk of the blocked
    # array -> maximally efficient DMA on the ~411 MB stream. Deeper buffering
    # keeps an extra weight DMA in flight (compute/step << DMA/step here).
    if buffered:
        try:
            w_spec = pl.BlockSpec((None, None, tk, tn),
                                  lambda j, k: (k, j, 0, 0),
                                  pipeline_mode=pl.Buffered(3))
        except TypeError:  # older BlockSpec without pipeline_mode
            w_spec = pl.BlockSpec((None, None, tk, tn),
                                  lambda j, k: (k, j, 0, 0))
            buffered = False
    else:
        w_spec = pl.BlockSpec((None, None, tk, tn), lambda j, k: (k, j, 0, 0))

    depth = 3 if buffered else 2
    tile_bytes = tk * tn * 4
    # depth weight buffers + (x, bias, out double buffers + slack) headroom.
    vmem_limit = depth * tile_bytes + 12 * 1024 * 1024

    cost = pl.CostEstimate(
        flops=2 * M * K * N,
        transcendentals=0,
        bytes_accessed=K * N * 4 + M * K * 4 + M * N * 4 + N * 4,
    )

    return pl.pallas_call(
        _linear_relu_kernel,
        out_shape=jax.ShapeDtypeStruct((M, N), jnp.float32),
        grid_spec=pltpu.PrefetchScalarGridSpec(
            num_scalar_prefetch=0,
            grid=(Nb, Kb),  # reduction axis (K) last -> output-resident acc OK
            in_specs=[
                pl.BlockSpec((M, K), lambda j, k: (0, 0)),    # x: loaded once
                w_spec,                                        # W1 tiles
                pl.BlockSpec((1, tn), lambda j, k: (0, j)),    # bias
            ],
            out_specs=pl.BlockSpec((M, tn), lambda j, k: (0, j)),
        ),
        compiler_params=pltpu.CompilerParams(
            dimension_semantics=("parallel", "arbitrary"),
            vmem_limit_bytes=vmem_limit,
        ),
        cost_estimate=cost,
    )(x, w_blocked, b)


# ---------------------------------------------------------------------------
# fused tail: relu(fc2) + concat(audio) + relu(fc3) in a single tiny kernel.
# ---------------------------------------------------------------------------
def _fused_tail_kernel(h1_ref, w2_ref, b2_ref, audio_ref,
                       w3i_ref, w3a_ref, b3_ref, o_ref):
    # h2 = relu(h1 @ W2 + b2)                       (B, 100)
    h2 = jnp.maximum(
        jnp.dot(h1_ref[...], w2_ref[...], preferred_element_type=jnp.float32)
        + b2_ref[...],
        0.0,
    )
    # concat([h2, audio]) @ W3 == h2 @ W3[:100] + audio @ W3[100:]
    fused = (
        jnp.dot(h2, w3i_ref[...], preferred_element_type=jnp.float32)
        + jnp.dot(audio_ref[...], w3a_ref[...], preferred_element_type=jnp.float32)
        + b3_ref[...]
    )
    o_ref[...] = jnp.maximum(fused, 0.0)


def fused_tail(h1, w2, b2, audio_flat, w3_img, w3_aud, b3):
    B = h1.shape[0]
    # All operands (~1.7 MB total) fit in VMEM as single full blocks; no grid.
    return pl.pallas_call(
        _fused_tail_kernel,
        out_shape=jax.ShapeDtypeStruct((B, 3), jnp.float32),
    )(h1, w2, b2, audio_flat, w3_img, w3_aud, b3)


# ---------------------------------------------------------------------------
# params / forward
# ---------------------------------------------------------------------------
def init_params(key):
    """Deterministic synthetic parameters with the exact MyNet shapes.
    Weights are stored as (in, out) == PyTorch weight.T."""
    k1, k2, k3, k4, k5, k6 = jax.random.split(key, 6)
    scale = 0.02
    return {
        "w1": jax.random.normal(k1, (25088, 4096), jnp.float32) * scale,
        "b1": jax.random.normal(k2, (1, 4096), jnp.float32) * scale,
        "w2": jax.random.normal(k3, (4096, 100), jnp.float32) * scale,
        "b2": jax.random.normal(k4, (1, 100), jnp.float32) * scale,
        "w3": jax.random.normal(k5, (180, 3), jnp.float32) * scale,
        "b3": jax.random.normal(k6, (1, 3), jnp.float32) * scale,
    }


def prepare_params(params, *, tk, tn):
    """One-time (eager, outside jit) re-layout of W1 so every (tk, tn) tile is
    a fully-contiguous chunk in HBM: (K, N) -> (Kb, Nb, tk, tn)."""
    w1 = params["w1"]
    K, N = w1.shape
    Kb, Nb = K // tk, N // tn
    assert Kb * tk == K and Nb * tn == N, (K, N, tk, tn)
    w1_blocked = jnp.transpose(w1.reshape(Kb, tk, Nb, tn), (0, 2, 1, 3))
    kparams = dict(params)
    del kparams["w1"]
    kparams["w1_blocked"] = w1_blocked
    return kparams


@functools.partial(jax.jit, static_argnames=("buffered",))
def mynet_forward(kparams, img, audio, *, buffered=True):
    # img: (B, 25088), audio: (B, ...) flattened to (B, 80)
    B = img.shape[0]

    # fc1: HBM-bound W1 stream, generation-specific tiling (see fc1_config).
    h1 = linear_relu_blocked(img, kparams["w1_blocked"], kparams["b1"],
                             buffered=buffered)

    # Glue (plain JAX): flatten audio and split W3 along its input dim so the
    # fused tail kernel can realize the concat as a split matmul.
    audio_flat = audio.reshape(B, -1)               # (B, 80)
    w3 = kparams["w3"]
    w3_img, w3_aud = w3[:100], w3[100:]             # (100, 3), (80, 3)

    # fc2 + concat + fc3 fused into one tiny single-step kernel.
    return fused_tail(h1, kparams["w2"], kparams["b2"], audio_flat,
                      w3_img, w3_aud, kparams["b3"])


def reference_forward(params, img, audio):
    B = img.shape[0]
    h1 = jnp.maximum(img @ params["w1"] + params["b1"], 0.0)
    h2 = jnp.maximum(h1 @ params["w2"] + params["b2"], 0.0)
    fuse_in = jnp.concatenate([h2, audio.reshape(B, -1)], axis=1)
    return jnp.maximum(fuse_in @ params["w3"] + params["b3"], 0.0)


if __name__ == "__main__":
    key = jax.random.PRNGKey(0)
    kp, ki, ka = jax.random.split(key, 3)

    params = init_params(kp)

    B = 2
    img = jax.random.normal(ki, (B, 25088), jnp.float32)     # image features
    audio = jax.random.normal(ka, (B, 2, 40), jnp.float32)   # flattened to (B, 80)

    cfg = fc1_config()
    kparams = prepare_params(params, tk=cfg["tk"], tn=cfg["tn"])

    try:
        out = mynet_forward(kparams, img, audio, buffered=cfg["buffered"])
        out = jax.block_until_ready(out)
    except Exception:
        # Safety net: retry with default double-buffering if deeper pipelining
        # is rejected on this platform/JAX version.
        out = mynet_forward(kparams, img, audio, buffered=False)
        out = jax.block_until_ready(out)

    assert out.shape == (B, 3), out.shape

    ref = reference_forward(params, img, audio)
    assert jnp.allclose(out, ref, atol=1e-3, rtol=1e-3), (
        float(jnp.max(jnp.abs(out - ref)))
    )

    print("KERNEL_OK")
</pallas_src>

<mosaic_0001>
module attributes {stable_mosaic.version = 11 : i64} {
  func.func @_linear_relu_kernel(%arg0: i32, %arg1: i32, %arg2: memref<2x25088xf32, #tpu.memory_space<vmem>>, %arg3: memref<1x1x1792x1024xf32, #tpu.memory_space<vmem>>, %arg4: memref<1x1024xf32, #tpu.memory_space<vmem>>, %arg5: memref<2x1024xf32, #tpu.memory_space<vmem>>) attributes {dimension_semantics = [#tpu.dimension_semantics<parallel>, #tpu.dimension_semantics<arbitrary>], iteration_bounds = array<i64: 4, 14>, scalar_prefetch = 0 : i64, scratch_operands = 0 : i64, tpu.core_type = #tpu.core_type<tc>, window_params = [{pipeline_mode = #tpu.pipeline_mode<synchronous>, transform_indices = @transform_0, window_bounds = array<i64: 2, 25088>}, {transform_indices = @transform_1, window_bounds = array<i64: 1, 1, 1792, 1024>}, {transform_indices = @transform_2, window_bounds = array<i64: 1, 1024>}, {transform_indices = @transform_3, window_bounds = array<i64: 2, 1024>}]} {
    %c0_i32 = arith.constant 0 : i32
    %0 = arith.cmpi eq, %arg1, %c0_i32 : i32
    %1 = arith.extui %0 : i1 to i32
    %c0_i32_0 = arith.constant 0 : i32
    %2 = arith.cmpi ne, %1, %c0_i32_0 : i32
    scf.if %2 {
      %cst_10 = arith.constant 0.000000e+00 : f32
      %16 = vector.broadcast %cst_10 : f32 to vector<2x1024xf32>
      %c0_11 = arith.constant 0 : index
      %c0_12 = arith.constant 0 : index
      %17 = vector.load %arg5[%c0_11, %c0_12] : memref<2x1024xf32, #tpu.memory_space<vmem>>, vector<2x1024xf32>
      tpu.vector_store %arg5[%c0_11, %c0_12], %16 {strides = array<i32>} : memref<2x1024xf32, #tpu.memory_space<vmem>>, vector<2x1024xf32>,
    } else {
    }
    %c1792_i32 = arith.constant 1792 : i32
    %3 = arith.muli %arg1, %c1792_i32 : i32
    %4 = tpu.assume_multiple %3, 128 : i32
    %c0 = arith.constant 0 : index
    %5 = arith.index_cast %4 : i32 to index
    %6 = vector.load %arg2[%c0, %5] : memref<2x25088xf32, #tpu.memory_space<vmem>>, vector<2x1792xf32>
    %c0_1 = arith.constant 0 : index
    %c0_2 = arith.constant 0 : index
    %7 = vector.load %arg5[%c0_1, %c0_2] : memref<2x1024xf32, #tpu.memory_space<vmem>>, vector<2x1024xf32>
    %c0_3 = arith.constant 0 : index
    %c0_4 = arith.constant 0 : index
    %c0_5 = arith.constant 0 : index
    %c0_6 = arith.constant 0 : index
    %8 = vector.load %arg3[%c0_3, %c0_4, %c0_5, %c0_6] : memref<1x1x1792x1024xf32, #tpu.memory_space<vmem>>, vector<1x1x1792x1024xf32>
    %9 = vector.shape_cast %8 : vector<1x1x1792x1024xf32> to vector<1792x1024xf32>
    %cst = arith.constant dense<0.000000e+00> : vector<2x1024xf32>
    %10 = tpu.matmul %6, %9, %cst {dimension_numbers = #tpu.dot_dimension_numbers<[1], [0], [0], [1], [0, 0, 1, 1], [], []>} : vector<2x1792xf32>, vector<1792x1024xf32>, vector<2x1024xf32> -> vector<2x1024xf32>
    %11 = arith.addf %7, %10 : vector<2x1024xf32>
    %c0_7 = arith.constant 0 : index
    %c0_8 = arith.constant 0 : index
    %12 = vector.load %arg5[%c0_7, %c0_8] : memref<2x1024xf32, #tpu.memory_space<vmem>>, vector<2x1024xf32>
    tpu.vector_store %arg5[%c0_7, %c0_8], %11 {strides = array<i32>} : memref<2x1024xf32, #tpu.memory_space<vmem>>, vector<2x1024xf32>,
    %c13_i32 = arith.constant 13 : i32
    %13 = arith.cmpi eq, %arg1, %c13_i32 : i32
    %14 = arith.extui %13 : i1 to i32
    %c0_i32_9 = arith.constant 0 : i32
    %15 = arith.cmpi ne, %14, %c0_i32_9 : i32
    scf.if %15 {
      %c0_10 = arith.constant 0 : index
      %c0_11 = arith.constant 0 : index
      %16 = vector.load %arg5[%c0_10, %c0_11] : memref<2x1024xf32, #tpu.memory_space<vmem>>, vector<2x1024xf32>
      %c0_12 = arith.constant 0 : index
      %c0_13 = arith.constant 0 : index
      %17 = vector.load %arg4[%c0_12, %c0_13] : memref<1x1024xf32, #tpu.memory_space<vmem>>, vector<1x1024xf32>
      %18 = vector.broadcast %17 : vector<1x1024xf32> to vector<2x1024xf32>
      %19 = arith.addf %16, %18 : vector<2x1024xf32>
      %cst_14 = arith.constant 0.000000e+00 : f32
      %20 = vector.broadcast %cst_14 : f32 to vector<2x1024xf32>
      %21 = arith.maximumf %19, %20 : vector<2x1024xf32>
      %c0_15 = arith.constant 0 : index
      %c0_16 = arith.constant 0 : index
      %22 = vector.load %arg5[%c0_15, %c0_16] : memref<2x1024xf32, #tpu.memory_space<vmem>>, vector<2x1024xf32>
      tpu.vector_store %arg5[%c0_15, %c0_16], %21 {strides = array<i32>} : memref<2x1024xf32, #tpu.memory_space<vmem>>, vector<2x1024xf32>,
    } else {
    }
    return
  }
  func.func @transform_0(%arg0: i32, %arg1: i32) -> (i32, i32) {
    %c0_i32 = arith.constant 0 : i32
    %c0_i32_0 = arith.constant 0 : i32
    %c0_i32_1 = arith.constant 0 : i32
    return %c0_i32, %c0_i32_0 : i32, i32
  }
  func.func @transform_1(%arg0: i32, %arg1: i32) -> (i32, i32, i32, i32) {
    %c0_i32 = arith.constant 0 : i32
    %c0_i32_0 = arith.constant 0 : i32
    %c0_i32_1 = arith.constant 0 : i32
    return %arg1, %arg0, %c0_i32, %c0_i32_0 : i32, i32, i32, i32
  }
  func.func @transform_2(%arg0: i32, %arg1: i32) -> (i32, i32) {
    %c0_i32 = arith.constant 0 : i32
    %c0_i32_0 = arith.constant 0 : i32
    return %c0_i32, %arg0 : i32, i32
  }
  func.func @transform_3(%arg0: i32, %arg1: i32) -> (i32, i32) {
    %c0_i32 = arith.constant 0 : i32
    %c0_i32_0 = arith.constant 0 : i32
    return %c0_i32, %arg0 : i32, i32
  }
}

module attributes {stable_mosaic.version = 11 : i64} {
  func.func @_fused_tail_kernel(%arg0: memref<2x4096xf32, #tpu.memory_space<vmem>>, %arg1: memref<4096x100xf32, #tpu.memory_space<vmem>>, %arg2: memref<1x100xf32, #tpu.memory_space<vmem>>, %arg3: memref<2x80xf32, #tpu.memory_space<vmem>>, %arg4: memref<100x3xf32, #tpu.memory_space<vmem>>, %arg5: memref<80x3xf32, #tpu.memory_space<vmem>>, %arg6: memref<1x3xf32, #tpu.memory_space<vmem>>, %arg7: memref<2x3xf32, #tpu.memory_space<vmem>>) attributes {dimension_semantics = [], scalar_prefetch = 0 : i64, scratch_operands = 0 : i64, tpu.core_type = #tpu.core_type<tc>} {
    %c0 = arith.constant 0 : index
    %c0_0 = arith.constant 0 : index
    %0 = vector.load %arg0[%c0, %c0_0] : memref<2x4096xf32, #tpu.memory_space<vmem>>, vector<2x4096xf32>
    %c0_1 = arith.constant 0 : index
    %c0_2 = arith.constant 0 : index
    %1 = vector.load %arg1[%c0_1, %c0_2] : memref<4096x100xf32, #tpu.memory_space<vmem>>, vector<4096x100xf32>
    %cst = arith.constant dense<0.000000e+00> : vector<2x100xf32>
    %2 = tpu.matmul %0, %1, %cst {dimension_numbers = #tpu.dot_dimension_numbers<[1], [0], [0], [1], [0, 0, 1, 1], [], []>} : vector<2x4096xf32>, vector<4096x100xf32>, vector<2x100xf32> -> vector<2x100xf32>
    %c0_3 = arith.constant 0 : index
    %c0_4 = arith.constant 0 : index
    %3 = vector.load %arg2[%c0_3, %c0_4] : memref<1x100xf32, #tpu.memory_space<vmem>>, vector<1x100xf32>
    %4 = vector.broadcast %3 : vector<1x100xf32> to vector<2x100xf32>
    %5 = arith.addf %2, %4 : vector<2x100xf32>
    %cst_5 = arith.constant 0.000000e+00 : f32
    %6 = vector.broadcast %cst_5 : f32 to vector<2x100xf32>
    %7 = arith.maximumf %5, %6 : vector<2x100xf32>
    %c0_6 = arith.constant 0 : index
    %c0_7 = arith.constant 0 : index
    %8 = vector.load %arg4[%c0_6, %c0_7] : memref<100x3xf32, #tpu.memory_space<vmem>>, vector<100x3xf32>
    %cst_8 = arith.constant dense<0.000000e+00> : vector<2x3xf32>
    %9 = tpu.matmul %7, %8, %cst_8 {dimension_numbers = #tpu.dot_dimension_numbers<[1], [0], [0], [1], [0, 0, 1, 1], [], []>} : vector<2x100xf32>, vector<100x3xf32>, vector<2x3xf32> -> vector<2x3xf32>
    %c0_9 = arith.constant 0 : index
    %c0_10 = arith.constant 0 : index
    %10 = vector.load %arg3[%c0_9, %c0_10] : memref<2x80xf32, #tpu.memory_space<vmem>>, vector<2x80xf32>
    %c0_11 = arith.constant 0 : index
    %c0_12 = arith.constant 0 : index
    %11 = vector.load %arg5[%c0_11, %c0_12] : memref<80x3xf32, #tpu.memory_space<vmem>>, vector<80x3xf32>
    %cst_13 = arith.constant dense<0.000000e+00> : vector<2x3xf32>
    %12 = tpu.matmul %10, %11, %cst_13 {dimension_numbers = #tpu.dot_dimension_numbers<[1], [0], [0], [1], [0, 0, 1, 1], [], []>} : vector<2x80xf32>, vector<80x3xf32>, vector<2x3xf32> -> vector<2x3xf32>
    %13 = arith.addf %9, %12 : vector<2x3xf32>
    %c0_14 = arith.constant 0 : index
    %c0_15 = arith.constant 0 : index
    %14 = vector.load %arg6[%c0_14, %c0_15] : memref<1x3xf32, #tpu.memory_space<vmem>>, vector<1x3xf32>
    %15 = vector.broadcast %14 : vector<1x3xf32> to vector<2x3xf32>
    %16 = arith.addf %13, %15 : vector<2x3xf32>
    %cst_16 = arith.constant 0.000000e+00 : f32
    %17 = vector.broadcast %cst_16 : f32 to vector<2x3xf32>
    %18 = arith.maximumf %16, %17 : vector<2x3xf32>
    %c0_17 = arith.constant 0 : index
    %c0_18 = arith.constant 0 : index
    %19 = vector.load %arg7[%c0_17, %c0_18] : memref<2x3xf32, #tpu.memory_space<vmem>>, vector<2x3xf32>
    tpu.vector_store %arg7[%c0_17, %c0_18], %18 {strides = array<i32>} : memref<2x3xf32, #tpu.memory_space<vmem>>, vector<2x3xf32>,
    return
  }
}

</mosaic_0001>

<bundles_post_ra>
// kernel: mynet_forward.3
= control target key start
LH: loop header
LB: loop body
LE: loop exit
PB: predicated region body
PF: predicated region fallthrough
CT: control target
= control target key end

     0   :  { %v3276_v47 = vmov 1983009808   ;;  %v566_v49 = vlaneseq  ;;  %s5059_s0 = inlined_call_operand.vmem [shape: f32[2,4096], index: 0, kind: input, shape index: {}]   ;;  %s5060_s1 = inlined_call_operand.vmem [shape: f32[4096,100], index: 1, kind: input, shape index: {}]   ;;  %s5061_s2 = inlined_call_operand.vmem [shape: f32[1,100], index: 2, kind: input, shape index: {}]   ;;  %s5062_s3 = inlined_call_operand.vmem [shape: f32[2,80], index: 3, kind: input, shape index: {}]   ;;  %s5063_s4 = inlined_call_operand.vmem [shape: f32[100,3], index: 4, kind: input, shape index: {}]   ;;  %s5064_s5 = inlined_call_operand.vmem [shape: f32[80,3], index: 5, kind: input, shape index: {}]   ;;  %s5065_s6 = inlined_call_operand.vmem [shape: f32[1,3], index: 6, kind: input, shape index: {}]   ;;  %s5066_s7 = inlined_call_operand.hbm [shape: f32[2,3], index: 7, kind: output, shape index: {}]  }
   0x1   :  { %v51_v0 = vld [vmem:[%s5060_s1 + $0x80] sm:$0xff]  ;;  %v52_v1 = vld [vmem:[%s5060_s1 + $0x88] sm:$0xff]  ;;  %v53_v11 = vld [vmem:[%s5060_s1 + $0x90] sm:$0xff]  ;;  %v564_v48 = vunpack.c.l.s4 %v3276_v47 }
   0x2   :  { %v35_v2 = vld [vmem:[%s5060_s1] sm:$0xff]  ;;  %v2694_v3 = vpack.c.bf16 %v52_v1, %v51_v0  ;;  %v36_v4 = vld [vmem:[%s5060_s1 + $0x8] sm:$0xff]  ;;  %v54_v13 = vld [vmem:[%s5060_s1 + $0x98] sm:$0xff]  ;;  %v567_v0 = vshrl.u32 %v566_v49, 7 }
   0x3   :  { %v83_v5 = vld [vmem:[%s5060_s1 + $0x180] sm:$0xff]  ;;  %v84_v6 = vld [vmem:[%s5060_s1 + $0x188] sm:$0xff]  ;;  %v2696_v7 = vpack.c.bf16 %v36_v4, %v35_v2  ;;  %v37_v14 = vld [vmem:[%s5060_s1 + $0x10] sm:$0xff]  ;;  %v2698_v16 = vpack.c.bf16 %v54_v13, %v53_v11  ;;  %v565_v63 = vunpack.c.0.s8 %v564_v48 }
   0x4   :  { %v2726_v8 = vpack.c.bf16 %v84_v6, %v83_v5  ;;  %v67_v9 = vld [vmem:[%s5060_s1 + $0x100] sm:$0xff]  ;;  %v68_v10 = vld [vmem:[%s5060_s1 + $0x108] sm:$0xff]  ;;  %2695 = vmatprep.subr.bf16.mxu0 %v2694_v3  ;;  %v38_v15 = vld [vmem:[%s5060_s1 + $0x18] sm:$0xff] }
   0x5   :  { %v2728_v12 = vpack.c.bf16 %v68_v10, %v67_v9  ;;  %2697 = vmatpush3.bf16.msra.mxu0 %v2696_v7  ;;  %v2700_v17 = vpack.c.bf16 %v38_v15, %v37_v14  ;;  %v85_v18 = vld [vmem:[%s5060_s1 + $0x190] sm:$0xff]  ;;  %v86_v19 = vld [vmem:[%s5060_s1 + $0x198] sm:$0xff]  ;;  %v55_v23 = vld [vmem:[%s5060_s1 + $0xa0] sm:$0xff]  ;;  %v3471_v13 = vsub.s32 %v565_v63, %v567_v0 }
   0x6   :  { %2727 = vmatprep.subr.bf16.mxu1 %v2726_v8  ;;  %v69_v20 = vld [vmem:[%s5060_s1 + $0x110] sm:$0xff]  ;;  %v2730_v21 = vpack.c.bf16 %v86_v19, %v85_v18  ;;  %v70_v22 = vld [vmem:[%s5060_s1 + $0x118] sm:$0xff]  ;;  %v56_v24 = vld [vmem:[%s5060_s1 + $0xa8] sm:$0xff]  ;;  %2699 = vmatprep.subr.bf16.mxu0 %v2698_v16 }
   0x7   :  { %2729 = vmatpush3.bf16.msra.mxu1 %v2728_v12  ;;  %v2732_v25 = vpack.c.bf16 %v70_v22, %v69_v20  ;;  %v2702_v26 = vpack.c.bf16 %v56_v24, %v55_v23  ;;  %v39_v27 = vld [vmem:[%s5060_s1 + $0x20] sm:$0xff]  ;;  %v40_v28 = vld [vmem:[%s5060_s1 + $0x28] sm:$0xff]  ;;  %v57_v35 = vld [vmem:[%s5060_s1 + $0xb0] sm:$0xff] }
   0x8   :  { %v87_v29 = vld [vmem:[%s5060_s1 + $0x1a0] sm:$0xff]  ;;  %2731 = vmatprep.subr.bf16.mxu1 %v2730_v21  ;;  %v88_v30 = vld [vmem:[%s5060_s1 + $0x1a8] sm:$0xff]  ;;  %v2704_v33 = vpack.c.bf16 %v40_v28, %v39_v27  ;;  %v58_v36 = vld [vmem:[%s5060_s1 + $0xb8] sm:$0xff] }
   0x9   :  { %v71_v31 = vld [vmem:[%s5060_s1 + $0x120] sm:$0xff]  ;;  %v72_v32 = vld [vmem:[%s5060_s1 + $0x128] sm:$0xff]  ;;  %2701 = vmatpush3.bf16.msra.mxu0 %v2700_v17  ;;  %v2734_v34 = vpack.c.bf16 %v88_v30, %v87_v29  ;;  %v41_v37 = vld [vmem:[%s5060_s1 + $0x30] sm:$0xff]  ;;  %v2706_v39 = vpack.c.bf16 %v58_v36, %v57_v35 }
   0xa   :  { %2703 = vmatprep.subr.bf16.mxu0 %v2702_v26  ;;  %v2736_v38 = vpack.c.bf16 %v72_v32, %v71_v31  ;;  %v42_v40 = vld [vmem:[%s5060_s1 + $0x38] sm:$0xff]  ;;  %v89_v41 = vld [vmem:[%s5060_s1 + $0x1b0] sm:$0xff]  ;;  %v59_v46 = vld [vmem:[%s5060_s1 + $0xc0] sm:$0xff] }
   0xb   :  { %2733 = vmatpush3.bf16.msra.mxu1 %v2732_v25  ;;  %v90_v42 = vld [vmem:[%s5060_s1 + $0x1b8] sm:$0xff]  ;;  %v73_v44 = vld [vmem:[%s5060_s1 + $0x130] sm:$0xff]  ;;  %v60_v50 = vld [vmem:[%s5060_s1 + $0xc8] sm:$0xff]  ;;  %v2708_v51 = vpack.c.bf16 %v42_v40, %v41_v37 }
   0xc   :  { %2735 = vmatprep.subr.bf16.mxu1 %v2734_v34  ;;  %v2738_v43 = vpack.c.bf16 %v90_v42, %v89_v41  ;;  %v74_v45 = vld [vmem:[%s5060_s1 + $0x138] sm:$0xff]  ;;  %v91_v52 = vld [vmem:[%s5060_s1 + $0x1c0] sm:$0xff]  ;;  %v92_v53 = vld [vmem:[%s5060_s1 + $0x1c8] sm:$0xff]  ;;  %v2710_v55 = vpack.c.bf16 %v60_v50, %v59_v46 }
   0xd   :  { %2705 = vmatpush3.bf16.msra.mxu0 %v2704_v33  ;;  %v2740_v54 = vpack.c.bf16 %v74_v45, %v73_v44  ;;  %v43_v56 = vld [vmem:[%s5060_s1 + $0x40] sm:$0xff]  ;;  %v44_v57 = vld [vmem:[%s5060_s1 + $0x48] sm:$0xff]  ;;  %v2742_v59 = vpack.c.bf16 %v92_v53, %v91_v52  ;;  %v61_v61 = vld [vmem:[%s5060_s1 + $0xd0] sm:$0xff] }
   0xe   :  { %2707 = vmatprep.subr.bf16.mxu0 %v2706_v39  ;;  %v75_v58 = vld [vmem:[%s5060_s1 + $0x140] sm:$0xff]  ;;  %v76_v60 = vld [vmem:[%s5060_s1 + $0x148] sm:$0xff]  ;;  %v62_v62 = vld [vmem:[%s5060_s1 + $0xd8] sm:$0xff]  ;;  %v2712_v3 = vpack.c.bf16 %v44_v57, %v43_v56 }
   0xf   :  { %2737 = vmatpush3.bf16.msra.mxu1 %v2736_v38  ;;  %v93_v1 = vld [vmem:[%s5060_s1 + $0x1d0] sm:$0xff]  ;;  %v94_v2 = vld [vmem:[%s5060_s1 + $0x1d8] sm:$0xff]  ;;  %v2744_v4 = vpack.c.bf16 %v76_v60, %v75_v58  ;;  %v2714_v5 = vpack.c.bf16 %v62_v62, %v61_v61  ;;  %v63_v11 = vld [vmem:[%s5060_s1 + $0xe0] sm:$0xff] }
  0x10   :  { %2739 = vmatprep.subr.bf16.mxu1 %v2738_v43  ;;  %v45_v6 = vld [vmem:[%s5060_s1 + $0x50] sm:$0xff]  ;;  %v46_v7 = vld [vmem:[%s5060_s1 + $0x58] sm:$0xff]  ;;  %v2746_v9 = vpack.c.bf16 %v94_v2, %v93_v1  ;;  %v64_v12 = vld [vmem:[%s5060_s1 + $0xe8] sm:$0xff] }
  0x11   :  { %2709 = vmatpush3.bf16.msra.mxu0 %v2708_v51  ;;  %v77_v8 = vld [vmem:[%s5060_s1 + $0x150] sm:$0xff]  ;;  %v78_v10 = vld [vmem:[%s5060_s1 + $0x158] sm:$0xff]  ;;  %v95_v14 = vld [vmem:[%s5060_s1 + $0x1e0] sm:$0xff]  ;;  %v2716_v16 = vpack.c.bf16 %v46_v7, %v45_v6  ;;  %v2718_v19 = vpack.c.bf16 %v64_v12, %v63_v11 }
  0x12   :  { %2711 = vmatprep.subr.bf16.mxu0 %v2710_v55  ;;  %v96_v15 = vld [vmem:[%s5060_s1 + $0x1e8] sm:$0xff]  ;;  %v47_v17 = vld [vmem:[%s5060_s1 + $0x60] sm:$0xff]  ;;  %v2748_v18 = vpack.c.bf16 %v78_v10, %v77_v8  ;;  %v65_v25 = vld [vmem:[%s5060_s1 + $0xf0] sm:$0xff] }
  0x13   :  { %2741 = vmatpush3.bf16.msra.mxu1 %v2740_v54  ;;  %v48_v20 = vld [vmem:[%s5060_s1 + $0x68] sm:$0xff]  ;;  %v79_v21 = vld [vmem:[%s5060_s1 + $0x160] sm:$0xff]  ;;  %v2750_v23 = vpack.c.bf16 %v96_v15, %v95_v14  ;;  %v66_v26 = vld [vmem:[%s5060_s1 + $0xf8] sm:$0xff] }
  0x14   :  { %2743 = vmatprep.subr.bf16.mxu1 %v2742_v59  ;;  %v27_v22 = vld [vmem:[%s5059_s0] sm:$0xff]  ;;  %v80_v24 = vld [vmem:[%s5060_s1 + $0x168] sm:$0xff]  ;;  %v97_v29 = vld [vmem:[%s5060_s1 + $0x1f0] sm:$0xff]  ;;  %v2720_v31 = vpack.c.bf16 %v48_v20, %v47_v17  ;;  %v2722_v35 = vpack.c.bf16 %v66_v26, %v65_v25 }
  0x15   :  { %2713 = vmatpush3.bf16.msra.mxu0 %v2712_v3  ;;  %v569_v27 = vrot.slane %v27_v22, %v3471_v13  ;;  %v562_v28 = vcombine.high %v27_v22, %v27_v22  ;;  %v98_v30 = vld [vmem:[%s5060_s1 + $0x1f8] sm:$0xff]  ;;  %v2752_v34 = vpack.c.bf16 %v80_v24, %v79_v21  ;;  %v49_v36 = vld [vmem:[%s5060_s1 + $0x70] sm:$0xff]  ;;  %v115_v41 = vld [vmem:[%s5060_s1 + $0x280] sm:$0xff] }
  0x16   :  { %2715 = vmatprep.subr.bf16.mxu0 %v2714_v5  ;;  %v50_v37 = vld [vmem:[%s5060_s1 + $0x78] sm:$0xff]  ;;  %v81_v38 = vld [vmem:[%s5060_s1 + $0x170] sm:$0xff]  ;;  %v2754_v39 = vpack.c.bf16 %v98_v30, %v97_v29  ;;  %v116_v42 = vld [vmem:[%s5060_s1 + $0x288] sm:$0xff] }
  0x17   :  { %2745 = vmatpush3.bf16.msra.mxu1 %v2744_v4  ;;  %v577_v32 = vcombine.high %v569_v27, %v569_v27  ;;  %v576_v33 = vrot.slane %v562_v28, %v3471_v13  ;;  %v82_v40 = vld [vmem:[%s5060_s1 + $0x178] sm:$0xff]  ;;  %v147_v44 = vld [vmem:[%s5060_s1 + $0x380] sm:$0xff]  ;;  %v148_v45 = vld [vmem:[%s5060_s1 + $0x388] sm:$0xff]  ;;  %v2724_v46 = vpack.c.bf16 %v50_v37, %v49_v36  ;;  %v2758_v48 = vpack.c.bf16 %v116_v42, %v115_v41 }
  0x18   :  { %2747 = vmatprep.subr.bf16.mxu1 %v2746_v9  ;;  %v2756_v47 = vpack.c.bf16 %v82_v40, %v81_v38  ;;  %v99_v49 = vld [vmem:[%s5060_s1 + $0x200] sm:$0xff]  ;;  %v100_v50 = vld [vmem:[%s5060_s1 + $0x208] sm:$0xff]  ;;  %v2790_v52 = vpack.c.bf16 %v148_v45, %v147_v44  ;;  %v117_v54 = vld [vmem:[%s5060_s1 + $0x290] sm:$0xff] }
  0x19   :  { %2717 = vmatpush3.bf16.msra.mxu0 %v2716_v16  ;;  %794 = vmatprep.mubr.f32.mxu0 %v577_v32  ;;  %v578_v43 = vcombine.high %v576_v33, %v576_v33  ;;  %v131_v51 = vld [vmem:[%s5060_s1 + $0x300] sm:$0xff]  ;;  %v132_v53 = vld [vmem:[%s5060_s1 + $0x308] sm:$0xff]  ;;  %v118_v55 = vld [vmem:[%s5060_s1 + $0x298] sm:$0xff]  ;;  %v2760_v58 = vpack.c.bf16 %v100_v50, %v99_v49 }
  0x1a   :  { %2719 = vmatprep.subr.bf16.mxu0 %v2718_v19  ;;  %v149_v56 = vld [vmem:[%s5060_s1 + $0x390] sm:$0xff]  ;;  %v150_v57 = vld [vmem:[%s5060_s1 + $0x398] sm:$0xff]  ;;  %v2792_v59 = vpack.c.bf16 %v132_v53, %v131_v51  ;;  %v2762_v60 = vpack.c.bf16 %v118_v55, %v117_v54  ;;  %v119_v2 = vld [vmem:[%s5060_s1 + $0x2a0] sm:$0xff] }
  0x1b   :  { %2749 = vmatpush3.bf16.msra.mxu1 %v2748_v18  ;;  %864 = vmatprep.mubr.f32.mxu1 %v578_v43  ;;  %v101_v61 = vld [vmem:[%s5060_s1 + $0x210] sm:$0xff]  ;;  %v102_v62 = vld [vmem:[%s5060_s1 + $0x218] sm:$0xff]  ;;  %v2794_v0 = vpack.c.bf16 %v150_v57, %v149_v56  ;;  %v120_v3 = vld [vmem:[%s5060_s1 + $0x2a8] sm:$0xff] }
  0x1c   :  { %2751 = vmatprep.subr.bf16.mxu1 %v2750_v23  ;;  %v133_v63 = vld [vmem:[%s5060_s1 + $0x310] sm:$0xff]  ;;  %v134_v1 = vld [vmem:[%s5060_s1 + $0x318] sm:$0xff]  ;;  %v151_v4 = vld [vmem:[%s5060_s1 + $0x3a0] sm:$0xff]  ;;  %v2764_v6 = vpack.c.bf16 %v102_v62, %v101_v61  ;;  %v2766_v8 = vpack.c.bf16 %v120_v3, %v119_v2 }
  0x1d   :  { %2721 = vmatpush3.bf16.msra.mxu0 %v2720_v31  ;;  %v152_v5 = vld [vmem:[%s5060_s1 + $0x3a8] sm:$0xff]  ;;  %v2796_v7 = vpack.c.bf16 %v134_v1, %v133_v63  ;;  %v103_v9 = vld [vmem:[%s5060_s1 + $0x220] sm:$0xff]  ;;  %v121_v15 = vld [vmem:[%s5060_s1 + $0x2b0] sm:$0xff] }
  0x1e   :  { %2723 = vmatprep.subr.bf16.mxu0 %v2722_v35  ;;  %v104_v10 = vld [vmem:[%s5060_s1 + $0x228] sm:$0xff]  ;;  %v135_v11 = vld [vmem:[%s5060_s1 + $0x320] sm:$0xff]  ;;  %v2798_v12 = vpack.c.bf16 %v152_v5, %v151_v4  ;;  %v122_v16 = vld [vmem:[%s5060_s1 + $0x2b8] sm:$0xff] }
  0x1f   :  { %2753 = vmatpush3.bf16.msra.mxu1 %v2752_v34  ;;  %v136_v14 = vld [vmem:[%s5060_s1 + $0x328] sm:$0xff]  ;;  %v153_v17 = vld [vmem:[%s5060_s1 + $0x3b0] sm:$0xff]  ;;  %v154_v18 = vld [vmem:[%s5060_s1 + $0x3b8] sm:$0xff]  ;;  %v2768_v19 = vpack.c.bf16 %v104_v10, %v103_v9  ;;  %v2770_v21 = vpack.c.bf16 %v122_v16, %v121_v15 }
  0x20   :  { %2755 = vmatprep.subr.bf16.mxu1 %v2754_v39  ;;  %v2800_v20 = vpack.c.bf16 %v136_v14, %v135_v11  ;;  %v105_v22 = vld [vmem:[%s5060_s1 + $0x230] sm:$0xff]  ;;  %v106_v23 = vld [vmem:[%s5060_s1 + $0x238] sm:$0xff]  ;;  %v2802_v25 = vpack.c.bf16 %v154_v18, %v153_v17  ;;  %v124_v28 = vld [vmem:[%s5060_s1 + $0x2c8] sm:$0xff] }
  0x21   :  { %2725 = vmatpush3.bf16.msra.mxu0 %v2724_v46  ;;  %v137_v24 = vld [vmem:[%s5060_s1 + $0x330] sm:$0xff]  ;;  %v138_v26 = vld [vmem:[%s5060_s1 + $0x338] sm:$0xff]  ;;  %v155_v29 = vld [vmem:[%s5060_s1 + $0x3c0] sm:$0xff]  ;;  %v2772_v32 = vpack.c.bf16 %v106_v23, %v105_v22 }
  0x22   :  { %2759 = vmatprep.subr.bf16.mxu0 %v2758_v48  ;;  %v156_v30 = vld [vmem:[%s5060_s1 + $0x3c8] sm:$0xff]  ;;  %v2804_v35 = vpack.c.bf16 %v138_v26, %v137_v24  ;;  %v107_v37 = vld [vmem:[%s5060_s1 + $0x240] sm:$0xff]  ;;  %v125_v42 = vld [vmem:[%s5060_s1 + $0x2d0] sm:$0xff] }
  0x23   :  { %2757 = vmatpush3.bf16.msra.mxu1 %v2756_v47  ;;  %v28_v31 = vld [vmem:[%s5059_s0 + $0x8] sm:$0xff]  ;;  %v139_v39 = vld [vmem:[%s5060_s1 + $0x340] sm:$0xff]  ;;  %v2806_v40 = vpack.c.bf16 %v156_v30, %v155_v29  ;;  %v126_v43 = vld [vmem:[%s5060_s1 + $0x2d8] sm:$0xff] }
  0x24   :  { %2791 = vmatprep.subr.bf16.mxu1 %v2790_v52  ;;  %795 = vmatmul.mubr.f32.vlgmr.msra.gmra.mrb[0].mxu0 %v569_v27  ;;  %v123_v27 = vld [vmem:[%s5060_s1 + $0x2c0] sm:$0xff]  ;;  %v579_v34 = vcombine.high %v28_v31, %v28_v31  ;;  %v108_v38 = vld [vmem:[%s5060_s1 + $0x248] sm:$0xff]  ;;  %v157_v46 = vld [vmem:[%s5060_s1 + $0x3d0] sm:$0xff]  ;;  %v2778_v51 = vpack.c.bf16 %v126_v43, %v125_v42 }
  0x25   :  { %2761 = vmatpush3.bf16.msra.mxu0 %v2760_v58  ;;  %v2774_v36 = vpack.c.bf16 %v124_v28, %v123_v27  ;;  %v140_v41 = vld [vmem:[%s5060_s1 + $0x348] sm:$0xff]  ;;  %v158_v47 = vld [vmem:[%s5060_s1 + $0x3d8] sm:$0xff]  ;;  %v2776_v48 = vpack.c.bf16 %v108_v38, %v107_v37  ;;  %v109_v52 = vld [vmem:[%s5060_s1 + $0x250] sm:$0xff] }
  0x26   :  { %865 = vmatmul.mubr.f32.vlgmr.msra.gmra.mrb[0].mxu1 %v576_v33  ;;  %2763 = vmatprep.subr.bf16.mxu0 %v2762_v60  ;;  %v3632_v33 = vrot.slane %v28_v31, %v3471_v13  ;;  %v3655_v45 = vrot.slane %v579_v34, %v3471_v13  ;;  %v2808_v50 = vpack.c.bf16 %v140_v41, %v139_v39  ;;  %v110_v53 = vld [vmem:[%s5060_s1 + $0x258] sm:$0xff]  ;;  %v141_v54 = vld [vmem:[%s5060_s1 + $0x350] sm:$0xff]  ;;  %v127_v57 = vld [vmem:[%s5060_s1 + $0x2e0] sm:$0xff] }
  0x27   :  { %2793 = vmatpush3.bf16.msra.mxu1 %v2792_v59  ;;  %v2810_v55 = vpack.c.bf16 %v158_v47, %v157_v46  ;;  %v142_v56 = vld [vmem:[%s5060_s1 + $0x358] sm:$0xff]  ;;  %v128_v58 = vld [vmem:[%s5060_s1 + $0x2e8] sm:$0xff]  ;;  %v159_v59 = vld [vmem:[%s5060_s1 + $0x3e0] sm:$0xff]  ;;  %v2780_v61 = vpack.c.bf16 %v110_v53, %v109_v52 }
  0x28   :  { %2795 = vmatprep.subr.bf16.mxu1 %v2794_v0  ;;  %v594_v44 = vcombine.high %v3632_v33, %v3632_v33  ;;  %v595_v49 = vcombine.high %v3655_v45, %v3655_v45  ;;  %v160_v60 = vld [vmem:[%s5060_s1 + $0x3e8] sm:$0xff]  ;;  %v2812_v62 = vpack.c.bf16 %v142_v56, %v141_v54  ;;  %v2782_v63 = vpack.c.bf16 %v128_v58, %v127_v57  ;;  %v111_v0 = vld [vmem:[%s5060_s1 + $0x260] sm:$0xff]  ;;  %v129_v5 = vld [vmem:[%s5060_s1 + $0x2f0] sm:$0xff] }
  0x29   :  { %2765 = vmatpush3.bf16.msra.mxu0 %v2764_v6  ;;  %v112_v1 = vld [vmem:[%s5060_s1 + $0x268] sm:$0xff]  ;;  %v143_v2 = vld [vmem:[%s5060_s1 + $0x360] sm:$0xff]  ;;  %v2814_v3 = vpack.c.bf16 %v160_v60, %v159_v59  ;;  %v130_v6 = vld [vmem:[%s5060_s1 + $0x2f8] sm:$0xff] }
  0x2a   :  { %2767 = vmatprep.subr.bf16.mxu0 %v2766_v8  ;;  %934 = vmatprep.mubr.f32.mxu0 %v594_v44  ;;  %v144_v4 = vld [vmem:[%s5060_s1 + $0x368] sm:$0xff]  ;;  %v162_v8 = vld [vmem:[%s5060_s1 + $0x3f8] sm:$0xff]  ;;  %v2784_v9 = vpack.c.bf16 %v112_v1, %v111_v0  ;;  %v2786_v11 = vpack.c.bf16 %v130_v6, %v129_v5  ;;  %v145_v15 = vld [vmem:[%s5060_s1 + $0x370] sm:$0xff] }
  0x2b   :  { %2797 = vmatpush3.bf16.msra.mxu1 %v2796_v7  ;;  %1004 = vmatprep.mubr.f32.mxu1 %v595_v49  ;;  %v161_v7 = vld [vmem:[%s5060_s1 + $0x3f0] sm:$0xff]  ;;  %v2816_v10 = vpack.c.bf16 %v144_v4, %v143_v2  ;;  %v114_v14 = vld [vmem:[%s5060_s1 + $0x278] sm:$0xff]  ;;  %v179_v18 = vld [vmem:[%s5060_s1 + $0x480] sm:$0xff] }
  0x2c   :  { %2799 = vmatprep.subr.bf16.mxu1 %v2798_v12  ;;  %v113_v12 = vld [vmem:[%s5060_s1 + $0x270] sm:$0xff]  ;;  %v2818_v16 = vpack.c.bf16 %v162_v8, %v161_v7  ;;  %v146_v17 = vld [vmem:[%s5060_s1 + $0x378] sm:$0xff]  ;;  %v163_v23 = vld [vmem:[%s5060_s1 + $0x400] sm:$0xff] }
  0x2d   :  { %2769 = vmatpush3.bf16.msra.mxu0 %v2768_v19  ;;  %v180_v19 = vld [vmem:[%s5060_s1 + $0x488] sm:$0xff]  ;;  %v2788_v22 = vpack.c.bf16 %v114_v14, %v113_v12  ;;  %v2820_v24 = vpack.c.bf16 %v146_v17, %v145_v15  ;;  %v195_v27 = vld [vmem:[%s5060_s1 + $0x500] sm:$0xff]  ;;  %v181_v30 = vld [vmem:[%s5060_s1 + $0x490] sm:$0xff] }
  0x2e   :  { %2771 = vmatprep.subr.bf16.mxu0 %v2770_v21  ;;  %v212_v21 = vld [vmem:[%s5060_s1 + $0x588] sm:$0xff]  ;;  %v182_v31 = vld [vmem:[%s5060_s1 + $0x498] sm:$0xff]  ;;  %v29_v37 = vld [vmem:[%s5059_s0 + $0x10] sm:$0xff] }
  0x2f   :  { %2801 = vmatpush3.bf16.msra.mxu1 %v2800_v20  ;;  %v211_v20 = vld [vmem:[%s5060_s1 + $0x580] sm:$0xff]  ;;  %v164_v26 = vld [vmem:[%s5060_s1 + $0x408] sm:$0xff]  ;;  %v214_v34 = vld [vmem:[%s5060_s1 + $0x598] sm:$0xff]  ;;  %v2826_v38 = vpack.c.bf16 %v182_v31, %v181_v30  ;;  %v3774_v42 = vrot.slane %v29_v37, %v3471_v13  ;;  %v596_v43 = vcombine.high %v29_v37, %v29_v37 }
  0x30   :  { %2803 = vmatprep.subr.bf16.mxu1 %v2802_v25  ;;  %v2822_v25 = vpack.c.bf16 %v180_v19, %v179_v18  ;;  %v196_v28 = vld [vmem:[%s5060_s1 + $0x508] sm:$0xff]  ;;  %v2854_v29 = vpack.c.bf16 %v212_v21, %v211_v20  ;;  %v165_v39 = vld [vmem:[%s5060_s1 + $0x410] sm:$0xff]  ;;  %v198_v46 = vld [vmem:[%s5060_s1 + $0x518] sm:$0xff] }
  0x31   :  { %2773 = vmatpush3.bf16.msra.mxu0 %v2772_v32  ;;  %v213_v32 = vld [vmem:[%s5060_s1 + $0x590] sm:$0xff]  ;;  %v183_v47 = vld [vmem:[%s5060_s1 + $0x4a0] sm:$0xff]  ;;  %v3795_v52 = vrot.slane %v596_v43, %v3471_v13  ;;  %v168_v56 = vld [vmem:[%s5060_s1 + $0x428] sm:$0xff] }
  0x32   :  { %2775 = vmatprep.subr.bf16.mxu0 %v2774_v36  ;;  %v2856_v36 = vpack.c.bf16 %v196_v28, %v195_v27  ;;  %v197_v41 = vld [vmem:[%s5060_s1 + $0x510] sm:$0xff]  ;;  %v2858_v44 = vpack.c.bf16 %v214_v34, %v213_v32  ;;  %v215_v49 = vld [vmem:[%s5060_s1 + $0x5a0] sm:$0xff]  ;;  %v200_v59 = vld [vmem:[%s5060_s1 + $0x528] sm:$0xff] }
  0x33   :  { %2805 = vmatpush3.bf16.msra.mxu1 %v2804_v35  ;;  %v2824_v35 = vpack.c.bf16 %v164_v26, %v163_v23  ;;  %v199_v57 = vld [vmem:[%s5060_s1 + $0x520] sm:$0xff]  ;;  %v185_v60 = vld [vmem:[%s5060_s1 + $0x4b0] sm:$0xff]  ;;  %v170_v4 = vld [vmem:[%s5060_s1 + $0x438] sm:$0xff] }
  0x34   :  { %2807 = vmatprep.subr.bf16.mxu1 %v2806_v40  ;;  %v166_v40 = vld [vmem:[%s5060_s1 + $0x418] sm:$0xff]  ;;  %v2864_v1 = vpack.c.bf16 %v200_v59, %v199_v57  ;;  %v201_v5 = vld [vmem:[%s5060_s1 + $0x530] sm:$0xff]  ;;  %v187_v8 = vld [vmem:[%s5060_s1 + $0x4c0] sm:$0xff] }
  0x35   :  { %2777 = vmatpush3.bf16.msra.mxu0 %v2776_v48  ;;  %v184_v48 = vld [vmem:[%s5060_s1 + $0x4a8] sm:$0xff]  ;;  %v2828_v53 = vpack.c.bf16 %v166_v40, %v165_v39  ;;  %v202_v7 = vld [vmem:[%s5060_s1 + $0x538] sm:$0xff]  ;;  %v203_v18 = vld [vmem:[%s5060_s1 + $0x540] sm:$0xff] }
  0x36   :  { %2779 = vmatprep.subr.bf16.mxu0 %v2778_v51  ;;  %v611_v51 = vcombine.high %v3774_v42, %v3774_v42  ;;  %v2830_v54 = vpack.c.bf16 %v184_v48, %v183_v47  ;;  %v2868_v14 = vpack.c.bf16 %v202_v7, %v201_v5  ;;  %v172_v17 = vld [vmem:[%s5060_s1 + $0x448] sm:$0xff]  ;;  %v189_v21 = vld [vmem:[%s5060_s1 + $0x4d0] sm:$0xff]  ;;  %v206_v32 = vld [vmem:[%s5060_s1 + $0x558] sm:$0xff] }
  0x37   :  { %2809 = vmatpush3.bf16.msra.mxu1 %v2808_v50  ;;  %v216_v50 = vld [vmem:[%s5060_s1 + $0x5a8] sm:$0xff]  ;;  %v221_v23 = vld [vmem:[%s5060_s1 + $0x5d0] sm:$0xff]  ;;  %v191_v34 = vld [vmem:[%s5060_s1 + $0x4e0] sm:$0xff] }
  0x38   :  { %2811 = vmatprep.subr.bf16.mxu1 %v2810_v55  ;;  %v167_v55 = vld [vmem:[%s5060_s1 + $0x420] sm:$0xff]  ;;  %v2862_v58 = vpack.c.bf16 %v216_v50, %v215_v49  ;;  %v204_v20 = vld [vmem:[%s5060_s1 + $0x548] sm:$0xff]  ;;  %v173_v28 = vld [vmem:[%s5060_s1 + $0x450] sm:$0xff] }
  0x39   :  { %2781 = vmatpush3.bf16.msra.mxu0 %v2780_v61  ;;  %v186_v61 = vld [vmem:[%s5060_s1 + $0x4b8] sm:$0xff]  ;;  %v2832_v0 = vpack.c.bf16 %v168_v56, %v167_v55  ;;  %v2872_v26 = vpack.c.bf16 %v204_v20, %v203_v18  ;;  %v205_v30 = vld [vmem:[%s5060_s1 + $0x550] sm:$0xff]  ;;  %v224_v37 = vld [vmem:[%s5060_s1 + $0x5e8] sm:$0xff] }
  0x3a   :  { %2783 = vmatprep.subr.bf16.mxu0 %v2782_v63  ;;  %v218_v63 = vld [vmem:[%s5060_s1 + $0x5b8] sm:$0xff]  ;;  %v2834_v2 = vpack.c.bf16 %v186_v61, %v185_v60  ;;  %v2876_v39 = vpack.c.bf16 %v206_v32, %v205_v30  ;;  %v176_v43 = vld [vmem:[%s5060_s1 + $0x468] sm:$0xff]  ;;  %v193_v48 = vld [vmem:[%s5060_s1 + $0x4f0] sm:$0xff] }
  0x3b   :  { %2813 = vmatpush3.bf16.msra.mxu1 %v2812_v62  ;;  %v217_v62 = vld [vmem:[%s5060_s1 + $0x5b0] sm:$0xff]  ;;  %v208_v47 = vld [vmem:[%s5060_s1 + $0x568] sm:$0xff]  ;;  %v194_v49 = vld [vmem:[%s5060_s1 + $0x4f8] sm:$0xff] }
  0x3c   :  { %2815 = vmatprep.subr.bf16.mxu1 %v2814_v3  ;;  %v169_v3 = vld [vmem:[%s5060_s1 + $0x430] sm:$0xff]  ;;  %v2866_v6 = vpack.c.bf16 %v218_v63, %v217_v62  ;;  %v2850_v55 = vpack.c.bf16 %v194_v49, %v193_v48  ;;  %v178_v57 = vld [vmem:[%s5060_s1 + $0x478] sm:$0xff]  ;;  %v243_v60 = vld [vmem:[%s5060_s1 + $0x680] sm:$0xff] }
  0x3d   :  { %2785 = vmatpush3.bf16.msra.mxu0 %v2784_v9  ;;  %v188_v9 = vld [vmem:[%s5060_s1 + $0x4c8] sm:$0xff]  ;;  %v2836_v12 = vpack.c.bf16 %v170_v4, %v169_v3  ;;  %v225_v50 = vld [vmem:[%s5060_s1 + $0x5f0] sm:$0xff]  ;;  %v210_v59 = vld [vmem:[%s5060_s1 + $0x578] sm:$0xff] }
  0x3e   :  { %2787 = vmatprep.subr.bf16.mxu0 %v2786_v11  ;;  %v220_v11 = vld [vmem:[%s5060_s1 + $0x5c8] sm:$0xff]  ;;  %v2838_v15 = vpack.c.bf16 %v188_v9, %v187_v8  ;;  %v177_v56 = vld [vmem:[%s5060_s1 + $0x470] sm:$0xff]  ;;  %v275_v62 = vld [vmem:[%s5060_s1 + $0x780] sm:$0xff] }
  0x3f   :  { %2817 = vmatpush3.bf16.msra.mxu1 %v2816_v10  ;;  %v219_v10 = vld [vmem:[%s5060_s1 + $0x5c0] sm:$0xff]  ;;  %v244_v61 = vld [vmem:[%s5060_s1 + $0x688] sm:$0xff]  ;;  %v245_v9 = vld [vmem:[%s5060_s1 + $0x690] sm:$0xff] }
  0x40   :  { %2819 = vmatprep.subr.bf16.mxu1 %v2818_v16  ;;  %v171_v16 = vld [vmem:[%s5060_s1 + $0x440] sm:$0xff]  ;;  %v2870_v19 = vpack.c.bf16 %v220_v11, %v219_v10  ;;  %v276_v63 = vld [vmem:[%s5060_s1 + $0x788] sm:$0xff]  ;;  %v2886_v3 = vpack.c.bf16 %v244_v61, %v243_v60  ;;  %v246_v10 = vld [vmem:[%s5060_s1 + $0x698] sm:$0xff] }
  0x41   :  { %2789 = vmatpush3.bf16.msra.mxu0 %v2788_v22  ;;  %v190_v22 = vld [vmem:[%s5060_s1 + $0x4d8] sm:$0xff]  ;;  %v227_v4 = vld [vmem:[%s5060_s1 + $0x600] sm:$0xff]  ;;  %v228_v5 = vld [vmem:[%s5060_s1 + $0x608] sm:$0xff]  ;;  %v2918_v7 = vpack.c.bf16 %v276_v63, %v275_v62  ;;  %v2890_v18 = vpack.c.bf16 %v246_v10, %v245_v9 }
  0x42   :  { %2823 = vmatprep.subr.bf16.mxu0 %v2822_v25  ;;  %v2840_v25 = vpack.c.bf16 %v172_v17, %v171_v16  ;;  %v2842_v27 = vpack.c.bf16 %v190_v22, %v189_v21  ;;  %v260_v8 = vld [vmem:[%s5060_s1 + $0x708] sm:$0xff]  ;;  %v2888_v16 = vpack.c.bf16 %v228_v5, %v227_v4  ;;  %v230_v20 = vld [vmem:[%s5060_s1 + $0x618] sm:$0xff]  ;;  %v261_v21 = vld [vmem:[%s5060_s1 + $0x710] sm:$0xff] }
  0x43   :  { %2821 = vmatpush3.bf16.msra.mxu1 %v2820_v24  ;;  %v222_v24 = vld [vmem:[%s5060_s1 + $0x5d8] sm:$0xff]  ;;  %v265_v48 = vld [vmem:[%s5060_s1 + $0x730] sm:$0xff]  ;;  %v268_v61 = vld [vmem:[%s5060_s1 + $0x748] sm:$0xff] }
  0x44   :  { %2855 = vmatprep.subr.bf16.mxu1 %v2854_v29  ;;  %935 = vmatmul.mubr.f32.vlgmr.msra.gmra.mrb[2].mxu0 %v3632_v33  ;;  %v2860_v33 = vpack.c.bf16 %v198_v46, %v197_v41  ;;  %v174_v29 = vld [vmem:[%s5060_s1 + $0x458] sm:$0xff]  ;;  %v2874_v31 = vpack.c.bf16 %v222_v24, %v221_v23  ;;  %v175_v41 = vld [vmem:[%s5060_s1 + $0x460] sm:$0xff]  ;;  %v253_v62 = vld [vmem:[%s5060_s1 + $0x6d0] sm:$0xff] }
  0x45   :  { %2825 = vmatpush3.bf16.msra.mxu0 %v2824_v35  ;;  %1074 = vmatprep.mubr.f32.mxu0 %v611_v51  ;;  %v192_v35 = vld [vmem:[%s5060_s1 + $0x4e8] sm:$0xff]  ;;  %v226_v51 = vld [vmem:[%s5060_s1 + $0x5f8] sm:$0xff]  ;;  %v247_v24 = vld [vmem:[%s5060_s1 + $0x6a0] sm:$0xff] }
  0x46   :  { %1005 = vmatmul.mubr.f32.vlgmr.msra.gmra.mrb[2].mxu1 %v3655_v45  ;;  %2827 = vmatprep.subr.bf16.mxu0 %v2826_v38  ;;  %v612_v45 = vcombine.high %v3795_v52, %v3795_v52  ;;  %v2844_v38 = vpack.c.bf16 %v174_v29, %v173_v28  ;;  %v2846_v40 = vpack.c.bf16 %v192_v35, %v191_v34  ;;  %v262_v23 = vld [vmem:[%s5060_s1 + $0x718] sm:$0xff]  ;;  %v280_v28 = vld [vmem:[%s5060_s1 + $0x7a8] sm:$0xff]  ;;  %v263_v35 = vld [vmem:[%s5060_s1 + $0x720] sm:$0xff] }
  0x47   :  { %2857 = vmatpush3.bf16.msra.mxu1 %v2856_v36  ;;  %v223_v36 = vld [vmem:[%s5060_s1 + $0x5e0] sm:$0xff]  ;;  %v232_v34 = vld [vmem:[%s5060_s1 + $0x628] sm:$0xff]  ;;  %v254_v63 = vld [vmem:[%s5060_s1 + $0x6d8] sm:$0xff] }
  0x48   :  { %2859 = vmatprep.subr.bf16.mxu1 %v2858_v44  ;;  %1144 = vmatprep.mubr.f32.mxu1 %v612_v45  ;;  %v207_v44 = vld [vmem:[%s5060_s1 + $0x560] sm:$0xff]  ;;  %v2878_v46 = vpack.c.bf16 %v224_v37, %v223_v36  ;;  %v209_v45 = vld [vmem:[%s5060_s1 + $0x570] sm:$0xff]  ;;  %v2906_v4 = vpack.c.bf16 %v254_v63, %v253_v62  ;;  %v270_v9 = vld [vmem:[%s5060_s1 + $0x758] sm:$0xff] }
  0x49   :  { %2829 = vmatpush3.bf16.msra.mxu0 %v2828_v53  ;;  %v2848_v53 = vpack.c.bf16 %v176_v43, %v175_v41  ;;  %v249_v37 = vld [vmem:[%s5060_s1 + $0x6b0] sm:$0xff]  ;;  %v255_v10 = vld [vmem:[%s5060_s1 + $0x6e0] sm:$0xff] }
  0x4a   :  { %2831 = vmatprep.subr.bf16.mxu0 %v2830_v54  ;;  %v2880_v54 = vpack.c.bf16 %v208_v47, %v207_v44  ;;  %v234_v47 = vld [vmem:[%s5060_s1 + $0x638] sm:$0xff]  ;;  %v237_v5 = vld [vmem:[%s5060_s1 + $0x650] sm:$0xff] }
  0x4b   :  { %2861 = vmatpush3.bf16.msra.mxu1 %v2860_v33  ;;  %v30_v33 = vld [vmem:[%s5059_s0 + $0x18] sm:$0xff]  ;;  %v325_v62 = vld [vmem:[%s5060_s1 + $0x910] sm:$0xff] }
  0x4c   :  { %2863 = vmatprep.subr.bf16.mxu1 %v2862_v58  ;;  %v2882_v58 = vpack.c.bf16 %v226_v51, %v225_v50  ;;  %v3966_v11 = vrot.slane %v30_v33, %v3471_v13  ;;  %v266_v50 = vld [vmem:[%s5060_s1 + $0x738] sm:$0xff]  ;;  %v251_v51 = vld [vmem:[%s5060_s1 + $0x6c0] sm:$0xff] }
  0x4d   :  { %2833 = vmatpush3.bf16.msra.mxu0 %v2832_v0  ;;  %v613_v0 = vcombine.high %v30_v33, %v30_v33  ;;  %v283_v33 = vld [vmem:[%s5060_s1 + $0x7c0] sm:$0xff] }
  0x4e   :  { %2835 = vmatprep.subr.bf16.mxu0 %v2834_v2  ;;  %v2884_v2 = vpack.c.bf16 %v210_v59, %v209_v45  ;;  %v235_v45 = vld [vmem:[%s5060_s1 + $0x640] sm:$0xff] }
  0x4f   :  { %2865 = vmatpush3.bf16.msra.mxu1 %v2864_v1  ;;  %v2852_v1 = vpack.c.bf16 %v178_v57, %v177_v56  ;;  %v2932_v56 = vpack.c.bf16 %v266_v50, %v265_v48  ;;  %v267_v59 = vld [vmem:[%s5060_s1 + $0x740] sm:$0xff]  ;;  %v292_v48 = vld [vmem:[%s5060_s1 + $0x808] sm:$0xff] }
  0x50   :  { %2867 = vmatprep.subr.bf16.mxu1 %v2866_v6  ;;  %v259_v6 = vld [vmem:[%s5060_s1 + $0x700] sm:$0xff] }
  0x51   :  { %2837 = vmatpush3.bf16.msra.mxu0 %v2836_v12  ;;  %v277_v12 = vld [vmem:[%s5060_s1 + $0x790] sm:$0xff]  ;;  %v2920_v17 = vpack.c.bf16 %v260_v8, %v259_v6  ;;  %v238_v6 = vld [vmem:[%s5060_s1 + $0x658] sm:$0xff] }
  0x52   :  { %2839 = vmatprep.subr.bf16.mxu0 %v2838_v15  ;;  %v3975_v15 = vrot.slane %v613_v0, %v3471_v13  ;;  %v285_v0 = vld [vmem:[%s5060_s1 + $0x7d0] sm:$0xff] }
  0x53   :  { %2869 = vmatpush3.bf16.msra.mxu1 %v2868_v14  ;;  %v278_v14 = vld [vmem:[%s5060_s1 + $0x798] sm:$0xff] }
  0x54   :  { %2871 = vmatprep.subr.bf16.mxu1 %v2870_v19  ;;  %v229_v19 = vld [vmem:[%s5060_s1 + $0x610] sm:$0xff]  ;;  %v2922_v22 = vpack.c.bf16 %v278_v14, %v277_v12  ;;  %v629_v29 = vcombine.high %v3975_v15, %v3975_v15  ;;  %v256_v12 = vld [vmem:[%s5060_s1 + $0x6e8] sm:$0xff]  ;;  %v287_v14 = vld [vmem:[%s5060_s1 + $0x7e0] sm:$0xff] }
  0x55   :  { %2841 = vmatpush3.bf16.msra.mxu0 %v2840_v25  ;;  %v248_v25 = vld [vmem:[%s5060_s1 + $0x6a8] sm:$0xff]  ;;  %v2892_v30 = vpack.c.bf16 %v230_v20, %v229_v19  ;;  %v2910_v19 = vpack.c.bf16 %v256_v12, %v255_v10  ;;  %v239_v20 = vld [vmem:[%s5060_s1 + $0x660] sm:$0xff] }
  0x56   :  { %2843 = vmatprep.subr.bf16.mxu0 %v2842_v27  ;;  %v279_v27 = vld [vmem:[%s5060_s1 + $0x7a0] sm:$0xff]  ;;  %v2894_v32 = vpack.c.bf16 %v248_v25, %v247_v24  ;;  %v272_v24 = vld [vmem:[%s5060_s1 + $0x768] sm:$0xff]  ;;  %v257_v25 = vld [vmem:[%s5060_s1 + $0x6f0] sm:$0xff] }
  0x57   :  { %2873 = vmatpush3.bf16.msra.mxu1 %v2872_v26  ;;  %v628_v26 = vcombine.high %v3966_v11, %v3966_v11  ;;  %v2926_v36 = vpack.c.bf16 %v280_v28, %v279_v27  ;;  %v289_v27 = vld [vmem:[%s5060_s1 + $0x7f0] sm:$0xff]  ;;  %v290_v28 = vld [vmem:[%s5060_s1 + $0x7f8] sm:$0xff]  ;;  %v296_v10 = vld [vmem:[%s5060_s1 + $0x828] sm:$0xff] }
  0x58   :  { %2875 = vmatprep.subr.bf16.mxu1 %v2874_v31  ;;  %v2924_v31 = vpack.c.bf16 %v262_v23, %v261_v21  ;;  %v240_v21 = vld [vmem:[%s5060_s1 + $0x668] sm:$0xff]  ;;  %v327_v12 = vld [vmem:[%s5060_s1 + $0x920] sm:$0xff] }
  0x59   :  { %2845 = vmatpush3.bf16.msra.mxu0 %v2844_v38  ;;  %v250_v38 = vld [vmem:[%s5060_s1 + $0x6b8] sm:$0xff] }
  0x5a   :  { %2847 = vmatprep.subr.bf16.mxu0 %v2846_v40  ;;  %v282_v40 = vld [vmem:[%s5060_s1 + $0x7b8] sm:$0xff]  ;;  %v2898_v44 = vpack.c.bf16 %v250_v38, %v249_v37  ;;  %v307_v37 = vld [vmem:[%s5060_s1 + $0x880] sm:$0xff]  ;;  %v308_v38 = vld [vmem:[%s5060_s1 + $0x888] sm:$0xff] }
  0x5b   :  { %2877 = vmatpush3.bf16.msra.mxu1 %v2876_v39  ;;  %v281_v39 = vld [vmem:[%s5060_s1 + $0x7b0] sm:$0xff] }
  0x5c   :  { %2879 = vmatprep.subr.bf16.mxu1 %v2878_v46  ;;  %v233_v46 = vld [vmem:[%s5060_s1 + $0x630] sm:$0xff]  ;;  %v2930_v49 = vpack.c.bf16 %v282_v40, %v281_v39  ;;  %v339_v39 = vld [vmem:[%s5060_s1 + $0x980] sm:$0xff]  ;;  %v340_v40 = vld [vmem:[%s5060_s1 + $0x988] sm:$0xff] }
  0x5d   :  { %2849 = vmatpush3.bf16.msra.mxu0 %v2848_v53  ;;  %v252_v53 = vld [vmem:[%s5060_s1 + $0x6c8] sm:$0xff]  ;;  %v2982_v50 = vpack.c.bf16 %v340_v40, %v339_v39  ;;  %v317_v39 = vld [vmem:[%s5060_s1 + $0x8d0] sm:$0xff]  ;;  %v318_v40 = vld [vmem:[%s5060_s1 + $0x8d8] sm:$0xff] }
  0x5e   :  { %2851 = vmatprep.subr.bf16.mxu0 %v2850_v55  ;;  %v2900_v55 = vpack.c.bf16 %v234_v47, %v233_v46  ;;  %v2902_v57 = vpack.c.bf16 %v252_v53, %v251_v51  ;;  %v2950_v46 = vpack.c.bf16 %v308_v38, %v307_v37  ;;  %v291_v47 = vld [vmem:[%s5060_s1 + $0x800] sm:$0xff]  ;;  %v324_v51 = vld [vmem:[%s5060_s1 + $0x908] sm:$0xff]  ;;  %v309_v53 = vld [vmem:[%s5060_s1 + $0x890] sm:$0xff] }
  0x5f   :  { %2881 = vmatpush3.bf16.msra.mxu1 %v2880_v54  ;;  %v284_v54 = vld [vmem:[%s5060_s1 + $0x7c8] sm:$0xff] }
  0x60   :  { %2883 = vmatprep.subr.bf16.mxu1 %v2882_v58  ;;  %v236_v58 = vld [vmem:[%s5060_s1 + $0x648] sm:$0xff]  ;;  %v2934_v60 = vpack.c.bf16 %v284_v54, %v283_v33  ;;  %v310_v33 = vld [vmem:[%s5060_s1 + $0x898] sm:$0xff] }
  0x61   :  { %2853 = vmatpush3.bf16.msra.mxu0 %v2852_v1  ;;  %v286_v1 = vld [vmem:[%s5060_s1 + $0x7d8] sm:$0xff]  ;;  %v332_v38 = vld [vmem:[%s5060_s1 + $0x948] sm:$0xff] }
  0x62   :  { %2887 = vmatprep.subr.bf16.mxu0 %v2886_v3  ;;  %v2936_v3 = vpack.c.bf16 %v268_v61, %v267_v59  ;;  %v2938_v8 = vpack.c.bf16 %v286_v1, %v285_v0  ;;  %v2954_v59 = vpack.c.bf16 %v310_v33, %v309_v53  ;;  %v294_v61 = vld [vmem:[%s5060_s1 + $0x818] sm:$0xff]  ;;  %v311_v1 = vld [vmem:[%s5060_s1 + $0x8a0] sm:$0xff] }
  0x63   :  { %2885 = vmatpush3.bf16.msra.mxu1 %v2884_v2  ;;  %v2904_v2 = vpack.c.bf16 %v236_v58, %v235_v45  ;;  %v2952_v45 = vpack.c.bf16 %v292_v48, %v291_v47  ;;  %v326_v0 = vld [vmem:[%s5060_s1 + $0x918] sm:$0xff]  ;;  %v2970_v47 = vpack.c.bf16 %v318_v40, %v317_v39  ;;  %v301_v48 = vld [vmem:[%s5060_s1 + $0x850] sm:$0xff]  ;;  %v319_v33 = vld [vmem:[%s5060_s1 + $0x8e0] sm:$0xff] }
  0x64   :  { %2919 = vmatprep.subr.bf16.mxu1 %v2918_v7  ;;  %1075 = vmatmul.mubr.f32.vlgmr.msra.gmra.mrb[4].mxu0 %v3774_v42  ;;  %v231_v42 = vld [vmem:[%s5060_s1 + $0x620] sm:$0xff]  ;;  %v269_v7 = vld [vmem:[%s5060_s1 + $0x750] sm:$0xff]  ;;  %v334_v53 = vld [vmem:[%s5060_s1 + $0x958] sm:$0xff] }
  0x65   :  { %2889 = vmatpush3.bf16.msra.mxu0 %v2888_v16  ;;  %1214 = vmatprep.mubr.f32.mxu0 %v628_v26  ;;  %v2896_v41 = vpack.c.bf16 %v232_v34, %v231_v42  ;;  %v288_v16 = vld [vmem:[%s5060_s1 + $0x7e8] sm:$0xff]  ;;  %v258_v26 = vld [vmem:[%s5060_s1 + $0x6f8] sm:$0xff]  ;;  %v241_v42 = vld [vmem:[%s5060_s1 + $0x670] sm:$0xff] }
  0x66   :  { %1145 = vmatmul.mubr.f32.vlgmr.msra.gmra.mrb[4].mxu1 %v3795_v52  ;;  %2891 = vmatprep.subr.bf16.mxu0 %v2890_v18  ;;  %v264_v52 = vld [vmem:[%s5060_s1 + $0x728] sm:$0xff]  ;;  %v2940_v18 = vpack.c.bf16 %v270_v9, %v269_v7  ;;  %v2942_v23 = vpack.c.bf16 %v288_v16, %v287_v14  ;;  %v242_v34 = vld [vmem:[%s5060_s1 + $0x678] sm:$0xff]  ;;  %v313_v16 = vld [vmem:[%s5060_s1 + $0x8b0] sm:$0xff] }
  0x67   :  { %2921 = vmatpush3.bf16.msra.mxu1 %v2920_v17  ;;  %1284 = vmatprep.mubr.f32.mxu1 %v629_v29  ;;  %v2928_v43 = vpack.c.bf16 %v264_v52, %v263_v35  ;;  %v2908_v17 = vpack.c.bf16 %v238_v6, %v237_v5  ;;  %v2912_v29 = vpack.c.bf16 %v240_v21, %v239_v20  ;;  %v273_v35 = vld [vmem:[%s5060_s1 + $0x770] sm:$0xff]  ;;  %v274_v52 = vld [vmem:[%s5060_s1 + $0x778] sm:$0xff]  ;;  %v344_v5 = vld [vmem:[%s5060_s1 + $0x9a8] sm:$0xff] }
  0x68   :  { %2923 = vmatprep.subr.bf16.mxu1 %v2922_v22  ;;  %v271_v22 = vld [vmem:[%s5060_s1 + $0x760] sm:$0xff]  ;;  %v389_v39 = vld [vmem:[%s5060_s1 + $0xb10] sm:$0xff] }
  0x69   :  { %2893 = vmatpush3.bf16.msra.mxu0 %v2892_v30  ;;  %v31_v30 = vld [vmem:[%s5059_s0 + $0x20] sm:$0xff] }
  0x6a   :  { %2895 = vmatprep.subr.bf16.mxu0 %v2894_v32  ;;  %v2914_v32 = vpack.c.bf16 %v258_v26, %v257_v25  ;;  %v4173_v54 = vrot.slane %v31_v30, %v3471_v13  ;;  %v329_v25 = vld [vmem:[%s5060_s1 + $0x930] sm:$0xff] }
  0x6b   :  { %2925 = vmatpush3.bf16.msra.mxu1 %v2924_v31  ;;  %v2944_v31 = vpack.c.bf16 %v272_v24, %v271_v22  ;;  %v298_v24 = vld [vmem:[%s5060_s1 + $0x838] sm:$0xff] }
  0x6c   :  { %2927 = vmatprep.subr.bf16.mxu1 %v2926_v36  ;;  %v2946_v36 = vpack.c.bf16 %v290_v28, %v289_v27  ;;  %v330_v27 = vld [vmem:[%s5060_s1 + $0x938] sm:$0xff]  ;;  %v315_v28 = vld [vmem:[%s5060_s1 + $0x8c0] sm:$0xff] }
  0x6d   :  { %2897 = vmatpush3.bf16.msra.mxu0 %v2896_v41  ;;  %v630_v41 = vcombine.high %v31_v30, %v31_v30  ;;  %v347_v30 = vld [vmem:[%s5060_s1 + $0x9c0] sm:$0xff] }
  0x6e   :  { %2899 = vmatprep.subr.bf16.mxu0 %v2898_v44  ;;  %v2948_v44 = vpack.c.bf16 %v274_v52, %v273_v35  ;;  %v299_v35 = vld [vmem:[%s5060_s1 + $0x840] sm:$0xff] }
  0x6f   :  { %2929 = vmatpush3.bf16.msra.mxu1 %v2928_v43  ;;  %v2916_v43 = vpack.c.bf16 %v242_v34, %v241_v42  ;;  %v2996_v42 = vpack.c.bf16 %v330_v27, %v329_v25  ;;  %v331_v52 = vld [vmem:[%s5060_s1 + $0x940] sm:$0xff]  ;;  %v356_v25 = vld [vmem:[%s5060_s1 + $0xa08] sm:$0xff] }
  0x70   :  { %2931 = vmatprep.subr.bf16.mxu1 %v2930_v49  ;;  %v323_v49 = vld [vmem:[%s5060_s1 + $0x900] sm:$0xff] }
  0x71   :  { %2901 = vmatpush3.bf16.msra.mxu0 %v2900_v55  ;;  %v341_v55 = vld [vmem:[%s5060_s1 + $0x990] sm:$0xff]  ;;  %v2984_v58 = vpack.c.bf16 %v324_v51, %v323_v49  ;;  %v302_v49 = vld [vmem:[%s5060_s1 + $0x858] sm:$0xff] }
  0x72   :  { %2903 = vmatprep.subr.bf16.mxu0 %v2902_v57  ;;  %v4182_v57 = vrot.slane %v630_v41, %v3471_v13  ;;  %v349_v41 = vld [vmem:[%s5060_s1 + $0x9d0] sm:$0xff] }
  0x73   :  { %2933 = vmatpush3.bf16.msra.mxu1 %v2932_v56  ;;  %v342_v56 = vld [vmem:[%s5060_s1 + $0x998] sm:$0xff] }
  0x74   :  { %2935 = vmatprep.subr.bf16.mxu1 %v2934_v60  ;;  %v293_v60 = vld [vmem:[%s5060_s1 + $0x810] sm:$0xff]  ;;  %v2986_v63 = vpack.c.bf16 %v342_v56, %v341_v55  ;;  %v646_v6 = vcombine.high %v4182_v57, %v4182_v57  ;;  %v320_v55 = vld [vmem:[%s5060_s1 + $0x8e8] sm:$0xff]  ;;  %v351_v56 = vld [vmem:[%s5060_s1 + $0x9e0] sm:$0xff] }
  0x75   :  { %2905 = vmatpush3.bf16.msra.mxu0 %v2904_v2  ;;  %v312_v2 = vld [vmem:[%s5060_s1 + $0x8a8] sm:$0xff]  ;;  %v2956_v7 = vpack.c.bf16 %v294_v61, %v293_v60  ;;  %v2974_v60 = vpack.c.bf16 %v320_v55, %v319_v33  ;;  %v303_v61 = vld [vmem:[%s5060_s1 + $0x860] sm:$0xff] }
  0x76   :  { %2907 = vmatprep.subr.bf16.mxu0 %v2906_v4  ;;  %v343_v4 = vld [vmem:[%s5060_s1 + $0x9a0] sm:$0xff]  ;;  %v2958_v9 = vpack.c.bf16 %v312_v2, %v311_v1  ;;  %v336_v1 = vld [vmem:[%s5060_s1 + $0x968] sm:$0xff]  ;;  %v321_v2 = vld [vmem:[%s5060_s1 + $0x8f0] sm:$0xff] }
  0x77   :  { %2937 = vmatpush3.bf16.msra.mxu1 %v2936_v3  ;;  %v645_v3 = vcombine.high %v4173_v54, %v4173_v54  ;;  %v2990_v14 = vpack.c.bf16 %v344_v5, %v343_v4  ;;  %v353_v4 = vld [vmem:[%s5060_s1 + $0x9f0] sm:$0xff]  ;;  %v354_v5 = vld [vmem:[%s5060_s1 + $0x9f8] sm:$0xff]  ;;  %v360_v33 = vld [vmem:[%s5060_s1 + $0xa28] sm:$0xff] }
  0x78   :  { %2939 = vmatprep.subr.bf16.mxu1 %v2938_v8  ;;  %v2988_v8 = vpack.c.bf16 %v326_v0, %v325_v62  ;;  %v304_v62 = vld [vmem:[%s5060_s1 + $0x868] sm:$0xff]  ;;  %v391_v55 = vld [vmem:[%s5060_s1 + $0xb20] sm:$0xff] }
  0x79   :  { %2909 = vmatpush3.bf16.msra.mxu0 %v2908_v17  ;;  %v314_v17 = vld [vmem:[%s5060_s1 + $0x8b8] sm:$0xff] }
  0x7a   :  { %2911 = vmatprep.subr.bf16.mxu0 %v2910_v19  ;;  %v346_v19 = vld [vmem:[%s5060_s1 + $0x9b8] sm:$0xff]  ;;  %v2962_v22 = vpack.c.bf16 %v314_v17, %v313_v16  ;;  %v371_v16 = vld [vmem:[%s5060_s1 + $0xa80] sm:$0xff]  ;;  %v372_v17 = vld [vmem:[%s5060_s1 + $0xa88] sm:$0xff] }
  0x7b   :  { %2941 = vmatpush3.bf16.msra.mxu1 %v2940_v18  ;;  %v345_v18 = vld [vmem:[%s5060_s1 + $0x9b0] sm:$0xff] }
  0x7c   :  { %2943 = vmatprep.subr.bf16.mxu1 %v2942_v23  ;;  %v297_v23 = vld [vmem:[%s5060_s1 + $0x830] sm:$0xff]  ;;  %v2994_v26 = vpack.c.bf16 %v346_v19, %v345_v18  ;;  %v403_v18 = vld [vmem:[%s5060_s1 + $0xb80] sm:$0xff]  ;;  %v404_v19 = vld [vmem:[%s5060_s1 + $0xb88] sm:$0xff] }
  0x7d   :  { %2913 = vmatpush3.bf16.msra.mxu0 %v2912_v29  ;;  %v316_v29 = vld [vmem:[%s5060_s1 + $0x8c8] sm:$0xff]  ;;  %v3046_v27 = vpack.c.bf16 %v404_v19, %v403_v18 }
  0x7e   :  { %2915 = vmatprep.subr.bf16.mxu0 %v2914_v32  ;;  %v2964_v32 = vpack.c.bf16 %v298_v24, %v297_v23  ;;  %v2966_v34 = vpack.c.bf16 %v316_v29, %v315_v28  ;;  %v3014_v23 = vpack.c.bf16 %v372_v17, %v371_v16  ;;  %v355_v24 = vld [vmem:[%s5060_s1 + $0xa00] sm:$0xff]  ;;  %v388_v28 = vld [vmem:[%s5060_s1 + $0xb08] sm:$0xff]  ;;  %v373_v29 = vld [vmem:[%s5060_s1 + $0xa90] sm:$0xff] }
  0x7f   :  { %2945 = vmatpush3.bf16.msra.mxu1 %v2944_v31  ;;  %v348_v31 = vld [vmem:[%s5060_s1 + $0x9c8] sm:$0xff] }
  0x80   :  { %2947 = vmatprep.subr.bf16.mxu1 %v2946_v36  ;;  %v300_v36 = vld [vmem:[%s5060_s1 + $0x848] sm:$0xff]  ;;  %v2998_v37 = vpack.c.bf16 %v348_v31, %v347_v30  ;;  %v374_v30 = vld [vmem:[%s5060_s1 + $0xa98] sm:$0xff] }
  0x81   :  { %2917 = vmatpush3.bf16.msra.mxu0 %v2916_v43  ;;  %v350_v43 = vld [vmem:[%s5060_s1 + $0x9d8] sm:$0xff] }
  0x82   :  { %2951 = vmatprep.subr.bf16.mxu0 %v2950_v46  ;;  %v3000_v46 = vpack.c.bf16 %v332_v38, %v331_v52  ;;  %v3002_v51 = vpack.c.bf16 %v350_v43, %v349_v41  ;;  %v3018_v52 = vpack.c.bf16 %v374_v30, %v373_v29  ;;  %v358_v38 = vld [vmem:[%s5060_s1 + $0xa18] sm:$0xff]  ;;  %v375_v43 = vld [vmem:[%s5060_s1 + $0xaa0] sm:$0xff] }
  0x83   :  { %2949 = vmatpush3.bf16.msra.mxu1 %v2948_v44  ;;  %v2968_v44 = vpack.c.bf16 %v300_v36, %v299_v35  ;;  %v3016_v35 = vpack.c.bf16 %v356_v25, %v355_v24  ;;  %v390_v41 = vld [vmem:[%s5060_s1 + $0xb18] sm:$0xff] }
  0x84   :  { %2983 = vmatprep.subr.bf16.mxu1 %v2982_v50  ;;  %1215 = vmatmul.mubr.f32.vlgmr.msra.gmra.mrb[6].mxu0 %v3966_v11  ;;  %v295_v11 = vld [vmem:[%s5060_s1 + $0x820] sm:$0xff]  ;;  %v333_v50 = vld [vmem:[%s5060_s1 + $0x950] sm:$0xff] }
  0x85   :  { %2953 = vmatpush3.bf16.msra.mxu0 %v2952_v45  ;;  %1354 = vmatprep.mubr.f32.mxu0 %v645_v3  ;;  %v2960_v20 = vpack.c.bf16 %v296_v10, %v295_v11  ;;  %v352_v45 = vld [vmem:[%s5060_s1 + $0x9e8] sm:$0xff]  ;;  %v322_v3 = vld [vmem:[%s5060_s1 + $0x8f8] sm:$0xff]  ;;  %v305_v11 = vld [vmem:[%s5060_s1 + $0x870] sm:$0xff] }
  0x86   :  { %1285 = vmatmul.mubr.f32.vlgmr.msra.gmra.mrb[6].mxu1 %v3975_v15  ;;  %2955 = vmatprep.subr.bf16.mxu0 %v2954_v59  ;;  %v328_v15 = vld [vmem:[%s5060_s1 + $0x928] sm:$0xff]  ;;  %v3004_v59 = vpack.c.bf16 %v334_v53, %v333_v50  ;;  %v3006_v0 = vpack.c.bf16 %v352_v45, %v351_v56  ;;  %v306_v10 = vld [vmem:[%s5060_s1 + $0x878] sm:$0xff]  ;;  %v377_v45 = vld [vmem:[%s5060_s1 + $0xab0] sm:$0xff] }
  0x87   :  { %2985 = vmatpush3.bf16.msra.mxu1 %v2984_v58  ;;  %1424 = vmatprep.mubr.f32.mxu1 %v646_v6  ;;  %v2992_v21 = vpack.c.bf16 %v328_v15, %v327_v12  ;;  %v2972_v58 = vpack.c.bf16 %v302_v49, %v301_v48  ;;  %v2976_v6 = vpack.c.bf16 %v304_v62, %v303_v61  ;;  %v337_v12 = vld [vmem:[%s5060_s1 + $0x970] sm:$0xff]  ;;  %v338_v15 = vld [vmem:[%s5060_s1 + $0x978] sm:$0xff]  ;;  %v408_v48 = vld [vmem:[%s5060_s1 + $0xba8] sm:$0xff] }
  0x88   :  { %2987 = vmatprep.subr.bf16.mxu1 %v2986_v63  ;;  %v335_v63 = vld [vmem:[%s5060_s1 + $0x960] sm:$0xff] }
  0x89   :  { %2957 = vmatpush3.bf16.msra.mxu0 %v2956_v7  ;;  %v32_v7 = vld [vmem:[%s5059_s0 + $0x28] sm:$0xff] }
  0x8a   :  { %2959 = vmatprep.subr.bf16.mxu0 %v2958_v9  ;;  %v2978_v9 = vpack.c.bf16 %v322_v3, %v321_v2  ;;  %v4380_v31 = vrot.slane %v32_v7, %v3471_v13  ;;  %v393_v2 = vld [vmem:[%s5060_s1 + $0xb30] sm:$0xff] }
  0x8b   :  { %2989 = vmatpush3.bf16.msra.mxu1 %v2988_v8  ;;  %v3008_v8 = vpack.c.bf16 %v336_v1, %v335_v63  ;;  %v362_v1 = vld [vmem:[%s5060_s1 + $0xa38] sm:$0xff] }
  0x8c   :  { %2991 = vmatprep.subr.bf16.mxu1 %v2990_v14  ;;  %v3010_v14 = vpack.c.bf16 %v354_v5, %v353_v4  ;;  %v394_v4 = vld [vmem:[%s5060_s1 + $0xb38] sm:$0xff]  ;;  %v379_v5 = vld [vmem:[%s5060_s1 + $0xac0] sm:$0xff] }
  0x8d   :  { %2961 = vmatpush3.bf16.msra.mxu0 %v2960_v20  ;;  %v647_v20 = vcombine.high %v32_v7, %v32_v7  ;;  %v411_v7 = vld [vmem:[%s5060_s1 + $0xbc0] sm:$0xff] }
  0x8e   :  { %2963 = vmatprep.subr.bf16.mxu0 %v2962_v22  ;;  %v3012_v22 = vpack.c.bf16 %v338_v15, %v337_v12  ;;  %v395_v15 = vld [vmem:[%s5060_s1 + $0xb40] sm:$0xff] }
  0x8f   :  { %2993 = vmatpush3.bf16.msra.mxu1 %v2992_v21  ;;  %v2980_v21 = vpack.c.bf16 %v306_v10, %v305_v11  ;;  %v363_v11 = vld [vmem:[%s5060_s1 + $0xa40] sm:$0xff]  ;;  %v3060_v10 = vpack.c.bf16 %v394_v4, %v393_v2 }
  0x90   :  { %2995 = vmatprep.subr.bf16.mxu1 %v2994_v26  ;;  %v387_v26 = vld [vmem:[%s5060_s1 + $0xb00] sm:$0xff] }
  0x91   :  { %2965 = vmatpush3.bf16.msra.mxu0 %v2964_v32  ;;  %v405_v32 = vld [vmem:[%s5060_s1 + $0xb90] sm:$0xff]  ;;  %v3048_v36 = vpack.c.bf16 %v388_v28, %v387_v26 }
  0x92   :  { %2967 = vmatprep.subr.bf16.mxu0 %v2966_v34  ;;  %v4389_v34 = vrot.slane %v647_v20, %v3471_v13 }
  0x93   :  { %2997 = vmatpush3.bf16.msra.mxu1 %v2996_v42  ;;  %v406_v42 = vld [vmem:[%s5060_s1 + $0xb98] sm:$0xff] }
  0x94   :  { %2999 = vmatprep.subr.bf16.mxu1 %v2998_v37  ;;  %v357_v37 = vld [vmem:[%s5060_s1 + $0xa10] sm:$0xff]  ;;  %v3050_v40 = vpack.c.bf16 %v406_v42, %v405_v32  ;;  %v663_v49 = vcombine.high %v4389_v34, %v4389_v34 }
  0x95   :  { %2969 = vmatpush3.bf16.msra.mxu0 %v2968_v44  ;;  %v376_v44 = vld [vmem:[%s5060_s1 + $0xaa8] sm:$0xff]  ;;  %v3020_v50 = vpack.c.bf16 %v358_v38, %v357_v37 }
  0x96   :  { %2971 = vmatprep.subr.bf16.mxu0 %v2970_v47  ;;  %v407_v47 = vld [vmem:[%s5060_s1 + $0xba0] sm:$0xff]  ;;  %v3022_v53 = vpack.c.bf16 %v376_v44, %v375_v43 }
  0x97   :  { %3001 = vmatpush3.bf16.msra.mxu1 %v3000_v46  ;;  %v662_v46 = vcombine.high %v4380_v31, %v4380_v31  ;;  %v3054_v56 = vpack.c.bf16 %v408_v48, %v407_v47 }
  0x98   :  { %3003 = vmatprep.subr.bf16.mxu1 %v3002_v51  ;;  %v3052_v51 = vpack.c.bf16 %v390_v41, %v389_v39 }
  0x99   :  { %2973 = vmatpush3.bf16.msra.mxu0 %v2972_v58  ;;  %v378_v58 = vld [vmem:[%s5060_s1 + $0xab8] sm:$0xff] }
  0x9a   :  { %2975 = vmatprep.subr.bf16.mxu0 %v2974_v60  ;;  %v410_v60 = vld [vmem:[%s5060_s1 + $0xbb8] sm:$0xff]  ;;  %v3026_v63 = vpack.c.bf16 %v378_v58, %v377_v45 }
  0x9b   :  { %3005 = vmatpush3.bf16.msra.mxu1 %v3004_v59  ;;  %v409_v59 = vld [vmem:[%s5060_s1 + $0xbb0] sm:$0xff] }
  0x9c   :  { %3007 = vmatprep.subr.bf16.mxu1 %v3006_v0  ;;  %v361_v0 = vld [vmem:[%s5060_s1 + $0xa30] sm:$0xff]  ;;  %v3058_v3 = vpack.c.bf16 %v410_v60, %v409_v59 }
  0x9d   :  { %2977 = vmatpush3.bf16.msra.mxu0 %v2976_v6  ;;  %v380_v6 = vld [vmem:[%s5060_s1 + $0xac8] sm:$0xff] }
  0x9e   :  { %2979 = vmatprep.subr.bf16.mxu0 %v2978_v9  ;;  %v3028_v9 = vpack.c.bf16 %v362_v1, %v361_v0  ;;  %v3030_v12 = vpack.c.bf16 %v380_v6, %v379_v5 }
  0x9f   :  { %3009 = vmatpush3.bf16.msra.mxu1 %v3008_v8  ;;  %v412_v8 = vld [vmem:[%s5060_s1 + $0xbc8] sm:$0xff] }
  0xa0   :  { %3011 = vmatprep.subr.bf16.mxu1 %v3010_v14  ;;  %v364_v14 = vld [vmem:[%s5060_s1 + $0xa48] sm:$0xff] }
  0xa1   :  { %2981 = vmatpush3.bf16.msra.mxu0 %v2980_v21 }
  0xa2   :  { %3015 = vmatprep.subr.bf16.mxu0 %v3014_v23 }
  0xa3   :  { %3013 = vmatpush3.bf16.msra.mxu1 %v3012_v22 }
  0xa4   :  { %3047 = vmatprep.subr.bf16.mxu1 %v3046_v27  ;;  %1355 = vmatmul.mubr.f32.vlgmr.msra.gmra.mrb[8].mxu0 %v4173_v54  ;;  %v359_v54 = vld [vmem:[%s5060_s1 + $0xa20] sm:$0xff] }
  0xa5   :  { %3017 = vmatpush3.bf16.msra.mxu0 %v3016_v35  ;;  %1494 = vmatprep.mubr.f32.mxu0 %v662_v46  ;;  %v3024_v61 = vpack.c.bf16 %v360_v33, %v359_v54 }
  0xa6   :  { %1425 = vmatmul.mubr.f32.vlgmr.msra.gmra.mrb[8].mxu1 %v4182_v57  ;;  %3019 = vmatprep.subr.bf16.mxu0 %v3018_v52  ;;  %v392_v57 = vld [vmem:[%s5060_s1 + $0xb28] sm:$0xff] }
  0xa7   :  { %3049 = vmatpush3.bf16.msra.mxu1 %v3048_v36  ;;  %1564 = vmatprep.mubr.f32.mxu1 %v663_v49  ;;  %v3056_v62 = vpack.c.bf16 %v392_v57, %v391_v55 }
  0xa8   :  { %3051 = vmatprep.subr.bf16.mxu1 %v3050_v40 }
  0xa9   :  { %3021 = vmatpush3.bf16.msra.mxu0 %v3020_v50 }
  0xaa   :  { %3023 = vmatprep.subr.bf16.mxu0 %v3022_v53 }
  0xab   :  { %3053 = vmatpush3.bf16.msra.mxu1 %v3052_v51 }
  0xac   :  { %3055 = vmatprep.subr.bf16.mxu1 %v3054_v56 }
  0xad   :  { %3025 = vmatpush3.bf16.msra.mxu0 %v3024_v61 }
  0xae   :  { %3027 = vmatprep.subr.bf16.mxu0 %v3026_v63 }
  0xaf   :  { %3057 = vmatpush3.bf16.msra.mxu1 %v3056_v62 }
  0xb0   :  { %12 = vsyncpa [#allocation3], 0  ;;  %3059 = vmatprep.subr.bf16.mxu1 %v3058_v3  ;;  %v3062_v16 = vpack.c.bf16 %v412_v8, %v411_v7  ;;  %v396_v17 = vld [vmem:[%s5060_s1 + $0xb48] sm:$0xff]  ;;  %v381_v18 = vld [vmem:[%s5060_s1 + $0xad0] sm:$0xff]  ;;  %v3032_v22 = vpack.c.bf16 %v364_v14, %v363_v11  ;;  %vm3278_vm0 = vmmov 0   ;;  %vm1875_vm1 = vcmask 654336  }
  0xb1   :  { %v382_v19 = vld [vmem:[%s5060_s1 + $0xad8] sm:$0xff]  ;;  %v413_v20 = vld [vmem:[%s5060_s1 + $0xbd0] sm:$0xff]  ;;  %3029 = vmatpush3.bf16.msra.mxu0 %v3028_v9  ;;  %v3064_v23 = vpack.c.bf16 %v396_v17, %v395_v15  ;;  %v383_v30 = vld [vmem:[%s5060_s1 + $0xae0] sm:$0xff]  ;;  %vm1953_vm2 = vcmask 1043456   ;;  %vm1949_vm3 = vcmask 818176   ;;  %vm2036_vm4 = vcmask 17408  }
  0xb2   :  { %v414_v21 = vld [vmem:[%s5060_s1 + $0xbd8] sm:$0xff]  ;;  %3031 = vmatprep.subr.bf16.mxu0 %v3030_v12  ;;  %v3034_v24 = vpack.c.bf16 %v382_v19, %v381_v18  ;;  %v365_v25 = vld [vmem:[%s5060_s1 + $0xa50] sm:$0xff]  ;;  %v384_v32 = vld [vmem:[%s5060_s1 + $0xae8] sm:$0xff] }
  0xb3   :  { %3061 = vmatpush3.bf16.msra.mxu1 %v3060_v10  ;;  %v366_v26 = vld [vmem:[%s5060_s1 + $0xa58] sm:$0xff]  ;;  %v397_v27 = vld [vmem:[%s5060_s1 + $0xb50] sm:$0xff]  ;;  %v3066_v28 = vpack.c.bf16 %v414_v21, %v413_v20  ;;  %v415_v42 = vld [vmem:[%s5060_s1 + $0xbe0] sm:$0xff]  ;;  %v3038_v37 = vpack.c.bf16 %v384_v32, %v383_v30 }
  0xb4   :  { %3063 = vmatprep.subr.bf16.mxu1 %v3062_v16  ;;  %v398_v29 = vld [vmem:[%s5060_s1 + $0xb58] sm:$0xff]  ;;  %v416_v35 = vld [vmem:[%s5060_s1 + $0xbe8] sm:$0xff]  ;;  %v3036_v36 = vpack.c.bf16 %v366_v26, %v365_v25  ;;  %v367_v38 = vld [vmem:[%s5060_s1 + $0xa60] sm:$0xff] }
  0xb5   :  { %3033 = vmatpush3.bf16.msra.mxu0 %v3032_v22  ;;  %v3068_v52 = vpack.c.bf16 %v398_v29, %v397_v27  ;;  %v368_v39 = vld [vmem:[%s5060_s1 + $0xa68] sm:$0xff]  ;;  %v399_v40 = vld [vmem:[%s5060_s1 + $0xb60] sm:$0xff]  ;;  %v3070_v41 = vpack.c.bf16 %v416_v35, %v415_v42  ;;  %v385_v44 = vld [vmem:[%s5060_s1 + $0xaf0] sm:$0xff] }
  0xb6   :  { %3035 = vmatprep.subr.bf16.mxu0 %v3034_v24  ;;  %v400_v43 = vld [vmem:[%s5060_s1 + $0xb68] sm:$0xff]  ;;  %v386_v46 = vld [vmem:[%s5060_s1 + $0xaf8] sm:$0xff]  ;;  %v417_v47 = vld [vmem:[%s5060_s1 + $0xbf0] sm:$0xff]  ;;  %v3040_v49 = vpack.c.bf16 %v368_v39, %v367_v38 }
  0xb7   :  { %3065 = vmatpush3.bf16.msra.mxu1 %v3064_v23  ;;  %v418_v48 = vld [vmem:[%s5060_s1 + $0xbf8] sm:$0xff]  ;;  %v33_v50 = vld [vmem:[%s5059_s0 + $0x30] sm:$0xff]  ;;  %v3072_v51 = vpack.c.bf16 %v400_v43, %v399_v40  ;;  %v3042_v53 = vpack.c.bf16 %v386_v46, %v385_v44  ;;  %v435_v45 = vld [vmem:[%s5060_s1 + $0xc80] sm:$0xff] }
  0xb8   :  { %3067 = vmatprep.subr.bf16.mxu1 %v3066_v28  ;;  %v369_v54 = vld [vmem:[%s5060_s1 + $0xa70] sm:$0xff]  ;;  %v370_v33 = vld [vmem:[%s5060_s1 + $0xa78] sm:$0xff]  ;;  %v3074_v56 = vpack.c.bf16 %v418_v48, %v417_v47  ;;  %v436_v58 = vld [vmem:[%s5060_s1 + $0xc88] sm:$0xff]  ;;  %v664_v61 = vcombine.high %v33_v50, %v33_v50  ;;  %v4587_v8 = vrot.slane %v33_v50, %v3471_v13 }
  0xb9   :  { %3037 = vmatpush3.bf16.msra.mxu0 %v3036_v36  ;;  %v401_v55 = vld [vmem:[%s5060_s1 + $0xb70] sm:$0xff]  ;;  %v402_v57 = vld [vmem:[%s5060_s1 + $0xb78] sm:$0xff]  ;;  %v467_v59 = vld [vmem:[%s5060_s1 + $0xd80] sm:$0xff]  ;;  %v3044_v62 = vpack.c.bf16 %v370_v33, %v369_v54  ;;  %v3078_v0 = vpack.c.bf16 %v436_v58, %v435_v45 }
  0xba   :  { %3039 = vmatprep.subr.bf16.mxu0 %v3038_v37  ;;  %v468_v60 = vld [vmem:[%s5060_s1 + $0xd88] sm:$0xff]  ;;  %v3076_v63 = vpack.c.bf16 %v402_v57, %v401_v55  ;;  %v419_v1 = vld [vmem:[%s5060_s1 + $0xc00] sm:$0xff]  ;;  %v437_v6 = vld [vmem:[%s5060_s1 + $0xc90] sm:$0xff]  ;;  %v4596_v10 = vrot.slane %v664_v61, %v3471_v13  ;;  %v679_v23 = vcombine.high %v4587_v8, %v4587_v8 }
  0xbb   :  { %3069 = vmatpush3.bf16.msra.mxu1 %v3068_v52  ;;  %v420_v2 = vld [vmem:[%s5060_s1 + $0xc08] sm:$0xff]  ;;  %v451_v3 = vld [vmem:[%s5060_s1 + $0xd00] sm:$0xff]  ;;  %v3110_v4 = vpack.c.bf16 %v468_v60, %v467_v59  ;;  %v438_v7 = vld [vmem:[%s5060_s1 + $0xc98] sm:$0xff] }
  0xbc   :  { %3071 = vmatprep.subr.bf16.mxu1 %v3070_v41  ;;  %v452_v5 = vld [vmem:[%s5060_s1 + $0xd08] sm:$0xff]  ;;  %v469_v9 = vld [vmem:[%s5060_s1 + $0xd90] sm:$0xff]  ;;  %v470_v11 = vld [vmem:[%s5060_s1 + $0xd98] sm:$0xff]  ;;  %v3080_v12 = vpack.c.bf16 %v420_v2, %v419_v1  ;;  %v3082_v15 = vpack.c.bf16 %v438_v7, %v437_v6  ;;  %v680_v26 = vcombine.high %v4596_v10, %v4596_v10 }
  0xbd   :  { %3041 = vmatpush3.bf16.msra.mxu0 %v3040_v49  ;;  %v3112_v14 = vpack.c.bf16 %v452_v5, %v451_v3  ;;  %v421_v16 = vld [vmem:[%s5060_s1 + $0xc10] sm:$0xff]  ;;  %v422_v17 = vld [vmem:[%s5060_s1 + $0xc18] sm:$0xff]  ;;  %v3114_v19 = vpack.c.bf16 %v470_v11, %v469_v9  ;;  %v439_v21 = vld [vmem:[%s5060_s1 + $0xca0] sm:$0xff] }
  0xbe   :  { %3043 = vmatprep.subr.bf16.mxu0 %v3042_v53  ;;  %v453_v18 = vld [vmem:[%s5060_s1 + $0xd10] sm:$0xff]  ;;  %v454_v20 = vld [vmem:[%s5060_s1 + $0xd18] sm:$0xff]  ;;  %v440_v22 = vld [vmem:[%s5060_s1 + $0xca8] sm:$0xff]  ;;  %v3084_v27 = vpack.c.bf16 %v422_v17, %v421_v16 }
  0xbf   :  { %3073 = vmatpush3.bf16.msra.mxu1 %v3072_v51  ;;  %v471_v24 = vld [vmem:[%s5060_s1 + $0xda0] sm:$0xff]  ;;  %v472_v25 = vld [vmem:[%s5060_s1 + $0xda8] sm:$0xff]  ;;  %v3116_v28 = vpack.c.bf16 %v454_v20, %v453_v18  ;;  %v3086_v29 = vpack.c.bf16 %v440_v22, %v439_v21  ;;  %v441_v35 = vld [vmem:[%s5060_s1 + $0xcb0] sm:$0xff] }
  0xc0   :  { %3075 = vmatprep.subr.bf16.mxu1 %v3074_v56  ;;  %v424_v30 = vld [vmem:[%s5060_s1 + $0xc28] sm:$0xff]  ;;  %v455_v32 = vld [vmem:[%s5060_s1 + $0xd20] sm:$0xff]  ;;  %v3118_v42 = vpack.c.bf16 %v472_v25, %v471_v24  ;;  %v442_v36 = vld [vmem:[%s5060_s1 + $0xcb8] sm:$0xff] }
  0xc1   :  { %3045 = vmatpush3.bf16.msra.mxu0 %v3044_v62  ;;  %v473_v52 = vld [vmem:[%s5060_s1 + $0xdb0] sm:$0xff]  ;;  %v474_v37 = vld [vmem:[%s5060_s1 + $0xdb8] sm:$0xff]  ;;  %v3090_v40 = vpack.c.bf16 %v442_v36, %v441_v35  ;;  %v443_v48 = vld [vmem:[%s5060_s1 + $0xcc0] sm:$0xff] }
  0xc2   :  { %3079 = vmatprep.subr.bf16.mxu0 %v3078_v0  ;;  %v425_v41 = vld [vmem:[%s5060_s1 + $0xc30] sm:$0xff]  ;;  %v426_v43 = vld [vmem:[%s5060_s1 + $0xc38] sm:$0xff]  ;;  %v3122_v46 = vpack.c.bf16 %v474_v37, %v473_v52  ;;  %v444_v49 = vld [vmem:[%s5060_s1 + $0xcc8] sm:$0xff] }
  0xc3   :  { %3077 = vmatpush3.bf16.msra.mxu1 %v3076_v63  ;;  %v457_v44 = vld [vmem:[%s5060_s1 + $0xd30] sm:$0xff]  ;;  %v458_v47 = vld [vmem:[%s5060_s1 + $0xd38] sm:$0xff]  ;;  %v475_v50 = vld [vmem:[%s5060_s1 + $0xdc0] sm:$0xff]  ;;  %v3092_v53 = vpack.c.bf16 %v426_v43, %v425_v41  ;;  %v3094_v33 = vpack.c.bf16 %v444_v49, %v443_v48 }
  0xc4   :  { %3111 = vmatprep.subr.bf16.mxu1 %v3110_v4  ;;  %1495 = vmatmul.mubr.f32.vlgmr.msra.gmra.mrb[10].mxu0 %v4380_v31  ;;  %v423_v31 = vld [vmem:[%s5060_s1 + $0xc20] sm:$0xff]  ;;  %v476_v51 = vld [vmem:[%s5060_s1 + $0xdc8] sm:$0xff]  ;;  %v3124_v54 = vpack.c.bf16 %v458_v47, %v457_v44  ;;  %v445_v59 = vld [vmem:[%s5060_s1 + $0xcd0] sm:$0xff] }
  0xc5   :  { %3081 = vmatpush3.bf16.msra.mxu0 %v3080_v12  ;;  %1634 = vmatprep.mubr.f32.mxu0 %v679_v23  ;;  %v3088_v38 = vpack.c.bf16 %v424_v30, %v423_v31  ;;  %v427_v55 = vld [vmem:[%s5060_s1 + $0xc40] sm:$0xff]  ;;  %v428_v56 = vld [vmem:[%s5060_s1 + $0xc48] sm:$0xff]  ;;  %v3126_v45 = vpack.c.bf16 %v476_v51, %v475_v50  ;;  %v446_v60 = vld [vmem:[%s5060_s1 + $0xcd8] sm:$0xff] }
  0xc6   :  { %1565 = vmatmul.mubr.f32.vlgmr.msra.gmra.mrb[10].mxu1 %v4389_v34  ;;  %3083 = vmatprep.subr.bf16.mxu0 %v3082_v15  ;;  %v456_v34 = vld [vmem:[%s5060_s1 + $0xd28] sm:$0xff]  ;;  %v459_v57 = vld [vmem:[%s5060_s1 + $0xd40] sm:$0xff]  ;;  %v477_v61 = vld [vmem:[%s5060_s1 + $0xdd0] sm:$0xff]  ;;  %v3096_v63 = vpack.c.bf16 %v428_v56, %v427_v55  ;;  %v3098_v1 = vpack.c.bf16 %v446_v60, %v445_v59 }
  0xc7   :  { %3113 = vmatpush3.bf16.msra.mxu1 %v3112_v14  ;;  %1704 = vmatprep.mubr.f32.mxu1 %v680_v26  ;;  %v3120_v39 = vpack.c.bf16 %v456_v34, %v455_v32  ;;  %v460_v58 = vld [vmem:[%s5060_s1 + $0xd48] sm:$0xff]  ;;  %v478_v62 = vld [vmem:[%s5060_s1 + $0xdd8] sm:$0xff]  ;;  %v429_v2 = vld [vmem:[%s5060_s1 + $0xc50] sm:$0xff] }
  0xc8   :  { %3115 = vmatprep.subr.bf16.mxu1 %v3114_v19  ;;  %v3128_v0 = vpack.c.bf16 %v460_v58, %v459_v57  ;;  %v430_v3 = vld [vmem:[%s5060_s1 + $0xc58] sm:$0xff]  ;;  %v461_v4 = vld [vmem:[%s5060_s1 + $0xd50] sm:$0xff]  ;;  %v3130_v5 = vpack.c.bf16 %v478_v62, %v477_v61  ;;  %v447_v7 = vld [vmem:[%s5060_s1 + $0xce0] sm:$0xff] }
  0xc9   :  { %3085 = vmatpush3.bf16.msra.mxu0 %v3084_v27  ;;  %v462_v6 = vld [vmem:[%s5060_s1 + $0xd58] sm:$0xff]  ;;  %v448_v9 = vld [vmem:[%s5060_s1 + $0xce8] sm:$0xff]  ;;  %v479_v11 = vld [vmem:[%s5060_s1 + $0xde0] sm:$0xff]  ;;  %v3100_v14 = vpack.c.bf16 %v430_v3, %v429_v2 }
  0xca   :  { %3087 = vmatprep.subr.bf16.mxu0 %v3086_v29  ;;  %v480_v12 = vld [vmem:[%s5060_s1 + $0xde8] sm:$0xff]  ;;  %v3132_v15 = vpack.c.bf16 %v462_v6, %v461_v4  ;;  %v3102_v16 = vpack.c.bf16 %v448_v9, %v447_v7  ;;  %v431_v17 = vld [vmem:[%s5060_s1 + $0xc60] sm:$0xff]  ;;  %v449_v22 = vld [vmem:[%s5060_s1 + $0xcf0] sm:$0xff] }
  0xcb   :  { %3117 = vmatpush3.bf16.msra.mxu1 %v3116_v28  ;;  %v432_v18 = vld [vmem:[%s5060_s1 + $0xc68] sm:$0xff]  ;;  %v463_v19 = vld [vmem:[%s5060_s1 + $0xd60] sm:$0xff]  ;;  %v3134_v20 = vpack.c.bf16 %v480_v12, %v479_v11  ;;  %v450_v23 = vld [vmem:[%s5060_s1 + $0xcf8] sm:$0xff] }
  0xcc   :  { %3119 = vmatprep.subr.bf16.mxu1 %v3118_v42  ;;  %v464_v21 = vld [vmem:[%s5060_s1 + $0xd68] sm:$0xff]  ;;  %v481_v24 = vld [vmem:[%s5060_s1 + $0xdf0] sm:$0xff]  ;;  %v482_v25 = vld [vmem:[%s5060_s1 + $0xdf8] sm:$0xff]  ;;  %v3104_v26 = vpack.c.bf16 %v432_v18, %v431_v17  ;;  %v3106_v29 = vpack.c.bf16 %v450_v23, %v449_v22 }
  0xcd   :  { %3089 = vmatpush3.bf16.msra.mxu0 %v3088_v38  ;;  %v34_v27 = vld [vmem:[%s5059_s0 + $0x38] sm:$0xff]  ;;  %v3136_v28 = vpack.c.bf16 %v464_v21, %v463_v19  ;;  %v433_v31 = vld [vmem:[%s5060_s1 + $0xc70] sm:$0xff]  ;;  %v3138_v42 = vpack.c.bf16 %v482_v25, %v481_v24  ;;  %v499_v35 = vld [vmem:[%s5060_s1 + $0xe80] sm:$0xff] }
  0xce   :  { %3091 = vmatprep.subr.bf16.mxu0 %v3090_v40  ;;  %v434_v30 = vld [vmem:[%s5060_s1 + $0xc78] sm:$0xff]  ;;  %v465_v32 = vld [vmem:[%s5060_s1 + $0xd70] sm:$0xff]  ;;  %v500_v36 = vld [vmem:[%s5060_s1 + $0xe88] sm:$0xff]  ;;  %v681_v38 = vcombine.high %v34_v27, %v34_v27  ;;  %v4794_v51 = vrot.slane %v34_v27, %v3471_v13 }
  0xcf   :  { %3121 = vmatpush3.bf16.msra.mxu1 %v3120_v39  ;;  %v466_v34 = vld [vmem:[%s5060_s1 + $0xd78] sm:$0xff]  ;;  %v531_v52 = vld [vmem:[%s5060_s1 + $0xf80] sm:$0xff]  ;;  %v532_v37 = vld [vmem:[%s5060_s1 + $0xf88] sm:$0xff]  ;;  %v3108_v39 = vpack.c.bf16 %v434_v30, %v433_v31  ;;  %v3142_v41 = vpack.c.bf16 %v500_v36, %v499_v35 }
  0xd0   :  { %3123 = vmatprep.subr.bf16.mxu1 %v3122_v46  ;;  %v3140_v40 = vpack.c.bf16 %v466_v34, %v465_v32  ;;  %v483_v43 = vld [vmem:[%s5060_s1 + $0xe00] sm:$0xff]  ;;  %v484_v44 = vld [vmem:[%s5060_s1 + $0xe08] sm:$0xff]  ;;  %v3174_v47 = vpack.c.bf16 %v532_v37, %v531_v52  ;;  %v501_v49 = vld [vmem:[%s5060_s1 + $0xe90] sm:$0xff] }
  0xd1   :  { %3093 = vmatpush3.bf16.msra.mxu0 %v3092_v53  ;;  %v515_v46 = vld [vmem:[%s5060_s1 + $0xf00] sm:$0xff]  ;;  %v516_v48 = vld [vmem:[%s5060_s1 + $0xf08] sm:$0xff]  ;;  %v502_v50 = vld [vmem:[%s5060_s1 + $0xe98] sm:$0xff]  ;;  %v3144_v55 = vpack.c.bf16 %v484_v44, %v483_v43 }
  0xd2   :  { %3095 = vmatprep.subr.bf16.mxu0 %v3094_v33  ;;  %v533_v53 = vld [vmem:[%s5060_s1 + $0xf90] sm:$0xff]  ;;  %v4803_v33 = vrot.slane %v681_v38, %v3471_v13  ;;  %v3176_v56 = vpack.c.bf16 %v516_v48, %v515_v46  ;;  %v3146_v57 = vpack.c.bf16 %v502_v50, %v501_v49  ;;  %v486_v58 = vld [vmem:[%s5060_s1 + $0xe18] sm:$0xff]  ;;  %v503_v61 = vld [vmem:[%s5060_s1 + $0xea0] sm:$0xff] }
  0xd3   :  { %3125 = vmatpush3.bf16.msra.mxu1 %v3124_v54  ;;  %v534_v54 = vld [vmem:[%s5060_s1 + $0xf98] sm:$0xff]  ;;  %v517_v59 = vld [vmem:[%s5060_s1 + $0xf10] sm:$0xff]  ;;  %v504_v62 = vld [vmem:[%s5060_s1 + $0xea8] sm:$0xff] }
  0xd4   :  { %3127 = vmatprep.subr.bf16.mxu1 %v3126_v45  ;;  %v485_v45 = vld [vmem:[%s5060_s1 + $0xe10] sm:$0xff]  ;;  %v3178_v13 = vpack.c.bf16 %v534_v54, %v533_v53  ;;  %v518_v60 = vld [vmem:[%s5060_s1 + $0xf18] sm:$0xff]  ;;  %v697_v2 = vcombine.high %v4803_v33, %v4803_v33  ;;  %v488_v6 = vld [vmem:[%s5060_s1 + $0xe28] sm:$0xff] }
  0xd5   :  { %3097 = vmatpush3.bf16.msra.mxu0 %v3096_v63  ;;  %v696_v63 = vcombine.high %v4794_v51, %v4794_v51  ;;  %v3148_v3 = vpack.c.bf16 %v486_v58, %v485_v45  ;;  %v3180_v4 = vpack.c.bf16 %v518_v60, %v517_v59  ;;  %v519_v7 = vld [vmem:[%s5060_s1 + $0xf20] sm:$0xff]  ;;  %v505_v11 = vld [vmem:[%s5060_s1 + $0xeb0] sm:$0xff]  ;;  %v506_v12 = vld [vmem:[%s5060_s1 + $0xeb8] sm:$0xff] }
  0xd6   :  { %3099 = vmatprep.subr.bf16.mxu0 %v3098_v1  ;;  %v536_v1 = vld [vmem:[%s5060_s1 + $0xfa8] sm:$0xff]  ;;  %v3154_v18 = vpack.c.bf16 %v506_v12, %v505_v11  ;;  %v489_v19 = vld [vmem:[%s5060_s1 + $0xe30] sm:$0xff]  ;;  %v522_v23 = vld [vmem:[%s5060_s1 + $0xf38] sm:$0xff] }
  0xd7   :  { %3129 = vmatpush3.bf16.msra.mxu1 %v3128_v0  ;;  %v535_v0 = vld [vmem:[%s5060_s1 + $0xfa0] sm:$0xff]  ;;  %v521_v21 = vld [vmem:[%s5060_s1 + $0xf30] sm:$0xff]  ;;  %v508_v25 = vld [vmem:[%s5060_s1 + $0xec8] sm:$0xff] }
  0xd8   :  { %3131 = vmatprep.subr.bf16.mxu1 %v3130_v5  ;;  %v3150_v5 = vpack.c.bf16 %v504_v62, %v503_v61  ;;  %v3182_v9 = vpack.c.bf16 %v536_v1, %v535_v0  ;;  %v507_v24 = vld [vmem:[%s5060_s1 + $0xec0] sm:$0xff]  ;;  %v540_v27 = vld [vmem:[%s5060_s1 + $0xfc8] sm:$0xff]  ;;  %v509_v36 = vld [vmem:[%s5060_s1 + $0xed0] sm:$0xff] }
  0xd9   :  { %3101 = vmatpush3.bf16.msra.mxu0 %v3100_v14  ;;  %v537_v14 = vld [vmem:[%s5060_s1 + $0xfb0] sm:$0xff]  ;;  %v3158_v31 = vpack.c.bf16 %v508_v25, %v507_v24  ;;  %v491_v30 = vld [vmem:[%s5060_s1 + $0xe40] sm:$0xff]  ;;  %v492_v32 = vld [vmem:[%s5060_s1 + $0xe48] sm:$0xff] }
  0xda   :  { %3103 = vmatprep.subr.bf16.mxu0 %v3102_v16  ;;  %v524_v35 = vld [vmem:[%s5060_s1 + $0xf48] sm:$0xff]  ;;  %v510_v52 = vld [vmem:[%s5060_s1 + $0xed8] sm:$0xff]  ;;  %v541_v37 = vld [vmem:[%s5060_s1 + $0xfd0] sm:$0xff] }
  0xdb   :  { %3133 = vmatpush3.bf16.msra.mxu1 %v3132_v15  ;;  %v538_v15 = vld [vmem:[%s5060_s1 + $0xfb8] sm:$0xff]  ;;  %v493_v43 = vld [vmem:[%s5060_s1 + $0xe50] sm:$0xff]  ;;  %v511_v49 = vld [vmem:[%s5060_s1 + $0xee0] sm:$0xff] }
  0xdc   :  { %3135 = vmatprep.subr.bf16.mxu1 %v3134_v20  ;;  %v490_v20 = vld [vmem:[%s5060_s1 + $0xe38] sm:$0xff]  ;;  %v3186_v22 = vpack.c.bf16 %v538_v15, %v537_v14  ;;  %v525_v46 = vld [vmem:[%s5060_s1 + $0xf50] sm:$0xff]  ;;  %v512_v50 = vld [vmem:[%s5060_s1 + $0xee8] sm:$0xff] }
  0xdd   :  { %3105 = vmatpush3.bf16.msra.mxu0 %v3104_v26  ;;  %v539_v26 = vld [vmem:[%s5060_s1 + $0xfc0] sm:$0xff]  ;;  %v542_v38 = vld [vmem:[%s5060_s1 + $0xfd8] sm:$0xff]  ;;  %v544_v54 = vld [vmem:[%s5060_s1 + $0xfe8] sm:$0xff] }
  0xde   :  { %3107 = vmatprep.subr.bf16.mxu0 %v3106_v29  ;;  %v3188_v29 = vpack.c.bf16 %v522_v23, %v521_v21  ;;  %v3190_v34 = vpack.c.bf16 %v540_v27, %v539_v26  ;;  %v494_v44 = vld [vmem:[%s5060_s1 + $0xe58] sm:$0xff]  ;;  %v543_v53 = vld [vmem:[%s5060_s1 + $0xfe0] sm:$0xff]  ;;  %v496_v58 = vld [vmem:[%s5060_s1 + $0xe68] sm:$0xff] }
  0xdf   :  { %3137 = vmatpush3.bf16.msra.mxu1 %v3136_v28  ;;  %v3156_v28 = vpack.c.bf16 %v490_v20, %v489_v19  ;;  %v526_v48 = vld [vmem:[%s5060_s1 + $0xf58] sm:$0xff]  ;;  %v495_v45 = vld [vmem:[%s5060_s1 + $0xe60] sm:$0xff]  ;;  %v3198_v60 = vpack.c.bf16 %v544_v54, %v543_v53  ;;  %v528_v61 = vld [vmem:[%s5060_s1 + $0xf68] sm:$0xff] }
  0xe0   :  { %3139 = vmatprep.subr.bf16.mxu1 %v3138_v42  ;;  %v523_v42 = vld [vmem:[%s5060_s1 + $0xf40] sm:$0xff]  ;;  %v513_v62 = vld [vmem:[%s5060_s1 + $0xef0] sm:$0xff]  ;;  %v498_v12 = vld [vmem:[%s5060_s1 + $0xe78] sm:$0xff] }
  0xe1   :  { %3109 = vmatpush3.bf16.msra.mxu0 %v3108_v39  ;;  %v3160_v39 = vpack.c.bf16 %v492_v32, %v491_v30  ;;  %v527_v59 = vld [vmem:[%s5060_s1 + $0xf60] sm:$0xff]  ;;  %v497_v11 = vld [vmem:[%s5060_s1 + $0xe70] sm:$0xff]  ;;  %v1870_v54 = vld [vmem:[%s5064_s5 + $0x28] sm:$0xff] }
  0xe2   :  { %3143 = vmatprep.subr.bf16.mxu0 %v3142_v41  ;;  %v3162_v41 = vpack.c.bf16 %v510_v52, %v509_v36  ;;  %v2052_v0 = vld [vmem:[%s5061_s2] ss:$0 sm:$0xff]  ;;  %v3172_v19 = vpack.c.bf16 %v498_v12, %v497_v11  ;;  %v1853_v52 = vld [vmem:[%s5063_s4 + $0x10] sm:$0xff] }
  0xe3   :  { %3141 = vmatpush3.bf16.msra.mxu1 %v3140_v40  ;;  %v3192_v40 = vpack.c.bf16 %v524_v35, %v523_v42  ;;  %v1869_v53 = vld [vmem:[%s5064_s5 + $0x20] sm:$0xff] }
  0xe4   :  { %3175 = vmatprep.subr.bf16.mxu1 %v3174_v47  ;;  %1635 = vmatmul.mubr.f32.vlgmr.msra.gmra.mrb[12].mxu0 %v4587_v8  ;;  %v487_v8 = vld [vmem:[%s5060_s1 + $0xe20] sm:$0xff]  ;;  %v3194_v47 = vpack.c.bf16 %v542_v38, %v541_v37  ;;  %v3277_v37 = vmov 0.0|0.0  }
  0xe5   :  { %3145 = vmatpush3.bf16.msra.mxu0 %v3144_v55  ;;  %1774 = vmatprep.mubr.f32.mxu0 %v696_v63  ;;  %v3152_v16 = vpack.c.bf16 %v488_v6, %v487_v8  ;;  %v3164_v55 = vpack.c.bf16 %v494_v44, %v493_v43  ;;  %v514_v63 = vld [vmem:[%s5060_s1 + $0xef8] sm:$0xff]  ;;  %v3168_v6 = vpack.c.bf16 %v496_v58, %v495_v45  ;;  %v1867_v44 = vld [vmem:[%s5064_s5 + $0x10] sm:$0xff] }
  0xe6   :  { %1705 = vmatmul.mubr.f32.vlgmr.msra.gmra.mrb[12].mxu1 %v4596_v10  ;;  %3147 = vmatprep.subr.bf16.mxu0 %v3146_v57  ;;  %v520_v10 = vld [vmem:[%s5060_s1 + $0xf28] sm:$0xff]  ;;  %v3166_v57 = vpack.c.bf16 %v512_v50, %v511_v49  ;;  %v3213_v45 = vpack.c.bf16 %v1870_v54, %v1869_v53 }
  0xe7   :  { %3177 = vmatpush3.bf16.msra.mxu1 %v3176_v56  ;;  %1844 = vmatprep.mubr.f32.mxu1 %v697_v2  ;;  %v3184_v17 = vpack.c.bf16 %v520_v10, %v519_v7  ;;  %v3196_v56 = vpack.c.bf16 %v526_v48, %v525_v46  ;;  %v3170_v10 = vpack.c.bf16 %v514_v63, %v513_v62  ;;  %v1855_v48 = vld [vmem:[%s5063_s4 + $0x20] sm:$0xff]  ;;  %v1856_v49 = vld [vmem:[%s5063_s4 + $0x28] sm:$0xff]  ;;  %v1872_v62 = vld [vmem:[%s5064_s5 + $0x38] sm:$0xff] }
  0xe8   :  { %3179 = vmatprep.subr.bf16.mxu1 %v3178_v13 }
  0xe9   :  { %3149 = vmatpush3.bf16.msra.mxu0 %v3148_v3  ;;  %v545_v3 = vld [vmem:[%s5060_s1 + $0xff0] sm:$0xff] }
  0xea   :  { %3151 = vmatprep.subr.bf16.mxu0 %v3150_v5 }
  0xeb   :  { %3181 = vmatpush3.bf16.msra.mxu1 %v3180_v4  ;;  %v546_v4 = vld [vmem:[%s5060_s1 + $0xff8] sm:$0xff] }
  0xec   :  { %3183 = vmatprep.subr.bf16.mxu1 %v3182_v9  ;;  %v3200_v9 = vpack.c.bf16 %v528_v61, %v527_v59  ;;  %v3202_v15 = vpack.c.bf16 %v546_v4, %v545_v3  ;;  %v1859_v59 = vld [vmem:[%s5063_s4 + $0x40] sm:$0xff]  ;;  %v1871_v61 = vld [vmem:[%s5064_s5 + $0x30] sm:$0xff] }
  0xed   :  { %3153 = vmatpush3.bf16.msra.mxu0 %v3152_v16  ;;  %v529_v16 = vld [vmem:[%s5060_s1 + $0xf70] sm:$0xff] }
  0xee   :  { %3155 = vmatprep.subr.bf16.mxu0 %v3154_v18 }
  0xef   :  { %3185 = vmatpush3.bf16.msra.mxu1 %v3184_v17  ;;  %v530_v17 = vld [vmem:[%s5060_s1 + $0xf78] sm:$0xff] }
  0xf0   :  { %3187 = vmatprep.subr.bf16.mxu1 %v3186_v22  ;;  %v3204_v20 = vpack.c.bf16 %v530_v17, %v529_v16  ;;  %v1864_v16 = vld [vmem:[%s5062_s3] sm:$0x3] }
  0xf1   :  { %3157 = vmatpush3.bf16.msra.mxu0 %v3156_v28  ;;  %v1863_v17 = vld [vmem:[%s5063_s4 + $0x60] sm:$0xf] }
  0xf2   :  { %3159 = vmatprep.subr.bf16.mxu0 %v3158_v31 }
  0xf3   :  { %3189 = vmatpush3.bf16.msra.mxu1 %v3188_v29 }
  0xf4   :  { %3191 = vmatprep.subr.bf16.mxu1 %v3190_v34 }
  0xf5   :  { %3161 = vmatpush3.bf16.msra.mxu0 %v3160_v39  ;;  %v1854_v39 = vld [vmem:[%s5063_s4 + $0x18] sm:$0xff] }
  0xf6   :  { %3163 = vmatprep.subr.bf16.mxu0 %v3162_v41  ;;  %v1866_v41 = vld [vmem:[%s5064_s5 + $0x8] sm:$0xff]  ;;  %v3225_v46 = vpack.c.bf16 %v1854_v39, %v1853_v52 }
  0xf7   :  { %3193 = vmatpush3.bf16.msra.mxu1 %v3192_v40  ;;  %v2089_v13 = vpop.f32.mrb[0].mxu0  ;;  %v1865_v40 = vld [vmem:[%s5064_s5] sm:$0xff] }
  0xf8   :  { %3195 = vmatprep.subr.bf16.mxu1 %v3194_v47  ;;  %v2090_v1 = vpop.f32.mrb[1].mxu0  ;;  %v3207_v43 = vpack.c.bf16 %v1866_v41, %v1865_v40  ;;  %v1868_v47 = vld [vmem:[%s5064_s5 + $0x18] sm:$0xff] }
  0xf9   :  { %v2124_v2 = vpop.f32.mrb[0].mxu1  ;;  %v2091_v5 = vadd.f32 %v2090_v1, %v2089_v13  ;;  %3165 = vmatpush3.bf16.msra.mxu0 %v3164_v55  ;;  %v3210_v50 = vpack.c.bf16 %v1868_v47, %v1867_v44  ;;  %v3228_v55 = vpack.c.bf16 %v1856_v49, %v1855_v48  ;;  %v1860_v13 = vld [vmem:[%s5063_s4 + $0x48] sm:$0xff] }
  0xfa   :  { %v2125_v8 = vpop.f32.mrb[1].mxu1  ;;  %3167 = vmatprep.subr.bf16.mxu0 %v3166_v57  ;;  %v1858_v57 = vld [vmem:[%s5063_s4 + $0x38] sm:$0xff] }
  0xfb   :  { %v2126_v7 = vadd.f32 %v2125_v8, %v2124_v2  ;;  %3197 = vmatpush3.bf16.msra.mxu1 %v3196_v56  ;;  %v797_v14 = vadd.f32 %v2091_v5, %v2052_v0  ;;  %v1857_v56 = vld [vmem:[%s5063_s4 + $0x30] sm:$0xff]  ;;  %v3216_v0 = vpack.c.bf16 %v1872_v62, %v1871_v61  ;;  %v1862_v8 = vld [vmem:[%s5063_s4 + $0x58] sm:$0xff] }
  0xfc   :  { %3199 = vmatprep.subr.bf16.mxu1 %v3198_v60  ;;  %v3231_v58 = vpack.c.bf16 %v1858_v57, %v1857_v56  ;;  %v3234_v60 = vpack.c.bf16 %v1860_v13, %v1859_v59  ;;  %v1861_v5 = vld [vmem:[%s5063_s4 + $0x50] sm:$0xff] }
  0xfd   :  { %v867_v18 = vadd.f32 %v2126_v7, %v797_v14  ;;  %3169 = vmatpush3.bf16.msra.mxu0 %v3168_v6  ;;  %v3237_v7 = vpack.c.bf16 %v1862_v8, %v1861_v5 }
  0xfe   :  { %3171 = vmatprep.subr.bf16.mxu0 %v3170_v10  ;;  %v1874_v10 = vld [vmem:[%s5064_s5 + $0x48] sm:$0xff] }
  0xff   :  { %3201 = vmatpush3.bf16.msra.mxu1 %v3200_v9  ;;  %v1873_v9 = vld [vmem:[%s5064_s5 + $0x40] sm:$0xff]  ;;  %s3280_s5 = smov [#allocation2]  }
 0x100   :  { %3203 = vmatprep.subr.bf16.mxu1 %v3202_v15  ;;  %v3219_v12 = vpack.c.bf16 %v1874_v10, %v1873_v9  ;;  %v3279_v15 = vmov 0.0   ;;  %s2044_s20 = sshll.u32 %s3280_s5, 4  ;;  %s2045_s20 = int_to_ptr.vmem [resolvable:$true] %s2044_s20 }
 0x101   :  { %3173 = vmatpush3.bf16.msra.mxu0 %v3172_v19  ;;  %s3252_s21 = scalar_lea.vmem %s2045_s20, 32  ;;  %p3257_p1 = scmp.lt.s32.totalorder %s2045_s20, %s2045_s20 }
 0x102   :  { %3206 = vmatprep.subr.bf16.mxu0 %v3277_v37  ;;  %p3253_p0 = scmp.ne.s32.totalorder %s2045_s20, %s3252_s21  ;;  %p3258_p2 = scmp.lt.s32.totalorder %s3252_s21, %s3252_s21 }
 0x103   :  { %3205 = vmatpush3.bf16.msra.mxu1 %v3204_v20 }
 0x104   :  { %1775 = vmatmul.mubr.f32.vlgmr.msra.gmra.mrb[14].mxu0 %v4794_v51  ;;  %v1851_v51 = vld [vmem:[%s5063_s4] sm:$0xff]  ;;  %3221 = vmatprep.subr.bf16.mxu1 %v3277_v37  ;;  %p3259_p3 = por %p3258_p2, %p3257_p1 }
 0x105   :  { %3208 = vmatpush3.bf16.msra.mxu0 %v3207_v43  ;;  %2662 = vmatprep.mubr.msk.f32.mxu0 %vm3278_vm0, %v3279_v15 }
 0x106   :  { %1845 = vmatmul.mubr.f32.vlgmr.msra.gmra.mrb[14].mxu1 %v4803_v33  ;;  %v1852_v33 = vld [vmem:[%s5063_s4 + $0x8] sm:$0xff]  ;;  %3209 = vmatprep.subr.bf16.mxu0 %v3277_v37  ;;  %p3260_p4 = pnand %p3259_p3, %p3253_p0 }
 0x107   :  { %v3222_v38 = vpack.c.bf16 %v1852_v33, %v1851_v51  ;;  %2691 = vmatprep.mubr.msk.f32.mxu1 %vm3278_vm0, %v3279_v15 }
 0x109   :  { %3223 = vmatpush3.bf16.msra.mxu1 %v3222_v38  ;;  %3211 = vmatpush3.bf16.msra.mxu0 %v3210_v50 }
 0x10a   :  { %3224 = vmatprep.subr.bf16.mxu1 %v3277_v37  ;;  %3212 = vmatprep.subr.bf16.mxu0 %v3277_v37 }
 0x10d   :  { %3226 = vmatpush3.bf16.msra.mxu1 %v3225_v46  ;;  %3214 = vmatpush3.bf16.msra.mxu0 %v3213_v45 }
 0x10e   :  { %3227 = vmatprep.subr.bf16.mxu1 %v3277_v37  ;;  %3215 = vmatprep.subr.bf16.mxu0 %v3277_v37 }
 0x111   :  { %3229 = vmatpush3.bf16.msra.mxu1 %v3228_v55  ;;  %3217 = vmatpush3.bf16.msra.mxu0 %v3216_v0  ;;  %v2056_v55 = vld [vmem:[%s5065_s6] ss:$0 sm:$0xff] }
 0x112   :  { %3230 = vmatprep.subr.bf16.mxu1 %v3277_v37  ;;  %3218 = vmatprep.subr.bf16.mxu0 %v3277_v37 }
 0x115   :  { %3232 = vmatpush3.bf16.msra.mxu1 %v3231_v58  ;;  %3220 = vmatpush3.bf16.msra.mxu0 %v3219_v12 }
 0x116   :  { %3233 = vmatprep.subr.bf16.mxu1 %v3277_v37 }
 0x117   :  { %v2159_v21 = vpop.f32.mrb[2].mxu0 }
 0x118   :  { %v2160_v22 = vpop.f32.mrb[3].mxu0  ;;  %2663 = vmatmul.mubr.msk.f32.vlgmr.msra.gmra.mrb[16].mxu0 %vm1875_vm1, %v1864_v16 }
 0x119   :  { %v2194_v23 = vpop.f32.mrb[2].mxu1  ;;  %v2161_v24 = vadd.f32 %v2160_v22, %v2159_v21  ;;  %3235 = vmatpush3.bf16.msra.mxu1 %v3234_v60 }
 0x11a   :  { %v2195_v25 = vpop.f32.mrb[3].mxu1  ;;  %3236 = vmatprep.subr.bf16.mxu1 %v3277_v37 }
 0x11b   :  { %v2196_v26 = vadd.f32 %v2195_v25, %v2194_v23  ;;  %v937_v27 = vadd.f32 %v2161_v24, %v867_v18 }
 0x11d   :  { %v1007_v28 = vadd.f32 %v2196_v26, %v937_v27  ;;  %3238 = vmatpush3.bf16.msra.mxu1 %v3237_v7 }
 0x11e   :  { %2689 = vmatprep.subr.mxu1 %v3279_v15 }
 0x121   :  { %2690 = vmatpush3.msk.msra.mxu1 %vm1953_vm2, %v1863_v17 }
 0x137   :  { %v2229_v29 = vpop.f32.mrb[4].mxu0 }
 0x138   :  { %v2230_v31 = vpop.f32.mrb[5].mxu0 }
 0x139   :  { %v2264_v30 = vpop.f32.mrb[4].mxu1  ;;  %v2231_v32 = vadd.f32 %v2230_v31, %v2229_v29 }
 0x13a   :  { %v2265_v42 = vpop.f32.mrb[5].mxu1 }
 0x13b   :  { %v2266_v34 = vadd.f32 %v2265_v42, %v2264_v30  ;;  %v1077_v35 = vadd.f32 %v2231_v32, %v1007_v28 }
 0x13d   :  { %v1147_v36 = vadd.f32 %v2266_v34, %v1077_v35 }
 0x157   :  { %v2299_v63 = vpop.f32.mrb[6].mxu0 }
 0x158   :  { %v2300_v1 = vpop.f32.mrb[7].mxu0 }
 0x159   :  { %v2334_v2 = vpop.f32.mrb[6].mxu1  ;;  %v2301_v3 = vadd.f32 %v2300_v1, %v2299_v63 }
 0x15a   :  { %v2335_v4 = vpop.f32.mrb[7].mxu1 }
 0x15b   :  { %v2336_v6 = vadd.f32 %v2335_v4, %v2334_v2  ;;  %v1217_v11 = vadd.f32 %v2301_v3, %v1147_v36 }
 0x15d   :  { %v1287_v14 = vadd.f32 %v2336_v6, %v1217_v11 }
 0x177   :  { %v2369_v18 = vpop.f32.mrb[8].mxu0 }
 0x178   :  { %v2370_v19 = vpop.f32.mrb[9].mxu0 }
 0x179   :  { %v2404_v20 = vpop.f32.mrb[8].mxu1  ;;  %v2371_v21 = vadd.f32 %v2370_v19, %v2369_v18 }
 0x17a   :  { %v2405_v22 = vpop.f32.mrb[9].mxu1 }
 0x17b   :  { %v2406_v23 = vadd.f32 %v2405_v22, %v2404_v20  ;;  %v1357_v24 = vadd.f32 %v2371_v21, %v1287_v14 }
 0x17d   :  { %v1427_v25 = vadd.f32 %v2406_v23, %v1357_v24 }
 0x197   :  { %v2439_v26 = vpop.f32.mrb[10].mxu0 }
 0x198   :  { %v2440_v27 = vpop.f32.mrb[11].mxu0 }
 0x199   :  { %v2474_v28 = vpop.f32.mrb[10].mxu1  ;;  %v2441_v29 = vadd.f32 %v2440_v27, %v2439_v26 }
 0x19a   :  { %v2475_v31 = vpop.f32.mrb[11].mxu1 }
 0x19b   :  { %v2476_v30 = vadd.f32 %v2475_v31, %v2474_v28  ;;  %v1497_v32 = vadd.f32 %v2441_v29, %v1427_v25 }
 0x19d   :  { %v1567_v42 = vadd.f32 %v2476_v30, %v1497_v32 }
 0x1b7   :  { %v2509_v34 = vpop.f32.mrb[12].mxu0 }
 0x1b8   :  { %v2510_v35 = vpop.f32.mrb[13].mxu0 }
 0x1b9   :  { %v2544_v36 = vpop.f32.mrb[12].mxu1  ;;  %v2511_v51 = vadd.f32 %v2510_v35, %v2509_v34 }
 0x1ba   :  { %v2545_v33 = vpop.f32.mrb[13].mxu1 }
 0x1bb   :  { %v2546_v52 = vadd.f32 %v2545_v33, %v2544_v36  ;;  %v1637_v37 = vadd.f32 %v2511_v51, %v1567_v42 }
 0x1bd   :  { %v1707_v38 = vadd.f32 %v2546_v52, %v1637_v37 }
 0x1d7   :  { %v2579_v39 = vpop.f32.mrb[14].mxu0 }
 0x1d8   :  { %v2580_v40 = vpop.f32.mrb[15].mxu0 }
 0x1d9   :  { %v2614_v41 = vpop.f32.mrb[14].mxu1  ;;  %v2581_v43 = vadd.f32 %v2580_v40, %v2579_v39 }
 0x1da   :  { %v2615_v44 = vpop.f32.mrb[15].mxu1 }
 0x1db   :  { %v2616_v46 = vadd.f32 %v2615_v44, %v2614_v41  ;;  %v1777_v47 = vadd.f32 %v2581_v43, %v1707_v38 }
 0x1dd   :  { %v1847_v48 = vadd.f32 %v2616_v46, %v1777_v47 }
 0x1df   :  { %v1850_v49 = vmax.f32 %v1847_v48, 0.0 }
 0x1e1   :  { %2692 = vmatmul.mubr.msk.f32.vlgmr.msra.gmra.mrb[16].mxu1 %vm1949_vm3, %v1850_v49 }
 0x1eb   :  { %v1945_v50 = vpop.f32.mrb[16].mxu0 }
 0x1ec   :  { %v2664_v53 = vpop.f32.mrb[17].mxu0 }
 0x2b4   :  { %v2023_v54 = vpop.f32.mrb[16].mxu1 }
 0x2b5   :  { %v2024_v56 = vadd.f32 %v2023_v54, %v1945_v50  ;;  %v2693_v57 = vpop.f32.mrb[17].mxu1 }
 0x2b7   :  { %v2034_v45 = vadd.f32 %v2056_v55, %v2024_v56 }
 0x2b9   :  { %v2035_v58 = vmax.f32 %v2034_v45, 0.0 }
 0x2bb   :  { %2037 = vst.msk [vmem:[#allocation2] sm:$0x3] %vm2036_vm4, %v2035_v58 }
 0x2bc   :  { %3263 = shalt.err (!%p3260_p4)
}
 0x2bd   :  { %s3264_s6 = scalar_lea.hbm %s5066_s7, 32 }
 0x2be   :  { %p3265_p5 = scmp.ne.s32.totalorder %s5066_s7, %s3264_s6  ;;  %p3268_p6 = scmp.lt.u32.totalorder %s3264_s6, %s5066_s7 }
 0x2c0   :  { %p3270_p7 = pnand %p3268_p6, %p3265_p5 }
 0x2c2   :  { %3273 = shalt.err (!%p3270_p7)
}
 0x2c3   :  { %2047 = dma.vmem_to_hbm [thread:$0]  %s2045_s20, 32, %s5066_s7, [#allocation3]  }
 0x2c4   :  { %3274 = dma.done.wait [#allocation3], 32  }
 0x2c5   :  { %3275 = vsyncadd [#allocation3], 4294967264 }
 0x2c6   :  { %2051 = vsyncpa [#allocation3], 1 }

// kernel: mynet_forward.2
= control target key start
LH: loop header
LB: loop body
LE: loop exit
PB: predicated region body
PF: predicated region fallthrough
CT: control target
= control target key end

     0   :  { %s8827_s0 = inlined_call_operand.hbm [shape: f32[2,25088], index: 0, kind: input, shape index: {}]   ;;  %s8828_s1 = inlined_call_operand.hbm [shape: f32[14,4,1792,1024], index: 1, kind: input, shape index: {}]   ;;  %s8829_s2 = inlined_call_operand.hbm [shape: f32[1,4096], index: 2, kind: input, shape index: {}]   ;;  %s8830_s3 = inlined_call_operand.vmem [shape: f32[2,4096], index: 3, kind: output, shape index: {}]  }
   0x1   :  { %8841 = sst [smem:[#allocation12_spill]] %s8828_s1 }
   0x2   :  { %8 = vsyncpa [#allocation3], 0 }
   0x3   :  { %9 = vsyncpa [#allocation5], 0 }
   0x4   :  { %11 = vsyncpa [#allocation5 + $0x1], 0  ;;  %s6576_s12 = smov 0   ;;  %s6578_s13 = smov 0  }
   0x5   :  { %s6580_s14 = smov 0   ;;  %s6582_s15 = smov 0  }
   0x6   :  { %s6584_s16 = smov 0   ;;  %s6586_s17 = smov 0  }
   0x7   :  { %s6588_s18 = smov 0   ;;  %s6590_s19 = smov 0  }
   0x8   :  { %s6592_s20 = smov 0   ;;  %s6594_s21 = smov 0  }
   0x9   :  { %s6596_s22 = smov 0  }
   0xa LB: > { %s26_s23 = sadd.s32 1, %s6539_s20  ;;  %s29_s24 = sadd.s32 1, %s6543_s21  ;;  %s6547_s22 = sphi %s6596_s22, %s17_s22   ;;  %s6543_s21 = sphi %s6594_s21, %s8872_s21   ;;  %s6539_s20 = sphi %s6592_s20, %s8871_s20   ;;  %s6535_s19 = sphi %s6590_s19, %s8870_s19   ;;  %s6531_s18 = sphi %s6588_s18, %s8869_s18   ;;  %s6527_s17 = sphi %s6586_s17, %s8868_s17   ;;  %s6523_s16 = sphi %s6584_s16, %s8867_s16   ;;  %s6519_s15 = sphi %s6582_s15, %s8866_s15   ;;  %s6515_s14 = sphi %s6580_s14, %s8865_s14   ;;  %s6511_s13 = sphi %s6578_s13, %s8864_s13   ;;  %s6507_s12 = sphi %s6576_s12, %s8863_s12  }
   0xb   : > { %p27_p0 = scmp.ge.s32.totalorder %s26_s23, 14  ;;  %s59_s25 = sadd.s32 1, %s6527_s17 }
   0xc   : > { %p66_p1 = scmp.ne.s32.totalorder %s6527_s17, %s6523_s16  ;;  %p8833_p2 = scmp.eq.s32.totalorder %s6547_s22, 0 }
   0xd   : > { %s8874_s23 = smov (%p27_p0, %s26_s23), 0  ;;  %s8876_s24 = smov (!%p27_p0, %s29_s24), %s6543_s21 }
   0xe   : > { %8842 = sst [smem:[#allocation10_spill]] %s8874_s23  ;;  %s54_s26 = ssub.s32 %s6539_s20, %s8874_s23 }
   0xf   : > { %p6644_p3 = por %p8833_p2, %p66_p1  ;;  %p31_p4 = scmp.ge.s32.totalorder %s8876_s24, 4 }
  0x10   : > { %p8832_p5 = scmp.lt.s32.totalorder %s6547_s22, 56  ;;  %s159_s28 = sand.u32 1, %s6547_s22  }
  0x11   : > { %s8878_s24 = smov (%p31_p4, %s8876_s24), 0  ;;  %s161_s29 = sand.u32 1, %s6527_s17  }
  0x12   : > { %8844 = sst [smem:[#allocation11_spill]] %s8878_s24  ;;  %s6655_s30 = ssub.s32 %s6543_s21, %s8878_s24 }
  0x13   : > { %s6238_s4 = smul.u32 14336, %s161_s29  ;;  %s56_s5 = sor.u32 %s6655_s30, %s54_s26 }
  0x14   : > { %p83_p6 = scmp.eq.s32.totalorder %s6655_s30, 0  ;;  %p57_p7 = scmp.eq.s32.totalorder %s56_s5, 0 }
  0x15   : > { %s6239_s6 = smul.u32 1792, %s6543_s21  ;;  %s163_s7 = scalar_lea.vmem [#allocation4], %s6238_s4 }
  0x16   : > { %s172_s8 = sshll.u32 %s163_s7, 4  ;;  %s6240_s10 = smul.u32 7168, %s6539_s20  ;;  %s6664_s8 = int_to_ptr.vmem [resolvable:$true] %s172_s8 }
  0x17   : > { %s6661_s9 = scalar_select %p57_p7, %s6527_s17, %s59_s25  }
  0x18   : > { %p6670_p8 = pnand %p8832_p5, %p6644_p3  ;;  %s169_s29 = sadd.s32 %s6240_s10, %s6239_s6 }
  0x19   : > { %s4382_s26 = sshll.u32 %s169_s29, 7  ;;  %s8846_s1 = sld [smem:[#allocation12_spill]] }
  0x1a   : > { %s6679_s25 = scalar_lea.sflag [#allocation5], %s159_s28  ;;  %p6363_p10 = pneg %p6670_p8 }
  0x1f   : > { %s6677_s4 = scalar_lea.hbm %s8846_s1, %s4382_s26  ;;  %s6366_s24 = scalar_lea.hbm %s8846_s1, 12845056 }
  0x20   : > { %s6361_s27 = scalar_lea.hbm %s6677_s4, 229376  ;;  %p6367_p13 = scmp.lt.u32.totalorder %s6677_s4, %s8846_s1 }
  0x21   : > { %p6362_p9 = scmp.ne.s32.totalorder %s6677_s4, %s6361_s27  ;;  %p6368_p0 = scmp.lt.u32.totalorder %s6366_s24, %s6361_s27 }
  0x22   : > { %p6370_p3 = scmp.lt.u32.totalorder %s6361_s27, %s6677_s4 }
  0x23   : > { %p6364_p11 = pnand %p6363_p10, %p6362_p9  ;;  %p6369_p1 = por %p6368_p0, %p6367_p13 }
  0x25   : > { %p6365_p12 = pneg %p6364_p11  ;;  %p6371_p4 = por %p6370_p3, %p6369_p1 }
  0x27   : > { %p6372_p7 = pnand %p6371_p4, %p6365_p12 }
  0x29   : > { %6375 = shalt.err (!%p6372_p7)
}
  0x2a   : > { %s6376_s28 = scalar_lea.vmem %s6664_s8, 229376  ;;  %s6549_s26 = smov [#allocation4]  }
  0x2b   : > { %p6377_p9 = scmp.ne.s32.totalorder %s6664_s8, %s6376_s28  ;;  %s6381_s5 = sshll.u32 %s6549_s26, 4  ;;  %s6382_s5 = int_to_ptr.vmem [resolvable:$false] %s6381_s5 }
  0x2c   : > { %s6383_s6 = scalar_lea.vmem %s6382_s5, 458752  ;;  %p6384_p2 = scmp.lt.s32.totalorder %s6664_s8, %s6382_s5 }
  0x2d   : > { %p6379_p11 = pnand %p6377_p9, %p6363_p10  ;;  %p6385_p13 = scmp.lt.s32.totalorder %s6383_s6, %s6376_s28 }
  0x2f   : > { %p6380_p5 = pneg %p6379_p11  ;;  %p6386_p0 = por %p6385_p13, %p6384_p2 }
  0x31   : > { %p6387_p1 = pnand %p6386_p0, %p6380_p5 }
  0x33   : > { %6390 = shalt.err (!%p6387_p1)
}
  0x34   : > { %s6550_s27 = smov 1024   ;;  %s6551_s7 = smov 64  }
  0x35   : > { %6257 = dma.hbm_to_vmem [thread:$0]  (!%p6670_p8), %s6677_s4, 229376, %s6664_s8, %s6679_s25, %s6550_s27, %s6550_s27, %s6551_s7  }
  0x36   : > { %s8834_s24 = sadd.s32 4294967295, %s6547_s22   ;;  %p72_p2 = scmp.ne.s32.totalorder %s6523_s16, %s6519_s15 }
  0x37   : > { %p6712_p5 = scmp.eq.s32.totalorder %s8834_s24, 0  ;;  %p98_p10 = scmp.ne.s32.totalorder %s6511_s13, %s6507_s12 }
  0x38   : > { %p4379_p12 = scmp.ge.s32.totalorder %s6547_s22, 1  ;;  %p135_p8 = scmp.lt.s32.totalorder %s6547_s22, 57 }
  0x39   : > { %s8847_s10 = scalar_select %p6712_p5, 1, 0 }
  0x3a   : > { %p6721_p3 = por %p6712_p5, %p72_p2  ;;  %p6728_p4 = por %p98_p10, %p6712_p5 }
  0x3b   : > { %p6732_p7 = pnand %p4379_p12, %p135_p8  ;;  %s6552_s4 = smov [#allocation2]  }
  0x3c   : > { %s8848_s8 = scalar_select %p6721_p3, 1, 0 }
  0x3d   : > { %s8849_s15 = scalar_select %p6728_p4, 1, 0 }
  0x3e   : > { %s8850_s11 = scalar_select %p6732_p7, 1, 0 }
  0x3f   : > { %s148_s29 = sshll.u32 %s6552_s4, 4  ;;  %p6250_p9 = pneg %p6732_p7  ;;  %s149_s29 = int_to_ptr.vmem [resolvable:$true] %s148_s29 }
  0x40   : > { %s4397_s12 = sshll.u32 %s6543_s21, 7  ;;  %s85_s26 = sadd.s32 1, %s6515_s14 }
  0x41   : > { %p6741_p11 = pnand %p6250_p9, %p6712_p5  ;;  %s6391_s7 = scalar_lea.hbm %s8827_s0, 6272 }
  0x42   : > { %s6749_s5 = scalar_select %p83_p6, %s6515_s14, %s85_s26  }
  0x43   : > { %p6392_p0 = scmp.ne.s32.totalorder %s8827_s0, %s6391_s7  ;;  %p6393_p1 = pneg %p6741_p11 }
  0x44   : > { %p6398_p12 = scmp.lt.u32.totalorder %s6391_s7, %s8827_s0 }
  0x45   : > { %p6394_p2 = pnand %p6393_p1, %p6392_p0 }
  0x47   : > { %p6395_p10 = pneg %p6394_p2 }
  0x49   : > { %p6400_p8 = pnand %p6398_p12, %p6395_p10 }
  0x4b   : > { %6403 = shalt.err (!%p6400_p8)
}
  0x4c   : > { %s6404_s30 = scalar_lea.vmem %s149_s29, 6272  ;;  %p6412_p4 = scmp.lt.s32.totalorder %s149_s29, %s149_s29 }
  0x4d   : > { %p6405_p6 = scmp.ne.s32.totalorder %s149_s29, %s6404_s30  ;;  %p6413_p3 = scmp.lt.s32.totalorder %s6404_s30, %s6404_s30 }
  0x4f   : > { %p6407_p9 = pnand %p6405_p6, %p6393_p1  ;;  %p6414_p5 = por %p6413_p3, %p6412_p4 }
  0x51   : > { %p6408_p13 = pneg %p6407_p9 }
  0x53   : > { %p6415_p7 = pnand %p6414_p5, %p6408_p13 }
  0x55   : > { %6418 = shalt.err (!%p6415_p7)
}
  0x56   : > { %6253 = dma.hbm_to_vmem [thread:$0]  (!%p6741_p11), %s8827_s0, 6272, %s149_s29, [#allocation3]  }
  0x57   : > { %p8852_p0 = scmp.eq.s32.totalorder %s6547_s22, 0  ;;  %p8853_p2 = scmp.ne.s32.totalorder %s6515_s14, %s6511_s13 }
  0x58   : > { %s184_s1 = sand.u32 1, %s6515_s14   ;;  %s6778_s7 = scalar_lea.hbm %s8829_s2, %s4397_s12 }
  0x59   : > { %p94_p1 = por %p8853_p2, %p8852_p0  ;;  %s4383_s23 = sshll.u32 %s184_s1, 3 }
  0x5a   : > { %p8854_p5 = scmp.lt.s32.totalorder %s6547_s22, 56  ;;  %s186_s29 = scalar_lea.vmem [#allocation6], %s4383_s23 }
  0x5b   : > { %s194_s4 = sshll.u32 %s186_s29, 4  ;;  %s6419_s30 = scalar_lea.hbm %s6778_s7, 128  ;;  %s195_s4 = int_to_ptr.vmem [resolvable:$true] %s194_s4 }
  0x5c   : > { %p6782_p3 = pnand %p8854_p5, %p94_p1  ;;  %p6420_p4 = scmp.ne.s32.totalorder %s6778_s7, %s6419_s30 }
  0x5d   : > { %s6424_s26 = scalar_lea.hbm %s8829_s2, 512  ;;  %p6425_p10 = scmp.lt.u32.totalorder %s6778_s7, %s8829_s2 }
  0x5e   : > { %p6421_p7 = pneg %p6782_p3  ;;  %p6426_p12 = scmp.lt.u32.totalorder %s6424_s26, %s6419_s30 }
  0x5f   : > { %p6428_p6 = scmp.lt.u32.totalorder %s6419_s30, %s6778_s7 }
  0x60   : > { %p6422_p11 = pnand %p6421_p7, %p6420_p4  ;;  %p6427_p8 = por %p6426_p12, %p6425_p10 }
  0x62   : > { %p6423_p13 = pneg %p6422_p11  ;;  %p6429_p9 = por %p6428_p6, %p6427_p8 }
  0x64   : > { %p6430_p0 = pnand %p6429_p9, %p6423_p13 }
  0x66   : > { %6433 = shalt.err (!%p6430_p0)
}
  0x67   : > { %s6434_s23 = scalar_lea.vmem %s195_s4, 128  ;;  %s6553_s27 = smov [#allocation6]  }
  0x68   : > { %p6435_p2 = scmp.ne.s32.totalorder %s195_s4, %s6434_s23  ;;  %s6439_s29 = sshll.u32 %s6553_s27, 4  ;;  %s6440_s29 = int_to_ptr.vmem [resolvable:$false] %s6439_s29 }
  0x69   : > { %s6441_s12 = scalar_lea.vmem %s6440_s29, 256  ;;  %p6442_p4 = scmp.lt.s32.totalorder %s195_s4, %s6440_s29 }
  0x6a   : > { %p6437_p1 = pnand %p6435_p2, %p6421_p7  ;;  %p6443_p11 = scmp.lt.s32.totalorder %s6441_s12, %s6434_s23 }
  0x6c   : > { %p6438_p5 = pneg %p6437_p1  ;;  %p6444_p10 = por %p6443_p11, %p6442_p4 }
  0x6e   : > { %p6445_p12 = pnand %p6444_p10, %p6438_p5 }
  0x70   : > { %6448 = shalt.err (!%p6445_p12)
}
  0x71   : > { %6260 = dma.hbm_to_vmem [thread:$0]  (!%p6782_p3), %s6778_s7, 128, %s195_s4, %s6679_s25  }
  0x72   : > { %p8856_p13 = scmp.ne.s32.totalorder %s8850_s11, 0 }
  0x73   : > { %p8857_p7 = scmp.ne.s32.totalorder (!%p8856_p13), %s8847_s10, 0 }
  0x74   : > { %203 = sbr.rel (%p8856_p13) target bundleno = 1277 (0x4fd), region = 32 }
  0x7b   : > { %6494 = dma.done.wait (%p8857_p7), [#allocation3], 6272  }
  0x7c   : > { %6496 = vsyncadd (%p8857_p7), [#allocation3], 4294961024  ;;  %s8858_s30 = sadd.s32 4294967295, %s6547_s22   ;;  %s211_s26 = sand.u32 1, %s6523_s16  }
  0x7d   : > { %s209_s24 = sand.u32 1, %s8858_s30   ;;  %s6241_s1 = smul.u32 14336, %s211_s26 }
  0x7e   : > { %s210_s28 = scalar_lea.sflag [#allocation5], %s209_s24  ;;  %p8859_p3 = scmp.ne.s32.totalorder %s8848_s8, 0 }
  0x7f   : > { %s6817_s6 = scalar_lea.vmem [#allocation4], %s6241_s1 }
  0x80   : > { %6498 = dma.done.wait (%p8859_p3), %s210_s28, 229376  }
  0x81   : > { %6500 = vsyncadd (%p8859_p3), %s210_s28, 4294737920  ;;  %s220_s25 = sand.u32 1, %s6511_s13   ;;  %p8860_p8 = scmp.ne.s32.totalorder %s8849_s15, 0 }
  0x82   : > { %s6824_s10 = sshll.u32 %s220_s25, 3 }
  0x83   : > { %s222_s11 = scalar_lea.vmem [#allocation6], %s6824_s10 }
  0x84   : > { %6502 = dma.done.wait (%p8860_p8), %s210_s28, 128  }
  0x85   : > { %6504 = vsyncadd (%p8860_p8), %s210_s28, 4294967168  ;;  %s4389_s7 = sshll.u32 %s6535_s19, 3  ;;  %p4391_p9 = scmp.ne.s32.totalorder %s6531_s18, 0 }
  0x86   : > { %p252_p6 = scmp.lt.s32.totalorder %s4389_s7, 31  ;;  %v6554_v0 = vmov (!%p4391_p9), 0.0  }
  0x87   : > { %260 = sbr.rel (%p4391_p9) target bundleno = 142 (0x8e), region = 48 }
  0x88   : > { %s8880_s7 = smov (!%p252_p6, %s4389_s7), 31 }
  0x89   : > { %s4390_s4 = sshll.u32 %s8880_s7, 1 }
  0x8a   : > { %s6835_s27 = scalar_lea.vmem %s8830_s3, %s4390_s4 }
  0x8b   : > { %261 = vst [vmem:[%s6835_s27] sm:$0xff] (!%p4391_p9), %v6554_v0  ;;  %262 = vst [vmem:[%s6835_s27 + $0x8] sm:$0xff] (!%p4391_p9), %v6554_v0 }
  0x8e PF: > { %v275_v1 = vld [vmem:[%s6817_s6 + $0x8] sm:$0xff]  ;;  %v277_v3 = vld [vmem:[%s6817_s6 + $0x18] sm:$0xff]  ;;  %v274_v6 = vld [vmem:[%s6817_s6] sm:$0xff]  ;;  %s263_s19 = smul.u32 1792, %s6531_s18  ;;  %p4394_p0 = scmp.ne.s32.totalorder %s6531_s18, 13 }
  0x8f   : > { %v283_v2 = vld [vmem:[%s6817_s6 + $0x48] sm:$0xff]  ;;  %v285_v5 = vld [vmem:[%s6817_s6 + $0x58] sm:$0xff]  ;;  %v282_v7 = vld [vmem:[%s6817_s6 + $0x40] sm:$0xff] }
  0x90   : > { %v4398_v4 = vpack.c.bf16 %v283_v2, %v275_v1  ;;  %v4846_v8 = vpack.c.bf16 %v285_v5, %v277_v3  ;;  %v4400_v9 = vpack.c.bf16 %v282_v7, %v274_v6  ;;  %v276_v10 = vld [vmem:[%s6817_s6 + $0x10] sm:$0xff]  ;;  %v291_v12 = vld [vmem:[%s6817_s6 + $0x88] sm:$0xff]  ;;  %v293_v15 = vld [vmem:[%s6817_s6 + $0x98] sm:$0xff]  ;;  %s6920_s15 = sshra.s32 %s263_s19, 7 }
  0x91   : > { %v284_v11 = vld [vmem:[%s6817_s6 + $0x50] sm:$0xff]  ;;  %v299_v14 = vld [vmem:[%s6817_s6 + $0xc8] sm:$0xff]  ;;  %v301_v16 = vld [vmem:[%s6817_s6 + $0xd8] sm:$0xff]  ;;  %s4392_s29 = sshll.u32 %s6920_s15, 1 }
  0x92   : > { %4399 = vmatprep.subr.bf16.mxu0 %v4398_v4  ;;  %v4848_v13 = vpack.c.bf16 %v284_v11, %v276_v10  ;;  %4847 = vmatprep.subr.bf16.mxu1 %v4846_v8  ;;  %v4402_v17 = vpack.c.bf16 %v299_v14, %v291_v12  ;;  %v4850_v18 = vpack.c.bf16 %v301_v16, %v293_v15  ;;  %v290_v19 = vld [vmem:[%s6817_s6 + $0x80] sm:$0xff]  ;;  %v292_v21 = vld [vmem:[%s6817_s6 + $0x90] sm:$0xff]  ;;  %v307_v24 = vld [vmem:[%s6817_s6 + $0x108] sm:$0xff]  ;;  %s6949_s12 = scalar_lea.vmem [#allocation2], %s4392_s29 }
  0x93   : > { %4401 = vmatpush1.bf16.msra.mxu0 %v4400_v9  ;;  %v298_v20 = vld [vmem:[%s6817_s6 + $0xc0] sm:$0xff]  ;;  %v300_v23 = vld [vmem:[%s6817_s6 + $0xd0] sm:$0xff]  ;;  %v315_v25 = vld [vmem:[%s6817_s6 + $0x148] sm:$0xff] }
  0x94   : > { %4849 = vmatpush1.bf16.msra.mxu1 %v4848_v13  ;;  %v4404_v22 = vpack.c.bf16 %v298_v20, %v290_v19  ;;  %4403 = vmatprep.subr.bf16.mxu0 %v4402_v17  ;;  %v4852_v26 = vpack.c.bf16 %v300_v23, %v292_v21  ;;  %v4406_v27 = vpack.c.bf16 %v315_v25, %v307_v24  ;;  %v309_v28 = vld [vmem:[%s6817_s6 + $0x118] sm:$0xff]  ;;  %v306_v30 = vld [vmem:[%s6817_s6 + $0x100] sm:$0xff]  ;;  %v308_v33 = vld [vmem:[%s6817_s6 + $0x110] sm:$0xff] }
  0x95   : > { %4851 = vmatprep.subr.bf16.mxu1 %v4850_v18  ;;  %v317_v29 = vld [vmem:[%s6817_s6 + $0x158] sm:$0xff]  ;;  %v314_v32 = vld [vmem:[%s6817_s6 + $0x140] sm:$0xff]  ;;  %v316_v34 = vld [vmem:[%s6817_s6 + $0x150] sm:$0xff] }
  0x96   : > { %v4854_v31 = vpack.c.bf16 %v317_v29, %v309_v28  ;;  %v4408_v35 = vpack.c.bf16 %v314_v32, %v306_v30  ;;  %v323_v36 = vld [vmem:[%s6817_s6 + $0x188] sm:$0xff]  ;;  %v325_v38 = vld [vmem:[%s6817_s6 + $0x198] sm:$0xff]  ;;  %v4856_v39 = vpack.c.bf16 %v316_v34, %v308_v33  ;;  %v322_v42 = vld [vmem:[%s6817_s6 + $0x180] sm:$0xff] }
  0x97   : > { %4405 = vmatpush1.bf16.msra.mxu0 %v4404_v22  ;;  %v331_v37 = vld [vmem:[%s6817_s6 + $0x1c8] sm:$0xff]  ;;  %v333_v41 = vld [vmem:[%s6817_s6 + $0x1d8] sm:$0xff]  ;;  %v330_v43 = vld [vmem:[%s6817_s6 + $0x1c0] sm:$0xff] }
  0x98   : > { %4853 = vmatpush1.bf16.msra.mxu1 %v4852_v26  ;;  %4407 = vmatprep.subr.bf16.mxu0 %v4406_v27  ;;  %v4410_v40 = vpack.c.bf16 %v331_v37, %v323_v36  ;;  %v4858_v44 = vpack.c.bf16 %v333_v41, %v325_v38  ;;  %v324_v45 = vld [vmem:[%s6817_s6 + $0x190] sm:$0xff]  ;;  %v339_v47 = vld [vmem:[%s6817_s6 + $0x208] sm:$0xff]  ;;  %v341_v49 = vld [vmem:[%s6817_s6 + $0x218] sm:$0xff]  ;;  %v4412_v51 = vpack.c.bf16 %v330_v43, %v322_v42 }
  0x99   : > { %4855 = vmatprep.subr.bf16.mxu1 %v4854_v31  ;;  %v332_v46 = vld [vmem:[%s6817_s6 + $0x1d0] sm:$0xff]  ;;  %v347_v48 = vld [vmem:[%s6817_s6 + $0x248] sm:$0xff]  ;;  %v349_v50 = vld [vmem:[%s6817_s6 + $0x258] sm:$0xff] }
  0x9a   : > { %v4860_v52 = vpack.c.bf16 %v332_v46, %v324_v45  ;;  %v4414_v53 = vpack.c.bf16 %v347_v48, %v339_v47  ;;  %v338_v54 = vld [vmem:[%s6817_s6 + $0x200] sm:$0xff]  ;;  %v340_v56 = vld [vmem:[%s6817_s6 + $0x210] sm:$0xff]  ;;  %v4862_v57 = vpack.c.bf16 %v349_v50, %v341_v49  ;;  %v355_v59 = vld [vmem:[%s6817_s6 + $0x288] sm:$0xff]  ;;  %v6555_v47 = vmov 1983009808  }
  0x9b   : > { %4409 = vmatpush1.bf16.msra.mxu0 %v4408_v35  ;;  %v346_v55 = vld [vmem:[%s6817_s6 + $0x240] sm:$0xff]  ;;  %v348_v58 = vld [vmem:[%s6817_s6 + $0x250] sm:$0xff]  ;;  %v363_v60 = vld [vmem:[%s6817_s6 + $0x2c8] sm:$0xff]  ;;  %v2072_v48 = vunpack.c.l.s4 %v6555_v47  ;;  %v2074_v49 = vlaneseq }
  0x9c   : > { %4857 = vmatpush1.bf16.msra.mxu1 %v4856_v39  ;;  %4411 = vmatprep.subr.bf16.mxu0 %v4410_v40  ;;  %v357_v61 = vld [vmem:[%s6817_s6 + $0x298] sm:$0xff]  ;;  %v4416_v63 = vpack.c.bf16 %v346_v55, %v338_v54  ;;  %v4864_v0 = vpack.c.bf16 %v348_v58, %v340_v56  ;;  %v4418_v1 = vpack.c.bf16 %v363_v60, %v355_v59  ;;  %v354_v2 = vld [vmem:[%s6817_s6 + $0x280] sm:$0xff]  ;;  %v356_v4 = vld [vmem:[%s6817_s6 + $0x290] sm:$0xff] }
  0x9d   : > { %4859 = vmatprep.subr.bf16.mxu1 %v4858_v44  ;;  %v365_v62 = vld [vmem:[%s6817_s6 + $0x2d8] sm:$0xff]  ;;  %v362_v3 = vld [vmem:[%s6817_s6 + $0x2c0] sm:$0xff]  ;;  %v364_v6 = vld [vmem:[%s6817_s6 + $0x2d0] sm:$0xff] }
  0x9e   : > { %v4866_v5 = vpack.c.bf16 %v365_v62, %v357_v61  ;;  %v371_v7 = vld [vmem:[%s6817_s6 + $0x308] sm:$0xff]  ;;  %v373_v9 = vld [vmem:[%s6817_s6 + $0x318] sm:$0xff]  ;;  %v4420_v11 = vpack.c.bf16 %v362_v3, %v354_v2  ;;  %v4868_v12 = vpack.c.bf16 %v364_v6, %v356_v4  ;;  %v370_v14 = vld [vmem:[%s6817_s6 + $0x300] sm:$0xff]  ;;  %v2073_v62 = vunpack.c.0.s8 %v2072_v48 }
  0x9f   : > { %4413 = vmatpush1.bf16.msra.mxu0 %v4412_v51  ;;  %v379_v8 = vld [vmem:[%s6817_s6 + $0x348] sm:$0xff]  ;;  %v381_v10 = vld [vmem:[%s6817_s6 + $0x358] sm:$0xff]  ;;  %v378_v15 = vld [vmem:[%s6817_s6 + $0x340] sm:$0xff] }
  0xa0   : > { %4861 = vmatpush1.bf16.msra.mxu1 %v4860_v52  ;;  %4415 = vmatprep.subr.bf16.mxu0 %v4414_v53  ;;  %v4422_v13 = vpack.c.bf16 %v379_v8, %v371_v7  ;;  %v372_v16 = vld [vmem:[%s6817_s6 + $0x310] sm:$0xff]  ;;  %v4870_v17 = vpack.c.bf16 %v381_v10, %v373_v9  ;;  %v387_v19 = vld [vmem:[%s6817_s6 + $0x388] sm:$0xff]  ;;  %v389_v21 = vld [vmem:[%s6817_s6 + $0x398] sm:$0xff]  ;;  %v4424_v23 = vpack.c.bf16 %v378_v15, %v370_v14 }
  0xa1   : > { %4863 = vmatprep.subr.bf16.mxu1 %v4862_v57  ;;  %v380_v18 = vld [vmem:[%s6817_s6 + $0x350] sm:$0xff]  ;;  %v395_v20 = vld [vmem:[%s6817_s6 + $0x3c8] sm:$0xff]  ;;  %v397_v22 = vld [vmem:[%s6817_s6 + $0x3d8] sm:$0xff] }
  0xa2   : > { %v4872_v24 = vpack.c.bf16 %v380_v18, %v372_v16  ;;  %v4426_v25 = vpack.c.bf16 %v395_v20, %v387_v19  ;;  %v386_v26 = vld [vmem:[%s6817_s6 + $0x380] sm:$0xff]  ;;  %v388_v28 = vld [vmem:[%s6817_s6 + $0x390] sm:$0xff]  ;;  %v4874_v29 = vpack.c.bf16 %v397_v22, %v389_v21  ;;  %v403_v31 = vld [vmem:[%s6817_s6 + $0x408] sm:$0xff] }
  0xa3   : > { %4417 = vmatpush1.bf16.msra.mxu0 %v4416_v63  ;;  %v394_v27 = vld [vmem:[%s6817_s6 + $0x3c0] sm:$0xff]  ;;  %v396_v30 = vld [vmem:[%s6817_s6 + $0x3d0] sm:$0xff]  ;;  %v411_v32 = vld [vmem:[%s6817_s6 + $0x448] sm:$0xff]  ;;  %v6927_v63 = vshrl.u32 %v2074_v49, 7 }
  0xa4   : > { %4865 = vmatpush1.bf16.msra.mxu1 %v4864_v0  ;;  %4419 = vmatprep.subr.bf16.mxu0 %v4418_v1  ;;  %v405_v33 = vld [vmem:[%s6817_s6 + $0x418] sm:$0xff]  ;;  %v4428_v35 = vpack.c.bf16 %v394_v27, %v386_v26  ;;  %v4876_v36 = vpack.c.bf16 %v396_v30, %v388_v28  ;;  %v4430_v37 = vpack.c.bf16 %v411_v32, %v403_v31  ;;  %v402_v38 = vld [vmem:[%s6817_s6 + $0x400] sm:$0xff]  ;;  %v404_v40 = vld [vmem:[%s6817_s6 + $0x410] sm:$0xff] }
  0xa5   : > { %4867 = vmatprep.subr.bf16.mxu1 %v4866_v5  ;;  %v413_v34 = vld [vmem:[%s6817_s6 + $0x458] sm:$0xff]  ;;  %v410_v39 = vld [vmem:[%s6817_s6 + $0x440] sm:$0xff]  ;;  %v412_v42 = vld [vmem:[%s6817_s6 + $0x450] sm:$0xff] }
  0xa6   : > { %v4878_v41 = vpack.c.bf16 %v413_v34, %v405_v33  ;;  %v419_v43 = vld [vmem:[%s6817_s6 + $0x488] sm:$0xff]  ;;  %v421_v45 = vld [vmem:[%s6817_s6 + $0x498] sm:$0xff]  ;;  %v4432_v50 = vpack.c.bf16 %v410_v39, %v402_v38  ;;  %v4880_v51 = vpack.c.bf16 %v412_v42, %v404_v40  ;;  %v418_v53 = vld [vmem:[%s6817_s6 + $0x480] sm:$0xff] }
  0xa7   : > { %4421 = vmatpush1.bf16.msra.mxu0 %v4420_v11  ;;  %v427_v44 = vld [vmem:[%s6817_s6 + $0x4c8] sm:$0xff]  ;;  %v429_v46 = vld [vmem:[%s6817_s6 + $0x4d8] sm:$0xff]  ;;  %v426_v54 = vld [vmem:[%s6817_s6 + $0x4c0] sm:$0xff] }
  0xa8   : > { %4869 = vmatpush1.bf16.msra.mxu1 %v4868_v12  ;;  %4423 = vmatprep.subr.bf16.mxu0 %v4422_v13  ;;  %v4434_v52 = vpack.c.bf16 %v427_v44, %v419_v43  ;;  %v420_v55 = vld [vmem:[%s6817_s6 + $0x490] sm:$0xff]  ;;  %v4882_v56 = vpack.c.bf16 %v429_v46, %v421_v45  ;;  %v435_v58 = vld [vmem:[%s6817_s6 + $0x508] sm:$0xff]  ;;  %v437_v60 = vld [vmem:[%s6817_s6 + $0x518] sm:$0xff]  ;;  %v4436_v0 = vpack.c.bf16 %v426_v54, %v418_v53 }
  0xa9   : > { %4871 = vmatprep.subr.bf16.mxu1 %v4870_v17  ;;  %v428_v57 = vld [vmem:[%s6817_s6 + $0x4d0] sm:$0xff]  ;;  %v443_v59 = vld [vmem:[%s6817_s6 + $0x548] sm:$0xff]  ;;  %v445_v61 = vld [vmem:[%s6817_s6 + $0x558] sm:$0xff]  ;;  %v6939_v12 = vsub.s32 %v2073_v62, %v6927_v63 }
  0xaa   : > { %v4884_v1 = vpack.c.bf16 %v428_v57, %v420_v55  ;;  %v4438_v2 = vpack.c.bf16 %v443_v59, %v435_v58  ;;  %v434_v3 = vld [vmem:[%s6817_s6 + $0x500] sm:$0xff]  ;;  %v436_v5 = vld [vmem:[%s6817_s6 + $0x510] sm:$0xff]  ;;  %v4886_v6 = vpack.c.bf16 %v445_v61, %v437_v60  ;;  %v451_v8 = vld [vmem:[%s6817_s6 + $0x588] sm:$0xff] }
  0xab   : > { %4425 = vmatpush1.bf16.msra.mxu0 %v4424_v23  ;;  %v442_v4 = vld [vmem:[%s6817_s6 + $0x540] sm:$0xff]  ;;  %v444_v7 = vld [vmem:[%s6817_s6 + $0x550] sm:$0xff]  ;;  %v459_v9 = vld [vmem:[%s6817_s6 + $0x5c8] sm:$0xff] }
  0xac   : > { %4873 = vmatpush1.bf16.msra.mxu1 %v4872_v24  ;;  %4427 = vmatprep.subr.bf16.mxu0 %v4426_v25  ;;  %v453_v10 = vld [vmem:[%s6817_s6 + $0x598] sm:$0xff]  ;;  %v4440_v13 = vpack.c.bf16 %v442_v4, %v434_v3  ;;  %v450_v14 = vld [vmem:[%s6817_s6 + $0x580] sm:$0xff]  ;;  %v4888_v15 = vpack.c.bf16 %v444_v7, %v436_v5  ;;  %v4442_v16 = vpack.c.bf16 %v459_v9, %v451_v8  ;;  %v452_v18 = vld [vmem:[%s6817_s6 + $0x590] sm:$0xff] }
  0xad   : > { %4875 = vmatprep.subr.bf16.mxu1 %v4874_v29  ;;  %v461_v11 = vld [vmem:[%s6817_s6 + $0x5d8] sm:$0xff]  ;;  %v458_v17 = vld [vmem:[%s6817_s6 + $0x5c0] sm:$0xff]  ;;  %v460_v19 = vld [vmem:[%s6817_s6 + $0x5d0] sm:$0xff] }
  0xae   : > { %v4890_v20 = vpack.c.bf16 %v461_v11, %v453_v10  ;;  %v467_v21 = vld [vmem:[%s6817_s6 + $0x608] sm:$0xff]  ;;  %v6952_v23 = vld [vmem:[%s6949_s12] sm:$0xff]  ;;  %v4444_v27 = vpack.c.bf16 %v458_v17, %v450_v14  ;;  %v4892_v28 = vpack.c.bf16 %v460_v19, %v452_v18  ;;  %v466_v30 = vld [vmem:[%s6817_s6 + $0x600] sm:$0xff] }
  0xaf   : > { %4429 = vmatpush1.bf16.msra.mxu0 %v4428_v35  ;;  %v475_v22 = vld [vmem:[%s6817_s6 + $0x648] sm:$0xff]  ;;  %v469_v24 = vld [vmem:[%s6817_s6 + $0x618] sm:$0xff]  ;;  %v6958_v26 = vrot.slane %v6952_v23, %v6939_v12  ;;  %v474_v31 = vld [vmem:[%s6817_s6 + $0x640] sm:$0xff]  ;;  %v2070_v11 = vcombine.high %v6952_v23, %v6952_v23 }
  0xb0   : > { %4877 = vmatpush1.bf16.msra.mxu1 %v4876_v36  ;;  %4431 = vmatprep.subr.bf16.mxu0 %v4430_v37  ;;  %v477_v25 = vld [vmem:[%s6817_s6 + $0x658] sm:$0xff]  ;;  %v4446_v29 = vpack.c.bf16 %v475_v22, %v467_v21  ;;  %v468_v32 = vld [vmem:[%s6817_s6 + $0x610] sm:$0xff]  ;;  %v483_v36 = vld [vmem:[%s6817_s6 + $0x688] sm:$0xff]  ;;  %v4448_v40 = vpack.c.bf16 %v474_v31, %v466_v30 }
  0xb1   : > { %4879 = vmatprep.subr.bf16.mxu1 %v4878_v41  ;;  %v6965_v33 = vcombine.high %v6958_v26, %v6958_v26  ;;  %v4894_v34 = vpack.c.bf16 %v477_v25, %v469_v24  ;;  %v476_v35 = vld [vmem:[%s6817_s6 + $0x650] sm:$0xff]  ;;  %v491_v37 = vld [vmem:[%s6817_s6 + $0x6c8] sm:$0xff]  ;;  %v485_v38 = vld [vmem:[%s6817_s6 + $0x698] sm:$0xff]  ;;  %v7007_v25 = vrot.slane %v2070_v11, %v6939_v12 }
  0xb2   : > { %v493_v39 = vld [vmem:[%s6817_s6 + $0x6d8] sm:$0xff]  ;;  %v4896_v41 = vpack.c.bf16 %v476_v35, %v468_v32  ;;  %v4450_v42 = vpack.c.bf16 %v491_v37, %v483_v36  ;;  %v482_v43 = vld [vmem:[%s6817_s6 + $0x680] sm:$0xff]  ;;  %v484_v45 = vld [vmem:[%s6817_s6 + $0x690] sm:$0xff] }
  0xb3   : > { %4433 = vmatpush1.bf16.msra.mxu0 %v4432_v50  ;;  %2207 = vmatprep.mubr.f32.mxu0 %v6965_v33  ;;  %v490_v44 = vld [vmem:[%s6817_s6 + $0x6c0] sm:$0xff]  ;;  %v4898_v46 = vpack.c.bf16 %v493_v39, %v485_v38  ;;  %v492_v47 = vld [vmem:[%s6817_s6 + $0x6d0] sm:$0xff]  ;;  %v499_v48 = vld [vmem:[%s6817_s6 + $0x708] sm:$0xff] }
  0xb4   : > { %4881 = vmatpush1.bf16.msra.mxu1 %v4880_v51  ;;  %4435 = vmatprep.subr.bf16.mxu0 %v4434_v52  ;;  %v507_v49 = vld [vmem:[%s6817_s6 + $0x748] sm:$0xff]  ;;  %v501_v50 = vld [vmem:[%s6817_s6 + $0x718] sm:$0xff]  ;;  %v4452_v52 = vpack.c.bf16 %v490_v44, %v482_v43  ;;  %v4900_v53 = vpack.c.bf16 %v492_v47, %v484_v45  ;;  %v498_v55 = vld [vmem:[%s6817_s6 + $0x700] sm:$0xff] }
  0xb5   : > { %4883 = vmatprep.subr.bf16.mxu1 %v4882_v56  ;;  %2704 = vmatprep.mubr.f32.mxu1 %v6965_v33  ;;  %v509_v51 = vld [vmem:[%s6817_s6 + $0x758] sm:$0xff]  ;;  %v4454_v54 = vpack.c.bf16 %v507_v49, %v499_v48  ;;  %v506_v56 = vld [vmem:[%s6817_s6 + $0x740] sm:$0xff]  ;;  %v500_v57 = vld [vmem:[%s6817_s6 + $0x710] sm:$0xff] }
  0xb6   : > { %v4902_v58 = vpack.c.bf16 %v509_v51, %v501_v50  ;;  %v508_v59 = vld [vmem:[%s6817_s6 + $0x750] sm:$0xff]  ;;  %v515_v60 = vld [vmem:[%s6817_s6 + $0x788] sm:$0xff]  ;;  %v517_v62 = vld [vmem:[%s6817_s6 + $0x798] sm:$0xff] }
  0xb7   : > { %4437 = vmatpush1.bf16.msra.mxu0 %v4436_v0  ;;  %v523_v61 = vld [vmem:[%s6817_s6 + $0x7c8] sm:$0xff]  ;;  %v525_v0 = vld [vmem:[%s6817_s6 + $0x7d8] sm:$0xff]  ;;  %v514_v4 = vld [vmem:[%s6817_s6 + $0x780] sm:$0xff] }
  0xb8   : > { %4885 = vmatpush1.bf16.msra.mxu1 %v4884_v1  ;;  %4439 = vmatprep.subr.bf16.mxu0 %v4438_v2  ;;  %v4456_v1 = vpack.c.bf16 %v506_v56, %v498_v55  ;;  %v4904_v2 = vpack.c.bf16 %v508_v59, %v500_v57  ;;  %v4458_v3 = vpack.c.bf16 %v523_v61, %v515_v60  ;;  %v522_v5 = vld [vmem:[%s6817_s6 + $0x7c0] sm:$0xff]  ;;  %v524_v8 = vld [vmem:[%s6817_s6 + $0x7d0] sm:$0xff]  ;;  %v531_v9 = vld [vmem:[%s6817_s6 + $0x808] sm:$0xff] }
  0xb9   : > { %4887 = vmatprep.subr.bf16.mxu1 %v4886_v6  ;;  %v516_v6 = vld [vmem:[%s6817_s6 + $0x790] sm:$0xff]  ;;  %v4906_v7 = vpack.c.bf16 %v525_v0, %v517_v62  ;;  %v539_v10 = vld [vmem:[%s6817_s6 + $0x848] sm:$0xff]  ;;  %v541_v14 = vld [vmem:[%s6817_s6 + $0x858] sm:$0xff] }
  0xba   : > { %v4462_v17 = vpack.c.bf16 %v539_v10, %v531_v9  ;;  %v530_v18 = vld [vmem:[%s6817_s6 + $0x800] sm:$0xff]  ;;  %v540_v22 = vld [vmem:[%s6817_s6 + $0x850] sm:$0xff]  ;;  %v547_v23 = vld [vmem:[%s6817_s6 + $0x888] sm:$0xff] }
  0xbb   : > { %4441 = vmatpush1.bf16.msra.mxu0 %v4440_v13  ;;  %v533_v13 = vld [vmem:[%s6817_s6 + $0x818] sm:$0xff]  ;;  %v538_v19 = vld [vmem:[%s6817_s6 + $0x840] sm:$0xff]  ;;  %v555_v24 = vld [vmem:[%s6817_s6 + $0x8c8] sm:$0xff] }
  0xbc   : > { %4889 = vmatpush1.bf16.msra.mxu1 %v4888_v15  ;;  %4443 = vmatprep.subr.bf16.mxu0 %v4442_v16  ;;  %v4460_v15 = vpack.c.bf16 %v522_v5, %v514_v4  ;;  %v4908_v16 = vpack.c.bf16 %v524_v8, %v516_v6  ;;  %v4910_v21 = vpack.c.bf16 %v541_v14, %v533_v13  ;;  %v546_v32 = vld [vmem:[%s6817_s6 + $0x880] sm:$0xff]  ;;  %v548_v35 = vld [vmem:[%s6817_s6 + $0x890] sm:$0xff]  ;;  %v563_v38 = vld [vmem:[%s6817_s6 + $0x908] sm:$0xff] }
  0xbd   : > { %4891 = vmatprep.subr.bf16.mxu1 %v4890_v20  ;;  %v532_v20 = vld [vmem:[%s6817_s6 + $0x810] sm:$0xff]  ;;  %v4466_v31 = vpack.c.bf16 %v555_v24, %v547_v23  ;;  %v571_v39 = vld [vmem:[%s6817_s6 + $0x948] sm:$0xff]  ;;  %v570_v47 = vld [vmem:[%s6817_s6 + $0x940] sm:$0xff] }
  0xbe   : > { %v4912_v30 = vpack.c.bf16 %v540_v22, %v532_v20  ;;  %v556_v37 = vld [vmem:[%s6817_s6 + $0x8d0] sm:$0xff]  ;;  %v4470_v45 = vpack.c.bf16 %v571_v39, %v563_v38  ;;  %v579_v51 = vld [vmem:[%s6817_s6 + $0x988] sm:$0xff]  ;;  %v586_v59 = vld [vmem:[%s6817_s6 + $0x9c0] sm:$0xff] }
  0xbf   : > { %4445 = vmatpush1.bf16.msra.mxu0 %v4444_v27  ;;  %v549_v27 = vld [vmem:[%s6817_s6 + $0x898] sm:$0xff]  ;;  %v4916_v44 = vpack.c.bf16 %v556_v37, %v548_v35  ;;  %v564_v48 = vld [vmem:[%s6817_s6 + $0x910] sm:$0xff]  ;;  %v595_v0 = vld [vmem:[%s6817_s6 + $0xa08] sm:$0xff] }
  0xc0   : > { %4893 = vmatpush1.bf16.msra.mxu1 %v4892_v28  ;;  %4447 = vmatprep.subr.bf16.mxu0 %v4446_v29  ;;  %v557_v28 = vld [vmem:[%s6817_s6 + $0x8d8] sm:$0xff]  ;;  %v4464_v29 = vpack.c.bf16 %v538_v19, %v530_v18  ;;  %v572_v50 = vld [vmem:[%s6817_s6 + $0x950] sm:$0xff]  ;;  %v602_v8 = vld [vmem:[%s6817_s6 + $0xa40] sm:$0xff] }
  0xc1   : > { %4895 = vmatprep.subr.bf16.mxu1 %v4894_v34  ;;  %v554_v34 = vld [vmem:[%s6817_s6 + $0x8c0] sm:$0xff]  ;;  %v4914_v36 = vpack.c.bf16 %v557_v28, %v549_v27  ;;  %v4920_v56 = vpack.c.bf16 %v572_v50, %v564_v48  ;;  %v580_v60 = vld [vmem:[%s6817_s6 + $0x990] sm:$0xff]  ;;  %v611_v13 = vld [vmem:[%s6817_s6 + $0xa88] sm:$0xff] }
  0xc2   : > { %v4468_v43 = vpack.c.bf16 %v554_v34, %v546_v32  ;;  %v588_v62 = vld [vmem:[%s6817_s6 + $0x9d0] sm:$0xff]  ;;  %v619_v14 = vld [vmem:[%s6817_s6 + $0xac8] sm:$0xff]  ;;  %v610_v20 = vld [vmem:[%s6817_s6 + $0xa80] sm:$0xff] }
  0xc3   : > { %4449 = vmatpush1.bf16.msra.mxu0 %v4448_v40  ;;  %v7019_v40 = vcombine.high %v7007_v25, %v7007_v25  ;;  %v4924_v5 = vpack.c.bf16 %v588_v62, %v580_v60  ;;  %v596_v9 = vld [vmem:[%s6817_s6 + $0xa10] sm:$0xff]  ;;  %v4482_v19 = vpack.c.bf16 %v619_v14, %v611_v13  ;;  %v627_v27 = vld [vmem:[%s6817_s6 + $0xb08] sm:$0xff]  ;;  %v626_v35 = vld [vmem:[%s6817_s6 + $0xb00] sm:$0xff] }
  0xc4   : > { %4897 = vmatpush1.bf16.msra.mxu1 %v4896_v41  ;;  %4451 = vmatprep.subr.bf16.mxu0 %v4450_v42  ;;  %v565_v41 = vld [vmem:[%s6817_s6 + $0x918] sm:$0xff]  ;;  %v604_v11 = vld [vmem:[%s6817_s6 + $0xa50] sm:$0xff]  ;;  %v635_v28 = vld [vmem:[%s6817_s6 + $0xb48] sm:$0xff] }
  0xc5   : > { %4899 = vmatprep.subr.bf16.mxu1 %v4898_v46  ;;  %v573_v42 = vld [vmem:[%s6817_s6 + $0x958] sm:$0xff]  ;;  %v562_v46 = vld [vmem:[%s6817_s6 + $0x900] sm:$0xff]  ;;  %v4928_v18 = vpack.c.bf16 %v604_v11, %v596_v9  ;;  %v612_v22 = vld [vmem:[%s6817_s6 + $0xa90] sm:$0xff]  ;;  %v4486_v34 = vpack.c.bf16 %v635_v28, %v627_v27 }
  0xc6   : > { %v4918_v49 = vpack.c.bf16 %v573_v42, %v565_v41  ;;  %v4472_v55 = vpack.c.bf16 %v570_v47, %v562_v46  ;;  %v620_v24 = vld [vmem:[%s6817_s6 + $0xad0] sm:$0xff]  ;;  %v643_v41 = vld [vmem:[%s6817_s6 + $0xb88] sm:$0xff]  ;;  %v642_v48 = vld [vmem:[%s6817_s6 + $0xb80] sm:$0xff] }
  0xc7   : > { %4453 = vmatpush1.bf16.msra.mxu0 %v4452_v52  ;;  %v587_v52 = vld [vmem:[%s6817_s6 + $0x9c8] sm:$0xff]  ;;  %v4932_v32 = vpack.c.bf16 %v620_v24, %v612_v22  ;;  %v628_v37 = vld [vmem:[%s6817_s6 + $0xb10] sm:$0xff]  ;;  %v658_v60 = vld [vmem:[%s6817_s6 + $0xc00] sm:$0xff] }
  0xc8   : > { %4901 = vmatpush1.bf16.msra.mxu1 %v4900_v53  ;;  %4455 = vmatprep.subr.bf16.mxu0 %v4454_v54  ;;  %v581_v53 = vld [vmem:[%s6817_s6 + $0x998] sm:$0xff]  ;;  %v4474_v57 = vpack.c.bf16 %v587_v52, %v579_v51  ;;  %v636_v39 = vld [vmem:[%s6817_s6 + $0xb50] sm:$0xff]  ;;  %v651_v42 = vld [vmem:[%s6817_s6 + $0xbc8] sm:$0xff] }
  0xc9   : > { %4903 = vmatprep.subr.bf16.mxu1 %v4902_v58  ;;  %v589_v54 = vld [vmem:[%s6817_s6 + $0x9d8] sm:$0xff]  ;;  %v578_v58 = vld [vmem:[%s6817_s6 + $0x980] sm:$0xff]  ;;  %v4936_v46 = vpack.c.bf16 %v636_v39, %v628_v37  ;;  %v4490_v47 = vpack.c.bf16 %v651_v42, %v643_v41  ;;  %v644_v50 = vld [vmem:[%s6817_s6 + $0xb90] sm:$0xff] }
  0xca   : > { %v4922_v61 = vpack.c.bf16 %v589_v54, %v581_v53  ;;  %v4476_v4 = vpack.c.bf16 %v586_v59, %v578_v58  ;;  %v652_v52 = vld [vmem:[%s6817_s6 + $0xbd0] sm:$0xff]  ;;  %v659_v53 = vld [vmem:[%s6817_s6 + $0xc08] sm:$0xff]  ;;  %v674_v9 = vld [vmem:[%s6817_s6 + $0xc80] sm:$0xff] }
  0xcb   : > { %4457 = vmatpush1.bf16.msra.mxu0 %v4456_v1  ;;  %v603_v1 = vld [vmem:[%s6817_s6 + $0xa48] sm:$0xff]  ;;  %v4940_v58 = vpack.c.bf16 %v652_v52, %v644_v50  ;;  %v660_v62 = vld [vmem:[%s6817_s6 + $0xc10] sm:$0xff]  ;;  %v690_v22 = vld [vmem:[%s6817_s6 + $0xd00] sm:$0xff] }
  0xcc   : > { %4905 = vmatpush1.bf16.msra.mxu1 %v4904_v2  ;;  %4459 = vmatprep.subr.bf16.mxu0 %v4458_v3  ;;  %v597_v2 = vld [vmem:[%s6817_s6 + $0xa18] sm:$0xff]  ;;  %v4478_v6 = vpack.c.bf16 %v603_v1, %v595_v0  ;;  %v667_v54 = vld [vmem:[%s6817_s6 + $0xc48] sm:$0xff]  ;;  %v668_v1 = vld [vmem:[%s6817_s6 + $0xc50] sm:$0xff] }
  0xcd   : > { %4907 = vmatprep.subr.bf16.mxu1 %v4906_v7  ;;  %v605_v3 = vld [vmem:[%s6817_s6 + $0xa58] sm:$0xff]  ;;  %v594_v7 = vld [vmem:[%s6817_s6 + $0xa00] sm:$0xff]  ;;  %v4494_v59 = vpack.c.bf16 %v667_v54, %v659_v53  ;;  %v676_v11 = vld [vmem:[%s6817_s6 + $0xc90] sm:$0xff] }
  0xce   : > { %v4926_v10 = vpack.c.bf16 %v605_v3, %v597_v2  ;;  %v675_v2 = vld [vmem:[%s6817_s6 + $0xc88] sm:$0xff]  ;;  %v684_v14 = vld [vmem:[%s6817_s6 + $0xcd0] sm:$0xff]  ;;  %v706_v37 = vld [vmem:[%s6817_s6 + $0xd80] sm:$0xff] }
  0xcf   : > { %4461 = vmatpush1.bf16.msra.mxu0 %v4460_v15  ;;  %v613_v15 = vld [vmem:[%s6817_s6 + $0xa98] sm:$0xff]  ;;  %v683_v3 = vld [vmem:[%s6817_s6 + $0xcc8] sm:$0xff]  ;;  %v692_v24 = vld [vmem:[%s6817_s6 + $0xd10] sm:$0xff] }
  0xd0   : > { %4909 = vmatpush1.bf16.msra.mxu1 %v4908_v16  ;;  %4463 = vmatprep.subr.bf16.mxu0 %v4462_v17  ;;  %v621_v16 = vld [vmem:[%s6817_s6 + $0xad8] sm:$0xff]  ;;  %v4480_v17 = vpack.c.bf16 %v602_v8, %v594_v7  ;;  %v4944_v7 = vpack.c.bf16 %v668_v1, %v660_v62  ;;  %v4498_v8 = vpack.c.bf16 %v683_v3, %v675_v2  ;;  %v700_v28 = vld [vmem:[%s6817_s6 + $0xd50] sm:$0xff]  ;;  %v722_v50 = vld [vmem:[%s6817_s6 + $0xe00] sm:$0xff] }
  0xd1   : > { %4911 = vmatprep.subr.bf16.mxu1 %v4910_v21  ;;  %v618_v21 = vld [vmem:[%s6817_s6 + $0xac0] sm:$0xff]  ;;  %v4930_v23 = vpack.c.bf16 %v621_v16, %v613_v15  ;;  %v691_v15 = vld [vmem:[%s6817_s6 + $0xd08] sm:$0xff]  ;;  %v708_v39 = vld [vmem:[%s6817_s6 + $0xd90] sm:$0xff] }
  0xd2   : > { %2208 = vmatmul.mubr.f32.vlgmr.msra.gmra.mrb[0].mxu0 %v6958_v26  ;;  %v699_v16 = vld [vmem:[%s6817_s6 + $0xd48] sm:$0xff]  ;;  %v716_v42 = vld [vmem:[%s6817_s6 + $0xdd0] sm:$0xff]  ;;  %v738_v62 = vld [vmem:[%s6817_s6 + $0xe80] sm:$0xff] }
  0xd3   : > { %4465 = vmatpush1.bf16.msra.mxu0 %v4464_v29  ;;  %2705 = vmatmul.mubr.f32.vlgmr.msra.gmra.mrb[0].mxu1 %v6958_v26  ;;  %v629_v29 = vld [vmem:[%s6817_s6 + $0xb18] sm:$0xff]  ;;  %v724_v52 = vld [vmem:[%s6817_s6 + $0xe10] sm:$0xff] }
  0xd4   : > { %4913 = vmatpush1.bf16.msra.mxu1 %v4912_v30  ;;  %4467 = vmatprep.subr.bf16.mxu0 %v4466_v31  ;;  %v637_v30 = vld [vmem:[%s6817_s6 + $0xb58] sm:$0xff]  ;;  %v4484_v31 = vpack.c.bf16 %v618_v21, %v610_v20  ;;  %v4948_v20 = vpack.c.bf16 %v684_v14, %v676_v11  ;;  %v4502_v21 = vpack.c.bf16 %v699_v16, %v691_v15  ;;  %v732_v54 = vld [vmem:[%s6817_s6 + $0xe50] sm:$0xff]  ;;  %v754_v11 = vld [vmem:[%s6817_s6 + $0xf00] sm:$0xff] }
  0xd5   : > { %4915 = vmatprep.subr.bf16.mxu1 %v4914_v36  ;;  %2278 = vmatprep.mubr.f32.mxu0 %v7019_v40  ;;  %v634_v36 = vld [vmem:[%s6817_s6 + $0xb40] sm:$0xff]  ;;  %v4934_v38 = vpack.c.bf16 %v637_v30, %v629_v29  ;;  %v707_v29 = vld [vmem:[%s6817_s6 + $0xd88] sm:$0xff]  ;;  %v740_v1 = vld [vmem:[%s6817_s6 + $0xe90] sm:$0xff] }
  0xd6   : > { %2775 = vmatprep.mubr.f32.mxu1 %v7019_v40  ;;  %v715_v30 = vld [vmem:[%s6817_s6 + $0xdc8] sm:$0xff]  ;;  %v748_v3 = vld [vmem:[%s6817_s6 + $0xed0] sm:$0xff] }
  0xd7   : > { %4469 = vmatpush1.bf16.msra.mxu0 %v4468_v43  ;;  %v645_v43 = vld [vmem:[%s6817_s6 + $0xb98] sm:$0xff]  ;;  %v756_v14 = vld [vmem:[%s6817_s6 + $0xf10] sm:$0xff] }
  0xd8   : > { %4917 = vmatpush1.bf16.msra.mxu1 %v4916_v44  ;;  %4471 = vmatprep.subr.bf16.mxu0 %v4470_v45  ;;  %v653_v44 = vld [vmem:[%s6817_s6 + $0xbd8] sm:$0xff]  ;;  %v4488_v45 = vpack.c.bf16 %v634_v36, %v626_v35  ;;  %v4952_v35 = vpack.c.bf16 %v700_v28, %v692_v24  ;;  %v4506_v36 = vpack.c.bf16 %v715_v30, %v707_v29  ;;  %v764_v16 = vld [vmem:[%s6817_s6 + $0xf50] sm:$0xff]  ;;  %v770_v24 = vld [vmem:[%s6817_s6 + $0xf80] sm:$0xff] }
  0xd9   : > { %4919 = vmatprep.subr.bf16.mxu1 %v4918_v49  ;;  %v650_v49 = vld [vmem:[%s6817_s6 + $0xbc0] sm:$0xff]  ;;  %v4938_v51 = vpack.c.bf16 %v653_v44, %v645_v43  ;;  %v723_v43 = vld [vmem:[%s6817_s6 + $0xe08] sm:$0xff]  ;;  %v772_v28 = vld [vmem:[%s6817_s6 + $0xf90] sm:$0xff] }
  0xda   : > { %v731_v44 = vld [vmem:[%s6817_s6 + $0xe48] sm:$0xff]  ;;  %v780_v30 = vld [vmem:[%s6817_s6 + $0xfd0] sm:$0xff] }
  0xdb   : > { %4473 = vmatpush1.bf16.msra.mxu0 %v4472_v55  ;;  %v661_v55 = vld [vmem:[%s6817_s6 + $0xc18] sm:$0xff] }
  0xdc   : > { %4921 = vmatpush1.bf16.msra.mxu1 %v4920_v56  ;;  %4475 = vmatprep.subr.bf16.mxu0 %v4474_v57  ;;  %v669_v56 = vld [vmem:[%s6817_s6 + $0xc58] sm:$0xff]  ;;  %v4492_v57 = vpack.c.bf16 %v650_v49, %v642_v48  ;;  %v4956_v48 = vpack.c.bf16 %v716_v42, %v708_v39  ;;  %v4510_v49 = vpack.c.bf16 %v731_v44, %v723_v43  ;;  %v786_v39 = vld [vmem:[%s6817_s6 + $0x1000] sm:$0xff]  ;;  %v788_v42 = vld [vmem:[%s6817_s6 + $0x1010] sm:$0xff] }
  0xdd   : > { %4923 = vmatprep.subr.bf16.mxu1 %v4922_v61  ;;  %v666_v61 = vld [vmem:[%s6817_s6 + $0xc40] sm:$0xff]  ;;  %v4942_v0 = vpack.c.bf16 %v669_v56, %v661_v55  ;;  %v739_v55 = vld [vmem:[%s6817_s6 + $0xe88] sm:$0xff]  ;;  %v796_v44 = vld [vmem:[%s6817_s6 + $0x1050] sm:$0xff] }
  0xde   : > { %v747_v56 = vld [vmem:[%s6817_s6 + $0xec8] sm:$0xff] }
  0xdf   : > { %4477 = vmatpush1.bf16.msra.mxu0 %v4476_v4  ;;  %v677_v4 = vld [vmem:[%s6817_s6 + $0xc98] sm:$0xff] }
  0xe0   : > { %4925 = vmatpush1.bf16.msra.mxu1 %v4924_v5  ;;  %4479 = vmatprep.subr.bf16.mxu0 %v4478_v6  ;;  %v685_v5 = vld [vmem:[%s6817_s6 + $0xcd8] sm:$0xff]  ;;  %v4496_v6 = vpack.c.bf16 %v666_v61, %v658_v60  ;;  %v4960_v60 = vpack.c.bf16 %v732_v54, %v724_v52  ;;  %v4514_v61 = vpack.c.bf16 %v747_v56, %v739_v55  ;;  %v810_v54 = vld [vmem:[%s6817_s6 + $0x10c0] sm:$0xff]  ;;  %v804_v55 = vld [vmem:[%s6817_s6 + $0x1090] sm:$0xff] }
  0xe1   : > { %4927 = vmatprep.subr.bf16.mxu1 %v4926_v10  ;;  %v682_v10 = vld [vmem:[%s6817_s6 + $0xcc0] sm:$0xff]  ;;  %v4946_v13 = vpack.c.bf16 %v685_v5, %v677_v4  ;;  %v755_v4 = vld [vmem:[%s6817_s6 + $0xf08] sm:$0xff] }
  0xe2   : > { %v763_v5 = vld [vmem:[%s6817_s6 + $0xf48] sm:$0xff] }
  0xe3   : > { %4481 = vmatpush1.bf16.msra.mxu0 %v4480_v17  ;;  %v693_v17 = vld [vmem:[%s6817_s6 + $0xd18] sm:$0xff] }
  0xe4   : > { %4929 = vmatpush1.bf16.msra.mxu1 %v4928_v18  ;;  %4483 = vmatprep.subr.bf16.mxu0 %v4482_v19  ;;  %v701_v18 = vld [vmem:[%s6817_s6 + $0xd58] sm:$0xff]  ;;  %v4500_v19 = vpack.c.bf16 %v682_v10, %v674_v9  ;;  %v4964_v9 = vpack.c.bf16 %v748_v3, %v740_v1  ;;  %v4518_v10 = vpack.c.bf16 %v763_v5, %v755_v4  ;;  %v818_v4 = vld [vmem:[%s6817_s6 + $0x1100] sm:$0xff] }
  0xe5   : > { %4931 = vmatprep.subr.bf16.mxu1 %v4930_v23  ;;  %v698_v23 = vld [vmem:[%s6817_s6 + $0xd40] sm:$0xff]  ;;  %v4950_v27 = vpack.c.bf16 %v701_v18, %v693_v17  ;;  %v771_v17 = vld [vmem:[%s6817_s6 + $0xf88] sm:$0xff] }
  0xe6   : > { %v779_v18 = vld [vmem:[%s6817_s6 + $0xfc8] sm:$0xff]  ;;  %v826_v5 = vld [vmem:[%s6817_s6 + $0x1140] sm:$0xff] }
  0xe7   : > { %4485 = vmatpush1.bf16.msra.mxu0 %v4484_v31  ;;  %v709_v31 = vld [vmem:[%s6817_s6 + $0xd98] sm:$0xff] }
  0xe8   : > { %4933 = vmatpush1.bf16.msra.mxu1 %v4932_v32  ;;  %4487 = vmatprep.subr.bf16.mxu0 %v4486_v34  ;;  %v717_v32 = vld [vmem:[%s6817_s6 + $0xdd8] sm:$0xff]  ;;  %v4504_v34 = vpack.c.bf16 %v698_v23, %v690_v22  ;;  %v4968_v22 = vpack.c.bf16 %v764_v16, %v756_v14  ;;  %v4522_v23 = vpack.c.bf16 %v779_v18, %v771_v17  ;;  %v834_v17 = vld [vmem:[%s6817_s6 + $0x1180] sm:$0xff] }
  0xe9   : > { %4935 = vmatprep.subr.bf16.mxu1 %v4934_v38  ;;  %v714_v38 = vld [vmem:[%s6817_s6 + $0xdc0] sm:$0xff]  ;;  %v4954_v41 = vpack.c.bf16 %v717_v32, %v709_v31  ;;  %v787_v31 = vld [vmem:[%s6817_s6 + $0x1008] sm:$0xff]  ;;  %v4536_v14 = vpack.c.bf16 %v826_v5, %v818_v4  ;;  %v901_v4 = vld [vmem:[%s6817_s6 + $0x1398] sm:$0xff] }
  0xea   : > { %v795_v32 = vld [vmem:[%s6817_s6 + $0x1048] sm:$0xff]  ;;  %v842_v18 = vld [vmem:[%s6817_s6 + $0x11c0] sm:$0xff]  ;;  %v909_v5 = vld [vmem:[%s6817_s6 + $0x13d8] sm:$0xff] }
  0xeb   : > { %4489 = vmatpush1.bf16.msra.mxu0 %v4488_v45  ;;  %v725_v45 = vld [vmem:[%s6817_s6 + $0xe18] sm:$0xff] }
  0xec   : > { %4937 = vmatpush1.bf16.msra.mxu1 %v4936_v46  ;;  %4491 = vmatprep.subr.bf16.mxu0 %v4490_v47  ;;  %v733_v46 = vld [vmem:[%s6817_s6 + $0xe58] sm:$0xff]  ;;  %v4508_v47 = vpack.c.bf16 %v714_v38, %v706_v37  ;;  %v4972_v37 = vpack.c.bf16 %v780_v30, %v772_v28  ;;  %v4526_v38 = vpack.c.bf16 %v795_v32, %v787_v31  ;;  %v850_v31 = vld [vmem:[%s6817_s6 + $0x1200] sm:$0xff] }
  0xed   : > { %4939 = vmatprep.subr.bf16.mxu1 %v4938_v51  ;;  %v730_v51 = vld [vmem:[%s6817_s6 + $0xe40] sm:$0xff]  ;;  %v4958_v53 = vpack.c.bf16 %v733_v46, %v725_v45  ;;  %v803_v45 = vld [vmem:[%s6817_s6 + $0x1088] sm:$0xff]  ;;  %v4540_v28 = vpack.c.bf16 %v842_v18, %v834_v17  ;;  %v917_v17 = vld [vmem:[%s6817_s6 + $0x1418] sm:$0xff] }
  0xee   : > { %v811_v46 = vld [vmem:[%s6817_s6 + $0x10c8] sm:$0xff]  ;;  %v858_v32 = vld [vmem:[%s6817_s6 + $0x1240] sm:$0xff]  ;;  %v925_v18 = vld [vmem:[%s6817_s6 + $0x1458] sm:$0xff] }
  0xef   : > { %4493 = vmatpush1.bf16.msra.mxu0 %v4492_v57  ;;  %v741_v57 = vld [vmem:[%s6817_s6 + $0xe98] sm:$0xff]  ;;  %v4530_v52 = vpack.c.bf16 %v811_v46, %v803_v45  ;;  %v866_v45 = vld [vmem:[%s6817_s6 + $0x1280] sm:$0xff] }
  0xf0   : > { %4941 = vmatpush1.bf16.msra.mxu1 %v4940_v58  ;;  %4495 = vmatprep.subr.bf16.mxu0 %v4494_v59  ;;  %v749_v58 = vld [vmem:[%s6817_s6 + $0xed8] sm:$0xff]  ;;  %v4512_v59 = vpack.c.bf16 %v730_v51, %v722_v50  ;;  %v7148_v50 = vld [vmem:[%s6949_s12 + $0x8] sm:$0xff]  ;;  %v4976_v51 = vpack.c.bf16 %v796_v44, %v788_v42  ;;  %v4544_v42 = vpack.c.bf16 %v858_v32, %v850_v31 }
  0xf1   : > { %4943 = vmatprep.subr.bf16.mxu1 %v4942_v0  ;;  %v746_v0 = vld [vmem:[%s6817_s6 + $0xec0] sm:$0xff]  ;;  %v4962_v2 = vpack.c.bf16 %v749_v58, %v741_v57  ;;  %v7155_v56 = vrot.slane %v7148_v50, %v6939_v12  ;;  %v812_v58 = vld [vmem:[%s6817_s6 + $0x10d0] sm:$0xff]  ;;  %v933_v31 = vld [vmem:[%s6817_s6 + $0x1498] sm:$0xff] }
  0xf2   : > { %v874_v46 = vld [vmem:[%s6817_s6 + $0x12c0] sm:$0xff]  ;;  %v941_v32 = vld [vmem:[%s6817_s6 + $0x14d8] sm:$0xff] }
  0xf3   : > { %4497 = vmatpush1.bf16.msra.mxu0 %v4496_v6  ;;  %v757_v6 = vld [vmem:[%s6817_s6 + $0xf18] sm:$0xff] }
  0xf4   : > { %4945 = vmatpush1.bf16.msra.mxu1 %v4944_v7  ;;  %4499 = vmatprep.subr.bf16.mxu0 %v4498_v8  ;;  %v765_v7 = vld [vmem:[%s6817_s6 + $0xf58] sm:$0xff]  ;;  %v4516_v8 = vpack.c.bf16 %v746_v0, %v738_v62  ;;  %v7165_v0 = vcombine.high %v7155_v56, %v7155_v56 }
  0xf5   : > { %4947 = vmatprep.subr.bf16.mxu1 %v4946_v13  ;;  %v762_v13 = vld [vmem:[%s6817_s6 + $0xf40] sm:$0xff]  ;;  %v4966_v15 = vpack.c.bf16 %v765_v7, %v757_v6  ;;  %v829_v62 = vld [vmem:[%s6817_s6 + $0x1158] sm:$0xff]  ;;  %v820_v6 = vld [vmem:[%s6817_s6 + $0x1110] sm:$0xff] }
  0xf7   : > { %4501 = vmatpush1.bf16.msra.mxu0 %v4500_v19  ;;  %v773_v19 = vld [vmem:[%s6817_s6 + $0xf98] sm:$0xff] }
  0xf8   : > { %4949 = vmatpush1.bf16.msra.mxu1 %v4948_v20  ;;  %4503 = vmatprep.subr.bf16.mxu0 %v4502_v21  ;;  %v781_v20 = vld [vmem:[%s6817_s6 + $0xfd8] sm:$0xff]  ;;  %v4520_v21 = vpack.c.bf16 %v762_v13, %v754_v11 }
  0xf9   : > { %4951 = vmatprep.subr.bf16.mxu1 %v4950_v27  ;;  %v778_v27 = vld [vmem:[%s6817_s6 + $0xfc0] sm:$0xff]  ;;  %v4970_v29 = vpack.c.bf16 %v781_v20, %v773_v19  ;;  %v837_v11 = vld [vmem:[%s6817_s6 + $0x1198] sm:$0xff]  ;;  %v836_v19 = vld [vmem:[%s6817_s6 + $0x1190] sm:$0xff] }
  0xfa   : > { %v845_v13 = vld [vmem:[%s6817_s6 + $0x11d8] sm:$0xff] }
  0xfb   : > { %4505 = vmatpush1.bf16.msra.mxu0 %v4504_v34  ;;  %v789_v34 = vld [vmem:[%s6817_s6 + $0x1018] sm:$0xff]  ;;  %v4986_v20 = vpack.c.bf16 %v845_v13, %v837_v11  ;;  %v900_v11 = vld [vmem:[%s6817_s6 + $0x1390] sm:$0xff]  ;;  %v5002_v13 = vpack.c.bf16 %v909_v5, %v901_v4 }
  0xfc   : > { %4953 = vmatpush1.bf16.msra.mxu1 %v4952_v35  ;;  %4507 = vmatprep.subr.bf16.mxu0 %v4506_v36  ;;  %v797_v35 = vld [vmem:[%s6817_s6 + $0x1058] sm:$0xff]  ;;  %v4524_v36 = vpack.c.bf16 %v778_v27, %v770_v24  ;;  %v964_v4 = vld [vmem:[%s6817_s6 + $0x1590] sm:$0xff] }
  0xfd   : > { %4955 = vmatprep.subr.bf16.mxu1 %v4954_v41  ;;  %v794_v41 = vld [vmem:[%s6817_s6 + $0x1040] sm:$0xff]  ;;  %v4974_v43 = vpack.c.bf16 %v797_v35, %v789_v34  ;;  %v853_v24 = vld [vmem:[%s6817_s6 + $0x1218] sm:$0xff]  ;;  %v852_v34 = vld [vmem:[%s6817_s6 + $0x1210] sm:$0xff] }
  0xfe   : > { %v861_v27 = vld [vmem:[%s6817_s6 + $0x1258] sm:$0xff] }
  0xff   : > { %4509 = vmatpush1.bf16.msra.mxu0 %v4508_v47  ;;  %v805_v47 = vld [vmem:[%s6817_s6 + $0x1098] sm:$0xff]  ;;  %v4990_v35 = vpack.c.bf16 %v861_v27, %v853_v24  ;;  %v916_v24 = vld [vmem:[%s6817_s6 + $0x1410] sm:$0xff]  ;;  %v5006_v27 = vpack.c.bf16 %v925_v18, %v917_v17 }
 0x100   : > { %4957 = vmatpush1.bf16.msra.mxu1 %v4956_v48  ;;  %4511 = vmatprep.subr.bf16.mxu0 %v4510_v49  ;;  %v813_v48 = vld [vmem:[%s6817_s6 + $0x10d8] sm:$0xff]  ;;  %v4528_v49 = vpack.c.bf16 %v794_v41, %v786_v39  ;;  %v980_v17 = vld [vmem:[%s6817_s6 + $0x1610] sm:$0xff] }
 0x101   : > { %4959 = vmatprep.subr.bf16.mxu1 %v4958_v53  ;;  %v802_v53 = vld [vmem:[%s6817_s6 + $0x1080] sm:$0xff]  ;;  %v4978_v57 = vpack.c.bf16 %v813_v48, %v805_v47  ;;  %v869_v39 = vld [vmem:[%s6817_s6 + $0x1298] sm:$0xff]  ;;  %v868_v47 = vld [vmem:[%s6817_s6 + $0x1290] sm:$0xff] }
 0x102   : > { %v4532_v1 = vpack.c.bf16 %v810_v54, %v802_v53  ;;  %v877_v41 = vld [vmem:[%s6817_s6 + $0x12d8] sm:$0xff] }
 0x103   : > { %4513 = vmatpush1.bf16.msra.mxu0 %v4512_v59  ;;  %v819_v59 = vld [vmem:[%s6817_s6 + $0x1108] sm:$0xff]  ;;  %v4994_v48 = vpack.c.bf16 %v877_v41, %v869_v39  ;;  %v885_v53 = vld [vmem:[%s6817_s6 + $0x1318] sm:$0xff]  ;;  %v932_v39 = vld [vmem:[%s6817_s6 + $0x1490] sm:$0xff]  ;;  %v5010_v41 = vpack.c.bf16 %v941_v32, %v933_v31 }
 0x104   : > { %4961 = vmatpush1.bf16.msra.mxu1 %v4960_v60  ;;  %4515 = vmatprep.subr.bf16.mxu0 %v4514_v61  ;;  %v827_v60 = vld [vmem:[%s6817_s6 + $0x1148] sm:$0xff]  ;;  %v821_v61 = vld [vmem:[%s6817_s6 + $0x1118] sm:$0xff]  ;;  %v996_v31 = vld [vmem:[%s6817_s6 + $0x1690] sm:$0xff] }
 0x105   : > { %4963 = vmatprep.subr.bf16.mxu1 %v4962_v2  ;;  %v4980_v2 = vpack.c.bf16 %v812_v58, %v804_v55  ;;  %v4534_v3 = vpack.c.bf16 %v827_v60, %v819_v59  ;;  %v4982_v7 = vpack.c.bf16 %v829_v62, %v821_v61  ;;  %v893_v54 = vld [vmem:[%s6817_s6 + $0x1358] sm:$0xff]  ;;  %v4548_v55 = vpack.c.bf16 %v874_v46, %v866_v45  ;;  %v882_v59 = vld [vmem:[%s6817_s6 + $0x1300] sm:$0xff]  ;;  %v884_v61 = vld [vmem:[%s6817_s6 + $0x1310] sm:$0xff] }
 0x106   : > { %v890_v60 = vld [vmem:[%s6817_s6 + $0x1340] sm:$0xff]  ;;  %v4998_v62 = vpack.c.bf16 %v893_v54, %v885_v53  ;;  %v949_v45 = vld [vmem:[%s6817_s6 + $0x1518] sm:$0xff]  ;;  %v948_v53 = vld [vmem:[%s6817_s6 + $0x1510] sm:$0xff] }
 0x107   : > { %4517 = vmatpush1.bf16.msra.mxu0 %v4516_v8  ;;  %v828_v8 = vld [vmem:[%s6817_s6 + $0x1150] sm:$0xff]  ;;  %v957_v46 = vld [vmem:[%s6817_s6 + $0x1558] sm:$0xff] }
 0x108   : > { %4965 = vmatpush1.bf16.msra.mxu1 %v4964_v9  ;;  %4519 = vmatprep.subr.bf16.mxu0 %v4518_v10  ;;  %v835_v9 = vld [vmem:[%s6817_s6 + $0x1188] sm:$0xff]  ;;  %v5014_v54 = vpack.c.bf16 %v957_v46, %v949_v45  ;;  %v1012_v45 = vld [vmem:[%s6817_s6 + $0x1710] sm:$0xff] }
 0x109   : > { %4967 = vmatprep.subr.bf16.mxu1 %v4966_v15  ;;  %v843_v10 = vld [vmem:[%s6817_s6 + $0x11c8] sm:$0xff]  ;;  %v4984_v15 = vpack.c.bf16 %v828_v8, %v820_v6  ;;  %v4552_v6 = vpack.c.bf16 %v890_v60, %v882_v59  ;;  %v965_v59 = vld [vmem:[%s6817_s6 + $0x1598] sm:$0xff] }
 0x10a   : > { %v4538_v16 = vpack.c.bf16 %v843_v10, %v835_v9  ;;  %v898_v9 = vld [vmem:[%s6817_s6 + $0x1380] sm:$0xff]  ;;  %v973_v60 = vld [vmem:[%s6817_s6 + $0x15d8] sm:$0xff] }
 0x10b   : > { %4521 = vmatpush1.bf16.msra.mxu0 %v4520_v21  ;;  %v844_v21 = vld [vmem:[%s6817_s6 + $0x11d0] sm:$0xff]  ;;  %v906_v10 = vld [vmem:[%s6817_s6 + $0x13c0] sm:$0xff]  ;;  %v5018_v5 = vpack.c.bf16 %v973_v60, %v965_v59 }
 0x10c   : > { %4969 = vmatpush1.bf16.msra.mxu1 %v4968_v22  ;;  %4523 = vmatprep.subr.bf16.mxu0 %v4522_v23  ;;  %v851_v22 = vld [vmem:[%s6817_s6 + $0x1208] sm:$0xff]  ;;  %v1028_v59 = vld [vmem:[%s6817_s6 + $0x1790] sm:$0xff] }
 0x10d   : > { %4971 = vmatprep.subr.bf16.mxu1 %v4970_v29  ;;  %v859_v23 = vld [vmem:[%s6817_s6 + $0x1248] sm:$0xff]  ;;  %v4988_v29 = vpack.c.bf16 %v844_v21, %v836_v19  ;;  %v4556_v19 = vpack.c.bf16 %v906_v10, %v898_v9  ;;  %v981_v9 = vld [vmem:[%s6817_s6 + $0x1618] sm:$0xff] }
 0x10e   : > { %v4542_v30 = vpack.c.bf16 %v859_v23, %v851_v22  ;;  %v914_v22 = vld [vmem:[%s6817_s6 + $0x1400] sm:$0xff]  ;;  %v989_v10 = vld [vmem:[%s6817_s6 + $0x1658] sm:$0xff] }
 0x10f   : > { %4525 = vmatpush1.bf16.msra.mxu0 %v4524_v36  ;;  %v860_v36 = vld [vmem:[%s6817_s6 + $0x1250] sm:$0xff]  ;;  %v922_v23 = vld [vmem:[%s6817_s6 + $0x1440] sm:$0xff]  ;;  %v5022_v18 = vpack.c.bf16 %v989_v10, %v981_v9 }
 0x110   : > { %4973 = vmatpush1.bf16.msra.mxu1 %v4972_v37  ;;  %4527 = vmatprep.subr.bf16.mxu0 %v4526_v38  ;;  %v867_v37 = vld [vmem:[%s6817_s6 + $0x1288] sm:$0xff]  ;;  %v1050_v9 = vld [vmem:[%s6817_s6 + $0x1840] sm:$0xff]  ;;  %v1044_v10 = vld [vmem:[%s6817_s6 + $0x1810] sm:$0xff] }
 0x111   : > { %4975 = vmatprep.subr.bf16.mxu1 %v4974_v43  ;;  %v875_v38 = vld [vmem:[%s6817_s6 + $0x12c8] sm:$0xff]  ;;  %v4992_v43 = vpack.c.bf16 %v860_v36, %v852_v34  ;;  %v4560_v34 = vpack.c.bf16 %v922_v23, %v914_v22  ;;  %v997_v22 = vld [vmem:[%s6817_s6 + $0x1698] sm:$0xff] }
 0x112   : > { %2279 = vmatmul.mubr.f32.vlgmr.msra.gmra.mrb[0].mxu0 %v7007_v25  ;;  %v4546_v44 = vpack.c.bf16 %v875_v38, %v867_v37  ;;  %v930_v37 = vld [vmem:[%s6817_s6 + $0x1480] sm:$0xff]  ;;  %v1005_v23 = vld [vmem:[%s6817_s6 + $0x16d8] sm:$0xff] }
 0x113   : > { %4529 = vmatpush1.bf16.msra.mxu0 %v4528_v49  ;;  %2776 = vmatmul.mubr.f32.vlgmr.msra.gmra.mrb[0].mxu1 %v7007_v25  ;;  %v876_v49 = vld [vmem:[%s6817_s6 + $0x12d0] sm:$0xff]  ;;  %v938_v38 = vld [vmem:[%s6817_s6 + $0x14c0] sm:$0xff]  ;;  %v5026_v32 = vpack.c.bf16 %v1005_v23, %v997_v22 }
 0x114   : > { %4977 = vmatpush1.bf16.msra.mxu1 %v4976_v51  ;;  %4531 = vmatprep.subr.bf16.mxu0 %v4530_v52  ;;  %v883_v51 = vld [vmem:[%s6817_s6 + $0x1308] sm:$0xff]  ;;  %v1066_v22 = vld [vmem:[%s6817_s6 + $0x18c0] sm:$0xff]  ;;  %v1060_v23 = vld [vmem:[%s6817_s6 + $0x1890] sm:$0xff] }
 0x115   : > { %4979 = vmatprep.subr.bf16.mxu1 %v4978_v57  ;;  %2349 = vmatprep.mubr.f32.mxu0 %v7165_v0  ;;  %v891_v52 = vld [vmem:[%s6817_s6 + $0x1348] sm:$0xff]  ;;  %v4996_v57 = vpack.c.bf16 %v876_v49, %v868_v47  ;;  %v4564_v47 = vpack.c.bf16 %v938_v38, %v930_v37  ;;  %v1013_v37 = vld [vmem:[%s6817_s6 + $0x1718] sm:$0xff] }
 0x116   : > { %2846 = vmatprep.mubr.f32.mxu1 %v7165_v0  ;;  %v4550_v58 = vpack.c.bf16 %v891_v52, %v883_v51  ;;  %v946_v51 = vld [vmem:[%s6817_s6 + $0x1500] sm:$0xff]  ;;  %v1021_v38 = vld [vmem:[%s6817_s6 + $0x1758] sm:$0xff] }
 0x117   : > { %4533 = vmatpush1.bf16.msra.mxu0 %v4532_v1  ;;  %v892_v1 = vld [vmem:[%s6817_s6 + $0x1350] sm:$0xff]  ;;  %v954_v52 = vld [vmem:[%s6817_s6 + $0x1540] sm:$0xff]  ;;  %v5030_v46 = vpack.c.bf16 %v1021_v38, %v1013_v37 }
 0x118   : > { %4981 = vmatpush1.bf16.msra.mxu1 %v4980_v2  ;;  %4535 = vmatprep.subr.bf16.mxu0 %v4534_v3  ;;  %v899_v2 = vld [vmem:[%s6817_s6 + $0x1388] sm:$0xff]  ;;  %v1074_v37 = vld [vmem:[%s6817_s6 + $0x1900] sm:$0xff] }
 0x119   : > { %4983 = vmatprep.subr.bf16.mxu1 %v4982_v7  ;;  %v907_v3 = vld [vmem:[%s6817_s6 + $0x13c8] sm:$0xff]  ;;  %v5000_v7 = vpack.c.bf16 %v892_v1, %v884_v61  ;;  %v4568_v61 = vpack.c.bf16 %v954_v52, %v946_v51  ;;  %v1029_v51 = vld [vmem:[%s6817_s6 + $0x1798] sm:$0xff]  ;;  %v1082_v38 = vld [vmem:[%s6817_s6 + $0x1940] sm:$0xff] }
 0x11a   : > { %v4554_v8 = vpack.c.bf16 %v907_v3, %v899_v2  ;;  %v962_v2 = vld [vmem:[%s6817_s6 + $0x1580] sm:$0xff]  ;;  %v1037_v52 = vld [vmem:[%s6817_s6 + $0x17d8] sm:$0xff] }
 0x11b   : > { %4537 = vmatpush1.bf16.msra.mxu0 %v4536_v14  ;;  %v908_v14 = vld [vmem:[%s6817_s6 + $0x13d0] sm:$0xff]  ;;  %v970_v3 = vld [vmem:[%s6817_s6 + $0x15c0] sm:$0xff]  ;;  %v5034_v60 = vpack.c.bf16 %v1037_v52, %v1029_v51 }
 0x11c   : > { %4985 = vmatpush1.bf16.msra.mxu1 %v4984_v15  ;;  %4539 = vmatprep.subr.bf16.mxu0 %v4538_v16  ;;  %v915_v15 = vld [vmem:[%s6817_s6 + $0x1408] sm:$0xff]  ;;  %v1090_v51 = vld [vmem:[%s6817_s6 + $0x1980] sm:$0xff] }
 0x11d   : > { %4987 = vmatprep.subr.bf16.mxu1 %v4986_v20  ;;  %v923_v16 = vld [vmem:[%s6817_s6 + $0x1448] sm:$0xff]  ;;  %v5004_v20 = vpack.c.bf16 %v908_v14, %v900_v11  ;;  %v4572_v11 = vpack.c.bf16 %v970_v3, %v962_v2  ;;  %v2087_v2 = vcombine.high %v7148_v50, %v7148_v50  ;;  %v1045_v3 = vld [vmem:[%s6817_s6 + $0x1818] sm:$0xff]  ;;  %v1052_v50 = vld [vmem:[%s6817_s6 + $0x1850] sm:$0xff] }
 0x11e   : > { %v4558_v21 = vpack.c.bf16 %v923_v16, %v915_v15  ;;  %v978_v15 = vld [vmem:[%s6817_s6 + $0x1600] sm:$0xff] }
 0x11f   : > { %4541 = vmatpush1.bf16.msra.mxu0 %v4540_v28  ;;  %v924_v28 = vld [vmem:[%s6817_s6 + $0x1450] sm:$0xff]  ;;  %v986_v16 = vld [vmem:[%s6817_s6 + $0x1640] sm:$0xff] }
 0x120   : > { %4989 = vmatpush1.bf16.msra.mxu1 %v4988_v29  ;;  %4543 = vmatprep.subr.bf16.mxu0 %v4542_v30  ;;  %v931_v29 = vld [vmem:[%s6817_s6 + $0x1488] sm:$0xff]  ;;  %v1098_v52 = vld [vmem:[%s6817_s6 + $0x19c0] sm:$0xff] }
 0x121   : > { %4991 = vmatprep.subr.bf16.mxu1 %v4990_v35  ;;  %v939_v30 = vld [vmem:[%s6817_s6 + $0x14c8] sm:$0xff]  ;;  %v5008_v35 = vpack.c.bf16 %v924_v28, %v916_v24  ;;  %v4576_v24 = vpack.c.bf16 %v986_v16, %v978_v15  ;;  %v7291_v15 = vrot.slane %v2087_v2, %v6939_v12  ;;  %v1061_v16 = vld [vmem:[%s6817_s6 + $0x1898] sm:$0xff]  ;;  %v1106_v2 = vld [vmem:[%s6817_s6 + $0x1a00] sm:$0xff] }
 0x122   : > { %v4562_v36 = vpack.c.bf16 %v939_v30, %v931_v29  ;;  %v994_v29 = vld [vmem:[%s6817_s6 + $0x1680] sm:$0xff] }
 0x123   : > { %4545 = vmatpush1.bf16.msra.mxu0 %v4544_v42  ;;  %v940_v42 = vld [vmem:[%s6817_s6 + $0x14d0] sm:$0xff]  ;;  %v1002_v30 = vld [vmem:[%s6817_s6 + $0x16c0] sm:$0xff] }
 0x124   : > { %4993 = vmatpush1.bf16.msra.mxu1 %v4992_v43  ;;  %4547 = vmatprep.subr.bf16.mxu0 %v4546_v44  ;;  %v947_v43 = vld [vmem:[%s6817_s6 + $0x1508] sm:$0xff] }
 0x125   : > { %4995 = vmatprep.subr.bf16.mxu1 %v4994_v48  ;;  %v955_v44 = vld [vmem:[%s6817_s6 + $0x1548] sm:$0xff]  ;;  %v5012_v48 = vpack.c.bf16 %v940_v42, %v932_v39  ;;  %v4580_v39 = vpack.c.bf16 %v1002_v30, %v994_v29  ;;  %v7303_v30 = vcombine.high %v7291_v15, %v7291_v15 }
 0x126   : > { %v4566_v49 = vpack.c.bf16 %v955_v44, %v947_v43  ;;  %v1010_v43 = vld [vmem:[%s6817_s6 + $0x1700] sm:$0xff]  ;;  %v1083_v29 = vld [vmem:[%s6817_s6 + $0x1948] sm:$0xff] }
 0x127   : > { %4549 = vmatpush1.bf16.msra.mxu0 %v4548_v55  ;;  %v956_v55 = vld [vmem:[%s6817_s6 + $0x1550] sm:$0xff]  ;;  %v1018_v44 = vld [vmem:[%s6817_s6 + $0x1740] sm:$0xff] }
 0x128   : > { %4997 = vmatpush1.bf16.msra.mxu1 %v4996_v57  ;;  %4551 = vmatprep.subr.bf16.mxu0 %v4550_v58  ;;  %v963_v57 = vld [vmem:[%s6817_s6 + $0x1588] sm:$0xff] }
 0x129   : > { %4999 = vmatprep.subr.bf16.mxu1 %v4998_v62  ;;  %v971_v58 = vld [vmem:[%s6817_s6 + $0x15c8] sm:$0xff]  ;;  %v5016_v62 = vpack.c.bf16 %v956_v55, %v948_v53  ;;  %v4584_v53 = vpack.c.bf16 %v1018_v44, %v1010_v43 }
 0x12a   : > { %v4570_v1 = vpack.c.bf16 %v971_v58, %v963_v57  ;;  %v1026_v57 = vld [vmem:[%s6817_s6 + $0x1780] sm:$0xff]  ;;  %v1091_v43 = vld [vmem:[%s6817_s6 + $0x1988] sm:$0xff] }
 0x12b   : > { %4553 = vmatpush1.bf16.msra.mxu0 %v4552_v6  ;;  %v972_v6 = vld [vmem:[%s6817_s6 + $0x15d0] sm:$0xff]  ;;  %v1034_v58 = vld [vmem:[%s6817_s6 + $0x17c0] sm:$0xff]  ;;  %v1099_v44 = vld [vmem:[%s6817_s6 + $0x19c8] sm:$0xff] }
 0x12c   : > { %5001 = vmatpush1.bf16.msra.mxu1 %v5000_v7  ;;  %4555 = vmatprep.subr.bf16.mxu0 %v4554_v8  ;;  %v979_v7 = vld [vmem:[%s6817_s6 + $0x1608] sm:$0xff] }
 0x12d   : > { %5003 = vmatprep.subr.bf16.mxu1 %v5002_v13  ;;  %v987_v8 = vld [vmem:[%s6817_s6 + $0x1648] sm:$0xff]  ;;  %v5020_v13 = vpack.c.bf16 %v972_v6, %v964_v4  ;;  %v1053_v4 = vld [vmem:[%s6817_s6 + $0x1858] sm:$0xff] }
 0x12e   : > { %v4574_v14 = vpack.c.bf16 %v987_v8, %v979_v7  ;;  %v1042_v8 = vld [vmem:[%s6817_s6 + $0x1800] sm:$0xff] }
 0x12f   : > { %4557 = vmatpush1.bf16.msra.mxu0 %v4556_v19  ;;  %v988_v19 = vld [vmem:[%s6817_s6 + $0x1650] sm:$0xff] }
 0x130   : > { %5005 = vmatpush1.bf16.msra.mxu1 %v5004_v20  ;;  %4559 = vmatprep.subr.bf16.mxu0 %v4558_v21  ;;  %v995_v20 = vld [vmem:[%s6817_s6 + $0x1688] sm:$0xff] }
 0x131   : > { %5007 = vmatprep.subr.bf16.mxu1 %v5006_v27  ;;  %v1003_v21 = vld [vmem:[%s6817_s6 + $0x16c8] sm:$0xff]  ;;  %v5024_v27 = vpack.c.bf16 %v988_v19, %v980_v17  ;;  %v1069_v17 = vld [vmem:[%s6817_s6 + $0x18d8] sm:$0xff]  ;;  %v5040_v19 = vpack.c.bf16 %v1052_v50, %v1044_v10 }
 0x132   : > { %v4578_v28 = vpack.c.bf16 %v1003_v21, %v995_v20  ;;  %v1058_v21 = vld [vmem:[%s6817_s6 + $0x1880] sm:$0xff]  ;;  %v1133_v10 = vld [vmem:[%s6817_s6 + $0x1ad8] sm:$0xff] }
 0x133   : > { %4561 = vmatpush1.bf16.msra.mxu0 %v4560_v34  ;;  %v1004_v34 = vld [vmem:[%s6817_s6 + $0x16d0] sm:$0xff] }
 0x134   : > { %5009 = vmatpush1.bf16.msra.mxu1 %v5008_v35  ;;  %4563 = vmatprep.subr.bf16.mxu0 %v4562_v36  ;;  %v1011_v35 = vld [vmem:[%s6817_s6 + $0x1708] sm:$0xff] }
 0x135   : > { %5011 = vmatprep.subr.bf16.mxu1 %v5010_v41  ;;  %v1019_v36 = vld [vmem:[%s6817_s6 + $0x1748] sm:$0xff]  ;;  %v5028_v41 = vpack.c.bf16 %v1004_v34, %v996_v31  ;;  %v1077_v31 = vld [vmem:[%s6817_s6 + $0x1918] sm:$0xff]  ;;  %v4596_v34 = vpack.c.bf16 %v1066_v22, %v1058_v21 }
 0x136   : > { %v4582_v42 = vpack.c.bf16 %v1019_v36, %v1011_v35  ;;  %v1147_v21 = vld [vmem:[%s6817_s6 + $0x1b48] sm:$0xff]  ;;  %v1141_v22 = vld [vmem:[%s6817_s6 + $0x1b18] sm:$0xff] }
 0x137   : > { %4565 = vmatpush1.bf16.msra.mxu0 %v4564_v47  ;;  %v1020_v47 = vld [vmem:[%s6817_s6 + $0x1750] sm:$0xff] }
 0x138   : > { %5013 = vmatpush1.bf16.msra.mxu1 %v5012_v48  ;;  %4567 = vmatprep.subr.bf16.mxu0 %v4566_v49  ;;  %v1027_v48 = vld [vmem:[%s6817_s6 + $0x1788] sm:$0xff] }
 0x139   : > { %5015 = vmatprep.subr.bf16.mxu1 %v5014_v54  ;;  %v1035_v49 = vld [vmem:[%s6817_s6 + $0x17c8] sm:$0xff]  ;;  %v5032_v54 = vpack.c.bf16 %v1020_v47, %v1012_v45  ;;  %v1093_v45 = vld [vmem:[%s6817_s6 + $0x1998] sm:$0xff]  ;;  %v4600_v47 = vpack.c.bf16 %v1082_v38, %v1074_v37 }
 0x13a   : > { %v4586_v55 = vpack.c.bf16 %v1035_v49, %v1027_v48  ;;  %v4602_v49 = vpack.c.bf16 %v1099_v44, %v1091_v43  ;;  %v1163_v37 = vld [vmem:[%s6817_s6 + $0x1bc8] sm:$0xff]  ;;  %v1157_v38 = vld [vmem:[%s6817_s6 + $0x1b98] sm:$0xff]  ;;  %v1154_v44 = vld [vmem:[%s6817_s6 + $0x1b80] sm:$0xff] }
 0x13b   : > { %4569 = vmatpush1.bf16.msra.mxu0 %v4568_v61  ;;  %v1036_v61 = vld [vmem:[%s6817_s6 + $0x17d0] sm:$0xff] }
 0x13c   : > { %5017 = vmatpush1.bf16.msra.mxu1 %v5016_v62  ;;  %4571 = vmatprep.subr.bf16.mxu0 %v4570_v1  ;;  %v1043_v62 = vld [vmem:[%s6817_s6 + $0x1808] sm:$0xff]  ;;  %v5036_v6 = vpack.c.bf16 %v1036_v61, %v1028_v59  ;;  %v1109_v59 = vld [vmem:[%s6817_s6 + $0x1a18] sm:$0xff]  ;;  %v4604_v61 = vpack.c.bf16 %v1098_v52, %v1090_v51 }
 0x13d   : > { %5019 = vmatprep.subr.bf16.mxu1 %v5018_v5  ;;  %v1051_v1 = vld [vmem:[%s6817_s6 + $0x1848] sm:$0xff]  ;;  %v4588_v5 = vpack.c.bf16 %v1034_v58, %v1026_v57  ;;  %v1173_v52 = vld [vmem:[%s6817_s6 + $0x1c18] sm:$0xff] }
 0x13e   : > { %v4590_v7 = vpack.c.bf16 %v1051_v1, %v1043_v62  ;;  %v1107_v57 = vld [vmem:[%s6817_s6 + $0x1a08] sm:$0xff] }
 0x13f   : > { %4573 = vmatpush1.bf16.msra.mxu0 %v4572_v11  ;;  %v5038_v11 = vpack.c.bf16 %v1053_v4, %v1045_v3  ;;  %v1115_v58 = vld [vmem:[%s6817_s6 + $0x1a48] sm:$0xff]  ;;  %v1114_v3 = vld [vmem:[%s6817_s6 + $0x1a40] sm:$0xff]  ;;  %v1108_v4 = vld [vmem:[%s6817_s6 + $0x1a10] sm:$0xff] }
 0x140   : > { %5021 = vmatpush1.bf16.msra.mxu1 %v5020_v13  ;;  %4575 = vmatprep.subr.bf16.mxu0 %v4574_v14  ;;  %v1059_v13 = vld [vmem:[%s6817_s6 + $0x1888] sm:$0xff]  ;;  %v4606_v1 = vpack.c.bf16 %v1115_v58, %v1107_v57  ;;  %v1170_v58 = vld [vmem:[%s6817_s6 + $0x1c00] sm:$0xff] }
 0x141   : > { %5023 = vmatprep.subr.bf16.mxu1 %v5022_v18  ;;  %v1067_v14 = vld [vmem:[%s6817_s6 + $0x18c8] sm:$0xff]  ;;  %v4592_v18 = vpack.c.bf16 %v1050_v9, %v1042_v8  ;;  %v1125_v9 = vld [vmem:[%s6817_s6 + $0x1a98] sm:$0xff] }
 0x142   : > { %v4594_v20 = vpack.c.bf16 %v1067_v14, %v1059_v13  ;;  %v1131_v8 = vld [vmem:[%s6817_s6 + $0x1ac8] sm:$0xff]  ;;  %v1122_v14 = vld [vmem:[%s6817_s6 + $0x1a80] sm:$0xff] }
 0x143   : > { %4577 = vmatpush1.bf16.msra.mxu0 %v4576_v24  ;;  %v5042_v24 = vpack.c.bf16 %v1069_v17, %v1061_v16  ;;  %v1130_v16 = vld [vmem:[%s6817_s6 + $0x1ac0] sm:$0xff]  ;;  %v1124_v17 = vld [vmem:[%s6817_s6 + $0x1a90] sm:$0xff]  ;;  %v1179_v51 = vld [vmem:[%s6817_s6 + $0x1c48] sm:$0xff] }
 0x144   : > { %5025 = vmatpush1.bf16.msra.mxu1 %v5024_v27  ;;  %4579 = vmatprep.subr.bf16.mxu0 %v4578_v28  ;;  %v1068_v27 = vld [vmem:[%s6817_s6 + $0x18d0] sm:$0xff]  ;;  %v1075_v28 = vld [vmem:[%s6817_s6 + $0x1908] sm:$0xff] }
 0x145   : > { %5027 = vmatprep.subr.bf16.mxu1 %v5026_v32  ;;  %v1085_v32 = vld [vmem:[%s6817_s6 + $0x1958] sm:$0xff]  ;;  %v5044_v35 = vpack.c.bf16 %v1068_v27, %v1060_v23  ;;  %v4598_v36 = vpack.c.bf16 %v1083_v29, %v1075_v28  ;;  %v1138_v29 = vld [vmem:[%s6817_s6 + $0x1b00] sm:$0xff] }
 0x146   : > { %v1149_v23 = vld [vmem:[%s6817_s6 + $0x1b58] sm:$0xff] }
 0x147   : > { %4581 = vmatpush1.bf16.msra.mxu0 %v4580_v39  ;;  %v1076_v39 = vld [vmem:[%s6817_s6 + $0x1910] sm:$0xff] }
 0x148   : > { %5029 = vmatpush1.bf16.msra.mxu1 %v5028_v41  ;;  %4583 = vmatprep.subr.bf16.mxu0 %v4582_v42  ;;  %v5046_v41 = vpack.c.bf16 %v1085_v32, %v1077_v31  ;;  %v1084_v42 = vld [vmem:[%s6817_s6 + $0x1950] sm:$0xff]  ;;  %v1146_v31 = vld [vmem:[%s6817_s6 + $0x1b40] sm:$0xff] }
 0x149   : > { %5031 = vmatprep.subr.bf16.mxu1 %v5030_v46  ;;  %v1101_v46 = vld [vmem:[%s6817_s6 + $0x19d8] sm:$0xff]  ;;  %v5048_v48 = vpack.c.bf16 %v1084_v42, %v1076_v39  ;;  %v1140_v32 = vld [vmem:[%s6817_s6 + $0x1b10] sm:$0xff] }
 0x14a   : > { %v1165_v39 = vld [vmem:[%s6817_s6 + $0x1bd8] sm:$0xff] }
 0x14b   : > { %4585 = vmatpush1.bf16.msra.mxu0 %v4584_v53  ;;  %v1092_v53 = vld [vmem:[%s6817_s6 + $0x1990] sm:$0xff] }
 0x14c   : > { %5033 = vmatpush1.bf16.msra.mxu1 %v5032_v54  ;;  %4587 = vmatprep.subr.bf16.mxu0 %v4586_v55  ;;  %v5050_v54 = vpack.c.bf16 %v1101_v46, %v1093_v45  ;;  %v1100_v55 = vld [vmem:[%s6817_s6 + $0x19d0] sm:$0xff]  ;;  %v1162_v45 = vld [vmem:[%s6817_s6 + $0x1bc0] sm:$0xff] }
 0x14d   : > { %5035 = vmatprep.subr.bf16.mxu1 %v5034_v60  ;;  %v1117_v60 = vld [vmem:[%s6817_s6 + $0x1a58] sm:$0xff]  ;;  %v5052_v62 = vpack.c.bf16 %v1100_v55, %v1092_v53  ;;  %v1156_v46 = vld [vmem:[%s6817_s6 + $0x1b90] sm:$0xff] }
 0x14e   : > { %v1181_v53 = vld [vmem:[%s6817_s6 + $0x1c58] sm:$0xff] }
 0x14f   : > { %4589 = vmatpush1.bf16.msra.mxu0 %v4588_v5  ;;  %v5054_v5 = vpack.c.bf16 %v1117_v60, %v1109_v59  ;;  %v1178_v59 = vld [vmem:[%s6817_s6 + $0x1c40] sm:$0xff]  ;;  %v1172_v60 = vld [vmem:[%s6817_s6 + $0x1c10] sm:$0xff] }
 0x150   : > { %5037 = vmatpush1.bf16.msra.mxu1 %v5036_v6  ;;  %4591 = vmatprep.subr.bf16.mxu0 %v4590_v7  ;;  %v1116_v6 = vld [vmem:[%s6817_s6 + $0x1a50] sm:$0xff]  ;;  %v1123_v7 = vld [vmem:[%s6817_s6 + $0x1a88] sm:$0xff] }
 0x151   : > { %5039 = vmatprep.subr.bf16.mxu1 %v5038_v11  ;;  %v4608_v11 = vpack.c.bf16 %v1114_v3, %v1106_v2  ;;  %v5056_v50 = vpack.c.bf16 %v1116_v6, %v1108_v4  ;;  %v4610_v13 = vpack.c.bf16 %v1131_v8, %v1123_v7  ;;  %v1195_v2 = vld [vmem:[%s6817_s6 + $0x1cc8] sm:$0xff]  ;;  %v1189_v3 = vld [vmem:[%s6817_s6 + $0x1c98] sm:$0xff]  ;;  %v1186_v8 = vld [vmem:[%s6817_s6 + $0x1c80] sm:$0xff] }
 0x152   : > { %2350 = vmatmul.mubr.f32.vlgmr.msra.gmra.mrb[0].mxu0 %v7155_v56  ;;  %v1197_v4 = vld [vmem:[%s6817_s6 + $0x1cd8] sm:$0xff] }
 0x153   : > { %4593 = vmatpush1.bf16.msra.mxu0 %v4592_v18  ;;  %2847 = vmatmul.mubr.f32.vlgmr.msra.gmra.mrb[0].mxu1 %v7155_v56  ;;  %v5058_v18 = vpack.c.bf16 %v1133_v10, %v1125_v9  ;;  %v1194_v9 = vld [vmem:[%s6817_s6 + $0x1cc0] sm:$0xff]  ;;  %v1188_v10 = vld [vmem:[%s6817_s6 + $0x1c90] sm:$0xff] }
 0x154   : > { %5041 = vmatpush1.bf16.msra.mxu1 %v5040_v19  ;;  %4595 = vmatprep.subr.bf16.mxu0 %v4594_v20  ;;  %v1132_v19 = vld [vmem:[%s6817_s6 + $0x1ad0] sm:$0xff]  ;;  %v1139_v20 = vld [vmem:[%s6817_s6 + $0x1b08] sm:$0xff] }
 0x155   : > { %5043 = vmatprep.subr.bf16.mxu1 %v5042_v24  ;;  %2420 = vmatprep.mubr.f32.mxu0 %v7303_v30  ;;  %v4612_v24 = vpack.c.bf16 %v1130_v16, %v1122_v14  ;;  %v5060_v27 = vpack.c.bf16 %v1132_v19, %v1124_v17  ;;  %v4614_v28 = vpack.c.bf16 %v1147_v21, %v1139_v20  ;;  %v1211_v14 = vld [vmem:[%s6817_s6 + $0x1d48] sm:$0xff]  ;;  %v1205_v16 = vld [vmem:[%s6817_s6 + $0x1d18] sm:$0xff]  ;;  %v1202_v21 = vld [vmem:[%s6817_s6 + $0x1d00] sm:$0xff] }
 0x156   : > { %2917 = vmatprep.mubr.f32.mxu1 %v7303_v30  ;;  %v1213_v17 = vld [vmem:[%s6817_s6 + $0x1d58] sm:$0xff] }
 0x157   : > { %4597 = vmatpush1.bf16.msra.mxu0 %v4596_v34  ;;  %v5062_v34 = vpack.c.bf16 %v1149_v23, %v1141_v22  ;;  %v1210_v22 = vld [vmem:[%s6817_s6 + $0x1d40] sm:$0xff]  ;;  %v1204_v23 = vld [vmem:[%s6817_s6 + $0x1d10] sm:$0xff] }
 0x158   : > { %5045 = vmatpush1.bf16.msra.mxu1 %v5044_v35  ;;  %4599 = vmatprep.subr.bf16.mxu0 %v4598_v36  ;;  %v1148_v35 = vld [vmem:[%s6817_s6 + $0x1b50] sm:$0xff]  ;;  %v1155_v36 = vld [vmem:[%s6817_s6 + $0x1b88] sm:$0xff] }
 0x159   : > { %5047 = vmatprep.subr.bf16.mxu1 %v5046_v41  ;;  %v4616_v41 = vpack.c.bf16 %v1146_v31, %v1138_v29  ;;  %v5064_v42 = vpack.c.bf16 %v1148_v35, %v1140_v32  ;;  %v4618_v43 = vpack.c.bf16 %v1163_v37, %v1155_v36  ;;  %v1227_v29 = vld [vmem:[%s6817_s6 + $0x1dc8] sm:$0xff]  ;;  %v1221_v31 = vld [vmem:[%s6817_s6 + $0x1d98] sm:$0xff]  ;;  %v1218_v37 = vld [vmem:[%s6817_s6 + $0x1d80] sm:$0xff] }
 0x15a   : > { %v1229_v32 = vld [vmem:[%s6817_s6 + $0x1dd8] sm:$0xff] }
 0x15b   : > { %4601 = vmatpush1.bf16.msra.mxu0 %v4600_v47  ;;  %v5066_v47 = vpack.c.bf16 %v1165_v39, %v1157_v38  ;;  %v1226_v38 = vld [vmem:[%s6817_s6 + $0x1dc0] sm:$0xff]  ;;  %v1220_v39 = vld [vmem:[%s6817_s6 + $0x1d90] sm:$0xff] }
 0x15c   : > { %5049 = vmatpush1.bf16.msra.mxu1 %v5048_v48  ;;  %4603 = vmatprep.subr.bf16.mxu0 %v4602_v49  ;;  %v1164_v48 = vld [vmem:[%s6817_s6 + $0x1bd0] sm:$0xff]  ;;  %v1171_v49 = vld [vmem:[%s6817_s6 + $0x1c08] sm:$0xff] }
 0x15d   : > { %5051 = vmatprep.subr.bf16.mxu1 %v5050_v54  ;;  %v4620_v54 = vpack.c.bf16 %v1162_v45, %v1154_v44  ;;  %v5068_v55 = vpack.c.bf16 %v1164_v48, %v1156_v46  ;;  %v4622_v57 = vpack.c.bf16 %v1179_v51, %v1171_v49  ;;  %v1243_v44 = vld [vmem:[%s6817_s6 + $0x1e48] sm:$0xff]  ;;  %v1237_v45 = vld [vmem:[%s6817_s6 + $0x1e18] sm:$0xff]  ;;  %v1234_v51 = vld [vmem:[%s6817_s6 + $0x1e00] sm:$0xff] }
 0x15e   : > { %v1245_v46 = vld [vmem:[%s6817_s6 + $0x1e58] sm:$0xff] }
 0x15f   : > { %4605 = vmatpush1.bf16.msra.mxu0 %v4604_v61  ;;  %v5070_v61 = vpack.c.bf16 %v1181_v53, %v1173_v52  ;;  %v1242_v52 = vld [vmem:[%s6817_s6 + $0x1e40] sm:$0xff]  ;;  %v1236_v53 = vld [vmem:[%s6817_s6 + $0x1e10] sm:$0xff] }
 0x160   : > { %5053 = vmatpush1.bf16.msra.mxu1 %v5052_v62  ;;  %4607 = vmatprep.subr.bf16.mxu0 %v4606_v1  ;;  %v1180_v62 = vld [vmem:[%s6817_s6 + $0x1c50] sm:$0xff]  ;;  %v1187_v1 = vld [vmem:[%s6817_s6 + $0x1c88] sm:$0xff] }
 0x161   : > { %5055 = vmatprep.subr.bf16.mxu1 %v5054_v5  ;;  %v4624_v5 = vpack.c.bf16 %v1178_v59, %v1170_v58  ;;  %v5072_v6 = vpack.c.bf16 %v1180_v62, %v1172_v60  ;;  %v4626_v7 = vpack.c.bf16 %v1195_v2, %v1187_v1  ;;  %v1259_v58 = vld [vmem:[%s6817_s6 + $0x1ec8] sm:$0xff]  ;;  %v1253_v59 = vld [vmem:[%s6817_s6 + $0x1e98] sm:$0xff]  ;;  %v1250_v2 = vld [vmem:[%s6817_s6 + $0x1e80] sm:$0xff] }
 0x162   : > { %v1261_v60 = vld [vmem:[%s6817_s6 + $0x1ed8] sm:$0xff] }
 0x163   : > { %4609 = vmatpush1.bf16.msra.mxu0 %v4608_v11  ;;  %v5074_v11 = vpack.c.bf16 %v1197_v4, %v1189_v3  ;;  %v1258_v3 = vld [vmem:[%s6817_s6 + $0x1ec0] sm:$0xff]  ;;  %v1252_v4 = vld [vmem:[%s6817_s6 + $0x1e90] sm:$0xff] }
 0x164   : > { %5057 = vmatpush1.bf16.msra.mxu1 %v5056_v50  ;;  %4611 = vmatprep.subr.bf16.mxu0 %v4610_v13  ;;  %v1196_v50 = vld [vmem:[%s6817_s6 + $0x1cd0] sm:$0xff]  ;;  %v1203_v13 = vld [vmem:[%s6817_s6 + $0x1d08] sm:$0xff] }
 0x165   : > { %5059 = vmatprep.subr.bf16.mxu1 %v5058_v18  ;;  %v4628_v18 = vpack.c.bf16 %v1194_v9, %v1186_v8  ;;  %v5076_v19 = vpack.c.bf16 %v1196_v50, %v1188_v10  ;;  %v4630_v20 = vpack.c.bf16 %v1211_v14, %v1203_v13  ;;  %v1275_v8 = vld [vmem:[%s6817_s6 + $0x1f48] sm:$0xff]  ;;  %v1269_v9 = vld [vmem:[%s6817_s6 + $0x1f18] sm:$0xff]  ;;  %v1266_v14 = vld [vmem:[%s6817_s6 + $0x1f00] sm:$0xff] }
 0x166   : > { %v1277_v10 = vld [vmem:[%s6817_s6 + $0x1f58] sm:$0xff] }
 0x167   : > { %4613 = vmatpush1.bf16.msra.mxu0 %v4612_v24  ;;  %v5078_v24 = vpack.c.bf16 %v1213_v17, %v1205_v16  ;;  %v1274_v16 = vld [vmem:[%s6817_s6 + $0x1f40] sm:$0xff]  ;;  %v1268_v17 = vld [vmem:[%s6817_s6 + $0x1f10] sm:$0xff] }
 0x168   : > { %5061 = vmatpush1.bf16.msra.mxu1 %v5060_v27  ;;  %4615 = vmatprep.subr.bf16.mxu0 %v4614_v28  ;;  %v1212_v27 = vld [vmem:[%s6817_s6 + $0x1d50] sm:$0xff]  ;;  %v1219_v28 = vld [vmem:[%s6817_s6 + $0x1d88] sm:$0xff] }
 0x169   : > { %5063 = vmatprep.subr.bf16.mxu1 %v5062_v34  ;;  %v4632_v34 = vpack.c.bf16 %v1210_v22, %v1202_v21  ;;  %v5080_v35 = vpack.c.bf16 %v1212_v27, %v1204_v23  ;;  %v4634_v36 = vpack.c.bf16 %v1227_v29, %v1219_v28  ;;  %v1291_v21 = vld [vmem:[%s6817_s6 + $0x1fc8] sm:$0xff]  ;;  %v1285_v22 = vld [vmem:[%s6817_s6 + $0x1f98] sm:$0xff]  ;;  %v1282_v29 = vld [vmem:[%s6817_s6 + $0x1f80] sm:$0xff] }
 0x16a   : > { %v1293_v23 = vld [vmem:[%s6817_s6 + $0x1fd8] sm:$0xff] }
 0x16b   : > { %4617 = vmatpush1.bf16.msra.mxu0 %v4616_v41  ;;  %v5082_v41 = vpack.c.bf16 %v1229_v32, %v1221_v31  ;;  %v1290_v31 = vld [vmem:[%s6817_s6 + $0x1fc0] sm:$0xff]  ;;  %v1284_v32 = vld [vmem:[%s6817_s6 + $0x1f90] sm:$0xff] }
 0x16c   : > { %5065 = vmatpush1.bf16.msra.mxu1 %v5064_v42  ;;  %4619 = vmatprep.subr.bf16.mxu0 %v4618_v43  ;;  %v1228_v42 = vld [vmem:[%s6817_s6 + $0x1dd0] sm:$0xff]  ;;  %v1235_v43 = vld [vmem:[%s6817_s6 + $0x1e08] sm:$0xff] }
 0x16d   : > { %5067 = vmatprep.subr.bf16.mxu1 %v5066_v47  ;;  %v4636_v47 = vpack.c.bf16 %v1226_v38, %v1218_v37  ;;  %v5084_v48 = vpack.c.bf16 %v1228_v42, %v1220_v39  ;;  %v4638_v49 = vpack.c.bf16 %v1243_v44, %v1235_v43  ;;  %v1307_v37 = vld [vmem:[%s6817_s6 + $0x2048] sm:$0xff]  ;;  %v1301_v38 = vld [vmem:[%s6817_s6 + $0x2018] sm:$0xff]  ;;  %v4652_v42 = vpack.c.bf16 %v1290_v31, %v1282_v29  ;;  %v1356_v31 = vld [vmem:[%s6817_s6 + $0x21d0] sm:$0xff] }
 0x16e   : > { %v1309_v39 = vld [vmem:[%s6817_s6 + $0x2058] sm:$0xff] }
 0x16f   : > { %4621 = vmatpush1.bf16.msra.mxu0 %v4620_v54  ;;  %v5086_v54 = vpack.c.bf16 %v1245_v46, %v1237_v45  ;;  %v1298_v45 = vld [vmem:[%s6817_s6 + $0x2000] sm:$0xff] }
 0x170   : > { %5069 = vmatpush1.bf16.msra.mxu1 %v5068_v55  ;;  %4623 = vmatprep.subr.bf16.mxu0 %v4622_v57  ;;  %v1244_v55 = vld [vmem:[%s6817_s6 + $0x1e50] sm:$0xff]  ;;  %v1251_v57 = vld [vmem:[%s6817_s6 + $0x1e88] sm:$0xff]  ;;  %v1306_v46 = vld [vmem:[%s6817_s6 + $0x2040] sm:$0xff] }
 0x171   : > { %5071 = vmatprep.subr.bf16.mxu1 %v5070_v61  ;;  %v4640_v61 = vpack.c.bf16 %v1242_v52, %v1234_v51  ;;  %v5088_v62 = vpack.c.bf16 %v1244_v55, %v1236_v53  ;;  %v4642_v1 = vpack.c.bf16 %v1259_v58, %v1251_v57  ;;  %v1315_v51 = vld [vmem:[%s6817_s6 + $0x2088] sm:$0xff]  ;;  %v1325_v55 = vld [vmem:[%s6817_s6 + $0x20d8] sm:$0xff]  ;;  %v4656_v57 = vpack.c.bf16 %v1306_v46, %v1298_v45  ;;  %v1372_v46 = vld [vmem:[%s6817_s6 + $0x2250] sm:$0xff] }
 0x172   : > { %v1323_v52 = vld [vmem:[%s6817_s6 + $0x20c8] sm:$0xff] }
 0x173   : > { %4625 = vmatpush1.bf16.msra.mxu0 %v4624_v5  ;;  %v5090_v5 = vpack.c.bf16 %v1261_v60, %v1253_v59  ;;  %v4658_v59 = vpack.c.bf16 %v1323_v52, %v1315_v51  ;;  %v1314_v60 = vld [vmem:[%s6817_s6 + $0x2080] sm:$0xff]  ;;  %v1389_v51 = vld [vmem:[%s6817_s6 + $0x22d8] sm:$0xff] }
 0x174   : > { %5073 = vmatpush1.bf16.msra.mxu1 %v5072_v6  ;;  %4627 = vmatprep.subr.bf16.mxu0 %v4626_v7  ;;  %v1260_v6 = vld [vmem:[%s6817_s6 + $0x1ed0] sm:$0xff]  ;;  %v1267_v7 = vld [vmem:[%s6817_s6 + $0x1f08] sm:$0xff] }
 0x175   : > { %5075 = vmatprep.subr.bf16.mxu1 %v5074_v11  ;;  %v4644_v11 = vpack.c.bf16 %v1258_v3, %v1250_v2  ;;  %v5092_v50 = vpack.c.bf16 %v1260_v6, %v1252_v4  ;;  %v4646_v13 = vpack.c.bf16 %v1275_v8, %v1267_v7  ;;  %v1324_v2 = vld [vmem:[%s6817_s6 + $0x20d0] sm:$0xff]  ;;  %v1331_v3 = vld [vmem:[%s6817_s6 + $0x2108] sm:$0xff]  ;;  %v1333_v6 = vld [vmem:[%s6817_s6 + $0x2118] sm:$0xff] }
 0x176   : > { %v1339_v4 = vld [vmem:[%s6817_s6 + $0x2148] sm:$0xff]  ;;  %v1341_v7 = vld [vmem:[%s6817_s6 + $0x2158] sm:$0xff] }
 0x177   : > { %4629 = vmatpush1.bf16.msra.mxu0 %v4628_v18  ;;  %v5094_v18 = vpack.c.bf16 %v1277_v10, %v1269_v9  ;;  %v4662_v10 = vpack.c.bf16 %v1339_v4, %v1331_v3  ;;  %v1405_v3 = vld [vmem:[%s6817_s6 + $0x2358] sm:$0xff] }
 0x178   : > { %5077 = vmatpush1.bf16.msra.mxu1 %v5076_v19  ;;  %4631 = vmatprep.subr.bf16.mxu0 %v4630_v20  ;;  %v1276_v19 = vld [vmem:[%s6817_s6 + $0x1f50] sm:$0xff]  ;;  %v1283_v20 = vld [vmem:[%s6817_s6 + $0x1f88] sm:$0xff] }
 0x179   : > { %5079 = vmatprep.subr.bf16.mxu1 %v5078_v24  ;;  %v4648_v24 = vpack.c.bf16 %v1274_v16, %v1266_v14  ;;  %v5096_v27 = vpack.c.bf16 %v1276_v19, %v1268_v17  ;;  %v4650_v28 = vpack.c.bf16 %v1291_v21, %v1283_v20  ;;  %v5110_v14 = vpack.c.bf16 %v1341_v7, %v1333_v6  ;;  %v1340_v16 = vld [vmem:[%s6817_s6 + $0x2150] sm:$0xff]  ;;  %v1347_v17 = vld [vmem:[%s6817_s6 + $0x2188] sm:$0xff]  ;;  %v1349_v19 = vld [vmem:[%s6817_s6 + $0x2198] sm:$0xff] }
 0x17a   : > { %v1357_v20 = vld [vmem:[%s6817_s6 + $0x21d8] sm:$0xff] }
 0x17b   : > { %4633 = vmatpush1.bf16.msra.mxu0 %v4632_v34  ;;  %v5098_v34 = vpack.c.bf16 %v1293_v23, %v1285_v22  ;;  %v5114_v29 = vpack.c.bf16 %v1357_v20, %v1349_v19 }
 0x17c   : > { %5081 = vmatpush1.bf16.msra.mxu1 %v5080_v35  ;;  %4635 = vmatprep.subr.bf16.mxu0 %v4634_v36  ;;  %v1292_v35 = vld [vmem:[%s6817_s6 + $0x1fd0] sm:$0xff]  ;;  %v1299_v36 = vld [vmem:[%s6817_s6 + $0x2008] sm:$0xff] }
 0x17d   : > { %5083 = vmatprep.subr.bf16.mxu1 %v5082_v41  ;;  %v7424_v41 = vld [vmem:[%s6949_s12 + $0x10] sm:$0xff]  ;;  %v5100_v43 = vpack.c.bf16 %v1292_v35, %v1284_v32  ;;  %v4654_v44 = vpack.c.bf16 %v1307_v37, %v1299_v36  ;;  %v1365_v35 = vld [vmem:[%s6817_s6 + $0x2218] sm:$0xff] }
 0x17e   : > { %v7434_v53 = vrot.slane %v7424_v41, %v6939_v12  ;;  %v1363_v32 = vld [vmem:[%s6817_s6 + $0x2208] sm:$0xff]  ;;  %v1373_v36 = vld [vmem:[%s6817_s6 + $0x2258] sm:$0xff] }
 0x17f   : > { %4637 = vmatpush1.bf16.msra.mxu0 %v4636_v47  ;;  %v1300_v47 = vld [vmem:[%s6817_s6 + $0x2010] sm:$0xff]  ;;  %v5118_v45 = vpack.c.bf16 %v1373_v36, %v1365_v35 }
 0x180   : > { %5085 = vmatpush1.bf16.msra.mxu1 %v5084_v48  ;;  %4639 = vmatprep.subr.bf16.mxu0 %v4638_v49  ;;  %v5102_v48 = vpack.c.bf16 %v1309_v39, %v1301_v38  ;;  %v1308_v49 = vld [vmem:[%s6817_s6 + $0x2050] sm:$0xff] }
 0x181   : > { %5087 = vmatprep.subr.bf16.mxu1 %v5086_v54  ;;  %v1317_v54 = vld [vmem:[%s6817_s6 + $0x2098] sm:$0xff]  ;;  %v5104_v58 = vpack.c.bf16 %v1308_v49, %v1300_v47  ;;  %v1379_v47 = vld [vmem:[%s6817_s6 + $0x2288] sm:$0xff] }
 0x182   : > { %v1381_v49 = vld [vmem:[%s6817_s6 + $0x2298] sm:$0xff] }
 0x183   : > { %4641 = vmatpush1.bf16.msra.mxu0 %v4640_v61  ;;  %v1322_v61 = vld [vmem:[%s6817_s6 + $0x20c0] sm:$0xff] }
 0x184   : > { %5089 = vmatpush1.bf16.msra.mxu1 %v5088_v62  ;;  %4643 = vmatprep.subr.bf16.mxu0 %v4642_v1  ;;  %v1316_v62 = vld [vmem:[%s6817_s6 + $0x2090] sm:$0xff]  ;;  %v5106_v1 = vpack.c.bf16 %v1325_v55, %v1317_v54  ;;  %v4660_v8 = vpack.c.bf16 %v1322_v61, %v1314_v60  ;;  %v5122_v60 = vpack.c.bf16 %v1389_v51, %v1381_v49 }
 0x185   : > { %5091 = vmatprep.subr.bf16.mxu1 %v5090_v5  ;;  %v7446_v5 = vcombine.high %v7434_v53, %v7434_v53  ;;  %v5108_v9 = vpack.c.bf16 %v1324_v2, %v1316_v62  ;;  %v1388_v61 = vld [vmem:[%s6817_s6 + $0x22d0] sm:$0xff]  ;;  %v1395_v62 = vld [vmem:[%s6817_s6 + $0x2308] sm:$0xff]  ;;  %v1397_v2 = vld [vmem:[%s6817_s6 + $0x2318] sm:$0xff] }
 0x187   : > { %4645 = vmatpush1.bf16.msra.mxu0 %v4644_v11  ;;  %v1330_v11 = vld [vmem:[%s6817_s6 + $0x2100] sm:$0xff] }
 0x188   : > { %5093 = vmatpush1.bf16.msra.mxu1 %v5092_v50  ;;  %4647 = vmatprep.subr.bf16.mxu0 %v4646_v13  ;;  %v1338_v50 = vld [vmem:[%s6817_s6 + $0x2140] sm:$0xff]  ;;  %v1332_v13 = vld [vmem:[%s6817_s6 + $0x2110] sm:$0xff] }
 0x189   : > { %5095 = vmatprep.subr.bf16.mxu1 %v5094_v18  ;;  %v1355_v18 = vld [vmem:[%s6817_s6 + $0x21c8] sm:$0xff]  ;;  %v4664_v21 = vpack.c.bf16 %v1338_v50, %v1330_v11  ;;  %v5112_v22 = vpack.c.bf16 %v1340_v16, %v1332_v13  ;;  %v5126_v11 = vpack.c.bf16 %v1405_v3, %v1397_v2  ;;  %v1404_v50 = vld [vmem:[%s6817_s6 + $0x2350] sm:$0xff]  ;;  %v1413_v16 = vld [vmem:[%s6817_s6 + $0x2398] sm:$0xff] }
 0x18a   : > { %v4666_v23 = vpack.c.bf16 %v1355_v18, %v1347_v17  ;;  %v1411_v13 = vld [vmem:[%s6817_s6 + $0x2388] sm:$0xff]  ;;  %v1421_v17 = vld [vmem:[%s6817_s6 + $0x23d8] sm:$0xff] }
 0x18b   : > { %4649 = vmatpush1.bf16.msra.mxu0 %v4648_v24  ;;  %v1346_v24 = vld [vmem:[%s6817_s6 + $0x2180] sm:$0xff] }
 0x18c   : > { %5097 = vmatpush1.bf16.msra.mxu1 %v5096_v27  ;;  %4651 = vmatprep.subr.bf16.mxu0 %v4650_v28  ;;  %v1354_v27 = vld [vmem:[%s6817_s6 + $0x21c0] sm:$0xff]  ;;  %v1348_v28 = vld [vmem:[%s6817_s6 + $0x2190] sm:$0xff] }
 0x18d   : > { %5099 = vmatprep.subr.bf16.mxu1 %v5098_v34  ;;  %v1371_v34 = vld [vmem:[%s6817_s6 + $0x2248] sm:$0xff]  ;;  %v4668_v37 = vpack.c.bf16 %v1354_v27, %v1346_v24  ;;  %v5116_v38 = vpack.c.bf16 %v1356_v31, %v1348_v28  ;;  %v5130_v24 = vpack.c.bf16 %v1421_v17, %v1413_v16  ;;  %v1420_v27 = vld [vmem:[%s6817_s6 + $0x23d0] sm:$0xff]  ;;  %v1429_v31 = vld [vmem:[%s6817_s6 + $0x2418] sm:$0xff] }
 0x18e   : > { %v4670_v39 = vpack.c.bf16 %v1371_v34, %v1363_v32  ;;  %v1427_v28 = vld [vmem:[%s6817_s6 + $0x2408] sm:$0xff]  ;;  %v1437_v32 = vld [vmem:[%s6817_s6 + $0x2458] sm:$0xff] }
 0x18f   : > { %4653 = vmatpush1.bf16.msra.mxu0 %v4652_v42  ;;  %v1362_v42 = vld [vmem:[%s6817_s6 + $0x2200] sm:$0xff] }
 0x190   : > { %5101 = vmatpush1.bf16.msra.mxu1 %v5100_v43  ;;  %4655 = vmatprep.subr.bf16.mxu0 %v4654_v44  ;;  %v1370_v43 = vld [vmem:[%s6817_s6 + $0x2240] sm:$0xff]  ;;  %v1364_v44 = vld [vmem:[%s6817_s6 + $0x2210] sm:$0xff] }
 0x191   : > { %5103 = vmatprep.subr.bf16.mxu1 %v5102_v48  ;;  %v1387_v48 = vld [vmem:[%s6817_s6 + $0x22c8] sm:$0xff]  ;;  %v4672_v52 = vpack.c.bf16 %v1370_v43, %v1362_v42  ;;  %v5120_v54 = vpack.c.bf16 %v1372_v46, %v1364_v44  ;;  %v5134_v42 = vpack.c.bf16 %v1437_v32, %v1429_v31  ;;  %v1436_v43 = vld [vmem:[%s6817_s6 + $0x2450] sm:$0xff]  ;;  %v1445_v46 = vld [vmem:[%s6817_s6 + $0x2498] sm:$0xff] }
 0x192   : > { %2421 = vmatmul.mubr.f32.vlgmr.msra.gmra.mrb[0].mxu0 %v7291_v15  ;;  %v4674_v55 = vpack.c.bf16 %v1387_v48, %v1379_v47  ;;  %v1443_v44 = vld [vmem:[%s6817_s6 + $0x2488] sm:$0xff]  ;;  %v1453_v47 = vld [vmem:[%s6817_s6 + $0x24d8] sm:$0xff] }
 0x193   : > { %4657 = vmatpush1.bf16.msra.mxu0 %v4656_v57  ;;  %2918 = vmatmul.mubr.f32.vlgmr.msra.gmra.mrb[0].mxu1 %v7291_v15  ;;  %v1378_v57 = vld [vmem:[%s6817_s6 + $0x2280] sm:$0xff] }
 0x194   : > { %5105 = vmatpush1.bf16.msra.mxu1 %v5104_v58  ;;  %4659 = vmatprep.subr.bf16.mxu0 %v4658_v59  ;;  %v1386_v58 = vld [vmem:[%s6817_s6 + $0x22c0] sm:$0xff]  ;;  %v1380_v59 = vld [vmem:[%s6817_s6 + $0x2290] sm:$0xff] }
 0x195   : > { %5107 = vmatprep.subr.bf16.mxu1 %v5106_v1  ;;  %2491 = vmatprep.mubr.f32.mxu0 %v7446_v5  ;;  %v1403_v1 = vld [vmem:[%s6817_s6 + $0x2348] sm:$0xff]  ;;  %v4676_v4 = vpack.c.bf16 %v1386_v58, %v1378_v57  ;;  %v5124_v6 = vpack.c.bf16 %v1388_v61, %v1380_v59  ;;  %v5138_v57 = vpack.c.bf16 %v1453_v47, %v1445_v46  ;;  %v1452_v58 = vld [vmem:[%s6817_s6 + $0x24d0] sm:$0xff]  ;;  %v1461_v61 = vld [vmem:[%s6817_s6 + $0x2518] sm:$0xff] }
 0x196   : > { %2988 = vmatprep.mubr.f32.mxu1 %v7446_v5  ;;  %v4678_v7 = vpack.c.bf16 %v1403_v1, %v1395_v62  ;;  %v1459_v59 = vld [vmem:[%s6817_s6 + $0x2508] sm:$0xff]  ;;  %v1469_v62 = vld [vmem:[%s6817_s6 + $0x2558] sm:$0xff] }
 0x197   : > { %4661 = vmatpush1.bf16.msra.mxu0 %v4660_v8  ;;  %v1394_v8 = vld [vmem:[%s6817_s6 + $0x2300] sm:$0xff] }
 0x198   : > { %5109 = vmatpush1.bf16.msra.mxu1 %v5108_v9  ;;  %4663 = vmatprep.subr.bf16.mxu0 %v4662_v10  ;;  %v1402_v9 = vld [vmem:[%s6817_s6 + $0x2340] sm:$0xff]  ;;  %v1396_v10 = vld [vmem:[%s6817_s6 + $0x2310] sm:$0xff] }
 0x199   : > { %5111 = vmatprep.subr.bf16.mxu1 %v5110_v14  ;;  %v1419_v14 = vld [vmem:[%s6817_s6 + $0x23c8] sm:$0xff]  ;;  %v4680_v18 = vpack.c.bf16 %v1402_v9, %v1394_v8  ;;  %v5128_v19 = vpack.c.bf16 %v1404_v50, %v1396_v10  ;;  %v5142_v8 = vpack.c.bf16 %v1469_v62, %v1461_v61  ;;  %v1468_v9 = vld [vmem:[%s6817_s6 + $0x2550] sm:$0xff]  ;;  %v1477_v50 = vld [vmem:[%s6817_s6 + $0x2598] sm:$0xff] }
 0x19a   : > { %v4682_v20 = vpack.c.bf16 %v1419_v14, %v1411_v13  ;;  %v1475_v10 = vld [vmem:[%s6817_s6 + $0x2588] sm:$0xff]  ;;  %v1485_v13 = vld [vmem:[%s6817_s6 + $0x25d8] sm:$0xff] }
 0x19b   : > { %4665 = vmatpush1.bf16.msra.mxu0 %v4664_v21  ;;  %v1410_v21 = vld [vmem:[%s6817_s6 + $0x2380] sm:$0xff] }
 0x19c   : > { %5113 = vmatpush1.bf16.msra.mxu1 %v5112_v22  ;;  %4667 = vmatprep.subr.bf16.mxu0 %v4666_v23  ;;  %v1418_v22 = vld [vmem:[%s6817_s6 + $0x23c0] sm:$0xff]  ;;  %v1412_v23 = vld [vmem:[%s6817_s6 + $0x2390] sm:$0xff] }
 0x19d   : > { %5115 = vmatprep.subr.bf16.mxu1 %v5114_v29  ;;  %v1435_v29 = vld [vmem:[%s6817_s6 + $0x2448] sm:$0xff]  ;;  %v4684_v34 = vpack.c.bf16 %v1418_v22, %v1410_v21  ;;  %v5132_v35 = vpack.c.bf16 %v1420_v27, %v1412_v23  ;;  %v5146_v21 = vpack.c.bf16 %v1485_v13, %v1477_v50  ;;  %v1484_v22 = vld [vmem:[%s6817_s6 + $0x25d0] sm:$0xff]  ;;  %v1493_v27 = vld [vmem:[%s6817_s6 + $0x2618] sm:$0xff] }
 0x19e   : > { %v4686_v36 = vpack.c.bf16 %v1435_v29, %v1427_v28  ;;  %v1491_v23 = vld [vmem:[%s6817_s6 + $0x2608] sm:$0xff]  ;;  %v1501_v28 = vld [vmem:[%s6817_s6 + $0x2658] sm:$0xff] }
 0x19f   : > { %4669 = vmatpush1.bf16.msra.mxu0 %v4668_v37  ;;  %v1426_v37 = vld [vmem:[%s6817_s6 + $0x2400] sm:$0xff] }
 0x1a0   : > { %5117 = vmatpush1.bf16.msra.mxu1 %v5116_v38  ;;  %4671 = vmatprep.subr.bf16.mxu0 %v4670_v39  ;;  %v1434_v38 = vld [vmem:[%s6817_s6 + $0x2440] sm:$0xff]  ;;  %v1428_v39 = vld [vmem:[%s6817_s6 + $0x2410] sm:$0xff] }
 0x1a1   : > { %5119 = vmatprep.subr.bf16.mxu1 %v5118_v45  ;;  %v1451_v45 = vld [vmem:[%s6817_s6 + $0x24c8] sm:$0xff]  ;;  %v4688_v48 = vpack.c.bf16 %v1434_v38, %v1426_v37  ;;  %v5136_v49 = vpack.c.bf16 %v1436_v43, %v1428_v39  ;;  %v5150_v37 = vpack.c.bf16 %v1501_v28, %v1493_v27  ;;  %v1500_v38 = vld [vmem:[%s6817_s6 + $0x2650] sm:$0xff]  ;;  %v1509_v43 = vld [vmem:[%s6817_s6 + $0x2698] sm:$0xff] }
 0x1a2   : > { %v4690_v51 = vpack.c.bf16 %v1451_v45, %v1443_v44  ;;  %v1507_v39 = vld [vmem:[%s6817_s6 + $0x2688] sm:$0xff]  ;;  %v1517_v44 = vld [vmem:[%s6817_s6 + $0x26d8] sm:$0xff] }
 0x1a3   : > { %4673 = vmatpush1.bf16.msra.mxu0 %v4672_v52  ;;  %v1442_v52 = vld [vmem:[%s6817_s6 + $0x2480] sm:$0xff] }
 0x1a4   : > { %5121 = vmatpush1.bf16.msra.mxu1 %v5120_v54  ;;  %4675 = vmatprep.subr.bf16.mxu0 %v4674_v55  ;;  %v1450_v54 = vld [vmem:[%s6817_s6 + $0x24c0] sm:$0xff]  ;;  %v1444_v55 = vld [vmem:[%s6817_s6 + $0x2490] sm:$0xff] }
 0x1a5   : > { %5123 = vmatprep.subr.bf16.mxu1 %v5122_v60  ;;  %v1467_v60 = vld [vmem:[%s6817_s6 + $0x2548] sm:$0xff]  ;;  %v4692_v1 = vpack.c.bf16 %v1450_v54, %v1442_v52  ;;  %v5140_v2 = vpack.c.bf16 %v1452_v58, %v1444_v55  ;;  %v5154_v52 = vpack.c.bf16 %v1517_v44, %v1509_v43  ;;  %v1516_v54 = vld [vmem:[%s6817_s6 + $0x26d0] sm:$0xff]  ;;  %v1525_v58 = vld [vmem:[%s6817_s6 + $0x2718] sm:$0xff] }
 0x1a6   : > { %v4694_v3 = vpack.c.bf16 %v1467_v60, %v1459_v59  ;;  %v1523_v55 = vld [vmem:[%s6817_s6 + $0x2708] sm:$0xff]  ;;  %v1533_v59 = vld [vmem:[%s6817_s6 + $0x2758] sm:$0xff] }
 0x1a7   : > { %4677 = vmatpush1.bf16.msra.mxu0 %v4676_v4  ;;  %v1458_v4 = vld [vmem:[%s6817_s6 + $0x2500] sm:$0xff] }
 0x1a8   : > { %5125 = vmatpush1.bf16.msra.mxu1 %v5124_v6  ;;  %4679 = vmatprep.subr.bf16.mxu0 %v4678_v7  ;;  %v1466_v6 = vld [vmem:[%s6817_s6 + $0x2540] sm:$0xff]  ;;  %v1460_v7 = vld [vmem:[%s6817_s6 + $0x2510] sm:$0xff] }
 0x1a9   : > { %5127 = vmatprep.subr.bf16.mxu1 %v5126_v11  ;;  %v1483_v11 = vld [vmem:[%s6817_s6 + $0x25c8] sm:$0xff]  ;;  %v4696_v14 = vpack.c.bf16 %v1466_v6, %v1458_v4  ;;  %v5144_v16 = vpack.c.bf16 %v1468_v9, %v1460_v7  ;;  %v5158_v4 = vpack.c.bf16 %v1533_v59, %v1525_v58  ;;  %v1532_v6 = vld [vmem:[%s6817_s6 + $0x2750] sm:$0xff]  ;;  %v1541_v9 = vld [vmem:[%s6817_s6 + $0x2798] sm:$0xff] }
 0x1aa   : > { %v4698_v17 = vpack.c.bf16 %v1483_v11, %v1475_v10  ;;  %v1539_v7 = vld [vmem:[%s6817_s6 + $0x2788] sm:$0xff]  ;;  %v1549_v10 = vld [vmem:[%s6817_s6 + $0x27d8] sm:$0xff] }
 0x1ab   : > { %4681 = vmatpush1.bf16.msra.mxu0 %v4680_v18  ;;  %v1474_v18 = vld [vmem:[%s6817_s6 + $0x2580] sm:$0xff]  ;;  %v1597_v58 = vld [vmem:[%s6817_s6 + $0x2958] sm:$0xff] }
 0x1ac   : > { %5129 = vmatpush1.bf16.msra.mxu1 %v5128_v19  ;;  %4683 = vmatprep.subr.bf16.mxu0 %v4682_v20  ;;  %v1482_v19 = vld [vmem:[%s6817_s6 + $0x25c0] sm:$0xff]  ;;  %v1476_v20 = vld [vmem:[%s6817_s6 + $0x2590] sm:$0xff] }
 0x1ad   : > { %5131 = vmatprep.subr.bf16.mxu1 %v5130_v24  ;;  %v1499_v24 = vld [vmem:[%s6817_s6 + $0x2648] sm:$0xff]  ;;  %v4700_v29 = vpack.c.bf16 %v1482_v19, %v1474_v18  ;;  %v5148_v31 = vpack.c.bf16 %v1484_v22, %v1476_v20  ;;  %v5162_v18 = vpack.c.bf16 %v1549_v10, %v1541_v9  ;;  %v1548_v19 = vld [vmem:[%s6817_s6 + $0x27d0] sm:$0xff]  ;;  %v2104_v22 = vcombine.high %v7424_v41, %v7424_v41  ;;  %v1613_v9 = vld [vmem:[%s6817_s6 + $0x29d8] sm:$0xff] }
 0x1ae   : > { %v4702_v32 = vpack.c.bf16 %v1499_v24, %v1491_v23  ;;  %v1555_v20 = vld [vmem:[%s6817_s6 + $0x2808] sm:$0xff]  ;;  %v1557_v23 = vld [vmem:[%s6817_s6 + $0x2818] sm:$0xff]  ;;  %v1564_v41 = vld [vmem:[%s6817_s6 + $0x2850] sm:$0xff] }
 0x1af   : > { %4685 = vmatpush1.bf16.msra.mxu0 %v4684_v34  ;;  %v1490_v34 = vld [vmem:[%s6817_s6 + $0x2600] sm:$0xff]  ;;  %v1565_v24 = vld [vmem:[%s6817_s6 + $0x2858] sm:$0xff] }
 0x1b0   : > { %5133 = vmatpush1.bf16.msra.mxu1 %v5132_v35  ;;  %4687 = vmatprep.subr.bf16.mxu0 %v4686_v36  ;;  %v1498_v35 = vld [vmem:[%s6817_s6 + $0x2640] sm:$0xff]  ;;  %v1492_v36 = vld [vmem:[%s6817_s6 + $0x2610] sm:$0xff] }
 0x1b1   : > { %5135 = vmatprep.subr.bf16.mxu1 %v5134_v42  ;;  %v1515_v42 = vld [vmem:[%s6817_s6 + $0x26c8] sm:$0xff]  ;;  %v4704_v45 = vpack.c.bf16 %v1498_v35, %v1490_v34  ;;  %v5152_v46 = vpack.c.bf16 %v1500_v38, %v1492_v36  ;;  %v1556_v34 = vld [vmem:[%s6817_s6 + $0x2810] sm:$0xff]  ;;  %v5166_v35 = vpack.c.bf16 %v1565_v24, %v1557_v23  ;;  %v7575_v38 = vrot.slane %v2104_v22, %v6939_v12  ;;  %v1629_v22 = vld [vmem:[%s6817_s6 + $0x2a58] sm:$0xff] }
 0x1b2   : > { %v4706_v47 = vpack.c.bf16 %v1515_v42, %v1507_v39  ;;  %v1571_v36 = vld [vmem:[%s6817_s6 + $0x2888] sm:$0xff]  ;;  %v1573_v39 = vld [vmem:[%s6817_s6 + $0x2898] sm:$0xff]  ;;  %v5168_v44 = vpack.c.bf16 %v1564_v41, %v1556_v34  ;;  %v1628_v34 = vld [vmem:[%s6817_s6 + $0x2a50] sm:$0xff] }
 0x1b3   : > { %4689 = vmatpush1.bf16.msra.mxu0 %v4688_v48  ;;  %v1506_v48 = vld [vmem:[%s6817_s6 + $0x2680] sm:$0xff]  ;;  %v1581_v42 = vld [vmem:[%s6817_s6 + $0x28d8] sm:$0xff]  ;;  %v1643_v41 = vld [vmem:[%s6817_s6 + $0x2ac8] sm:$0xff] }
 0x1b4   : > { %5137 = vmatpush1.bf16.msra.mxu1 %v5136_v49  ;;  %4691 = vmatprep.subr.bf16.mxu0 %v4690_v51  ;;  %v1514_v49 = vld [vmem:[%s6817_s6 + $0x26c0] sm:$0xff]  ;;  %v1508_v51 = vld [vmem:[%s6817_s6 + $0x2690] sm:$0xff] }
 0x1b5   : > { %5139 = vmatprep.subr.bf16.mxu1 %v5138_v57  ;;  %v1531_v57 = vld [vmem:[%s6817_s6 + $0x2748] sm:$0xff]  ;;  %v4708_v60 = vpack.c.bf16 %v1514_v49, %v1506_v48  ;;  %v5156_v61 = vpack.c.bf16 %v1516_v54, %v1508_v51  ;;  %v1572_v48 = vld [vmem:[%s6817_s6 + $0x2890] sm:$0xff]  ;;  %v5170_v49 = vpack.c.bf16 %v1581_v42, %v1573_v39 }
 0x1b6   : > { %v4710_v62 = vpack.c.bf16 %v1531_v57, %v1523_v55  ;;  %v1580_v51 = vld [vmem:[%s6817_s6 + $0x28d0] sm:$0xff]  ;;  %v1595_v54 = vld [vmem:[%s6817_s6 + $0x2948] sm:$0xff]  ;;  %v7587_v55 = vcombine.high %v7575_v38, %v7575_v38  ;;  %v1589_v57 = vld [vmem:[%s6817_s6 + $0x2918] sm:$0xff] }
 0x1b7   : > { %4693 = vmatpush1.bf16.msra.mxu0 %v4692_v1  ;;  %v1522_v1 = vld [vmem:[%s6817_s6 + $0x2700] sm:$0xff] }
 0x1b8   : > { %5141 = vmatpush1.bf16.msra.mxu1 %v5140_v2  ;;  %4695 = vmatprep.subr.bf16.mxu0 %v4694_v3  ;;  %v1530_v2 = vld [vmem:[%s6817_s6 + $0x2740] sm:$0xff]  ;;  %v1524_v3 = vld [vmem:[%s6817_s6 + $0x2710] sm:$0xff] }
 0x1b9   : > { %5143 = vmatprep.subr.bf16.mxu1 %v5142_v8  ;;  %v1547_v8 = vld [vmem:[%s6817_s6 + $0x27c8] sm:$0xff]  ;;  %v4712_v11 = vpack.c.bf16 %v1530_v2, %v1522_v1  ;;  %v5160_v50 = vpack.c.bf16 %v1532_v6, %v1524_v3  ;;  %v1594_v1 = vld [vmem:[%s6817_s6 + $0x2940] sm:$0xff]  ;;  %v1588_v2 = vld [vmem:[%s6817_s6 + $0x2910] sm:$0xff]  ;;  %v5174_v3 = vpack.c.bf16 %v1597_v58, %v1589_v57 }
 0x1ba   : > { %v4714_v13 = vpack.c.bf16 %v1547_v8, %v1539_v7  ;;  %v1603_v6 = vld [vmem:[%s6817_s6 + $0x2988] sm:$0xff]  ;;  %v1605_v8 = vld [vmem:[%s6817_s6 + $0x2998] sm:$0xff] }
 0x1bb   : > { %4697 = vmatpush1.bf16.msra.mxu0 %v4696_v14  ;;  %v1538_v14 = vld [vmem:[%s6817_s6 + $0x2780] sm:$0xff]  ;;  %v1611_v7 = vld [vmem:[%s6817_s6 + $0x29c8] sm:$0xff] }
 0x1bc   : > { %5145 = vmatpush1.bf16.msra.mxu1 %v5144_v16  ;;  %4699 = vmatprep.subr.bf16.mxu0 %v4698_v17  ;;  %v1546_v16 = vld [vmem:[%s6817_s6 + $0x27c0] sm:$0xff]  ;;  %v1540_v17 = vld [vmem:[%s6817_s6 + $0x2790] sm:$0xff] }
 0x1bd   : > { %5147 = vmatprep.subr.bf16.mxu1 %v5146_v21  ;;  %v1563_v21 = vld [vmem:[%s6817_s6 + $0x2848] sm:$0xff]  ;;  %v4716_v27 = vpack.c.bf16 %v1546_v16, %v1538_v14  ;;  %v5164_v28 = vpack.c.bf16 %v1548_v19, %v1540_v17  ;;  %v1610_v14 = vld [vmem:[%s6817_s6 + $0x29c0] sm:$0xff]  ;;  %v1604_v16 = vld [vmem:[%s6817_s6 + $0x2990] sm:$0xff]  ;;  %v5178_v17 = vpack.c.bf16 %v1613_v9, %v1605_v8 }
 0x1be   : > { %v1619_v19 = vld [vmem:[%s6817_s6 + $0x2a08] sm:$0xff] }
 0x1bf   : > { %4701 = vmatpush1.bf16.msra.mxu0 %v4700_v29  ;;  %v4718_v29 = vpack.c.bf16 %v1563_v21, %v1555_v20  ;;  %v1627_v20 = vld [vmem:[%s6817_s6 + $0x2a48] sm:$0xff]  ;;  %v1621_v21 = vld [vmem:[%s6817_s6 + $0x2a18] sm:$0xff] }
 0x1c0   : > { %5149 = vmatpush1.bf16.msra.mxu1 %v5148_v31  ;;  %4703 = vmatprep.subr.bf16.mxu0 %v4702_v32  ;;  %v1554_v31 = vld [vmem:[%s6817_s6 + $0x2800] sm:$0xff] }
 0x1c1   : > { %5151 = vmatprep.subr.bf16.mxu1 %v5150_v37  ;;  %v1562_v32 = vld [vmem:[%s6817_s6 + $0x2840] sm:$0xff]  ;;  %v1579_v37 = vld [vmem:[%s6817_s6 + $0x28c8] sm:$0xff] }
 0x1c2   : > { %v4720_v43 = vpack.c.bf16 %v1562_v32, %v1554_v31  ;;  %v1620_v31 = vld [vmem:[%s6817_s6 + $0x2a10] sm:$0xff]  ;;  %v5182_v32 = vpack.c.bf16 %v1629_v22, %v1621_v21 }
 0x1c3   : > { %4705 = vmatpush1.bf16.msra.mxu0 %v4704_v45  ;;  %v4722_v45 = vpack.c.bf16 %v1579_v37, %v1571_v36  ;;  %v1637_v36 = vld [vmem:[%s6817_s6 + $0x2a98] sm:$0xff]  ;;  %v5184_v42 = vpack.c.bf16 %v1628_v34, %v1620_v31  ;;  %v1692_v31 = vld [vmem:[%s6817_s6 + $0x2c50] sm:$0xff]  ;;  %v1707_v34 = vld [vmem:[%s6817_s6 + $0x2cc8] sm:$0xff] }
 0x1c4   : > { %5153 = vmatpush1.bf16.msra.mxu1 %v5152_v46  ;;  %4707 = vmatprep.subr.bf16.mxu0 %v4706_v47  ;;  %v1570_v46 = vld [vmem:[%s6817_s6 + $0x2880] sm:$0xff]  ;;  %v1645_v37 = vld [vmem:[%s6817_s6 + $0x2ad8] sm:$0xff] }
 0x1c5   : > { %5155 = vmatprep.subr.bf16.mxu1 %v5154_v52  ;;  %v1578_v47 = vld [vmem:[%s6817_s6 + $0x28c0] sm:$0xff]  ;;  %v1587_v52 = vld [vmem:[%s6817_s6 + $0x2908] sm:$0xff] }
 0x1c6   : > { %v4724_v59 = vpack.c.bf16 %v1578_v47, %v1570_v46  ;;  %v1636_v46 = vld [vmem:[%s6817_s6 + $0x2a90] sm:$0xff]  ;;  %v5186_v47 = vpack.c.bf16 %v1645_v37, %v1637_v36 }
 0x1c7   : > { %4709 = vmatpush1.bf16.msra.mxu0 %v4708_v60  ;;  %v5172_v60 = vpack.c.bf16 %v1580_v51, %v1572_v48  ;;  %v1644_v48 = vld [vmem:[%s6817_s6 + $0x2ad0] sm:$0xff]  ;;  %v1659_v51 = vld [vmem:[%s6817_s6 + $0x2b48] sm:$0xff] }
 0x1c8   : > { %5157 = vmatpush1.bf16.msra.mxu1 %v5156_v61  ;;  %4711 = vmatprep.subr.bf16.mxu0 %v4710_v62  ;;  %v4726_v61 = vpack.c.bf16 %v1595_v54, %v1587_v52  ;;  %v1586_v62 = vld [vmem:[%s6817_s6 + $0x2900] sm:$0xff]  ;;  %v1653_v52 = vld [vmem:[%s6817_s6 + $0x2b18] sm:$0xff]  ;;  %v5188_v58 = vpack.c.bf16 %v1644_v48, %v1636_v46  ;;  %v1708_v46 = vld [vmem:[%s6817_s6 + $0x2cd0] sm:$0xff] }
 0x1c9   : > { %5159 = vmatprep.subr.bf16.mxu1 %v5158_v4  ;;  %v1596_v4 = vld [vmem:[%s6817_s6 + $0x2950] sm:$0xff]  ;;  %v4728_v10 = vpack.c.bf16 %v1594_v1, %v1586_v62  ;;  %v1661_v54 = vld [vmem:[%s6817_s6 + $0x2b58] sm:$0xff]  ;;  %v1723_v48 = vld [vmem:[%s6817_s6 + $0x2d48] sm:$0xff] }
 0x1ca   : > { %v1652_v62 = vld [vmem:[%s6817_s6 + $0x2b10] sm:$0xff]  ;;  %v5190_v1 = vpack.c.bf16 %v1661_v54, %v1653_v52 }
 0x1cb   : > { %4713 = vmatpush1.bf16.msra.mxu0 %v4712_v11  ;;  %v5176_v11 = vpack.c.bf16 %v1596_v4, %v1588_v2  ;;  %v1660_v2 = vld [vmem:[%s6817_s6 + $0x2b50] sm:$0xff]  ;;  %v1675_v4 = vld [vmem:[%s6817_s6 + $0x2bc8] sm:$0xff] }
 0x1cc   : > { %5161 = vmatpush1.bf16.msra.mxu1 %v5160_v50  ;;  %4715 = vmatprep.subr.bf16.mxu0 %v4714_v13  ;;  %v4730_v50 = vpack.c.bf16 %v1611_v7, %v1603_v6  ;;  %v1602_v13 = vld [vmem:[%s6817_s6 + $0x2980] sm:$0xff]  ;;  %v1669_v6 = vld [vmem:[%s6817_s6 + $0x2b98] sm:$0xff]  ;;  %v5192_v9 = vpack.c.bf16 %v1660_v2, %v1652_v62  ;;  %v1724_v62 = vld [vmem:[%s6817_s6 + $0x2d50] sm:$0xff] }
 0x1cd   : > { %5163 = vmatprep.subr.bf16.mxu1 %v5162_v18  ;;  %v1612_v18 = vld [vmem:[%s6817_s6 + $0x29d0] sm:$0xff]  ;;  %v4732_v23 = vpack.c.bf16 %v1610_v14, %v1602_v13  ;;  %v1677_v7 = vld [vmem:[%s6817_s6 + $0x2bd8] sm:$0xff]  ;;  %v1739_v2 = vld [vmem:[%s6817_s6 + $0x2dc8] sm:$0xff] }
 0x1ce   : > { %v5180_v24 = vpack.c.bf16 %v1612_v18, %v1604_v16  ;;  %v1668_v13 = vld [vmem:[%s6817_s6 + $0x2b90] sm:$0xff]  ;;  %v5194_v14 = vpack.c.bf16 %v1677_v7, %v1669_v6  ;;  %v1691_v18 = vld [vmem:[%s6817_s6 + $0x2c48] sm:$0xff] }
 0x1cf   : > { %4717 = vmatpush1.bf16.msra.mxu0 %v4716_v27  ;;  %v4734_v27 = vpack.c.bf16 %v1627_v20, %v1619_v19  ;;  %v1676_v16 = vld [vmem:[%s6817_s6 + $0x2bd0] sm:$0xff]  ;;  %v1685_v19 = vld [vmem:[%s6817_s6 + $0x2c18] sm:$0xff] }
 0x1d0   : > { %5165 = vmatpush1.bf16.msra.mxu1 %v5164_v28  ;;  %4719 = vmatprep.subr.bf16.mxu0 %v4718_v29  ;;  %v1618_v28 = vld [vmem:[%s6817_s6 + $0x2a00] sm:$0xff]  ;;  %v1693_v20 = vld [vmem:[%s6817_s6 + $0x2c58] sm:$0xff]  ;;  %v5196_v22 = vpack.c.bf16 %v1676_v16, %v1668_v13  ;;  %v1740_v13 = vld [vmem:[%s6817_s6 + $0x2dd0] sm:$0xff] }
 0x1d1   : > { %5167 = vmatprep.subr.bf16.mxu1 %v5166_v35  ;;  %v1626_v29 = vld [vmem:[%s6817_s6 + $0x2a40] sm:$0xff]  ;;  %v1635_v35 = vld [vmem:[%s6817_s6 + $0x2a88] sm:$0xff] }
 0x1d2   : > { %2492 = vmatmul.mubr.f32.vlgmr.msra.gmra.mrb[0].mxu0 %v7434_v53  ;;  %v4736_v39 = vpack.c.bf16 %v1626_v29, %v1618_v28  ;;  %v1684_v28 = vld [vmem:[%s6817_s6 + $0x2c10] sm:$0xff]  ;;  %v5198_v29 = vpack.c.bf16 %v1693_v20, %v1685_v19  ;;  %v1755_v16 = vld [vmem:[%s6817_s6 + $0x2e48] sm:$0xff] }
 0x1d3   : > { %4721 = vmatpush1.bf16.msra.mxu0 %v4720_v43  ;;  %2989 = vmatmul.mubr.f32.vlgmr.msra.gmra.mrb[0].mxu1 %v7434_v53  ;;  %v4738_v43 = vpack.c.bf16 %v1643_v41, %v1635_v35  ;;  %v1701_v35 = vld [vmem:[%s6817_s6 + $0x2c98] sm:$0xff]  ;;  %v5200_v37 = vpack.c.bf16 %v1692_v31, %v1684_v28  ;;  %v1756_v28 = vld [vmem:[%s6817_s6 + $0x2e50] sm:$0xff]  ;;  %v1771_v31 = vld [vmem:[%s6817_s6 + $0x2ec8] sm:$0xff] }
 0x1d4   : > { %5169 = vmatpush1.bf16.msra.mxu1 %v5168_v44  ;;  %4723 = vmatprep.subr.bf16.mxu0 %v4722_v45  ;;  %v1634_v44 = vld [vmem:[%s6817_s6 + $0x2a80] sm:$0xff]  ;;  %v1709_v41 = vld [vmem:[%s6817_s6 + $0x2cd8] sm:$0xff] }
 0x1d5   : > { %5171 = vmatprep.subr.bf16.mxu1 %v5170_v49  ;;  %2562 = vmatprep.mubr.f32.mxu0 %v7587_v55  ;;  %v1642_v45 = vld [vmem:[%s6817_s6 + $0x2ac0] sm:$0xff]  ;;  %v1651_v49 = vld [vmem:[%s6817_s6 + $0x2b08] sm:$0xff] }
 0x1d6   : > { %3059 = vmatprep.mubr.f32.mxu1 %v7587_v55  ;;  %v4740_v57 = vpack.c.bf16 %v1642_v45, %v1634_v44  ;;  %v1700_v44 = vld [vmem:[%s6817_s6 + $0x2c90] sm:$0xff]  ;;  %v5202_v45 = vpack.c.bf16 %v1709_v41, %v1701_v35 }
 0x1d7   : > { %4725 = vmatpush1.bf16.msra.mxu0 %v4724_v59  ;;  %v4742_v59 = vpack.c.bf16 %v1659_v51, %v1651_v49  ;;  %v1717_v49 = vld [vmem:[%s6817_s6 + $0x2d18] sm:$0xff]  ;;  %v5204_v54 = vpack.c.bf16 %v1708_v46, %v1700_v44  ;;  %v1772_v44 = vld [vmem:[%s6817_s6 + $0x2ed0] sm:$0xff]  ;;  %v1787_v46 = vld [vmem:[%s6817_s6 + $0x2f48] sm:$0xff] }
 0x1d8   : > { %5173 = vmatpush1.bf16.msra.mxu1 %v5172_v60  ;;  %4727 = vmatprep.subr.bf16.mxu0 %v4726_v61  ;;  %v1650_v60 = vld [vmem:[%s6817_s6 + $0x2b00] sm:$0xff]  ;;  %v1725_v51 = vld [vmem:[%s6817_s6 + $0x2d58] sm:$0xff] }
 0x1d9   : > { %5175 = vmatprep.subr.bf16.mxu1 %v5174_v3  ;;  %v1658_v61 = vld [vmem:[%s6817_s6 + $0x2b40] sm:$0xff]  ;;  %v1667_v3 = vld [vmem:[%s6817_s6 + $0x2b88] sm:$0xff] }
 0x1da   : > { %v4744_v8 = vpack.c.bf16 %v1658_v61, %v1650_v60  ;;  %v1716_v60 = vld [vmem:[%s6817_s6 + $0x2d10] sm:$0xff]  ;;  %v5206_v61 = vpack.c.bf16 %v1725_v51, %v1717_v49 }
 0x1db   : > { %4729 = vmatpush1.bf16.msra.mxu0 %v4728_v10  ;;  %v4746_v10 = vpack.c.bf16 %v1675_v4, %v1667_v3  ;;  %v1733_v3 = vld [vmem:[%s6817_s6 + $0x2d98] sm:$0xff]  ;;  %v5208_v7 = vpack.c.bf16 %v1724_v62, %v1716_v60  ;;  %v1788_v60 = vld [vmem:[%s6817_s6 + $0x2f50] sm:$0xff]  ;;  %v1803_v62 = vld [vmem:[%s6817_s6 + $0x2fc8] sm:$0xff] }
 0x1dc   : > { %5177 = vmatpush1.bf16.msra.mxu1 %v5176_v11  ;;  %4731 = vmatprep.subr.bf16.mxu0 %v4730_v50  ;;  %v1666_v11 = vld [vmem:[%s6817_s6 + $0x2b80] sm:$0xff]  ;;  %v1741_v4 = vld [vmem:[%s6817_s6 + $0x2dd8] sm:$0xff] }
 0x1dd   : > { %5179 = vmatprep.subr.bf16.mxu1 %v5178_v17  ;;  %v1674_v50 = vld [vmem:[%s6817_s6 + $0x2bc0] sm:$0xff]  ;;  %v1683_v17 = vld [vmem:[%s6817_s6 + $0x2c08] sm:$0xff] }
 0x1de   : > { %v4748_v21 = vpack.c.bf16 %v1674_v50, %v1666_v11  ;;  %v1732_v11 = vld [vmem:[%s6817_s6 + $0x2d90] sm:$0xff]  ;;  %v5210_v50 = vpack.c.bf16 %v1741_v4, %v1733_v3 }
 0x1df   : > { %4733 = vmatpush1.bf16.msra.mxu0 %v4732_v23  ;;  %v4750_v23 = vpack.c.bf16 %v1691_v18, %v1683_v17  ;;  %v1749_v17 = vld [vmem:[%s6817_s6 + $0x2e18] sm:$0xff]  ;;  %v5212_v20 = vpack.c.bf16 %v1740_v13, %v1732_v11  ;;  %v1804_v11 = vld [vmem:[%s6817_s6 + $0x2fd0] sm:$0xff]  ;;  %v1819_v13 = vld [vmem:[%s6817_s6 + $0x3048] sm:$0xff] }
 0x1e0   : > { %5181 = vmatpush1.bf16.msra.mxu1 %v5180_v24  ;;  %4735 = vmatprep.subr.bf16.mxu0 %v4734_v27  ;;  %v1682_v24 = vld [vmem:[%s6817_s6 + $0x2c00] sm:$0xff]  ;;  %v1757_v18 = vld [vmem:[%s6817_s6 + $0x2e58] sm:$0xff] }
 0x1e1   : > { %5183 = vmatprep.subr.bf16.mxu1 %v5182_v32  ;;  %v1690_v27 = vld [vmem:[%s6817_s6 + $0x2c40] sm:$0xff]  ;;  %v1699_v32 = vld [vmem:[%s6817_s6 + $0x2c88] sm:$0xff] }
 0x1e2   : > { %v4752_v36 = vpack.c.bf16 %v1690_v27, %v1682_v24  ;;  %v1748_v24 = vld [vmem:[%s6817_s6 + $0x2e10] sm:$0xff]  ;;  %v5214_v27 = vpack.c.bf16 %v1757_v18, %v1749_v17 }
 0x1e3   : > { %4737 = vmatpush1.bf16.msra.mxu0 %v4736_v39  ;;  %v4754_v39 = vpack.c.bf16 %v1707_v34, %v1699_v32  ;;  %v1765_v32 = vld [vmem:[%s6817_s6 + $0x2e98] sm:$0xff]  ;;  %v5216_v41 = vpack.c.bf16 %v1756_v28, %v1748_v24  ;;  %v1820_v24 = vld [vmem:[%s6817_s6 + $0x3050] sm:$0xff]  ;;  %v1835_v28 = vld [vmem:[%s6817_s6 + $0x30c8] sm:$0xff] }
 0x1e4   : > { %5185 = vmatpush1.bf16.msra.mxu1 %v5184_v42  ;;  %4739 = vmatprep.subr.bf16.mxu0 %v4738_v43  ;;  %v1698_v42 = vld [vmem:[%s6817_s6 + $0x2c80] sm:$0xff]  ;;  %v1773_v34 = vld [vmem:[%s6817_s6 + $0x2ed8] sm:$0xff] }
 0x1e5   : > { %5187 = vmatprep.subr.bf16.mxu1 %v5186_v47  ;;  %v1706_v43 = vld [vmem:[%s6817_s6 + $0x2cc0] sm:$0xff]  ;;  %v1715_v47 = vld [vmem:[%s6817_s6 + $0x2d08] sm:$0xff] }
 0x1e6   : > { %v4756_v52 = vpack.c.bf16 %v1706_v43, %v1698_v42  ;;  %v1764_v42 = vld [vmem:[%s6817_s6 + $0x2e90] sm:$0xff]  ;;  %v5218_v43 = vpack.c.bf16 %v1773_v34, %v1765_v32 }
 0x1e7   : > { %4741 = vmatpush1.bf16.msra.mxu0 %v4740_v57  ;;  %v4758_v57 = vpack.c.bf16 %v1723_v48, %v1715_v47  ;;  %v1781_v47 = vld [vmem:[%s6817_s6 + $0x2f18] sm:$0xff]  ;;  %v5220_v51 = vpack.c.bf16 %v1772_v44, %v1764_v42  ;;  %v7716_v32 = vld.sshfl [vmem:[%s6949_s12 + $0x18] sm:$0x33 pattern:$0x76325410]  ;;  %v1843_v44 = vld [vmem:[%s6817_s6 + $0x3108] sm:$0xff] }
 0x1e8   : > { %5189 = vmatpush1.bf16.msra.mxu1 %v5188_v58  ;;  %4743 = vmatprep.subr.bf16.mxu0 %v4742_v59  ;;  %v1714_v58 = vld [vmem:[%s6817_s6 + $0x2d00] sm:$0xff]  ;;  %v1789_v48 = vld [vmem:[%s6817_s6 + $0x2f58] sm:$0xff] }
 0x1e9   : > { %5191 = vmatprep.subr.bf16.mxu1 %v5190_v1  ;;  %v1722_v59 = vld [vmem:[%s6817_s6 + $0x2d40] sm:$0xff]  ;;  %v1731_v1 = vld [vmem:[%s6817_s6 + $0x2d88] sm:$0xff] }
 0x1ea   : > { %v4760_v6 = vpack.c.bf16 %v1722_v59, %v1714_v58  ;;  %v1780_v58 = vld [vmem:[%s6817_s6 + $0x2f10] sm:$0xff]  ;;  %v5222_v59 = vpack.c.bf16 %v1789_v48, %v1781_v47  ;;  %v1845_v47 = vld [vmem:[%s6817_s6 + $0x3118] sm:$0xff] }
 0x1eb   : > { %4745 = vmatpush1.bf16.msra.mxu0 %v4744_v8  ;;  %v4762_v8 = vpack.c.bf16 %v1739_v2, %v1731_v1  ;;  %v1797_v1 = vld [vmem:[%s6817_s6 + $0x2f98] sm:$0xff]  ;;  %v5224_v4 = vpack.c.bf16 %v1788_v60, %v1780_v58  ;;  %v1844_v58 = vld [vmem:[%s6817_s6 + $0x3110] sm:$0xff] }
 0x1ec   : > { %5193 = vmatpush1.bf16.msra.mxu1 %v5192_v9  ;;  %4747 = vmatprep.subr.bf16.mxu0 %v4746_v10  ;;  %v1730_v9 = vld [vmem:[%s6817_s6 + $0x2d80] sm:$0xff]  ;;  %v1805_v2 = vld [vmem:[%s6817_s6 + $0x2fd8] sm:$0xff]  ;;  %v1852_v60 = vld [vmem:[%s6817_s6 + $0x3150] sm:$0xff] }
 0x1ed   : > { %5195 = vmatprep.subr.bf16.mxu1 %v5194_v14  ;;  %v1738_v10 = vld [vmem:[%s6817_s6 + $0x2dc0] sm:$0xff]  ;;  %v1747_v14 = vld [vmem:[%s6817_s6 + $0x2e08] sm:$0xff]  ;;  %v1853_v48 = vld [vmem:[%s6817_s6 + $0x3158] sm:$0xff] }
 0x1ee   : > { %v4764_v19 = vpack.c.bf16 %v1738_v10, %v1730_v9  ;;  %v1796_v9 = vld [vmem:[%s6817_s6 + $0x2f90] sm:$0xff]  ;;  %v5226_v10 = vpack.c.bf16 %v1805_v2, %v1797_v1  ;;  %v1861_v1 = vld [vmem:[%s6817_s6 + $0x3198] sm:$0xff] }
 0x1ef   : > { %4749 = vmatpush1.bf16.msra.mxu0 %v4748_v21  ;;  %v4766_v21 = vpack.c.bf16 %v1755_v16, %v1747_v14  ;;  %v1813_v14 = vld [vmem:[%s6817_s6 + $0x3018] sm:$0xff]  ;;  %v5228_v18 = vpack.c.bf16 %v1804_v11, %v1796_v9  ;;  %v1860_v9 = vld [vmem:[%s6817_s6 + $0x3190] sm:$0xff] }
 0x1f0   : > { %5197 = vmatpush1.bf16.msra.mxu1 %v5196_v22  ;;  %4751 = vmatprep.subr.bf16.mxu0 %v4750_v23  ;;  %v1746_v22 = vld [vmem:[%s6817_s6 + $0x2e00] sm:$0xff]  ;;  %v1821_v16 = vld [vmem:[%s6817_s6 + $0x3058] sm:$0xff]  ;;  %v1868_v11 = vld [vmem:[%s6817_s6 + $0x31d0] sm:$0xff] }
 0x1f1   : > { %5199 = vmatprep.subr.bf16.mxu1 %v5198_v29  ;;  %v1754_v23 = vld [vmem:[%s6817_s6 + $0x2e40] sm:$0xff]  ;;  %v1763_v29 = vld [vmem:[%s6817_s6 + $0x2e88] sm:$0xff]  ;;  %v1869_v2 = vld [vmem:[%s6817_s6 + $0x31d8] sm:$0xff] }
 0x1f2   : > { %v4768_v35 = vpack.c.bf16 %v1754_v23, %v1746_v22  ;;  %v1812_v22 = vld [vmem:[%s6817_s6 + $0x3010] sm:$0xff]  ;;  %v5230_v23 = vpack.c.bf16 %v1821_v16, %v1813_v14  ;;  %v1877_v14 = vld [vmem:[%s6817_s6 + $0x3218] sm:$0xff] }
 0x1f3   : > { %4753 = vmatpush1.bf16.msra.mxu0 %v4752_v36  ;;  %v4770_v36 = vpack.c.bf16 %v1771_v31, %v1763_v29  ;;  %v1829_v29 = vld [vmem:[%s6817_s6 + $0x3098] sm:$0xff] }
 0x1f4   : > { %5201 = vmatpush1.bf16.msra.mxu1 %v5200_v37  ;;  %4755 = vmatprep.subr.bf16.mxu0 %v4754_v39  ;;  %v1762_v37 = vld [vmem:[%s6817_s6 + $0x2e80] sm:$0xff]  ;;  %v1837_v31 = vld [vmem:[%s6817_s6 + $0x30d8] sm:$0xff] }
 0x1f5   : > { %5203 = vmatprep.subr.bf16.mxu1 %v5202_v45  ;;  %v1770_v39 = vld [vmem:[%s6817_s6 + $0x2ec0] sm:$0xff]  ;;  %v1779_v45 = vld [vmem:[%s6817_s6 + $0x2f08] sm:$0xff]  ;;  %v5234_v42 = vpack.c.bf16 %v1837_v31, %v1829_v29  ;;  %v1885_v16 = vld [vmem:[%s6817_s6 + $0x3258] sm:$0xff] }
 0x1f6   : > { %v4772_v49 = vpack.c.bf16 %v1770_v39, %v1762_v37  ;;  %v1834_v37 = vld [vmem:[%s6817_s6 + $0x30c0] sm:$0xff]  ;;  %v1828_v39 = vld [vmem:[%s6817_s6 + $0x3090] sm:$0xff]  ;;  %v1893_v29 = vld [vmem:[%s6817_s6 + $0x3298] sm:$0xff] }
 0x1f7   : > { %4757 = vmatpush1.bf16.msra.mxu0 %v4756_v52  ;;  %v4774_v52 = vpack.c.bf16 %v1787_v46, %v1779_v45  ;;  %v1851_v45 = vld [vmem:[%s6817_s6 + $0x3148] sm:$0xff]  ;;  %v7726_v46 = vcombine.high %v7716_v32, %v7716_v32  ;;  %v1901_v31 = vld [vmem:[%s6817_s6 + $0x32d8] sm:$0xff] }
 0x1f8   : > { %5205 = vmatpush1.bf16.msra.mxu1 %v5204_v54  ;;  %4759 = vmatprep.subr.bf16.mxu0 %v4758_v57  ;;  %v1778_v54 = vld [vmem:[%s6817_s6 + $0x2f00] sm:$0xff] }
 0x1f9   : > { %5207 = vmatprep.subr.bf16.mxu1 %v5206_v61  ;;  %v1786_v57 = vld [vmem:[%s6817_s6 + $0x2f40] sm:$0xff]  ;;  %v1795_v61 = vld [vmem:[%s6817_s6 + $0x2f88] sm:$0xff] }
 0x1fa   : > { %v4776_v3 = vpack.c.bf16 %v1786_v57, %v1778_v54  ;;  %v1842_v54 = vld [vmem:[%s6817_s6 + $0x3100] sm:$0xff] }
 0x1fb   : > { %4761 = vmatpush1.bf16.msra.mxu0 %v4760_v6  ;;  %v4778_v6 = vpack.c.bf16 %v1803_v62, %v1795_v61  ;;  %v1850_v57 = vld [vmem:[%s6817_s6 + $0x3140] sm:$0xff]  ;;  %v1859_v61 = vld [vmem:[%s6817_s6 + $0x3188] sm:$0xff] }
 0x1fc   : > { %5209 = vmatpush1.bf16.msra.mxu1 %v5208_v7  ;;  %4763 = vmatprep.subr.bf16.mxu0 %v4762_v8  ;;  %v1794_v7 = vld [vmem:[%s6817_s6 + $0x2f80] sm:$0xff]  ;;  %v1867_v62 = vld [vmem:[%s6817_s6 + $0x31c8] sm:$0xff] }
 0x1fd   : > { %5211 = vmatprep.subr.bf16.mxu1 %v5210_v50  ;;  %v1802_v8 = vld [vmem:[%s6817_s6 + $0x2fc0] sm:$0xff]  ;;  %v1811_v50 = vld [vmem:[%s6817_s6 + $0x3008] sm:$0xff] }
 0x1fe   : > { %v4780_v17 = vpack.c.bf16 %v1802_v8, %v1794_v7  ;;  %v1858_v7 = vld [vmem:[%s6817_s6 + $0x3180] sm:$0xff] }
 0x1ff   : > { %4765 = vmatpush1.bf16.msra.mxu0 %v4764_v19  ;;  %v4782_v19 = vpack.c.bf16 %v1819_v13, %v1811_v50  ;;  %v1866_v8 = vld [vmem:[%s6817_s6 + $0x31c0] sm:$0xff]  ;;  %v1875_v50 = vld [vmem:[%s6817_s6 + $0x3208] sm:$0xff] }
 0x200   : > { %5213 = vmatpush1.bf16.msra.mxu1 %v5212_v20  ;;  %4767 = vmatprep.subr.bf16.mxu0 %v4766_v21  ;;  %v1810_v20 = vld [vmem:[%s6817_s6 + $0x3000] sm:$0xff]  ;;  %v1883_v13 = vld [vmem:[%s6817_s6 + $0x3248] sm:$0xff] }
 0x201   : > { %5215 = vmatprep.subr.bf16.mxu1 %v5214_v27  ;;  %v1818_v21 = vld [vmem:[%s6817_s6 + $0x3040] sm:$0xff]  ;;  %v1827_v27 = vld [vmem:[%s6817_s6 + $0x3088] sm:$0xff] }
 0x202   : > { %v4784_v34 = vpack.c.bf16 %v1818_v21, %v1810_v20  ;;  %v1874_v20 = vld [vmem:[%s6817_s6 + $0x3200] sm:$0xff] }
 0x203   : > { %4769 = vmatpush1.bf16.msra.mxu0 %v4768_v35  ;;  %v5232_v35 = vpack.c.bf16 %v1820_v24, %v1812_v22  ;;  %v1882_v21 = vld [vmem:[%s6817_s6 + $0x3240] sm:$0xff]  ;;  %v1876_v22 = vld [vmem:[%s6817_s6 + $0x3210] sm:$0xff] }
 0x204   : > { %5217 = vmatpush1.bf16.msra.mxu1 %v5216_v41  ;;  %4771 = vmatprep.subr.bf16.mxu0 %v4770_v36  ;;  %v4786_v41 = vpack.c.bf16 %v1835_v28, %v1827_v27  ;;  %v1826_v36 = vld [vmem:[%s6817_s6 + $0x3080] sm:$0xff]  ;;  %v1884_v24 = vld [vmem:[%s6817_s6 + $0x3250] sm:$0xff]  ;;  %v1891_v27 = vld [vmem:[%s6817_s6 + $0x3288] sm:$0xff] }
 0x205   : > { %5219 = vmatprep.subr.bf16.mxu1 %v5218_v43  ;;  %v1836_v43 = vld [vmem:[%s6817_s6 + $0x30d0] sm:$0xff]  ;;  %v1899_v28 = vld [vmem:[%s6817_s6 + $0x32c8] sm:$0xff] }
 0x207   : > { %4773 = vmatpush1.bf16.msra.mxu0 %v4772_v49  ;;  %v4788_v49 = vpack.c.bf16 %v1834_v37, %v1826_v36  ;;  %v1890_v36 = vld [vmem:[%s6817_s6 + $0x3280] sm:$0xff] }
 0x208   : > { %5221 = vmatpush1.bf16.msra.mxu1 %v5220_v51  ;;  %4775 = vmatprep.subr.bf16.mxu0 %v4774_v52  ;;  %v5236_v51 = vpack.c.bf16 %v1836_v43, %v1828_v39  ;;  %v4790_v52 = vpack.c.bf16 %v1851_v45, %v1843_v44  ;;  %v1898_v37 = vld [vmem:[%s6817_s6 + $0x32c0] sm:$0xff]  ;;  %v1892_v39 = vld [vmem:[%s6817_s6 + $0x3290] sm:$0xff]  ;;  %v1907_v44 = vld [vmem:[%s6817_s6 + $0x3308] sm:$0xff] }
 0x209   : > { %5223 = vmatprep.subr.bf16.mxu1 %v5222_v59  ;;  %v5238_v59 = vpack.c.bf16 %v1853_v48, %v1845_v47  ;;  %v1900_v43 = vld [vmem:[%s6817_s6 + $0x32d0] sm:$0xff]  ;;  %v1915_v45 = vld [vmem:[%s6817_s6 + $0x3348] sm:$0xff]  ;;  %v1909_v47 = vld [vmem:[%s6817_s6 + $0x3318] sm:$0xff] }
 0x20a   : > { %v1917_v48 = vld [vmem:[%s6817_s6 + $0x3358] sm:$0xff] }
 0x20b   : > { %4777 = vmatpush1.bf16.msra.mxu0 %v4776_v3  ;;  %v4792_v3 = vpack.c.bf16 %v1850_v57, %v1842_v54  ;;  %v1906_v54 = vld [vmem:[%s6817_s6 + $0x3300] sm:$0xff] }
 0x20c   : > { %5225 = vmatpush1.bf16.msra.mxu1 %v5224_v4  ;;  %4779 = vmatprep.subr.bf16.mxu0 %v4778_v6  ;;  %v5240_v4 = vpack.c.bf16 %v1852_v60, %v1844_v58  ;;  %v4794_v6 = vpack.c.bf16 %v1867_v62, %v1859_v61  ;;  %v1914_v57 = vld [vmem:[%s6817_s6 + $0x3340] sm:$0xff]  ;;  %v1908_v58 = vld [vmem:[%s6817_s6 + $0x3310] sm:$0xff]  ;;  %v1923_v61 = vld [vmem:[%s6817_s6 + $0x3388] sm:$0xff] }
 0x20d   : > { %5227 = vmatprep.subr.bf16.mxu1 %v5226_v10  ;;  %v5242_v10 = vpack.c.bf16 %v1869_v2, %v1861_v1  ;;  %v1916_v60 = vld [vmem:[%s6817_s6 + $0x3350] sm:$0xff]  ;;  %v1931_v62 = vld [vmem:[%s6817_s6 + $0x33c8] sm:$0xff]  ;;  %v1925_v1 = vld [vmem:[%s6817_s6 + $0x3398] sm:$0xff] }
 0x20e   : > { %v1933_v2 = vld [vmem:[%s6817_s6 + $0x33d8] sm:$0xff] }
 0x20f   : > { %4781 = vmatpush1.bf16.msra.mxu0 %v4780_v17  ;;  %v4796_v17 = vpack.c.bf16 %v1866_v8, %v1858_v7  ;;  %v1922_v7 = vld [vmem:[%s6817_s6 + $0x3380] sm:$0xff] }
 0x210   : > { %5229 = vmatpush1.bf16.msra.mxu1 %v5228_v18  ;;  %4783 = vmatprep.subr.bf16.mxu0 %v4782_v19  ;;  %v5244_v18 = vpack.c.bf16 %v1868_v11, %v1860_v9  ;;  %v4798_v19 = vpack.c.bf16 %v1883_v13, %v1875_v50  ;;  %v1930_v8 = vld [vmem:[%s6817_s6 + $0x33c0] sm:$0xff]  ;;  %v1924_v9 = vld [vmem:[%s6817_s6 + $0x3390] sm:$0xff]  ;;  %v1939_v50 = vld [vmem:[%s6817_s6 + $0x3408] sm:$0xff] }
 0x211   : > { %5231 = vmatprep.subr.bf16.mxu1 %v5230_v23  ;;  %v5246_v23 = vpack.c.bf16 %v1885_v16, %v1877_v14  ;;  %v1932_v11 = vld [vmem:[%s6817_s6 + $0x33d0] sm:$0xff]  ;;  %v1947_v13 = vld [vmem:[%s6817_s6 + $0x3448] sm:$0xff]  ;;  %v1941_v14 = vld [vmem:[%s6817_s6 + $0x3418] sm:$0xff] }
 0x212   : > { %2563 = vmatmul.mubr.f32.vlgmr.msra.gmra.mrb[0].mxu0 %v7575_v38  ;;  %v1949_v16 = vld [vmem:[%s6817_s6 + $0x3458] sm:$0xff] }
 0x213   : > { %4785 = vmatpush1.bf16.msra.mxu0 %v4784_v34  ;;  %3060 = vmatmul.mubr.f32.vlgmr.msra.gmra.mrb[0].mxu1 %v7575_v38  ;;  %v4800_v34 = vpack.c.bf16 %v1882_v21, %v1874_v20  ;;  %v1938_v20 = vld [vmem:[%s6817_s6 + $0x3400] sm:$0xff] }
 0x214   : > { %5233 = vmatpush1.bf16.msra.mxu1 %v5232_v35  ;;  %4787 = vmatprep.subr.bf16.mxu0 %v4786_v41  ;;  %v5248_v35 = vpack.c.bf16 %v1884_v24, %v1876_v22  ;;  %v4802_v41 = vpack.c.bf16 %v1899_v28, %v1891_v27  ;;  %v1946_v21 = vld [vmem:[%s6817_s6 + $0x3440] sm:$0xff]  ;;  %v1940_v22 = vld [vmem:[%s6817_s6 + $0x3410] sm:$0xff]  ;;  %v1955_v27 = vld [vmem:[%s6817_s6 + $0x3488] sm:$0xff] }
 0x215   : > { %5235 = vmatprep.subr.bf16.mxu1 %v5234_v42  ;;  %2633 = vmatprep.mubr.f32.mxu0 %v7726_v46  ;;  %v5250_v42 = vpack.c.bf16 %v1901_v31, %v1893_v29  ;;  %v1948_v24 = vld [vmem:[%s6817_s6 + $0x3450] sm:$0xff]  ;;  %v1963_v28 = vld [vmem:[%s6817_s6 + $0x34c8] sm:$0xff]  ;;  %v1957_v29 = vld [vmem:[%s6817_s6 + $0x3498] sm:$0xff] }
 0x216   : > { %3130 = vmatprep.mubr.f32.mxu1 %v7726_v46  ;;  %v1965_v31 = vld [vmem:[%s6817_s6 + $0x34d8] sm:$0xff] }
 0x217   : > { %4789 = vmatpush1.bf16.msra.mxu0 %v4788_v49  ;;  %v4804_v49 = vpack.c.bf16 %v1898_v37, %v1890_v36  ;;  %v1954_v36 = vld [vmem:[%s6817_s6 + $0x3480] sm:$0xff] }
 0x218   : > { %5237 = vmatpush1.bf16.msra.mxu1 %v5236_v51  ;;  %4791 = vmatprep.subr.bf16.mxu0 %v4790_v52  ;;  %v5252_v51 = vpack.c.bf16 %v1900_v43, %v1892_v39  ;;  %v4806_v52 = vpack.c.bf16 %v1915_v45, %v1907_v44  ;;  %v1962_v37 = vld [vmem:[%s6817_s6 + $0x34c0] sm:$0xff]  ;;  %v1956_v39 = vld [vmem:[%s6817_s6 + $0x3490] sm:$0xff]  ;;  %v1971_v44 = vld [vmem:[%s6817_s6 + $0x3508] sm:$0xff] }
 0x219   : > { %5239 = vmatprep.subr.bf16.mxu1 %v5238_v59  ;;  %v5254_v59 = vpack.c.bf16 %v1917_v48, %v1909_v47  ;;  %v1964_v43 = vld [vmem:[%s6817_s6 + $0x34d0] sm:$0xff]  ;;  %v1979_v45 = vld [vmem:[%s6817_s6 + $0x3548] sm:$0xff]  ;;  %v1973_v47 = vld [vmem:[%s6817_s6 + $0x3518] sm:$0xff] }
 0x21a   : > { %v1981_v48 = vld [vmem:[%s6817_s6 + $0x3558] sm:$0xff] }
 0x21b   : > { %4793 = vmatpush1.bf16.msra.mxu0 %v4792_v3  ;;  %v4808_v3 = vpack.c.bf16 %v1914_v57, %v1906_v54  ;;  %v1970_v54 = vld [vmem:[%s6817_s6 + $0x3500] sm:$0xff] }
 0x21c   : > { %5241 = vmatpush1.bf16.msra.mxu1 %v5240_v4  ;;  %4795 = vmatprep.subr.bf16.mxu0 %v4794_v6  ;;  %v5256_v4 = vpack.c.bf16 %v1916_v60, %v1908_v58  ;;  %v4810_v6 = vpack.c.bf16 %v1931_v62, %v1923_v61  ;;  %v1978_v57 = vld [vmem:[%s6817_s6 + $0x3540] sm:$0xff]  ;;  %v1972_v58 = vld [vmem:[%s6817_s6 + $0x3510] sm:$0xff]  ;;  %v1987_v61 = vld [vmem:[%s6817_s6 + $0x3588] sm:$0xff] }
 0x21d   : > { %5243 = vmatprep.subr.bf16.mxu1 %v5242_v10  ;;  %v5258_v10 = vpack.c.bf16 %v1933_v2, %v1925_v1  ;;  %v1980_v60 = vld [vmem:[%s6817_s6 + $0x3550] sm:$0xff]  ;;  %v1995_v62 = vld [vmem:[%s6817_s6 + $0x35c8] sm:$0xff]  ;;  %v1989_v1 = vld [vmem:[%s6817_s6 + $0x3598] sm:$0xff] }
 0x21e   : > { %v1997_v2 = vld [vmem:[%s6817_s6 + $0x35d8] sm:$0xff] }
 0x21f   : > { %4797 = vmatpush1.bf16.msra.mxu0 %v4796_v17  ;;  %v4812_v17 = vpack.c.bf16 %v1930_v8, %v1922_v7  ;;  %v1986_v7 = vld [vmem:[%s6817_s6 + $0x3580] sm:$0xff] }
 0x220   : > { %5245 = vmatpush1.bf16.msra.mxu1 %v5244_v18  ;;  %4799 = vmatprep.subr.bf16.mxu0 %v4798_v19  ;;  %v5260_v18 = vpack.c.bf16 %v1932_v11, %v1924_v9  ;;  %v4814_v19 = vpack.c.bf16 %v1947_v13, %v1939_v50  ;;  %v1994_v8 = vld [vmem:[%s6817_s6 + $0x35c0] sm:$0xff]  ;;  %v1988_v9 = vld [vmem:[%s6817_s6 + $0x3590] sm:$0xff]  ;;  %v2003_v50 = vld [vmem:[%s6817_s6 + $0x3608] sm:$0xff] }
 0x221   : > { %5247 = vmatprep.subr.bf16.mxu1 %v5246_v23  ;;  %v5262_v23 = vpack.c.bf16 %v1949_v16, %v1941_v14  ;;  %v1996_v11 = vld [vmem:[%s6817_s6 + $0x35d0] sm:$0xff]  ;;  %v2011_v13 = vld [vmem:[%s6817_s6 + $0x3648] sm:$0xff]  ;;  %v2005_v14 = vld [vmem:[%s6817_s6 + $0x3618] sm:$0xff] }
 0x222   : > { %v2013_v16 = vld [vmem:[%s6817_s6 + $0x3658] sm:$0xff] }
 0x223   : > { %4801 = vmatpush1.bf16.msra.mxu0 %v4800_v34  ;;  %v4816_v34 = vpack.c.bf16 %v1946_v21, %v1938_v20  ;;  %v2002_v20 = vld [vmem:[%s6817_s6 + $0x3600] sm:$0xff] }
 0x224   : > { %5249 = vmatpush1.bf16.msra.mxu1 %v5248_v35  ;;  %4803 = vmatprep.subr.bf16.mxu0 %v4802_v41  ;;  %v5264_v35 = vpack.c.bf16 %v1948_v24, %v1940_v22  ;;  %v4818_v41 = vpack.c.bf16 %v1963_v28, %v1955_v27  ;;  %v2010_v21 = vld [vmem:[%s6817_s6 + $0x3640] sm:$0xff]  ;;  %v2004_v22 = vld [vmem:[%s6817_s6 + $0x3610] sm:$0xff]  ;;  %v2019_v27 = vld [vmem:[%s6817_s6 + $0x3688] sm:$0xff] }
 0x225   : > { %5251 = vmatprep.subr.bf16.mxu1 %v5250_v42  ;;  %v5266_v42 = vpack.c.bf16 %v1965_v31, %v1957_v29  ;;  %v2012_v24 = vld [vmem:[%s6817_s6 + $0x3650] sm:$0xff]  ;;  %v2027_v28 = vld [vmem:[%s6817_s6 + $0x36c8] sm:$0xff]  ;;  %v2021_v29 = vld [vmem:[%s6817_s6 + $0x3698] sm:$0xff] }
 0x226   : > { %v2029_v31 = vld [vmem:[%s6817_s6 + $0x36d8] sm:$0xff] }
 0x227   : > { %4805 = vmatpush1.bf16.msra.mxu0 %v4804_v49  ;;  %v4820_v49 = vpack.c.bf16 %v1962_v37, %v1954_v36  ;;  %v2018_v36 = vld [vmem:[%s6817_s6 + $0x3680] sm:$0xff] }
 0x228   : > { %5253 = vmatpush1.bf16.msra.mxu1 %v5252_v51  ;;  %4807 = vmatprep.subr.bf16.mxu0 %v4806_v52  ;;  %v5268_v51 = vpack.c.bf16 %v1964_v43, %v1956_v39  ;;  %v4822_v52 = vpack.c.bf16 %v1979_v45, %v1971_v44  ;;  %v2026_v37 = vld [vmem:[%s6817_s6 + $0x36c0] sm:$0xff]  ;;  %v2020_v39 = vld [vmem:[%s6817_s6 + $0x3690] sm:$0xff]  ;;  %v2035_v44 = vld [vmem:[%s6817_s6 + $0x3708] sm:$0xff] }
 0x229   : > { %5255 = vmatprep.subr.bf16.mxu1 %v5254_v59  ;;  %v5270_v59 = vpack.c.bf16 %v1981_v48, %v1973_v47  ;;  %v2028_v43 = vld [vmem:[%s6817_s6 + $0x36d0] sm:$0xff]  ;;  %v2043_v45 = vld [vmem:[%s6817_s6 + $0x3748] sm:$0xff]  ;;  %v2037_v47 = vld [vmem:[%s6817_s6 + $0x3718] sm:$0xff] }
 0x22a   : > { %v2045_v48 = vld [vmem:[%s6817_s6 + $0x3758] sm:$0xff] }
 0x22b   : > { %4809 = vmatpush1.bf16.msra.mxu0 %v4808_v3  ;;  %v4824_v3 = vpack.c.bf16 %v1978_v57, %v1970_v54  ;;  %v2034_v54 = vld [vmem:[%s6817_s6 + $0x3700] sm:$0xff] }
 0x22c   : > { %5257 = vmatpush1.bf16.msra.mxu1 %v5256_v4  ;;  %4811 = vmatprep.subr.bf16.mxu0 %v4810_v6  ;;  %v5272_v4 = vpack.c.bf16 %v1980_v60, %v1972_v58  ;;  %v4826_v6 = vpack.c.bf16 %v1995_v62, %v1987_v61  ;;  %v2042_v57 = vld [vmem:[%s6817_s6 + $0x3740] sm:$0xff]  ;;  %v2036_v58 = vld [vmem:[%s6817_s6 + $0x3710] sm:$0xff]  ;;  %v2051_v61 = vld [vmem:[%s6817_s6 + $0x3788] sm:$0xff] }
 0x22d   : > { %5259 = vmatprep.subr.bf16.mxu1 %v5258_v10  ;;  %v5274_v10 = vpack.c.bf16 %v1997_v2, %v1989_v1  ;;  %v2044_v60 = vld [vmem:[%s6817_s6 + $0x3750] sm:$0xff]  ;;  %v2059_v62 = vld [vmem:[%s6817_s6 + $0x37c8] sm:$0xff]  ;;  %v2053_v1 = vld [vmem:[%s6817_s6 + $0x3798] sm:$0xff] }
 0x22e   : > { %v2061_v2 = vld [vmem:[%s6817_s6 + $0x37d8] sm:$0xff] }
 0x22f   : > { %4813 = vmatpush1.bf16.msra.mxu0 %v4812_v17  ;;  %v4828_v17 = vpack.c.bf16 %v1994_v8, %v1986_v7  ;;  %v2050_v7 = vld [vmem:[%s6817_s6 + $0x3780] sm:$0xff] }
 0x230   : > { %5261 = vmatpush1.bf16.msra.mxu1 %v5260_v18  ;;  %4815 = vmatprep.subr.bf16.mxu0 %v4814_v19  ;;  %v5276_v18 = vpack.c.bf16 %v1996_v11, %v1988_v9  ;;  %v4830_v19 = vpack.c.bf16 %v2011_v13, %v2003_v50  ;;  %v2058_v8 = vld [vmem:[%s6817_s6 + $0x37c0] sm:$0xff]  ;;  %v2052_v9 = vld [vmem:[%s6817_s6 + $0x3790] sm:$0xff]  ;;  %v279_v50 = vld [vmem:[%s6817_s6 + $0x28] sm:$0xff] }
 0x231   : > { %5263 = vmatprep.subr.bf16.mxu1 %v5262_v23  ;;  %v5278_v23 = vpack.c.bf16 %v2013_v16, %v2005_v14  ;;  %v2060_v11 = vld [vmem:[%s6817_s6 + $0x37d0] sm:$0xff]  ;;  %v287_v13 = vld [vmem:[%s6817_s6 + $0x68] sm:$0xff]  ;;  %v281_v14 = vld [vmem:[%s6817_s6 + $0x38] sm:$0xff] }
 0x232   : > { %v289_v16 = vld [vmem:[%s6817_s6 + $0x78] sm:$0xff] }
 0x233   : > { %4817 = vmatpush1.bf16.msra.mxu0 %v4816_v34  ;;  %v4832_v34 = vpack.c.bf16 %v2010_v21, %v2002_v20  ;;  %v278_v20 = vld [vmem:[%s6817_s6 + $0x20] sm:$0xff] }
 0x234   : > { %5265 = vmatpush1.bf16.msra.mxu1 %v5264_v35  ;;  %4819 = vmatprep.subr.bf16.mxu0 %v4818_v41  ;;  %v5280_v35 = vpack.c.bf16 %v2012_v24, %v2004_v22  ;;  %v4834_v41 = vpack.c.bf16 %v2027_v28, %v2019_v27  ;;  %v286_v21 = vld [vmem:[%s6817_s6 + $0x60] sm:$0xff]  ;;  %v280_v22 = vld [vmem:[%s6817_s6 + $0x30] sm:$0xff]  ;;  %v295_v27 = vld [vmem:[%s6817_s6 + $0xa8] sm:$0xff] }
 0x235   : > { %5267 = vmatprep.subr.bf16.mxu1 %v5266_v42  ;;  %v5282_v42 = vpack.c.bf16 %v2029_v31, %v2021_v29  ;;  %v288_v24 = vld [vmem:[%s6817_s6 + $0x70] sm:$0xff]  ;;  %v303_v28 = vld [vmem:[%s6817_s6 + $0xe8] sm:$0xff]  ;;  %v297_v29 = vld [vmem:[%s6817_s6 + $0xb8] sm:$0xff] }
 0x236   : > { %v305_v31 = vld [vmem:[%s6817_s6 + $0xf8] sm:$0xff] }
 0x237   : > { %4821 = vmatpush1.bf16.msra.mxu0 %v4820_v49  ;;  %v4836_v49 = vpack.c.bf16 %v2026_v37, %v2018_v36  ;;  %v294_v36 = vld [vmem:[%s6817_s6 + $0xa0] sm:$0xff] }
 0x238   : > { %5269 = vmatpush1.bf16.msra.mxu1 %v5268_v51  ;;  %4823 = vmatprep.subr.bf16.mxu0 %v4822_v52  ;;  %v5284_v51 = vpack.c.bf16 %v2028_v43, %v2020_v39  ;;  %v4838_v52 = vpack.c.bf16 %v2043_v45, %v2035_v44  ;;  %v302_v37 = vld [vmem:[%s6817_s6 + $0xe0] sm:$0xff]  ;;  %v296_v39 = vld [vmem:[%s6817_s6 + $0xb0] sm:$0xff]  ;;  %v311_v44 = vld [vmem:[%s6817_s6 + $0x128] sm:$0xff] }
 0x239   : > { %5271 = vmatprep.subr.bf16.mxu1 %v5270_v59  ;;  %v5286_v59 = vpack.c.bf16 %v2045_v48, %v2037_v47  ;;  %v304_v43 = vld [vmem:[%s6817_s6 + $0xf0] sm:$0xff]  ;;  %v319_v45 = vld [vmem:[%s6817_s6 + $0x168] sm:$0xff]  ;;  %v313_v47 = vld [vmem:[%s6817_s6 + $0x138] sm:$0xff] }
 0x23a   : > { %v321_v48 = vld [vmem:[%s6817_s6 + $0x178] sm:$0xff] }
 0x23b   : > { %4825 = vmatpush1.bf16.msra.mxu0 %v4824_v3  ;;  %v4840_v3 = vpack.c.bf16 %v2042_v57, %v2034_v54  ;;  %v310_v54 = vld [vmem:[%s6817_s6 + $0x120] sm:$0xff] }
 0x23c   : > { %5273 = vmatpush1.bf16.msra.mxu1 %v5272_v4  ;;  %4827 = vmatprep.subr.bf16.mxu0 %v4826_v6  ;;  %v5288_v4 = vpack.c.bf16 %v2044_v60, %v2036_v58  ;;  %v4842_v6 = vpack.c.bf16 %v2059_v62, %v2051_v61  ;;  %v318_v57 = vld [vmem:[%s6817_s6 + $0x160] sm:$0xff]  ;;  %v312_v58 = vld [vmem:[%s6817_s6 + $0x130] sm:$0xff]  ;;  %v327_v61 = vld [vmem:[%s6817_s6 + $0x1a8] sm:$0xff] }
 0x23d   : > { %5275 = vmatprep.subr.bf16.mxu1 %v5274_v10  ;;  %v5290_v10 = vpack.c.bf16 %v2061_v2, %v2053_v1  ;;  %v320_v60 = vld [vmem:[%s6817_s6 + $0x170] sm:$0xff]  ;;  %v335_v62 = vld [vmem:[%s6817_s6 + $0x1e8] sm:$0xff]  ;;  %v337_v1 = vld [vmem:[%s6817_s6 + $0x1f8] sm:$0xff]  ;;  %v5304_v2 = vpack.c.bf16 %v318_v57, %v310_v54 }
 0x23e   : > { %v376_v54 = vld [vmem:[%s6817_s6 + $0x330] sm:$0xff] }
 0x23f   : > { %4829 = vmatpush1.bf16.msra.mxu0 %v4828_v17  ;;  %v4844_v17 = vpack.c.bf16 %v2058_v8, %v2050_v7  ;;  %v334_v7 = vld [vmem:[%s6817_s6 + $0x1e0] sm:$0xff]  ;;  %v328_v8 = vld [vmem:[%s6817_s6 + $0x1b0] sm:$0xff] }
 0x240   : > { %5277 = vmatpush1.bf16.msra.mxu1 %v5276_v18  ;;  %4831 = vmatprep.subr.bf16.mxu0 %v4830_v19  ;;  %v5292_v18 = vpack.c.bf16 %v2060_v11, %v2052_v9  ;;  %v5294_v19 = vpack.c.bf16 %v287_v13, %v279_v50  ;;  %v343_v11 = vld [vmem:[%s6817_s6 + $0x228] sm:$0xff]  ;;  %v345_v50 = vld [vmem:[%s6817_s6 + $0x238] sm:$0xff] }
 0x241   : > { %5279 = vmatprep.subr.bf16.mxu1 %v5278_v23  ;;  %v5742_v23 = vpack.c.bf16 %v289_v16, %v281_v14  ;;  %v353_v13 = vld [vmem:[%s6817_s6 + $0x278] sm:$0xff] }
 0x243   : > { %4833 = vmatpush1.bf16.msra.mxu0 %v4832_v34  ;;  %v5296_v34 = vpack.c.bf16 %v286_v21, %v278_v20  ;;  %v344_v20 = vld [vmem:[%s6817_s6 + $0x230] sm:$0xff]  ;;  %v5758_v21 = vpack.c.bf16 %v353_v13, %v345_v50 }
 0x244   : > { %5281 = vmatpush1.bf16.msra.mxu1 %v5280_v35  ;;  %4835 = vmatprep.subr.bf16.mxu0 %v4834_v41  ;;  %v5744_v35 = vpack.c.bf16 %v288_v24, %v280_v22  ;;  %v5298_v41 = vpack.c.bf16 %v303_v28, %v295_v27  ;;  %v352_v22 = vld [vmem:[%s6817_s6 + $0x270] sm:$0xff]  ;;  %v367_v24 = vld [vmem:[%s6817_s6 + $0x2e8] sm:$0xff]  ;;  %v361_v27 = vld [vmem:[%s6817_s6 + $0x2b8] sm:$0xff] }
 0x245   : > { %5283 = vmatprep.subr.bf16.mxu1 %v5282_v42  ;;  %v5746_v42 = vpack.c.bf16 %v305_v31, %v297_v29  ;;  %v369_v28 = vld [vmem:[%s6817_s6 + $0x2f8] sm:$0xff]  ;;  %v5760_v31 = vpack.c.bf16 %v352_v22, %v344_v20  ;;  %v416_v20 = vld [vmem:[%s6817_s6 + $0x470] sm:$0xff]  ;;  %v431_v22 = vld [vmem:[%s6817_s6 + $0x4e8] sm:$0xff] }
 0x247   : > { %4837 = vmatpush1.bf16.msra.mxu0 %v4836_v49  ;;  %v5300_v49 = vpack.c.bf16 %v302_v37, %v294_v36  ;;  %v360_v36 = vld [vmem:[%s6817_s6 + $0x2b0] sm:$0xff]  ;;  %v5762_v37 = vpack.c.bf16 %v369_v28, %v361_v27 }
 0x248   : > { %5285 = vmatpush1.bf16.msra.mxu1 %v5284_v51  ;;  %4839 = vmatprep.subr.bf16.mxu0 %v4838_v52  ;;  %v5748_v51 = vpack.c.bf16 %v304_v43, %v296_v39  ;;  %v5302_v52 = vpack.c.bf16 %v319_v45, %v311_v44  ;;  %v368_v39 = vld [vmem:[%s6817_s6 + $0x2f0] sm:$0xff]  ;;  %v383_v43 = vld [vmem:[%s6817_s6 + $0x368] sm:$0xff]  ;;  %v377_v44 = vld [vmem:[%s6817_s6 + $0x338] sm:$0xff] }
 0x249   : > { %5287 = vmatprep.subr.bf16.mxu1 %v5286_v59  ;;  %v5750_v59 = vpack.c.bf16 %v321_v48, %v313_v47  ;;  %v385_v45 = vld [vmem:[%s6817_s6 + $0x378] sm:$0xff]  ;;  %v5764_v48 = vpack.c.bf16 %v368_v39, %v360_v36  ;;  %v432_v36 = vld [vmem:[%s6817_s6 + $0x4f0] sm:$0xff]  ;;  %v447_v39 = vld [vmem:[%s6817_s6 + $0x568] sm:$0xff] }
 0x24a   : > { %v5766_v57 = vpack.c.bf16 %v385_v45, %v377_v44 }
 0x24b   : > { %4841 = vmatpush1.bf16.msra.mxu0 %v4840_v3  ;;  %v5752_v3 = vpack.c.bf16 %v320_v60, %v312_v58  ;;  %v384_v58 = vld [vmem:[%s6817_s6 + $0x370] sm:$0xff]  ;;  %v399_v60 = vld [vmem:[%s6817_s6 + $0x3e8] sm:$0xff] }
 0x24c   : > { %5289 = vmatpush1.bf16.msra.mxu1 %v5288_v4  ;;  %4843 = vmatprep.subr.bf16.mxu0 %v4842_v6  ;;  %v5306_v4 = vpack.c.bf16 %v335_v62, %v327_v61  ;;  %v326_v6 = vld [vmem:[%s6817_s6 + $0x1a0] sm:$0xff]  ;;  %v393_v61 = vld [vmem:[%s6817_s6 + $0x3b8] sm:$0xff] }
 0x24d   : > { %5291 = vmatprep.subr.bf16.mxu1 %v5290_v10  ;;  %v336_v10 = vld [vmem:[%s6817_s6 + $0x1f0] sm:$0xff]  ;;  %v5308_v14 = vpack.c.bf16 %v334_v7, %v326_v6  ;;  %v401_v62 = vld [vmem:[%s6817_s6 + $0x3f8] sm:$0xff] }
 0x24e   : > { %v5756_v16 = vpack.c.bf16 %v336_v10, %v328_v8  ;;  %v392_v6 = vld [vmem:[%s6817_s6 + $0x3b0] sm:$0xff]  ;;  %v5770_v7 = vpack.c.bf16 %v401_v62, %v393_v61  ;;  %v415_v10 = vld [vmem:[%s6817_s6 + $0x468] sm:$0xff] }
 0x24f   : > { %4845 = vmatpush1.bf16.msra.mxu0 %v4844_v17  ;;  %v400_v8 = vld [vmem:[%s6817_s6 + $0x3f0] sm:$0xff] }
 0x250   : > { %5293 = vmatpush1.bf16.msra.mxu1 %v5292_v18  ;;  %5295 = vmatprep.subr.bf16.mxu0 %v5294_v19  ;;  %v342_v18 = vld [vmem:[%s6817_s6 + $0x220] sm:$0xff]  ;;  %v5772_v13 = vpack.c.bf16 %v400_v8, %v392_v6  ;;  %v464_v6 = vld [vmem:[%s6817_s6 + $0x5f0] sm:$0xff]  ;;  %v479_v8 = vld [vmem:[%s6817_s6 + $0x668] sm:$0xff] }
 0x251   : > { %5743 = vmatprep.subr.bf16.mxu1 %v5742_v23  ;;  %v350_v19 = vld [vmem:[%s6817_s6 + $0x260] sm:$0xff]  ;;  %v359_v23 = vld [vmem:[%s6817_s6 + $0x2a8] sm:$0xff] }
 0x252   : > { %2634 = vmatmul.mubr.f32.vlgmr.msra.gmra.mrb[0].mxu0 %v7716_v32  ;;  %v5312_v29 = vpack.c.bf16 %v350_v19, %v342_v18  ;;  %v408_v18 = vld [vmem:[%s6817_s6 + $0x430] sm:$0xff] }
 0x253   : > { %3131 = vmatmul.mubr.f32.vlgmr.msra.gmra.mrb[0].mxu1 %v7716_v32  ;;  %5297 = vmatpush1.bf16.msra.mxu0 %v5296_v34  ;;  %v329_v32 = vld [vmem:[%s6817_s6 + $0x1b8] sm:$0xff]  ;;  %v5314_v34 = vpack.c.bf16 %v367_v24, %v359_v23  ;;  %v5776_v28 = vpack.c.bf16 %v416_v20, %v408_v18  ;;  %v480_v18 = vld [vmem:[%s6817_s6 + $0x670] sm:$0xff]  ;;  %v495_v20 = vld [vmem:[%s6817_s6 + $0x6e8] sm:$0xff] }
 0x254   : > { %5745 = vmatpush1.bf16.msra.mxu1 %v5744_v35  ;;  %5299 = vmatprep.subr.bf16.mxu0 %v5298_v41  ;;  %v5754_v9 = vpack.c.bf16 %v337_v1, %v329_v32  ;;  %v358_v35 = vld [vmem:[%s6817_s6 + $0x2a0] sm:$0xff]  ;;  %v5768_v1 = vpack.c.bf16 %v384_v58, %v376_v54  ;;  %v425_v23 = vld [vmem:[%s6817_s6 + $0x4b8] sm:$0xff]  ;;  %v448_v54 = vld [vmem:[%s6817_s6 + $0x570] sm:$0xff] }
 0x255   : > { %5747 = vmatprep.subr.bf16.mxu1 %v5746_v42  ;;  %3201 = vmatprep.mubr.f32.mxu0 %v6965_v33  ;;  %v366_v41 = vld [vmem:[%s6817_s6 + $0x2e0] sm:$0xff]  ;;  %v375_v42 = vld [vmem:[%s6817_s6 + $0x328] sm:$0xff]  ;;  %v433_v24 = vld [vmem:[%s6817_s6 + $0x4f8] sm:$0xff] }
 0x256   : > { %3698 = vmatprep.mubr.f32.mxu1 %v6965_v33  ;;  %v351_v33 = vld [vmem:[%s6817_s6 + $0x268] sm:$0xff]  ;;  %v5316_v47 = vpack.c.bf16 %v366_v41, %v358_v35  ;;  %v424_v35 = vld [vmem:[%s6817_s6 + $0x4b0] sm:$0xff]  ;;  %v5778_v41 = vpack.c.bf16 %v433_v24, %v425_v23 }
 0x257   : > { %5301 = vmatpush1.bf16.msra.mxu0 %v5300_v49  ;;  %v5310_v17 = vpack.c.bf16 %v351_v33, %v343_v11  ;;  %v5318_v49 = vpack.c.bf16 %v383_v43, %v375_v42  ;;  %v409_v11 = vld [vmem:[%s6817_s6 + $0x438] sm:$0xff]  ;;  %v5780_v45 = vpack.c.bf16 %v432_v36, %v424_v35  ;;  %v463_v58 = vld [vmem:[%s6817_s6 + $0x5e8] sm:$0xff]  ;;  %v496_v35 = vld [vmem:[%s6817_s6 + $0x6f0] sm:$0xff] }
 0x258   : > { %5749 = vmatpush1.bf16.msra.mxu1 %v5748_v51  ;;  %5303 = vmatprep.subr.bf16.mxu0 %v5302_v52  ;;  %v374_v51 = vld [vmem:[%s6817_s6 + $0x320] sm:$0xff]  ;;  %v417_v33 = vld [vmem:[%s6817_s6 + $0x478] sm:$0xff]  ;;  %v511_v36 = vld [vmem:[%s6817_s6 + $0x768] sm:$0xff] }
 0x259   : > { %5751 = vmatprep.subr.bf16.mxu1 %v5750_v59  ;;  %v382_v52 = vld [vmem:[%s6817_s6 + $0x360] sm:$0xff]  ;;  %v391_v59 = vld [vmem:[%s6817_s6 + $0x3a8] sm:$0xff]  ;;  %v5774_v19 = vpack.c.bf16 %v417_v33, %v409_v11  ;;  %v441_v42 = vld [vmem:[%s6817_s6 + $0x538] sm:$0xff] }
 0x25a   : > { %v5320_v32 = vpack.c.bf16 %v382_v52, %v374_v51  ;;  %v449_v43 = vld [vmem:[%s6817_s6 + $0x578] sm:$0xff]  ;;  %v440_v51 = vld [vmem:[%s6817_s6 + $0x530] sm:$0xff] }
 0x25b   : > { %5305 = vmatpush1.bf16.msra.mxu0 %v5304_v2  ;;  %v5322_v2 = vpack.c.bf16 %v399_v60, %v391_v59  ;;  %v5782_v52 = vpack.c.bf16 %v449_v43, %v441_v42  ;;  %v457_v59 = vld [vmem:[%s6817_s6 + $0x5b8] sm:$0xff]  ;;  %v5784_v62 = vpack.c.bf16 %v448_v54, %v440_v51  ;;  %v512_v51 = vld [vmem:[%s6817_s6 + $0x770] sm:$0xff]  ;;  %v527_v54 = vld [vmem:[%s6817_s6 + $0x7e8] sm:$0xff] }
 0x25c   : > { %5753 = vmatpush1.bf16.msra.mxu1 %v5752_v3  ;;  %5307 = vmatprep.subr.bf16.mxu0 %v5306_v4  ;;  %v390_v3 = vld [vmem:[%s6817_s6 + $0x3a0] sm:$0xff]  ;;  %v465_v60 = vld [vmem:[%s6817_s6 + $0x5f8] sm:$0xff] }
 0x25d   : > { %5755 = vmatprep.subr.bf16.mxu1 %v5754_v9  ;;  %v398_v4 = vld [vmem:[%s6817_s6 + $0x3e0] sm:$0xff]  ;;  %v407_v9 = vld [vmem:[%s6817_s6 + $0x428] sm:$0xff] }
 0x25e   : > { %v5324_v50 = vpack.c.bf16 %v398_v4, %v390_v3  ;;  %v456_v3 = vld [vmem:[%s6817_s6 + $0x5b0] sm:$0xff]  ;;  %v5786_v4 = vpack.c.bf16 %v465_v60, %v457_v59 }
 0x25f   : > { %5309 = vmatpush1.bf16.msra.mxu0 %v5308_v14  ;;  %v5326_v14 = vpack.c.bf16 %v415_v10, %v407_v9  ;;  %v473_v9 = vld [vmem:[%s6817_s6 + $0x638] sm:$0xff]  ;;  %v5788_v33 = vpack.c.bf16 %v464_v6, %v456_v3  ;;  %v528_v3 = vld [vmem:[%s6817_s6 + $0x7f0] sm:$0xff]  ;;  %v543_v6 = vld [vmem:[%s6817_s6 + $0x868] sm:$0xff] }
 0x260   : > { %5757 = vmatpush1.bf16.msra.mxu1 %v5756_v16  ;;  %5311 = vmatprep.subr.bf16.mxu0 %v5310_v17  ;;  %v406_v16 = vld [vmem:[%s6817_s6 + $0x420] sm:$0xff]  ;;  %v481_v10 = vld [vmem:[%s6817_s6 + $0x678] sm:$0xff] }
 0x261   : > { %5759 = vmatprep.subr.bf16.mxu1 %v5758_v21  ;;  %v414_v17 = vld [vmem:[%s6817_s6 + $0x460] sm:$0xff]  ;;  %v423_v21 = vld [vmem:[%s6817_s6 + $0x4a8] sm:$0xff] }
 0x262   : > { %v5328_v27 = vpack.c.bf16 %v414_v17, %v406_v16  ;;  %v472_v16 = vld [vmem:[%s6817_s6 + $0x630] sm:$0xff]  ;;  %v5790_v17 = vpack.c.bf16 %v481_v10, %v473_v9 }
 0x263   : > { %5313 = vmatpush1.bf16.msra.mxu0 %v5312_v29  ;;  %v5330_v29 = vpack.c.bf16 %v431_v22, %v423_v21  ;;  %v489_v21 = vld [vmem:[%s6817_s6 + $0x6b8] sm:$0xff]  ;;  %v5792_v24 = vpack.c.bf16 %v480_v18, %v472_v16  ;;  %v544_v16 = vld [vmem:[%s6817_s6 + $0x870] sm:$0xff]  ;;  %v559_v18 = vld [vmem:[%s6817_s6 + $0x8e8] sm:$0xff] }
 0x264   : > { %5761 = vmatpush1.bf16.msra.mxu1 %v5760_v31  ;;  %5315 = vmatprep.subr.bf16.mxu0 %v5314_v34  ;;  %v422_v31 = vld [vmem:[%s6817_s6 + $0x4a0] sm:$0xff]  ;;  %v497_v22 = vld [vmem:[%s6817_s6 + $0x6f8] sm:$0xff] }
 0x265   : > { %5763 = vmatprep.subr.bf16.mxu1 %v5762_v37  ;;  %v430_v34 = vld [vmem:[%s6817_s6 + $0x4e0] sm:$0xff]  ;;  %v439_v37 = vld [vmem:[%s6817_s6 + $0x528] sm:$0xff] }
 0x266   : > { %v5332_v44 = vpack.c.bf16 %v430_v34, %v422_v31  ;;  %v488_v31 = vld [vmem:[%s6817_s6 + $0x6b0] sm:$0xff]  ;;  %v5794_v34 = vpack.c.bf16 %v497_v22, %v489_v21 }
 0x267   : > { %5317 = vmatpush1.bf16.msra.mxu0 %v5316_v47  ;;  %v5334_v47 = vpack.c.bf16 %v447_v39, %v439_v37  ;;  %v505_v37 = vld [vmem:[%s6817_s6 + $0x738] sm:$0xff]  ;;  %v5796_v43 = vpack.c.bf16 %v496_v35, %v488_v31  ;;  %v560_v31 = vld [vmem:[%s6817_s6 + $0x8f0] sm:$0xff]  ;;  %v575_v35 = vld [vmem:[%s6817_s6 + $0x968] sm:$0xff] }
 0x268   : > { %5765 = vmatpush1.bf16.msra.mxu1 %v5764_v48  ;;  %5319 = vmatprep.subr.bf16.mxu0 %v5318_v49  ;;  %v438_v48 = vld [vmem:[%s6817_s6 + $0x520] sm:$0xff]  ;;  %v513_v39 = vld [vmem:[%s6817_s6 + $0x778] sm:$0xff] }
 0x269   : > { %5767 = vmatprep.subr.bf16.mxu1 %v5766_v57  ;;  %v446_v49 = vld [vmem:[%s6817_s6 + $0x560] sm:$0xff]  ;;  %v455_v57 = vld [vmem:[%s6817_s6 + $0x5a8] sm:$0xff] }
 0x26a   : > { %v5336_v61 = vpack.c.bf16 %v446_v49, %v438_v48  ;;  %v504_v48 = vld [vmem:[%s6817_s6 + $0x730] sm:$0xff]  ;;  %v5798_v49 = vpack.c.bf16 %v513_v39, %v505_v37 }
 0x26b   : > { %5321 = vmatpush1.bf16.msra.mxu0 %v5320_v32  ;;  %v5338_v32 = vpack.c.bf16 %v463_v58, %v455_v57  ;;  %v521_v57 = vld [vmem:[%s6817_s6 + $0x7b8] sm:$0xff]  ;;  %v5800_v60 = vpack.c.bf16 %v512_v51, %v504_v48  ;;  %v576_v48 = vld [vmem:[%s6817_s6 + $0x970] sm:$0xff]  ;;  %v591_v51 = vld [vmem:[%s6817_s6 + $0x9e8] sm:$0xff] }
 0x26c   : > { %5769 = vmatpush1.bf16.msra.mxu1 %v5768_v1  ;;  %5323 = vmatprep.subr.bf16.mxu0 %v5322_v2  ;;  %v454_v1 = vld [vmem:[%s6817_s6 + $0x5a0] sm:$0xff]  ;;  %v529_v58 = vld [vmem:[%s6817_s6 + $0x7f8] sm:$0xff] }
 0x26d   : > { %5771 = vmatprep.subr.bf16.mxu1 %v5770_v7  ;;  %v462_v2 = vld [vmem:[%s6817_s6 + $0x5e0] sm:$0xff]  ;;  %v471_v7 = vld [vmem:[%s6817_s6 + $0x628] sm:$0xff] }
 0x26e   : > { %v5340_v11 = vpack.c.bf16 %v462_v2, %v454_v1  ;;  %v520_v1 = vld [vmem:[%s6817_s6 + $0x7b0] sm:$0xff]  ;;  %v5802_v2 = vpack.c.bf16 %v529_v58, %v521_v57 }
 0x26f   : > { %5325 = vmatpush1.bf16.msra.mxu0 %v5324_v50  ;;  %v5342_v50 = vpack.c.bf16 %v479_v8, %v471_v7  ;;  %v537_v7 = vld [vmem:[%s6817_s6 + $0x838] sm:$0xff]  ;;  %v5804_v10 = vpack.c.bf16 %v528_v3, %v520_v1  ;;  %v599_v1 = vld [vmem:[%s6817_s6 + $0xa28] sm:$0xff] }
 0x270   : > { %5773 = vmatpush1.bf16.msra.mxu1 %v5772_v13  ;;  %5327 = vmatprep.subr.bf16.mxu0 %v5326_v14  ;;  %v470_v13 = vld [vmem:[%s6817_s6 + $0x620] sm:$0xff]  ;;  %v545_v8 = vld [vmem:[%s6817_s6 + $0x878] sm:$0xff] }
 0x271   : > { %5775 = vmatprep.subr.bf16.mxu1 %v5774_v19  ;;  %v478_v14 = vld [vmem:[%s6817_s6 + $0x660] sm:$0xff]  ;;  %v487_v19 = vld [vmem:[%s6817_s6 + $0x6a8] sm:$0xff]  ;;  %v609_v3 = vld [vmem:[%s6817_s6 + $0xa78] sm:$0xff] }
 0x272   : > { %v5344_v23 = vpack.c.bf16 %v478_v14, %v470_v13  ;;  %v536_v13 = vld [vmem:[%s6817_s6 + $0x830] sm:$0xff]  ;;  %v5806_v14 = vpack.c.bf16 %v545_v8, %v537_v7  ;;  %v598_v8 = vld [vmem:[%s6817_s6 + $0xa20] sm:$0xff] }
 0x273   : > { %5329 = vmatpush1.bf16.msra.mxu0 %v5328_v27  ;;  %v5346_v27 = vpack.c.bf16 %v495_v20, %v487_v19  ;;  %v553_v19 = vld [vmem:[%s6817_s6 + $0x8b8] sm:$0xff]  ;;  %v5808_v22 = vpack.c.bf16 %v544_v16, %v536_v13  ;;  %v623_v13 = vld [vmem:[%s6817_s6 + $0xae8] sm:$0xff] }
 0x274   : > { %5777 = vmatpush1.bf16.msra.mxu1 %v5776_v28  ;;  %5331 = vmatprep.subr.bf16.mxu0 %v5330_v29  ;;  %v486_v28 = vld [vmem:[%s6817_s6 + $0x6a0] sm:$0xff]  ;;  %v561_v20 = vld [vmem:[%s6817_s6 + $0x8f8] sm:$0xff] }
 0x275   : > { %5779 = vmatprep.subr.bf16.mxu1 %v5778_v41  ;;  %v494_v29 = vld [vmem:[%s6817_s6 + $0x6e0] sm:$0xff]  ;;  %v503_v41 = vld [vmem:[%s6817_s6 + $0x728] sm:$0xff]  ;;  %v625_v16 = vld [vmem:[%s6817_s6 + $0xaf8] sm:$0xff] }
 0x276   : > { %v5348_v42 = vpack.c.bf16 %v494_v29, %v486_v28  ;;  %v552_v28 = vld [vmem:[%s6817_s6 + $0x8b0] sm:$0xff]  ;;  %v5810_v29 = vpack.c.bf16 %v561_v20, %v553_v19  ;;  %v614_v20 = vld [vmem:[%s6817_s6 + $0xaa0] sm:$0xff] }
 0x277   : > { %5333 = vmatpush1.bf16.msra.mxu0 %v5332_v44  ;;  %v5350_v44 = vpack.c.bf16 %v511_v36, %v503_v41  ;;  %v569_v41 = vld [vmem:[%s6817_s6 + $0x938] sm:$0xff]  ;;  %v5812_v39 = vpack.c.bf16 %v560_v31, %v552_v28  ;;  %v639_v28 = vld [vmem:[%s6817_s6 + $0xb68] sm:$0xff] }
 0x278   : > { %5781 = vmatpush1.bf16.msra.mxu1 %v5780_v45  ;;  %5335 = vmatprep.subr.bf16.mxu0 %v5334_v47  ;;  %v502_v45 = vld [vmem:[%s6817_s6 + $0x720] sm:$0xff]  ;;  %v577_v36 = vld [vmem:[%s6817_s6 + $0x978] sm:$0xff] }
 0x279   : > { %5783 = vmatprep.subr.bf16.mxu1 %v5782_v52  ;;  %v510_v47 = vld [vmem:[%s6817_s6 + $0x760] sm:$0xff]  ;;  %v519_v52 = vld [vmem:[%s6817_s6 + $0x7a8] sm:$0xff]  ;;  %v641_v31 = vld [vmem:[%s6817_s6 + $0xb78] sm:$0xff] }
 0x27a   : > { %v5352_v59 = vpack.c.bf16 %v510_v47, %v502_v45  ;;  %v568_v45 = vld [vmem:[%s6817_s6 + $0x930] sm:$0xff]  ;;  %v5814_v47 = vpack.c.bf16 %v577_v36, %v569_v41  ;;  %v630_v36 = vld [vmem:[%s6817_s6 + $0xb20] sm:$0xff] }
 0x27b   : > { %5337 = vmatpush1.bf16.msra.mxu0 %v5336_v61  ;;  %v5354_v61 = vpack.c.bf16 %v527_v54, %v519_v52  ;;  %v593_v52 = vld [vmem:[%s6817_s6 + $0x9f8] sm:$0xff]  ;;  %v5816_v57 = vpack.c.bf16 %v576_v48, %v568_v45  ;;  %v655_v45 = vld [vmem:[%s6817_s6 + $0xbe8] sm:$0xff] }
 0x27c   : > { %5785 = vmatpush1.bf16.msra.mxu1 %v5784_v62  ;;  %5339 = vmatprep.subr.bf16.mxu0 %v5338_v32  ;;  %v518_v62 = vld [vmem:[%s6817_s6 + $0x7a0] sm:$0xff]  ;;  %v657_v48 = vld [vmem:[%s6817_s6 + $0xbf8] sm:$0xff] }
 0x27d   : > { %5787 = vmatprep.subr.bf16.mxu1 %v5786_v4  ;;  %v526_v32 = vld [vmem:[%s6817_s6 + $0x7e0] sm:$0xff]  ;;  %v535_v4 = vld [vmem:[%s6817_s6 + $0x828] sm:$0xff] }
 0x27e   : > { %v5356_v9 = vpack.c.bf16 %v526_v32, %v518_v62  ;;  %v592_v32 = vld [vmem:[%s6817_s6 + $0x9f0] sm:$0xff] }
 0x27f   : > { %5341 = vmatpush1.bf16.msra.mxu0 %v5340_v11  ;;  %v5358_v11 = vpack.c.bf16 %v543_v6, %v535_v4 }
 0x280   : > { %5789 = vmatpush1.bf16.msra.mxu1 %v5788_v33  ;;  %5343 = vmatprep.subr.bf16.mxu0 %v5342_v50  ;;  %v534_v33 = vld [vmem:[%s6817_s6 + $0x820] sm:$0xff] }
 0x281   : > { %5791 = vmatprep.subr.bf16.mxu1 %v5790_v17  ;;  %v542_v50 = vld [vmem:[%s6817_s6 + $0x860] sm:$0xff]  ;;  %v551_v17 = vld [vmem:[%s6817_s6 + $0x8a8] sm:$0xff] }
 0x282   : > { %v5360_v21 = vpack.c.bf16 %v542_v50, %v534_v33  ;;  %v608_v33 = vld [vmem:[%s6817_s6 + $0xa70] sm:$0xff]  ;;  %v615_v50 = vld [vmem:[%s6817_s6 + $0xaa8] sm:$0xff] }
 0x283   : > { %5345 = vmatpush1.bf16.msra.mxu0 %v5344_v23  ;;  %v5362_v23 = vpack.c.bf16 %v559_v18, %v551_v17  ;;  %v5378_v19 = vpack.c.bf16 %v623_v13, %v615_v50 }
 0x284   : > { %5793 = vmatpush1.bf16.msra.mxu1 %v5792_v24  ;;  %5347 = vmatprep.subr.bf16.mxu0 %v5346_v27  ;;  %v550_v24 = vld [vmem:[%s6817_s6 + $0x8a0] sm:$0xff] }
 0x285   : > { %5795 = vmatprep.subr.bf16.mxu1 %v5794_v34  ;;  %v558_v27 = vld [vmem:[%s6817_s6 + $0x8e0] sm:$0xff]  ;;  %v567_v34 = vld [vmem:[%s6817_s6 + $0x928] sm:$0xff] }
 0x286   : > { %v5364_v37 = vpack.c.bf16 %v558_v27, %v550_v24  ;;  %v624_v24 = vld [vmem:[%s6817_s6 + $0xaf0] sm:$0xff]  ;;  %v631_v27 = vld [vmem:[%s6817_s6 + $0xb28] sm:$0xff] }
 0x287   : > { %5349 = vmatpush1.bf16.msra.mxu0 %v5348_v42  ;;  %v5366_v42 = vpack.c.bf16 %v575_v35, %v567_v34  ;;  %v5382_v41 = vpack.c.bf16 %v639_v28, %v631_v27 }
 0x288   : > { %5797 = vmatpush1.bf16.msra.mxu1 %v5796_v43  ;;  %5351 = vmatprep.subr.bf16.mxu0 %v5350_v44  ;;  %v566_v43 = vld [vmem:[%s6817_s6 + $0x920] sm:$0xff] }
 0x289   : > { %5799 = vmatprep.subr.bf16.mxu1 %v5798_v49  ;;  %v574_v44 = vld [vmem:[%s6817_s6 + $0x960] sm:$0xff]  ;;  %v583_v49 = vld [vmem:[%s6817_s6 + $0x9a8] sm:$0xff] }
 0x28a   : > { %v5368_v54 = vpack.c.bf16 %v574_v44, %v566_v43  ;;  %v5370_v58 = vpack.c.bf16 %v591_v51, %v583_v49  ;;  %v640_v43 = vld [vmem:[%s6817_s6 + $0xb70] sm:$0xff]  ;;  %v647_v44 = vld [vmem:[%s6817_s6 + $0xba8] sm:$0xff] }
 0x28b   : > { %5353 = vmatpush1.bf16.msra.mxu0 %v5352_v59  ;;  %v582_v59 = vld [vmem:[%s6817_s6 + $0x9a0] sm:$0xff] }
 0x28c   : > { %5801 = vmatpush1.bf16.msra.mxu1 %v5800_v60  ;;  %5355 = vmatprep.subr.bf16.mxu0 %v5354_v61  ;;  %v590_v60 = vld [vmem:[%s6817_s6 + $0x9e0] sm:$0xff]  ;;  %v584_v61 = vld [vmem:[%s6817_s6 + $0x9b0] sm:$0xff] }
 0x28d   : > { %5803 = vmatprep.subr.bf16.mxu1 %v5802_v2  ;;  %v601_v2 = vld [vmem:[%s6817_s6 + $0xa38] sm:$0xff]  ;;  %v5372_v4 = vpack.c.bf16 %v590_v60, %v582_v59  ;;  %v5820_v6 = vpack.c.bf16 %v592_v32, %v584_v61  ;;  %v656_v59 = vld [vmem:[%s6817_s6 + $0xbf0] sm:$0xff]  ;;  %v663_v60 = vld [vmem:[%s6817_s6 + $0xc28] sm:$0xff] }
 0x28e   : > { %v671_v61 = vld [vmem:[%s6817_s6 + $0xc68] sm:$0xff]  ;;  %v673_v32 = vld [vmem:[%s6817_s6 + $0xc78] sm:$0xff] }
 0x28f   : > { %5357 = vmatpush1.bf16.msra.mxu0 %v5356_v9  ;;  %v606_v9 = vld [vmem:[%s6817_s6 + $0xa60] sm:$0xff] }
 0x290   : > { %5805 = vmatpush1.bf16.msra.mxu1 %v5804_v10  ;;  %5359 = vmatprep.subr.bf16.mxu0 %v5358_v11  ;;  %v600_v10 = vld [vmem:[%s6817_s6 + $0xa30] sm:$0xff]  ;;  %v5822_v11 = vpack.c.bf16 %v609_v3, %v601_v2  ;;  %v5376_v17 = vpack.c.bf16 %v606_v9, %v598_v8  ;;  %v5390_v2 = vpack.c.bf16 %v671_v61, %v663_v60  ;;  %v662_v3 = vld [vmem:[%s6817_s6 + $0xc20] sm:$0xff]  ;;  %v679_v9 = vld [vmem:[%s6817_s6 + $0xca8] sm:$0xff] }
 0x291   : > { %5807 = vmatprep.subr.bf16.mxu1 %v5806_v14  ;;  %v617_v14 = vld [vmem:[%s6817_s6 + $0xab8] sm:$0xff]  ;;  %v5824_v18 = vpack.c.bf16 %v608_v33, %v600_v10  ;;  %v672_v8 = vld [vmem:[%s6817_s6 + $0xc70] sm:$0xff]  ;;  %v687_v10 = vld [vmem:[%s6817_s6 + $0xce8] sm:$0xff] }
 0x292   : > { %3202 = vmatmul.mubr.f32.vlgmr.msra.gmra.mrb[2].mxu0 %v6958_v26  ;;  %v689_v33 = vld [vmem:[%s6817_s6 + $0xcf8] sm:$0xff] }
 0x293   : > { %5361 = vmatpush1.bf16.msra.mxu0 %v5360_v21  ;;  %3699 = vmatmul.mubr.f32.vlgmr.msra.gmra.mrb[2].mxu1 %v6958_v26  ;;  %v585_v26 = vld [vmem:[%s6817_s6 + $0x9b8] sm:$0xff]  ;;  %v622_v21 = vld [vmem:[%s6817_s6 + $0xae0] sm:$0xff] }
 0x294   : > { %5809 = vmatpush1.bf16.msra.mxu1 %v5808_v22  ;;  %5363 = vmatprep.subr.bf16.mxu0 %v5362_v23  ;;  %v5818_v62 = vpack.c.bf16 %v593_v52, %v585_v26  ;;  %v616_v22 = vld [vmem:[%s6817_s6 + $0xab0] sm:$0xff]  ;;  %v5826_v23 = vpack.c.bf16 %v625_v16, %v617_v14  ;;  %v5380_v34 = vpack.c.bf16 %v622_v21, %v614_v20  ;;  %v646_v52 = vld [vmem:[%s6817_s6 + $0xba0] sm:$0xff]  ;;  %v695_v21 = vld [vmem:[%s6817_s6 + $0xd28] sm:$0xff] }
 0x295   : > { %5811 = vmatprep.subr.bf16.mxu1 %v5810_v29  ;;  %3272 = vmatprep.mubr.f32.mxu0 %v7019_v40  ;;  %v633_v29 = vld [vmem:[%s6817_s6 + $0xb38] sm:$0xff]  ;;  %v5828_v35 = vpack.c.bf16 %v624_v24, %v616_v22  ;;  %v5386_v26 = vpack.c.bf16 %v655_v45, %v647_v44  ;;  %v5394_v14 = vpack.c.bf16 %v687_v10, %v679_v9  ;;  %v678_v16 = vld [vmem:[%s6817_s6 + $0xca0] sm:$0xff]  ;;  %v688_v20 = vld [vmem:[%s6817_s6 + $0xcf0] sm:$0xff] }
 0x296   : > { %3769 = vmatprep.mubr.f32.mxu1 %v7019_v40  ;;  %v607_v40 = vld [vmem:[%s6817_s6 + $0xa68] sm:$0xff]  ;;  %v705_v24 = vld [vmem:[%s6817_s6 + $0xd78] sm:$0xff] }
 0x297   : > { %5365 = vmatpush1.bf16.msra.mxu0 %v5364_v37  ;;  %v5374_v7 = vpack.c.bf16 %v607_v40, %v599_v1  ;;  %v638_v37 = vld [vmem:[%s6817_s6 + $0xb60] sm:$0xff]  ;;  %v703_v22 = vld [vmem:[%s6817_s6 + $0xd68] sm:$0xff] }
 0x298   : > { %5813 = vmatpush1.bf16.msra.mxu1 %v5812_v39  ;;  %5367 = vmatprep.subr.bf16.mxu0 %v5366_v42  ;;  %v632_v39 = vld [vmem:[%s6817_s6 + $0xb30] sm:$0xff]  ;;  %v5830_v42 = vpack.c.bf16 %v641_v31, %v633_v29  ;;  %v5384_v49 = vpack.c.bf16 %v638_v37, %v630_v36  ;;  %v5398_v29 = vpack.c.bf16 %v703_v22, %v695_v21  ;;  %v694_v31 = vld [vmem:[%s6817_s6 + $0xd20] sm:$0xff]  ;;  %v711_v37 = vld [vmem:[%s6817_s6 + $0xda8] sm:$0xff] }
 0x299   : > { %5815 = vmatprep.subr.bf16.mxu1 %v5814_v47  ;;  %v649_v47 = vld [vmem:[%s6817_s6 + $0xbb8] sm:$0xff]  ;;  %v5832_v51 = vpack.c.bf16 %v640_v43, %v632_v39  ;;  %v704_v36 = vld [vmem:[%s6817_s6 + $0xd70] sm:$0xff]  ;;  %v719_v39 = vld [vmem:[%s6817_s6 + $0xde8] sm:$0xff] }
 0x29a   : > { %v721_v43 = vld [vmem:[%s6817_s6 + $0xdf8] sm:$0xff] }
 0x29b   : > { %5369 = vmatpush1.bf16.msra.mxu0 %v5368_v54  ;;  %v654_v54 = vld [vmem:[%s6817_s6 + $0xbe0] sm:$0xff] }
 0x29c   : > { %5817 = vmatpush1.bf16.msra.mxu1 %v5816_v57  ;;  %5371 = vmatprep.subr.bf16.mxu0 %v5370_v58  ;;  %v648_v57 = vld [vmem:[%s6817_s6 + $0xbb0] sm:$0xff]  ;;  %v5834_v58 = vpack.c.bf16 %v657_v48, %v649_v47  ;;  %v5388_v1 = vpack.c.bf16 %v654_v54, %v646_v52  ;;  %v5402_v47 = vpack.c.bf16 %v719_v39, %v711_v37  ;;  %v710_v48 = vld [vmem:[%s6817_s6 + $0xda0] sm:$0xff]  ;;  %v727_v54 = vld [vmem:[%s6817_s6 + $0xe28] sm:$0xff] }
 0x29d   : > { %5819 = vmatprep.subr.bf16.mxu1 %v5818_v62  ;;  %v665_v62 = vld [vmem:[%s6817_s6 + $0xc38] sm:$0xff]  ;;  %v5836_v40 = vpack.c.bf16 %v656_v59, %v648_v57  ;;  %v720_v52 = vld [vmem:[%s6817_s6 + $0xdf0] sm:$0xff]  ;;  %v735_v57 = vld [vmem:[%s6817_s6 + $0xe68] sm:$0xff] }
 0x29e   : > { %v737_v59 = vld [vmem:[%s6817_s6 + $0xe78] sm:$0xff] }
 0x29f   : > { %5373 = vmatpush1.bf16.msra.mxu0 %v5372_v4  ;;  %v670_v4 = vld [vmem:[%s6817_s6 + $0xc60] sm:$0xff] }
 0x2a0   : > { %5821 = vmatpush1.bf16.msra.mxu1 %v5820_v6  ;;  %5375 = vmatprep.subr.bf16.mxu0 %v5374_v7  ;;  %v664_v6 = vld [vmem:[%s6817_s6 + $0xc30] sm:$0xff]  ;;  %v5838_v7 = vpack.c.bf16 %v673_v32, %v665_v62  ;;  %v5392_v50 = vpack.c.bf16 %v670_v4, %v662_v3  ;;  %v5406_v62 = vpack.c.bf16 %v735_v57, %v727_v54  ;;  %v726_v32 = vld [vmem:[%s6817_s6 + $0xe20] sm:$0xff]  ;;  %v743_v4 = vld [vmem:[%s6817_s6 + $0xea8] sm:$0xff] }
 0x2a1   : > { %5823 = vmatprep.subr.bf16.mxu1 %v5822_v11  ;;  %v681_v11 = vld [vmem:[%s6817_s6 + $0xcb8] sm:$0xff]  ;;  %v5840_v13 = vpack.c.bf16 %v672_v8, %v664_v6  ;;  %v736_v3 = vld [vmem:[%s6817_s6 + $0xe70] sm:$0xff]  ;;  %v751_v6 = vld [vmem:[%s6817_s6 + $0xee8] sm:$0xff] }
 0x2a2   : > { %v753_v8 = vld [vmem:[%s6817_s6 + $0xef8] sm:$0xff] }
 0x2a3   : > { %5377 = vmatpush1.bf16.msra.mxu0 %v5376_v17  ;;  %v686_v17 = vld [vmem:[%s6817_s6 + $0xce0] sm:$0xff] }
 0x2a4   : > { %5825 = vmatpush1.bf16.msra.mxu1 %v5824_v18  ;;  %5379 = vmatprep.subr.bf16.mxu0 %v5378_v19  ;;  %v680_v18 = vld [vmem:[%s6817_s6 + $0xcb0] sm:$0xff]  ;;  %v5842_v19 = vpack.c.bf16 %v689_v33, %v681_v11  ;;  %v5396_v27 = vpack.c.bf16 %v686_v17, %v678_v16  ;;  %v5410_v11 = vpack.c.bf16 %v751_v6, %v743_v4  ;;  %v742_v33 = vld [vmem:[%s6817_s6 + $0xea0] sm:$0xff]  ;;  %v759_v17 = vld [vmem:[%s6817_s6 + $0xf28] sm:$0xff] }
 0x2a5   : > { %5827 = vmatprep.subr.bf16.mxu1 %v5826_v23  ;;  %v697_v23 = vld [vmem:[%s6817_s6 + $0xd38] sm:$0xff]  ;;  %v5844_v28 = vpack.c.bf16 %v688_v20, %v680_v18  ;;  %v752_v16 = vld [vmem:[%s6817_s6 + $0xef0] sm:$0xff]  ;;  %v767_v18 = vld [vmem:[%s6817_s6 + $0xf68] sm:$0xff] }
 0x2a6   : > { %v769_v20 = vld [vmem:[%s6817_s6 + $0xf78] sm:$0xff] }
 0x2a7   : > { %5381 = vmatpush1.bf16.msra.mxu0 %v5380_v34  ;;  %v702_v34 = vld [vmem:[%s6817_s6 + $0xd60] sm:$0xff] }
 0x2a8   : > { %5829 = vmatpush1.bf16.msra.mxu1 %v5828_v35  ;;  %5383 = vmatprep.subr.bf16.mxu0 %v5382_v41  ;;  %v696_v35 = vld [vmem:[%s6817_s6 + $0xd30] sm:$0xff]  ;;  %v5846_v41 = vpack.c.bf16 %v705_v24, %v697_v23  ;;  %v5400_v44 = vpack.c.bf16 %v702_v34, %v694_v31  ;;  %v5414_v23 = vpack.c.bf16 %v767_v18, %v759_v17  ;;  %v758_v24 = vld [vmem:[%s6817_s6 + $0xf20] sm:$0xff]  ;;  %v775_v34 = vld [vmem:[%s6817_s6 + $0xfa8] sm:$0xff] }
 0x2a9   : > { %5831 = vmatprep.subr.bf16.mxu1 %v5830_v42  ;;  %v713_v42 = vld [vmem:[%s6817_s6 + $0xdb8] sm:$0xff]  ;;  %v5848_v45 = vpack.c.bf16 %v704_v36, %v696_v35  ;;  %v768_v31 = vld [vmem:[%s6817_s6 + $0xf70] sm:$0xff]  ;;  %v783_v35 = vld [vmem:[%s6817_s6 + $0xfe8] sm:$0xff] }
 0x2aa   : > { %v785_v36 = vld [vmem:[%s6817_s6 + $0xff8] sm:$0xff] }
 0x2ab   : > { %5385 = vmatpush1.bf16.msra.mxu0 %v5384_v49  ;;  %v718_v49 = vld [vmem:[%s6817_s6 + $0xde0] sm:$0xff] }
 0x2ac   : > { %5833 = vmatpush1.bf16.msra.mxu1 %v5832_v51  ;;  %5387 = vmatprep.subr.bf16.mxu0 %v5386_v26  ;;  %v712_v51 = vld [vmem:[%s6817_s6 + $0xdb0] sm:$0xff]  ;;  %v5850_v26 = vpack.c.bf16 %v721_v43, %v713_v42  ;;  %v5404_v60 = vpack.c.bf16 %v718_v49, %v710_v48  ;;  %v5418_v42 = vpack.c.bf16 %v783_v35, %v775_v34  ;;  %v774_v43 = vld [vmem:[%s6817_s6 + $0xfa0] sm:$0xff]  ;;  %v791_v49 = vld [vmem:[%s6817_s6 + $0x1028] sm:$0xff] }
 0x2ad   : > { %5835 = vmatprep.subr.bf16.mxu1 %v5834_v58  ;;  %v729_v58 = vld [vmem:[%s6817_s6 + $0xe38] sm:$0xff]  ;;  %v5852_v61 = vpack.c.bf16 %v720_v52, %v712_v51  ;;  %v784_v48 = vld [vmem:[%s6817_s6 + $0xff0] sm:$0xff]  ;;  %v799_v51 = vld [vmem:[%s6817_s6 + $0x1068] sm:$0xff] }
 0x2ae   : > { %v801_v52 = vld [vmem:[%s6817_s6 + $0x1078] sm:$0xff] }
 0x2af   : > { %5389 = vmatpush1.bf16.msra.mxu0 %v5388_v1  ;;  %v734_v1 = vld [vmem:[%s6817_s6 + $0xe60] sm:$0xff] }
 0x2b0   : > { %5837 = vmatpush1.bf16.msra.mxu1 %v5836_v40  ;;  %5391 = vmatprep.subr.bf16.mxu0 %v5390_v2  ;;  %v728_v40 = vld [vmem:[%s6817_s6 + $0xe30] sm:$0xff]  ;;  %v5854_v2 = vpack.c.bf16 %v737_v59, %v729_v58  ;;  %v5408_v9 = vpack.c.bf16 %v734_v1, %v726_v32  ;;  %v5422_v58 = vpack.c.bf16 %v799_v51, %v791_v49  ;;  %v790_v59 = vld [vmem:[%s6817_s6 + $0x1020] sm:$0xff]  ;;  %v807_v1 = vld [vmem:[%s6817_s6 + $0x10a8] sm:$0xff] }
 0x2b1   : > { %5839 = vmatprep.subr.bf16.mxu1 %v5838_v7  ;;  %v745_v7 = vld [vmem:[%s6817_s6 + $0xeb8] sm:$0xff]  ;;  %v5856_v10 = vpack.c.bf16 %v736_v3, %v728_v40  ;;  %v800_v32 = vld [vmem:[%s6817_s6 + $0x1070] sm:$0xff]  ;;  %v815_v40 = vld [vmem:[%s6817_s6 + $0x10e8] sm:$0xff] }
 0x2b2   : > { %v817_v3 = vld [vmem:[%s6817_s6 + $0x10f8] sm:$0xff]  ;;  %v854_v51 = vld [vmem:[%s6817_s6 + $0x1220] sm:$0xff] }
 0x2b3   : > { %5393 = vmatpush1.bf16.msra.mxu0 %v5392_v50  ;;  %v750_v50 = vld [vmem:[%s6817_s6 + $0xee0] sm:$0xff] }
 0x2b4   : > { %5841 = vmatpush1.bf16.msra.mxu1 %v5840_v13  ;;  %5395 = vmatprep.subr.bf16.mxu0 %v5394_v14  ;;  %v744_v13 = vld [vmem:[%s6817_s6 + $0xeb0] sm:$0xff]  ;;  %v5858_v14 = vpack.c.bf16 %v753_v8, %v745_v7  ;;  %v5412_v21 = vpack.c.bf16 %v750_v50, %v742_v33  ;;  %v5426_v7 = vpack.c.bf16 %v815_v40, %v807_v1  ;;  %v806_v8 = vld [vmem:[%s6817_s6 + $0x10a0] sm:$0xff]  ;;  %v823_v50 = vld [vmem:[%s6817_s6 + $0x1128] sm:$0xff] }
 0x2b5   : > { %5843 = vmatprep.subr.bf16.mxu1 %v5842_v19  ;;  %v761_v19 = vld [vmem:[%s6817_s6 + $0xf38] sm:$0xff]  ;;  %v5860_v22 = vpack.c.bf16 %v752_v16, %v744_v13  ;;  %v816_v33 = vld [vmem:[%s6817_s6 + $0x10f0] sm:$0xff]  ;;  %v831_v13 = vld [vmem:[%s6817_s6 + $0x1168] sm:$0xff] }
 0x2b6   : > { %v833_v16 = vld [vmem:[%s6817_s6 + $0x1178] sm:$0xff]  ;;  %v870_v40 = vld [vmem:[%s6817_s6 + $0x12a0] sm:$0xff] }
 0x2b7   : > { %5397 = vmatpush1.bf16.msra.mxu0 %v5396_v27  ;;  %v766_v27 = vld [vmem:[%s6817_s6 + $0xf60] sm:$0xff] }
 0x2b8   : > { %5845 = vmatpush1.bf16.msra.mxu1 %v5844_v28  ;;  %5399 = vmatprep.subr.bf16.mxu0 %v5398_v29  ;;  %v760_v28 = vld [vmem:[%s6817_s6 + $0xf30] sm:$0xff]  ;;  %v5862_v29 = vpack.c.bf16 %v769_v20, %v761_v19  ;;  %v5416_v37 = vpack.c.bf16 %v766_v27, %v758_v24  ;;  %v5430_v19 = vpack.c.bf16 %v831_v13, %v823_v50  ;;  %v822_v20 = vld [vmem:[%s6817_s6 + $0x1120] sm:$0xff]  ;;  %v839_v27 = vld [vmem:[%s6817_s6 + $0x11a8] sm:$0xff] }
 0x2b9   : > { %5847 = vmatprep.subr.bf16.mxu1 %v5846_v41  ;;  %v777_v41 = vld [vmem:[%s6817_s6 + $0xfb8] sm:$0xff]  ;;  %v5864_v39 = vpack.c.bf16 %v768_v31, %v760_v28  ;;  %v832_v24 = vld [vmem:[%s6817_s6 + $0x1170] sm:$0xff]  ;;  %v847_v28 = vld [vmem:[%s6817_s6 + $0x11e8] sm:$0xff] }
 0x2ba   : > { %v5434_v35 = vpack.c.bf16 %v847_v28, %v839_v27  ;;  %v886_v13 = vld [vmem:[%s6817_s6 + $0x1320] sm:$0xff] }
 0x2bb   : > { %5401 = vmatpush1.bf16.msra.mxu0 %v5400_v44  ;;  %v782_v44 = vld [vmem:[%s6817_s6 + $0xfe0] sm:$0xff] }
 0x2bc   : > { %5849 = vmatpush1.bf16.msra.mxu1 %v5848_v45  ;;  %5403 = vmatprep.subr.bf16.mxu0 %v5402_v47  ;;  %v776_v45 = vld [vmem:[%s6817_s6 + $0xfb0] sm:$0xff]  ;;  %v5866_v47 = vpack.c.bf16 %v785_v36, %v777_v41  ;;  %v5420_v54 = vpack.c.bf16 %v782_v44, %v774_v43  ;;  %v838_v41 = vld [vmem:[%s6817_s6 + $0x11a0] sm:$0xff]  ;;  %v855_v43 = vld [vmem:[%s6817_s6 + $0x1228] sm:$0xff] }
 0x2bd   : > { %5851 = vmatprep.subr.bf16.mxu1 %v5850_v26  ;;  %v793_v26 = vld [vmem:[%s6817_s6 + $0x1038] sm:$0xff]  ;;  %v5868_v57 = vpack.c.bf16 %v784_v48, %v776_v45  ;;  %v846_v36 = vld [vmem:[%s6817_s6 + $0x11e0] sm:$0xff] }
 0x2be   : > { %v857_v44 = vld [vmem:[%s6817_s6 + $0x1238] sm:$0xff]  ;;  %v902_v28 = vld [vmem:[%s6817_s6 + $0x13a0] sm:$0xff] }
 0x2bf   : > { %5405 = vmatpush1.bf16.msra.mxu0 %v5404_v60  ;;  %v798_v60 = vld [vmem:[%s6817_s6 + $0x1060] sm:$0xff]  ;;  %v865_v45 = vld [vmem:[%s6817_s6 + $0x1278] sm:$0xff] }
 0x2c0   : > { %5853 = vmatpush1.bf16.msra.mxu1 %v5852_v61  ;;  %5407 = vmatprep.subr.bf16.mxu0 %v5406_v62  ;;  %v792_v61 = vld [vmem:[%s6817_s6 + $0x1030] sm:$0xff]  ;;  %v5870_v62 = vpack.c.bf16 %v801_v52, %v793_v26  ;;  %v5424_v4 = vpack.c.bf16 %v798_v60, %v790_v59  ;;  %v862_v26 = vld [vmem:[%s6817_s6 + $0x1260] sm:$0xff]  ;;  %v879_v59 = vld [vmem:[%s6817_s6 + $0x12e8] sm:$0xff] }
 0x2c1   : > { %5855 = vmatprep.subr.bf16.mxu1 %v5854_v2  ;;  %v809_v2 = vld [vmem:[%s6817_s6 + $0x10b8] sm:$0xff]  ;;  %v5872_v6 = vpack.c.bf16 %v800_v32, %v792_v61  ;;  %v856_v52 = vld [vmem:[%s6817_s6 + $0x1230] sm:$0xff] }
 0x2c2   : > { %v873_v60 = vld [vmem:[%s6817_s6 + $0x12b8] sm:$0xff] }
 0x2c3   : > { %5409 = vmatpush1.bf16.msra.mxu0 %v5408_v9  ;;  %v814_v9 = vld [vmem:[%s6817_s6 + $0x10e0] sm:$0xff]  ;;  %v881_v61 = vld [vmem:[%s6817_s6 + $0x12f8] sm:$0xff] }
 0x2c4   : > { %5857 = vmatpush1.bf16.msra.mxu1 %v5856_v10  ;;  %5411 = vmatprep.subr.bf16.mxu0 %v5410_v11  ;;  %v808_v10 = vld [vmem:[%s6817_s6 + $0x10b0] sm:$0xff]  ;;  %v5874_v11 = vpack.c.bf16 %v817_v3, %v809_v2  ;;  %v5428_v17 = vpack.c.bf16 %v814_v9, %v806_v8  ;;  %v878_v2 = vld [vmem:[%s6817_s6 + $0x12e0] sm:$0xff]  ;;  %v895_v8 = vld [vmem:[%s6817_s6 + $0x1368] sm:$0xff] }
 0x2c5   : > { %5859 = vmatprep.subr.bf16.mxu1 %v5858_v14  ;;  %v825_v14 = vld [vmem:[%s6817_s6 + $0x1138] sm:$0xff]  ;;  %v5876_v18 = vpack.c.bf16 %v816_v33, %v808_v10  ;;  %v872_v3 = vld [vmem:[%s6817_s6 + $0x12b0] sm:$0xff] }
 0x2c6   : > { %v889_v9 = vld [vmem:[%s6817_s6 + $0x1338] sm:$0xff] }
 0x2c7   : > { %5413 = vmatpush1.bf16.msra.mxu0 %v5412_v21  ;;  %v830_v21 = vld [vmem:[%s6817_s6 + $0x1160] sm:$0xff]  ;;  %v897_v10 = vld [vmem:[%s6817_s6 + $0x1378] sm:$0xff] }
 0x2c8   : > { %5861 = vmatpush1.bf16.msra.mxu1 %v5860_v22  ;;  %5415 = vmatprep.subr.bf16.mxu0 %v5414_v23  ;;  %v824_v22 = vld [vmem:[%s6817_s6 + $0x1130] sm:$0xff]  ;;  %v5878_v23 = vpack.c.bf16 %v833_v16, %v825_v14  ;;  %v5432_v31 = vpack.c.bf16 %v830_v21, %v822_v20  ;;  %v894_v14 = vld [vmem:[%s6817_s6 + $0x1360] sm:$0xff]  ;;  %v911_v20 = vld [vmem:[%s6817_s6 + $0x13e8] sm:$0xff] }
 0x2c9   : > { %5863 = vmatprep.subr.bf16.mxu1 %v5862_v29  ;;  %v849_v29 = vld [vmem:[%s6817_s6 + $0x11f8] sm:$0xff]  ;;  %v5880_v34 = vpack.c.bf16 %v832_v24, %v824_v22  ;;  %v888_v16 = vld [vmem:[%s6817_s6 + $0x1330] sm:$0xff] }
 0x2ca   : > { %v905_v21 = vld [vmem:[%s6817_s6 + $0x13b8] sm:$0xff] }
 0x2cb   : > { %5417 = vmatpush1.bf16.msra.mxu0 %v5416_v37  ;;  %v840_v37 = vld [vmem:[%s6817_s6 + $0x11b0] sm:$0xff]  ;;  %v913_v22 = vld [vmem:[%s6817_s6 + $0x13f8] sm:$0xff] }
 0x2cc   : > { %5865 = vmatpush1.bf16.msra.mxu1 %v5864_v39  ;;  %5419 = vmatprep.subr.bf16.mxu0 %v5418_v42  ;;  %v848_v42 = vld [vmem:[%s6817_s6 + $0x11f0] sm:$0xff] }
 0x2cd   : > { %5867 = vmatprep.subr.bf16.mxu1 %v5866_v47  ;;  %v5436_v47 = vpack.c.bf16 %v846_v36, %v838_v41  ;;  %v5884_v48 = vpack.c.bf16 %v848_v42, %v840_v37  ;;  %v927_v41 = vld [vmem:[%s6817_s6 + $0x1468] sm:$0xff]  ;;  %v921_v36 = vld [vmem:[%s6817_s6 + $0x1438] sm:$0xff] }
 0x2ce   : > { %v929_v37 = vld [vmem:[%s6817_s6 + $0x1478] sm:$0xff] }
 0x2cf   : > { %5421 = vmatpush1.bf16.msra.mxu0 %v5420_v54  ;;  %v5886_v54 = vpack.c.bf16 %v865_v45, %v857_v44  ;;  %v926_v44 = vld [vmem:[%s6817_s6 + $0x1460] sm:$0xff]  ;;  %v920_v45 = vld [vmem:[%s6817_s6 + $0x1430] sm:$0xff] }
 0x2d0   : > { %5869 = vmatpush1.bf16.msra.mxu1 %v5868_v57  ;;  %5423 = vmatprep.subr.bf16.mxu0 %v5422_v58  ;;  %v864_v57 = vld [vmem:[%s6817_s6 + $0x1270] sm:$0xff]  ;;  %v871_v58 = vld [vmem:[%s6817_s6 + $0x12a8] sm:$0xff] }
 0x2d1   : > { %5871 = vmatprep.subr.bf16.mxu1 %v5870_v62  ;;  %v5440_v62 = vpack.c.bf16 %v862_v26, %v854_v51  ;;  %v5888_v32 = vpack.c.bf16 %v864_v57, %v856_v52  ;;  %v5442_v1 = vpack.c.bf16 %v879_v59, %v871_v58  ;;  %v943_v51 = vld [vmem:[%s6817_s6 + $0x14e8] sm:$0xff]  ;;  %v937_v26 = vld [vmem:[%s6817_s6 + $0x14b8] sm:$0xff]  ;;  %v934_v59 = vld [vmem:[%s6817_s6 + $0x14a0] sm:$0xff] }
 0x2d2   : > { %3273 = vmatmul.mubr.f32.vlgmr.msra.gmra.mrb[2].mxu0 %v7007_v25  ;;  %v945_v52 = vld [vmem:[%s6817_s6 + $0x14f8] sm:$0xff] }
 0x2d3   : > { %5425 = vmatpush1.bf16.msra.mxu0 %v5424_v4  ;;  %3770 = vmatmul.mubr.f32.vlgmr.msra.gmra.mrb[2].mxu1 %v7007_v25  ;;  %v841_v25 = vld [vmem:[%s6817_s6 + $0x11b8] sm:$0xff]  ;;  %v5890_v4 = vpack.c.bf16 %v881_v61, %v873_v60  ;;  %v942_v60 = vld [vmem:[%s6817_s6 + $0x14e0] sm:$0xff]  ;;  %v936_v61 = vld [vmem:[%s6817_s6 + $0x14b0] sm:$0xff] }
 0x2d4   : > { %5873 = vmatpush1.bf16.msra.mxu1 %v5872_v6  ;;  %5427 = vmatprep.subr.bf16.mxu0 %v5426_v7  ;;  %v5882_v39 = vpack.c.bf16 %v849_v29, %v841_v25  ;;  %v880_v6 = vld [vmem:[%s6817_s6 + $0x12f0] sm:$0xff]  ;;  %v887_v7 = vld [vmem:[%s6817_s6 + $0x1328] sm:$0xff]  ;;  %v910_v25 = vld [vmem:[%s6817_s6 + $0x13e0] sm:$0xff] }
 0x2d5   : > { %5875 = vmatprep.subr.bf16.mxu1 %v5874_v11  ;;  %3343 = vmatprep.mubr.f32.mxu0 %v7165_v0  ;;  %v5444_v11 = vpack.c.bf16 %v878_v2, %v870_v40  ;;  %v5892_v33 = vpack.c.bf16 %v880_v6, %v872_v3  ;;  %v5446_v50 = vpack.c.bf16 %v895_v8, %v887_v7  ;;  %v904_v29 = vld [vmem:[%s6817_s6 + $0x13b0] sm:$0xff]  ;;  %v959_v40 = vld [vmem:[%s6817_s6 + $0x1568] sm:$0xff]  ;;  %v953_v2 = vld [vmem:[%s6817_s6 + $0x1538] sm:$0xff] }
 0x2d6   : > { %3840 = vmatprep.mubr.f32.mxu1 %v7165_v0  ;;  %v863_v0 = vld [vmem:[%s6817_s6 + $0x1268] sm:$0xff]  ;;  %v961_v3 = vld [vmem:[%s6817_s6 + $0x1578] sm:$0xff]  ;;  %v950_v8 = vld [vmem:[%s6817_s6 + $0x1520] sm:$0xff] }
 0x2d7   : > { %5429 = vmatpush1.bf16.msra.mxu0 %v5428_v17  ;;  %v5438_v49 = vpack.c.bf16 %v863_v0, %v855_v43  ;;  %v5894_v17 = vpack.c.bf16 %v897_v10, %v889_v9  ;;  %v918_v0 = vld [vmem:[%s6817_s6 + $0x1420] sm:$0xff]  ;;  %v952_v10 = vld [vmem:[%s6817_s6 + $0x1530] sm:$0xff] }
 0x2d8   : > { %5877 = vmatpush1.bf16.msra.mxu1 %v5876_v18  ;;  %5431 = vmatprep.subr.bf16.mxu0 %v5430_v19  ;;  %v896_v18 = vld [vmem:[%s6817_s6 + $0x1370] sm:$0xff]  ;;  %v903_v19 = vld [vmem:[%s6817_s6 + $0x13a8] sm:$0xff]  ;;  %v958_v9 = vld [vmem:[%s6817_s6 + $0x1560] sm:$0xff] }
 0x2d9   : > { %5879 = vmatprep.subr.bf16.mxu1 %v5878_v23  ;;  %v5448_v23 = vpack.c.bf16 %v894_v14, %v886_v13  ;;  %v5896_v24 = vpack.c.bf16 %v896_v18, %v888_v16  ;;  %v5450_v27 = vpack.c.bf16 %v911_v20, %v903_v19  ;;  %v975_v13 = vld [vmem:[%s6817_s6 + $0x15e8] sm:$0xff]  ;;  %v969_v14 = vld [vmem:[%s6817_s6 + $0x15b8] sm:$0xff]  ;;  %v966_v20 = vld [vmem:[%s6817_s6 + $0x15a0] sm:$0xff] }
 0x2da   : > { %v977_v16 = vld [vmem:[%s6817_s6 + $0x15f8] sm:$0xff] }
 0x2db   : > { %5433 = vmatpush1.bf16.msra.mxu0 %v5432_v31  ;;  %v5898_v31 = vpack.c.bf16 %v913_v22, %v905_v21  ;;  %v974_v21 = vld [vmem:[%s6817_s6 + $0x15e0] sm:$0xff]  ;;  %v968_v22 = vld [vmem:[%s6817_s6 + $0x15b0] sm:$0xff] }
 0x2dc   : > { %5881 = vmatpush1.bf16.msra.mxu1 %v5880_v34  ;;  %5435 = vmatprep.subr.bf16.mxu0 %v5434_v35  ;;  %v912_v34 = vld [vmem:[%s6817_s6 + $0x13f0] sm:$0xff]  ;;  %v919_v35 = vld [vmem:[%s6817_s6 + $0x1428] sm:$0xff] }
 0x2dd   : > { %5883 = vmatprep.subr.bf16.mxu1 %v5882_v39  ;;  %v5452_v39 = vpack.c.bf16 %v910_v25, %v902_v28  ;;  %v5900_v42 = vpack.c.bf16 %v912_v34, %v904_v29  ;;  %v5454_v43 = vpack.c.bf16 %v927_v41, %v919_v35  ;;  %v991_v28 = vld [vmem:[%s6817_s6 + $0x1668] sm:$0xff]  ;;  %v985_v25 = vld [vmem:[%s6817_s6 + $0x1638] sm:$0xff]  ;;  %v982_v41 = vld [vmem:[%s6817_s6 + $0x1620] sm:$0xff] }
 0x2de   : > { %v993_v29 = vld [vmem:[%s6817_s6 + $0x1678] sm:$0xff] }
 0x2df   : > { %5437 = vmatpush1.bf16.msra.mxu0 %v5436_v47  ;;  %v5902_v47 = vpack.c.bf16 %v929_v37, %v921_v36  ;;  %v990_v36 = vld [vmem:[%s6817_s6 + $0x1660] sm:$0xff]  ;;  %v984_v37 = vld [vmem:[%s6817_s6 + $0x1630] sm:$0xff] }
 0x2e0   : > { %5885 = vmatpush1.bf16.msra.mxu1 %v5884_v48  ;;  %5439 = vmatprep.subr.bf16.mxu0 %v5438_v49  ;;  %v928_v48 = vld [vmem:[%s6817_s6 + $0x1470] sm:$0xff]  ;;  %v935_v49 = vld [vmem:[%s6817_s6 + $0x14a8] sm:$0xff] }
 0x2e1   : > { %5887 = vmatprep.subr.bf16.mxu1 %v5886_v54  ;;  %v5456_v54 = vpack.c.bf16 %v926_v44, %v918_v0  ;;  %v5904_v57 = vpack.c.bf16 %v928_v48, %v920_v45  ;;  %v5458_v58 = vpack.c.bf16 %v943_v51, %v935_v49  ;;  %v1007_v0 = vld [vmem:[%s6817_s6 + $0x16e8] sm:$0xff]  ;;  %v1001_v44 = vld [vmem:[%s6817_s6 + $0x16b8] sm:$0xff]  ;;  %v998_v51 = vld [vmem:[%s6817_s6 + $0x16a0] sm:$0xff] }
 0x2e2   : > { %v1009_v45 = vld [vmem:[%s6817_s6 + $0x16f8] sm:$0xff] }
 0x2e3   : > { %5441 = vmatpush1.bf16.msra.mxu0 %v5440_v62  ;;  %v5906_v62 = vpack.c.bf16 %v945_v52, %v937_v26  ;;  %v1006_v26 = vld [vmem:[%s6817_s6 + $0x16e0] sm:$0xff]  ;;  %v1000_v52 = vld [vmem:[%s6817_s6 + $0x16b0] sm:$0xff] }
 0x2e4   : > { %5889 = vmatpush1.bf16.msra.mxu1 %v5888_v32  ;;  %5443 = vmatprep.subr.bf16.mxu0 %v5442_v1  ;;  %v944_v32 = vld [vmem:[%s6817_s6 + $0x14f0] sm:$0xff]  ;;  %v951_v1 = vld [vmem:[%s6817_s6 + $0x1528] sm:$0xff] }
 0x2e5   : > { %5891 = vmatprep.subr.bf16.mxu1 %v5890_v4  ;;  %v5460_v4 = vpack.c.bf16 %v942_v60, %v934_v59  ;;  %v5908_v6 = vpack.c.bf16 %v944_v32, %v936_v61  ;;  %v5462_v7 = vpack.c.bf16 %v959_v40, %v951_v1  ;;  %v1023_v59 = vld [vmem:[%s6817_s6 + $0x1768] sm:$0xff]  ;;  %v1017_v60 = vld [vmem:[%s6817_s6 + $0x1738] sm:$0xff]  ;;  %v1014_v40 = vld [vmem:[%s6817_s6 + $0x1720] sm:$0xff] }
 0x2e6   : > { %v1025_v61 = vld [vmem:[%s6817_s6 + $0x1778] sm:$0xff] }
 0x2e7   : > { %5445 = vmatpush1.bf16.msra.mxu0 %v5444_v11  ;;  %v5910_v11 = vpack.c.bf16 %v961_v3, %v953_v2  ;;  %v1022_v2 = vld [vmem:[%s6817_s6 + $0x1760] sm:$0xff]  ;;  %v1016_v3 = vld [vmem:[%s6817_s6 + $0x1730] sm:$0xff] }
 0x2e8   : > { %5893 = vmatpush1.bf16.msra.mxu1 %v5892_v33  ;;  %5447 = vmatprep.subr.bf16.mxu0 %v5446_v50  ;;  %v960_v33 = vld [vmem:[%s6817_s6 + $0x1570] sm:$0xff]  ;;  %v967_v50 = vld [vmem:[%s6817_s6 + $0x15a8] sm:$0xff] }
 0x2e9   : > { %5895 = vmatprep.subr.bf16.mxu1 %v5894_v17  ;;  %v5464_v17 = vpack.c.bf16 %v958_v9, %v950_v8  ;;  %v5912_v18 = vpack.c.bf16 %v960_v33, %v952_v10  ;;  %v5466_v19 = vpack.c.bf16 %v975_v13, %v967_v50  ;;  %v1039_v8 = vld [vmem:[%s6817_s6 + $0x17e8] sm:$0xff]  ;;  %v1033_v9 = vld [vmem:[%s6817_s6 + $0x17b8] sm:$0xff]  ;;  %v1030_v13 = vld [vmem:[%s6817_s6 + $0x17a0] sm:$0xff] }
 0x2ea   : > { %v1041_v10 = vld [vmem:[%s6817_s6 + $0x17f8] sm:$0xff] }
 0x2eb   : > { %5449 = vmatpush1.bf16.msra.mxu0 %v5448_v23  ;;  %v5914_v23 = vpack.c.bf16 %v977_v16, %v969_v14  ;;  %v1038_v14 = vld [vmem:[%s6817_s6 + $0x17e0] sm:$0xff]  ;;  %v1032_v16 = vld [vmem:[%s6817_s6 + $0x17b0] sm:$0xff] }
 0x2ec   : > { %5897 = vmatpush1.bf16.msra.mxu1 %v5896_v24  ;;  %5451 = vmatprep.subr.bf16.mxu0 %v5450_v27  ;;  %v976_v24 = vld [vmem:[%s6817_s6 + $0x15f0] sm:$0xff]  ;;  %v983_v27 = vld [vmem:[%s6817_s6 + $0x1628] sm:$0xff] }
 0x2ed   : > { %5899 = vmatprep.subr.bf16.mxu1 %v5898_v31  ;;  %v5468_v31 = vpack.c.bf16 %v974_v21, %v966_v20  ;;  %v5916_v34 = vpack.c.bf16 %v976_v24, %v968_v22  ;;  %v5470_v35 = vpack.c.bf16 %v991_v28, %v983_v27  ;;  %v1055_v20 = vld [vmem:[%s6817_s6 + $0x1868] sm:$0xff]  ;;  %v1049_v21 = vld [vmem:[%s6817_s6 + $0x1838] sm:$0xff]  ;;  %v1046_v28 = vld [vmem:[%s6817_s6 + $0x1820] sm:$0xff] }
 0x2ee   : > { %v1057_v22 = vld [vmem:[%s6817_s6 + $0x1878] sm:$0xff] }
 0x2ef   : > { %5453 = vmatpush1.bf16.msra.mxu0 %v5452_v39  ;;  %v5918_v39 = vpack.c.bf16 %v993_v29, %v985_v25  ;;  %v1054_v25 = vld [vmem:[%s6817_s6 + $0x1860] sm:$0xff]  ;;  %v1048_v29 = vld [vmem:[%s6817_s6 + $0x1830] sm:$0xff] }
 0x2f0   : > { %5901 = vmatpush1.bf16.msra.mxu1 %v5900_v42  ;;  %5455 = vmatprep.subr.bf16.mxu0 %v5454_v43  ;;  %v992_v42 = vld [vmem:[%s6817_s6 + $0x1670] sm:$0xff]  ;;  %v999_v43 = vld [vmem:[%s6817_s6 + $0x16a8] sm:$0xff] }
 0x2f1   : > { %5903 = vmatprep.subr.bf16.mxu1 %v5902_v47  ;;  %v5472_v47 = vpack.c.bf16 %v990_v36, %v982_v41  ;;  %v5920_v48 = vpack.c.bf16 %v992_v42, %v984_v37  ;;  %v5474_v49 = vpack.c.bf16 %v1007_v0, %v999_v43  ;;  %v1071_v41 = vld [vmem:[%s6817_s6 + $0x18e8] sm:$0xff]  ;;  %v1065_v36 = vld [vmem:[%s6817_s6 + $0x18b8] sm:$0xff]  ;;  %v1062_v0 = vld [vmem:[%s6817_s6 + $0x18a0] sm:$0xff] }
 0x2f2   : > { %v1073_v37 = vld [vmem:[%s6817_s6 + $0x18f8] sm:$0xff] }
 0x2f3   : > { %5457 = vmatpush1.bf16.msra.mxu0 %v5456_v54  ;;  %v5922_v54 = vpack.c.bf16 %v1009_v45, %v1001_v44  ;;  %v1070_v44 = vld [vmem:[%s6817_s6 + $0x18e0] sm:$0xff]  ;;  %v1064_v45 = vld [vmem:[%s6817_s6 + $0x18b0] sm:$0xff] }
 0x2f4   : > { %5905 = vmatpush1.bf16.msra.mxu1 %v5904_v57  ;;  %5459 = vmatprep.subr.bf16.mxu0 %v5458_v58  ;;  %v1008_v57 = vld [vmem:[%s6817_s6 + $0x16f0] sm:$0xff]  ;;  %v1015_v58 = vld [vmem:[%s6817_s6 + $0x1728] sm:$0xff] }
 0x2f5   : > { %5907 = vmatprep.subr.bf16.mxu1 %v5906_v62  ;;  %v5476_v62 = vpack.c.bf16 %v1006_v26, %v998_v51  ;;  %v5924_v32 = vpack.c.bf16 %v1008_v57, %v1000_v52  ;;  %v5478_v1 = vpack.c.bf16 %v1023_v59, %v1015_v58  ;;  %v1087_v51 = vld [vmem:[%s6817_s6 + $0x1968] sm:$0xff]  ;;  %v1081_v26 = vld [vmem:[%s6817_s6 + $0x1938] sm:$0xff]  ;;  %v1078_v59 = vld [vmem:[%s6817_s6 + $0x1920] sm:$0xff] }
 0x2f6   : > { %v1089_v52 = vld [vmem:[%s6817_s6 + $0x1978] sm:$0xff] }
 0x2f7   : > { %5461 = vmatpush1.bf16.msra.mxu0 %v5460_v4  ;;  %v5926_v4 = vpack.c.bf16 %v1025_v61, %v1017_v60  ;;  %v1086_v60 = vld [vmem:[%s6817_s6 + $0x1960] sm:$0xff]  ;;  %v1080_v61 = vld [vmem:[%s6817_s6 + $0x1930] sm:$0xff] }
 0x2f8   : > { %5909 = vmatpush1.bf16.msra.mxu1 %v5908_v6  ;;  %5463 = vmatprep.subr.bf16.mxu0 %v5462_v7  ;;  %v1024_v6 = vld [vmem:[%s6817_s6 + $0x1770] sm:$0xff]  ;;  %v1031_v7 = vld [vmem:[%s6817_s6 + $0x17a8] sm:$0xff] }
 0x2f9   : > { %5911 = vmatprep.subr.bf16.mxu1 %v5910_v11  ;;  %v5480_v11 = vpack.c.bf16 %v1022_v2, %v1014_v40  ;;  %v5928_v33 = vpack.c.bf16 %v1024_v6, %v1016_v3  ;;  %v5482_v50 = vpack.c.bf16 %v1039_v8, %v1031_v7  ;;  %v1103_v40 = vld [vmem:[%s6817_s6 + $0x19e8] sm:$0xff]  ;;  %v1105_v2 = vld [vmem:[%s6817_s6 + $0x19f8] sm:$0xff]  ;;  %v5496_v3 = vpack.c.bf16 %v1086_v60, %v1078_v59  ;;  %v1094_v7 = vld [vmem:[%s6817_s6 + $0x19a0] sm:$0xff] }
 0x2fa   : > { %v1102_v8 = vld [vmem:[%s6817_s6 + $0x19e0] sm:$0xff] }
 0x2fb   : > { %5465 = vmatpush1.bf16.msra.mxu0 %v5464_v17  ;;  %v5930_v17 = vpack.c.bf16 %v1041_v10, %v1033_v9  ;;  %v1096_v9 = vld [vmem:[%s6817_s6 + $0x19b0] sm:$0xff] }
 0x2fc   : > { %5913 = vmatpush1.bf16.msra.mxu1 %v5912_v18  ;;  %5467 = vmatprep.subr.bf16.mxu0 %v5466_v19  ;;  %v1040_v18 = vld [vmem:[%s6817_s6 + $0x17f0] sm:$0xff]  ;;  %v1047_v19 = vld [vmem:[%s6817_s6 + $0x1828] sm:$0xff] }
 0x2fd   : > { %5915 = vmatprep.subr.bf16.mxu1 %v5914_v23  ;;  %v5484_v23 = vpack.c.bf16 %v1038_v14, %v1030_v13  ;;  %v5932_v24 = vpack.c.bf16 %v1040_v18, %v1032_v16  ;;  %v5486_v27 = vpack.c.bf16 %v1055_v20, %v1047_v19  ;;  %v1121_v13 = vld [vmem:[%s6817_s6 + $0x1a78] sm:$0xff]  ;;  %v5500_v14 = vpack.c.bf16 %v1102_v8, %v1094_v7  ;;  %v1110_v18 = vld [vmem:[%s6817_s6 + $0x1a20] sm:$0xff]  ;;  %v1112_v20 = vld [vmem:[%s6817_s6 + $0x1a30] sm:$0xff] }
 0x2fe   : > { %v1118_v19 = vld [vmem:[%s6817_s6 + $0x1a60] sm:$0xff]  ;;  %v1160_v7 = vld [vmem:[%s6817_s6 + $0x1bb0] sm:$0xff] }
 0x2ff   : > { %5469 = vmatpush1.bf16.msra.mxu0 %v5468_v31  ;;  %v5934_v31 = vpack.c.bf16 %v1057_v22, %v1049_v21  ;;  %v1120_v22 = vld [vmem:[%s6817_s6 + $0x1a70] sm:$0xff] }
 0x300   : > { %5917 = vmatpush1.bf16.msra.mxu1 %v5916_v34  ;;  %5471 = vmatprep.subr.bf16.mxu0 %v5470_v35  ;;  %v1056_v34 = vld [vmem:[%s6817_s6 + $0x1870] sm:$0xff]  ;;  %v1063_v35 = vld [vmem:[%s6817_s6 + $0x18a8] sm:$0xff] }
 0x301   : > { %5919 = vmatprep.subr.bf16.mxu1 %v5918_v39  ;;  %v5488_v39 = vpack.c.bf16 %v1054_v25, %v1046_v28  ;;  %v5936_v42 = vpack.c.bf16 %v1056_v34, %v1048_v29  ;;  %v5490_v43 = vpack.c.bf16 %v1071_v41, %v1063_v35  ;;  %v1137_v28 = vld [vmem:[%s6817_s6 + $0x1af8] sm:$0xff]  ;;  %v5504_v25 = vpack.c.bf16 %v1118_v19, %v1110_v18  ;;  %v1126_v34 = vld [vmem:[%s6817_s6 + $0x1aa0] sm:$0xff]  ;;  %v1128_v41 = vld [vmem:[%s6817_s6 + $0x1ab0] sm:$0xff] }
 0x302   : > { %v5952_v29 = vpack.c.bf16 %v1120_v22, %v1112_v20  ;;  %v1134_v35 = vld [vmem:[%s6817_s6 + $0x1ae0] sm:$0xff]  ;;  %v1176_v22 = vld [vmem:[%s6817_s6 + $0x1c30] sm:$0xff] }
 0x303   : > { %5473 = vmatpush1.bf16.msra.mxu0 %v5472_v47  ;;  %v5938_v47 = vpack.c.bf16 %v1073_v37, %v1065_v36  ;;  %v1136_v37 = vld [vmem:[%s6817_s6 + $0x1af0] sm:$0xff]  ;;  %v1174_v20 = vld [vmem:[%s6817_s6 + $0x1c20] sm:$0xff] }
 0x304   : > { %5921 = vmatpush1.bf16.msra.mxu1 %v5920_v48  ;;  %5475 = vmatprep.subr.bf16.mxu0 %v5474_v49  ;;  %v1072_v48 = vld [vmem:[%s6817_s6 + $0x18f0] sm:$0xff]  ;;  %v1079_v49 = vld [vmem:[%s6817_s6 + $0x1928] sm:$0xff] }
 0x305   : > { %5923 = vmatprep.subr.bf16.mxu1 %v5922_v54  ;;  %v5492_v54 = vpack.c.bf16 %v1070_v44, %v1062_v0  ;;  %v5940_v57 = vpack.c.bf16 %v1072_v48, %v1064_v45  ;;  %v5494_v58 = vpack.c.bf16 %v1087_v51, %v1079_v49  ;;  %v1153_v0 = vld [vmem:[%s6817_s6 + $0x1b78] sm:$0xff]  ;;  %v5508_v44 = vpack.c.bf16 %v1134_v35, %v1126_v34  ;;  %v1142_v48 = vld [vmem:[%s6817_s6 + $0x1b20] sm:$0xff]  ;;  %v1144_v51 = vld [vmem:[%s6817_s6 + $0x1b30] sm:$0xff] }
 0x306   : > { %v5956_v45 = vpack.c.bf16 %v1136_v37, %v1128_v41  ;;  %v1150_v49 = vld [vmem:[%s6817_s6 + $0x1b60] sm:$0xff] }
 0x307   : > { %5477 = vmatpush1.bf16.msra.mxu0 %v5476_v62  ;;  %v5942_v62 = vpack.c.bf16 %v1089_v52, %v1081_v26  ;;  %v1198_v37 = vld [vmem:[%s6817_s6 + $0x1ce0] sm:$0xff] }
 0x308   : > { %5925 = vmatpush1.bf16.msra.mxu1 %v5924_v32  ;;  %5479 = vmatprep.subr.bf16.mxu0 %v5478_v1  ;;  %v1088_v32 = vld [vmem:[%s6817_s6 + $0x1970] sm:$0xff]  ;;  %v1095_v1 = vld [vmem:[%s6817_s6 + $0x19a8] sm:$0xff] }
 0x309   : > { %5927 = vmatprep.subr.bf16.mxu1 %v5926_v4  ;;  %v5944_v4 = vpack.c.bf16 %v1088_v32, %v1080_v61  ;;  %v5498_v6 = vpack.c.bf16 %v1103_v40, %v1095_v1  ;;  %v1161_v61 = vld [vmem:[%s6817_s6 + $0x1bb8] sm:$0xff]  ;;  %v5512_v40 = vpack.c.bf16 %v1150_v49, %v1142_v48 }
 0x30b   : > { %5481 = vmatpush1.bf16.msra.mxu0 %v5480_v11  ;;  %v1104_v11 = vld [vmem:[%s6817_s6 + $0x19f0] sm:$0xff] }
 0x30c   : > { %5929 = vmatpush1.bf16.msra.mxu1 %v5928_v33  ;;  %5483 = vmatprep.subr.bf16.mxu0 %v5482_v50  ;;  %v1111_v33 = vld [vmem:[%s6817_s6 + $0x1a28] sm:$0xff]  ;;  %v1113_v50 = vld [vmem:[%s6817_s6 + $0x1a38] sm:$0xff]  ;;  %v5948_v16 = vpack.c.bf16 %v1104_v11, %v1096_v9 }
 0x30d   : > { %5931 = vmatprep.subr.bf16.mxu1 %v5930_v17  ;;  %v5950_v21 = vpack.c.bf16 %v1121_v13, %v1113_v50  ;;  %v1175_v11 = vld [vmem:[%s6817_s6 + $0x1c28] sm:$0xff]  ;;  %v1177_v50 = vld [vmem:[%s6817_s6 + $0x1c38] sm:$0xff] }
 0x30e   : > { %v1185_v13 = vld [vmem:[%s6817_s6 + $0x1c78] sm:$0xff] }
 0x30f   : > { %5485 = vmatpush1.bf16.msra.mxu0 %v5484_v23  ;;  %v1127_v23 = vld [vmem:[%s6817_s6 + $0x1aa8] sm:$0xff] }
 0x310   : > { %5933 = vmatpush1.bf16.msra.mxu1 %v5932_v24  ;;  %5487 = vmatprep.subr.bf16.mxu0 %v5486_v27  ;;  %v1135_v24 = vld [vmem:[%s6817_s6 + $0x1ae8] sm:$0xff]  ;;  %v1129_v27 = vld [vmem:[%s6817_s6 + $0x1ab8] sm:$0xff] }
 0x311   : > { %5935 = vmatprep.subr.bf16.mxu1 %v5934_v31  ;;  %v5506_v31 = vpack.c.bf16 %v1135_v24, %v1127_v23  ;;  %v5954_v36 = vpack.c.bf16 %v1137_v28, %v1129_v27  ;;  %v5966_v23 = vpack.c.bf16 %v1185_v13, %v1177_v50  ;;  %v1184_v24 = vld [vmem:[%s6817_s6 + $0x1c70] sm:$0xff]  ;;  %v1191_v27 = vld [vmem:[%s6817_s6 + $0x1ca8] sm:$0xff]  ;;  %v1238_v50 = vld [vmem:[%s6817_s6 + $0x1e20] sm:$0xff] }
 0x312   : > { %3344 = vmatmul.mubr.f32.vlgmr.msra.gmra.mrb[2].mxu0 %v7155_v56  ;;  %v1199_v28 = vld [vmem:[%s6817_s6 + $0x1ce8] sm:$0xff]  ;;  %v5968_v35 = vpack.c.bf16 %v1184_v24, %v1176_v22  ;;  %v1246_v13 = vld [vmem:[%s6817_s6 + $0x1e60] sm:$0xff] }
 0x313   : > { %5489 = vmatpush1.bf16.msra.mxu0 %v5488_v39  ;;  %3841 = vmatmul.mubr.f32.vlgmr.msra.gmra.mrb[2].mxu1 %v7155_v56  ;;  %v1097_v56 = vld [vmem:[%s6817_s6 + $0x19b8] sm:$0xff]  ;;  %v1143_v39 = vld [vmem:[%s6817_s6 + $0x1b28] sm:$0xff]  ;;  %v5522_v41 = vpack.c.bf16 %v1199_v28, %v1191_v27  ;;  %v5536_v22 = vpack.c.bf16 %v1246_v13, %v1238_v50  ;;  %v1254_v27 = vld [vmem:[%s6817_s6 + $0x1ea0] sm:$0xff] }
 0x314   : > { %5937 = vmatpush1.bf16.msra.mxu1 %v5936_v42  ;;  %5491 = vmatprep.subr.bf16.mxu0 %v5490_v43  ;;  %v5946_v10 = vpack.c.bf16 %v1105_v2, %v1097_v56  ;;  %v1151_v42 = vld [vmem:[%s6817_s6 + $0x1b68] sm:$0xff]  ;;  %v1145_v43 = vld [vmem:[%s6817_s6 + $0x1b38] sm:$0xff]  ;;  %v1262_v28 = vld [vmem:[%s6817_s6 + $0x1ee0] sm:$0xff] }
 0x315   : > { %5939 = vmatprep.subr.bf16.mxu1 %v5938_v47  ;;  %3414 = vmatprep.mubr.f32.mxu0 %v7303_v30  ;;  %v5510_v47 = vpack.c.bf16 %v1151_v42, %v1143_v39  ;;  %v5958_v52 = vpack.c.bf16 %v1153_v0, %v1145_v43  ;;  %v1192_v39 = vld [vmem:[%s6817_s6 + $0x1cb0] sm:$0xff]  ;;  %v1207_v0 = vld [vmem:[%s6817_s6 + $0x1d28] sm:$0xff]  ;;  %v1329_v50 = vld [vmem:[%s6817_s6 + $0x20f8] sm:$0xff] }
 0x316   : > { %3911 = vmatprep.mubr.f32.mxu1 %v7303_v30  ;;  %v1119_v30 = vld [vmem:[%s6817_s6 + $0x1a68] sm:$0xff]  ;;  %v1200_v43 = vld [vmem:[%s6817_s6 + $0x1cf0] sm:$0xff] }
 0x317   : > { %5493 = vmatpush1.bf16.msra.mxu0 %v5492_v54  ;;  %v5502_v17 = vpack.c.bf16 %v1119_v30, %v1111_v33  ;;  %v1152_v54 = vld [vmem:[%s6817_s6 + $0x1b70] sm:$0xff]  ;;  %v1183_v33 = vld [vmem:[%s6817_s6 + $0x1c68] sm:$0xff]  ;;  %v5972_v49 = vpack.c.bf16 %v1200_v43, %v1192_v39  ;;  %v1270_v43 = vld [vmem:[%s6817_s6 + $0x1f20] sm:$0xff] }
 0x318   : > { %5941 = vmatpush1.bf16.msra.mxu1 %v5940_v57  ;;  %5495 = vmatprep.subr.bf16.mxu0 %v5494_v58  ;;  %v1159_v57 = vld [vmem:[%s6817_s6 + $0x1ba8] sm:$0xff]  ;;  %v5960_v2 = vpack.c.bf16 %v1152_v54, %v1144_v51  ;;  %v5518_v19 = vpack.c.bf16 %v1183_v33, %v1175_v11  ;;  %v1208_v54 = vld [vmem:[%s6817_s6 + $0x1d30] sm:$0xff] }
 0x319   : > { %5943 = vmatprep.subr.bf16.mxu1 %v5942_v62  ;;  %v1167_v58 = vld [vmem:[%s6817_s6 + $0x1be8] sm:$0xff]  ;;  %v1169_v62 = vld [vmem:[%s6817_s6 + $0x1bf8] sm:$0xff] }
 0x31a   : > { %v5962_v9 = vpack.c.bf16 %v1169_v62, %v1161_v61  ;;  %v1225_v61 = vld [vmem:[%s6817_s6 + $0x1db8] sm:$0xff] }
 0x31b   : > { %5497 = vmatpush1.bf16.msra.mxu0 %v5496_v3  ;;  %v5514_v3 = vpack.c.bf16 %v1167_v58, %v1159_v57  ;;  %v1216_v58 = vld [vmem:[%s6817_s6 + $0x1d70] sm:$0xff]  ;;  %v1233_v62 = vld [vmem:[%s6817_s6 + $0x1df8] sm:$0xff] }
 0x31c   : > { %5945 = vmatpush1.bf16.msra.mxu1 %v5944_v4  ;;  %5499 = vmatprep.subr.bf16.mxu0 %v5498_v6  ;;  %v1158_v4 = vld [vmem:[%s6817_s6 + $0x1ba0] sm:$0xff] }
 0x31d   : > { %5947 = vmatprep.subr.bf16.mxu1 %v5946_v10  ;;  %v1166_v6 = vld [vmem:[%s6817_s6 + $0x1be0] sm:$0xff]  ;;  %v1168_v10 = vld [vmem:[%s6817_s6 + $0x1bf0] sm:$0xff] }
 0x31e   : > { %v5964_v18 = vpack.c.bf16 %v1168_v10, %v1160_v7  ;;  %v1239_v7 = vld [vmem:[%s6817_s6 + $0x1e28] sm:$0xff]  ;;  %v1249_v10 = vld [vmem:[%s6817_s6 + $0x1e78] sm:$0xff] }
 0x31f   : > { %5501 = vmatpush1.bf16.msra.mxu0 %v5500_v14  ;;  %v272_v14 = vld [vmem:[%s6835_s27] sm:$0xff] }
 0x320   : > { %5949 = vmatpush1.bf16.msra.mxu1 %v5948_v16  ;;  %5503 = vmatprep.subr.bf16.mxu0 %v5502_v17  ;;  %v5516_v16 = vpack.c.bf16 %v1166_v6, %v1158_v4  ;;  %v5978_v4 = vpack.c.bf16 %v1233_v62, %v1225_v61  ;;  %v1232_v6 = vld [vmem:[%s6817_s6 + $0x1df0] sm:$0xff] }
 0x321   : > { %5951 = vmatprep.subr.bf16.mxu1 %v5950_v21  ;;  %v1182_v21 = vld [vmem:[%s6817_s6 + $0x1c60] sm:$0xff]  ;;  %v1296_v62 = vld [vmem:[%s6817_s6 + $0x1ff0] sm:$0xff] }
 0x322   : > { %v5520_v34 = vpack.c.bf16 %v1182_v21, %v1174_v20  ;;  %v1257_v20 = vld [vmem:[%s6817_s6 + $0x1eb8] sm:$0xff] }
 0x323   : > { %5505 = vmatpush1.bf16.msra.mxu0 %v5504_v25  ;;  %v1265_v21 = vld [vmem:[%s6817_s6 + $0x1ef8] sm:$0xff] }
 0x324   : > { %5953 = vmatpush1.bf16.msra.mxu1 %v5952_v29  ;;  %5507 = vmatprep.subr.bf16.mxu0 %v5506_v31  ;;  %v1193_v29 = vld [vmem:[%s6817_s6 + $0x1cb8] sm:$0xff] }
 0x325   : > { %v2635_v26 = vpop.f32.mrb[0].mxu0  ;;  %5955 = vmatprep.subr.bf16.mxu1 %v5954_v36  ;;  %v1201_v31 = vld [vmem:[%s6817_s6 + $0x1cf8] sm:$0xff]  ;;  %v1190_v36 = vld [vmem:[%s6817_s6 + $0x1ca0] sm:$0xff] }
 0x326   : > { %v3132_v59 = vpop.f32.mrb[0].mxu1  ;;  %v2637_v60 = vpop.f32.mrb[1].mxu0  ;;  %v5970_v42 = vpack.c.bf16 %v1201_v31, %v1193_v29  ;;  %v5524_v48 = vpack.c.bf16 %v1198_v37, %v1190_v36  ;;  %v5986_v29 = vpack.c.bf16 %v1265_v21, %v1257_v20  ;;  %v1264_v31 = vld [vmem:[%s6817_s6 + $0x1ef0] sm:$0xff]  ;;  %v1281_v36 = vld [vmem:[%s6817_s6 + $0x1f78] sm:$0xff]  ;;  %v5540_v37 = vpack.c.bf16 %v1262_v28, %v1254_v27 }
 0x327   : > { %v4139_v32 = vcombine.low %v2635_v26, %v2637_v60  ;;  %v3134_v1 = vpop.f32.mrb[1].mxu1  ;;  %5509 = vmatpush1.bf16.msra.mxu0 %v5508_v44  ;;  %v1215_v44 = vld [vmem:[%s6817_s6 + $0x1d68] sm:$0xff]  ;;  %v1206_v26 = vld [vmem:[%s6817_s6 + $0x1d20] sm:$0xff]  ;;  %v1328_v21 = vld [vmem:[%s6817_s6 + $0x20f0] sm:$0xff] }
 0x328   : > { %v4140_v56 = vcombine.low %v3132_v59, %v3134_v1  ;;  %5957 = vmatpush1.bf16.msra.mxu1 %v5956_v45  ;;  %5511 = vmatprep.subr.bf16.mxu0 %v5510_v47  ;;  %v1209_v45 = vld [vmem:[%s6817_s6 + $0x1d38] sm:$0xff]  ;;  %v5526_v51 = vpack.c.bf16 %v1215_v44, %v1207_v0  ;;  %v1223_v59 = vld [vmem:[%s6817_s6 + $0x1da8] sm:$0xff]  ;;  %v5976_v1 = vpack.c.bf16 %v1216_v58, %v1208_v54  ;;  %v1278_v0 = vld [vmem:[%s6817_s6 + $0x1f60] sm:$0xff] }
 0x329   : > { %v4147_v8 = vrot.slane %v4139_v32, %v6939_v12  ;;  %5959 = vmatprep.subr.bf16.mxu1 %v5958_v52  ;;  %v1217_v47 = vld [vmem:[%s6817_s6 + $0x1d78] sm:$0xff]  ;;  %v1214_v52 = vld [vmem:[%s6817_s6 + $0x1d60] sm:$0xff]  ;;  %v1231_v60 = vld [vmem:[%s6817_s6 + $0x1de8] sm:$0xff] }
 0x32a   : > { %v4154_v30 = vrot.slane %v4140_v56, %v6939_v12  ;;  %v5974_v57 = vpack.c.bf16 %v1217_v47, %v1209_v45  ;;  %v5528_v32 = vpack.c.bf16 %v1214_v52, %v1206_v26  ;;  %v1222_v56 = vld [vmem:[%s6817_s6 + $0x1da0] sm:$0xff]  ;;  %v1272_v44 = vld [vmem:[%s6817_s6 + $0x1f30] sm:$0xff]  ;;  %v1297_v26 = vld [vmem:[%s6817_s6 + $0x1ff8] sm:$0xff]  ;;  %v5544_v52 = vpack.c.bf16 %v1278_v0, %v1270_v43 }
 0x32b   : > { %5513 = vmatpush1.bf16.msra.mxu0 %v5512_v40  ;;  %v5530_v40 = vpack.c.bf16 %v1231_v60, %v1223_v59  ;;  %v1280_v47 = vld [vmem:[%s6817_s6 + $0x1f70] sm:$0xff]  ;;  %v1286_v58 = vld [vmem:[%s6817_s6 + $0x1fa0] sm:$0xff]  ;;  %v1345_v27 = vld [vmem:[%s6817_s6 + $0x2178] sm:$0xff] }
 0x32c   : > { %v4155_v17 = vcombine.low %v4147_v8, %v4154_v30  ;;  %5961 = vmatpush1.bf16.msra.mxu1 %v5960_v2  ;;  %5515 = vmatprep.subr.bf16.mxu0 %v5514_v3  ;;  %v1230_v2 = vld [vmem:[%s6817_s6 + $0x1de0] sm:$0xff]  ;;  %v1224_v3 = vld [vmem:[%s6817_s6 + $0x1db0] sm:$0xff]  ;;  %v1247_v8 = vld [vmem:[%s6817_s6 + $0x1e68] sm:$0xff]  ;;  %v5992_v54 = vpack.c.bf16 %v1280_v47, %v1272_v44 }
 0x32d   : > { %5963 = vmatprep.subr.bf16.mxu1 %v5962_v9  ;;  %v1241_v9 = vld [vmem:[%s6817_s6 + $0x1e38] sm:$0xff]  ;;  %v5532_v11 = vpack.c.bf16 %v1230_v2, %v1222_v56  ;;  %v5980_v33 = vpack.c.bf16 %v1232_v6, %v1224_v3  ;;  %v5534_v30 = vpack.c.bf16 %v1247_v8, %v1239_v7  ;;  %v1294_v59 = vld [vmem:[%s6817_s6 + $0x1fe0] sm:$0xff]  ;;  %v1288_v60 = vld [vmem:[%s6817_s6 + $0x1fb0] sm:$0xff] }
 0x32e   : > { %v4175_v25 = vadd.f32 %v4155_v17, %v272_v14  ;;  %v1240_v14 = vld [vmem:[%s6817_s6 + $0x1e30] sm:$0xff]  ;;  %v1313_v56 = vld [vmem:[%s6817_s6 + $0x2078] sm:$0xff]  ;;  %v5548_v2 = vpack.c.bf16 %v1294_v59, %v1286_v58  ;;  %v5996_v3 = vpack.c.bf16 %v1296_v62, %v1288_v60  ;;  %v1302_v6 = vld [vmem:[%s6817_s6 + $0x2020] sm:$0xff] }
 0x32f   : > { %5517 = vmatpush1.bf16.msra.mxu0 %v5516_v16  ;;  %v5982_v16 = vpack.c.bf16 %v1249_v10, %v1241_v9  ;;  %v1248_v17 = vld [vmem:[%s6817_s6 + $0x1e70] sm:$0xff]  ;;  %v1310_v7 = vld [vmem:[%s6817_s6 + $0x2060] sm:$0xff] }
 0x330   : > { %4177 = vst [vmem:[%s6835_s27] sm:$0xff] %v4175_v25  ;;  %5965 = vmatpush1.bf16.msra.mxu1 %v5964_v18  ;;  %5519 = vmatprep.subr.bf16.mxu0 %v5518_v19  ;;  %v1255_v18 = vld [vmem:[%s6817_s6 + $0x1ea8] sm:$0xff]  ;;  %v1256_v25 = vld [vmem:[%s6817_s6 + $0x1eb0] sm:$0xff]  ;;  %v5552_v13 = vpack.c.bf16 %v1310_v7, %v1302_v6  ;;  %v1358_v47 = vld [vmem:[%s6817_s6 + $0x21e0] sm:$0xff] }
 0x331   : > { %5967 = vmatprep.subr.bf16.mxu1 %v5966_v23  ;;  %v1263_v19 = vld [vmem:[%s6817_s6 + $0x1ee8] sm:$0xff]  ;;  %v5984_v23 = vpack.c.bf16 %v1248_v17, %v1240_v14  ;;  %v5988_v39 = vpack.c.bf16 %v1264_v31, %v1256_v25  ;;  %v1304_v8 = vld [vmem:[%s6817_s6 + $0x2030] sm:$0xff]  ;;  %v1318_v17 = vld [vmem:[%s6817_s6 + $0x20a0] sm:$0xff] }
 0x332   : > { %v5538_v24 = vpack.c.bf16 %v1263_v19, %v1255_v18  ;;  %v1312_v10 = vld [vmem:[%s6817_s6 + $0x2070] sm:$0xff]  ;;  %v1326_v18 = vld [vmem:[%s6817_s6 + $0x20e0] sm:$0xff] }
 0x333   : > { %5521 = vmatpush1.bf16.msra.mxu0 %v5520_v34  ;;  %v1271_v34 = vld [vmem:[%s6817_s6 + $0x1f28] sm:$0xff]  ;;  %v6000_v14 = vpack.c.bf16 %v1312_v10, %v1304_v8  ;;  %v1320_v19 = vld [vmem:[%s6817_s6 + $0x20b0] sm:$0xff]  ;;  %v5556_v28 = vpack.c.bf16 %v1326_v18, %v1318_v17  ;;  %v1334_v31 = vld [vmem:[%s6817_s6 + $0x2120] sm:$0xff] }
 0x334   : > { %5969 = vmatpush1.bf16.msra.mxu1 %v5968_v35  ;;  %5523 = vmatprep.subr.bf16.mxu0 %v5522_v41  ;;  %v1279_v35 = vld [vmem:[%s6817_s6 + $0x1f68] sm:$0xff]  ;;  %v1273_v41 = vld [vmem:[%s6817_s6 + $0x1f38] sm:$0xff]  ;;  %v6004_v25 = vpack.c.bf16 %v1328_v21, %v1320_v19  ;;  %v1366_v60 = vld [vmem:[%s6817_s6 + $0x2220] sm:$0xff] }
 0x335   : > { %5971 = vmatprep.subr.bf16.mxu1 %v5970_v42  ;;  %v5542_v42 = vpack.c.bf16 %v1279_v35, %v1271_v34  ;;  %v5990_v45 = vpack.c.bf16 %v1281_v36, %v1273_v41  ;;  %v1342_v34 = vld [vmem:[%s6817_s6 + $0x2160] sm:$0xff]  ;;  %v1336_v35 = vld [vmem:[%s6817_s6 + $0x2130] sm:$0xff] }
 0x336   : > { %v1344_v36 = vld [vmem:[%s6817_s6 + $0x2170] sm:$0xff]  ;;  %v5560_v43 = vpack.c.bf16 %v1342_v34, %v1334_v31  ;;  %v1382_v8 = vld [vmem:[%s6817_s6 + $0x22a0] sm:$0xff] }
 0x337   : > { %5525 = vmatpush1.bf16.msra.mxu0 %v5524_v48  ;;  %v1287_v48 = vld [vmem:[%s6817_s6 + $0x1fa8] sm:$0xff]  ;;  %v6008_v0 = vpack.c.bf16 %v1344_v36, %v1336_v35  ;;  %v1368_v62 = vld [vmem:[%s6817_s6 + $0x2230] sm:$0xff]  ;;  %v1398_v19 = vld [vmem:[%s6817_s6 + $0x2320] sm:$0xff] }
 0x338   : > { %5973 = vmatpush1.bf16.msra.mxu1 %v5972_v49  ;;  %5527 = vmatprep.subr.bf16.mxu0 %v5526_v51  ;;  %v1295_v49 = vld [vmem:[%s6817_s6 + $0x1fe8] sm:$0xff]  ;;  %v1289_v51 = vld [vmem:[%s6817_s6 + $0x1fb8] sm:$0xff]  ;;  %v1384_v10 = vld [vmem:[%s6817_s6 + $0x22b0] sm:$0xff] }
 0x339   : > { %5975 = vmatprep.subr.bf16.mxu1 %v5974_v57  ;;  %v5546_v57 = vpack.c.bf16 %v1295_v49, %v1287_v48  ;;  %v5994_v61 = vpack.c.bf16 %v1297_v26, %v1289_v51  ;;  %v1352_v48 = vld [vmem:[%s6817_s6 + $0x21b0] sm:$0xff]  ;;  %v1367_v26 = vld [vmem:[%s6817_s6 + $0x2228] sm:$0xff]  ;;  %v1414_v35 = vld [vmem:[%s6817_s6 + $0x23a0] sm:$0xff] }
 0x33a   : > { %v1360_v51 = vld [vmem:[%s6817_s6 + $0x21f0] sm:$0xff] }
 0x33b   : > { %5529 = vmatpush1.bf16.msra.mxu0 %v5528_v32  ;;  %v1303_v32 = vld [vmem:[%s6817_s6 + $0x2028] sm:$0xff]  ;;  %v6012_v58 = vpack.c.bf16 %v1360_v51, %v1352_v48  ;;  %v1400_v21 = vld [vmem:[%s6817_s6 + $0x2330] sm:$0xff]  ;;  %v1430_v48 = vld [vmem:[%s6817_s6 + $0x2420] sm:$0xff] }
 0x33c   : > { %5977 = vmatpush1.bf16.msra.mxu1 %v5976_v1  ;;  %5531 = vmatprep.subr.bf16.mxu0 %v5530_v40  ;;  %v1311_v1 = vld [vmem:[%s6817_s6 + $0x2068] sm:$0xff]  ;;  %v1305_v40 = vld [vmem:[%s6817_s6 + $0x2038] sm:$0xff]  ;;  %v1416_v36 = vld [vmem:[%s6817_s6 + $0x23b0] sm:$0xff] }
 0x33d   : > { %5979 = vmatprep.subr.bf16.mxu1 %v5978_v4  ;;  %v5550_v4 = vpack.c.bf16 %v1311_v1, %v1303_v32  ;;  %v5998_v9 = vpack.c.bf16 %v1313_v56, %v1305_v40  ;;  %v1376_v1 = vld [vmem:[%s6817_s6 + $0x2270] sm:$0xff]  ;;  %v1383_v40 = vld [vmem:[%s6817_s6 + $0x22a8] sm:$0xff] }
 0x33e   : > { %v1391_v56 = vld [vmem:[%s6817_s6 + $0x22e8] sm:$0xff]  ;;  %v6016_v6 = vpack.c.bf16 %v1376_v1, %v1368_v62  ;;  %v1432_v51 = vld [vmem:[%s6817_s6 + $0x2430] sm:$0xff]  ;;  %v1446_v62 = vld [vmem:[%s6817_s6 + $0x24a0] sm:$0xff] }
 0x33f   : > { %5533 = vmatpush1.bf16.msra.mxu0 %v5532_v11  ;;  %v1319_v11 = vld [vmem:[%s6817_s6 + $0x20a8] sm:$0xff]  ;;  %v5570_v7 = vpack.c.bf16 %v1391_v56, %v1383_v40  ;;  %v1448_v1 = vld [vmem:[%s6817_s6 + $0x24b0] sm:$0xff] }
 0x340   : > { %5981 = vmatpush1.bf16.msra.mxu1 %v5980_v33  ;;  %5535 = vmatprep.subr.bf16.mxu0 %v5534_v30  ;;  %v1327_v33 = vld [vmem:[%s6817_s6 + $0x20e8] sm:$0xff]  ;;  %v1321_v30 = vld [vmem:[%s6817_s6 + $0x20b8] sm:$0xff]  ;;  %v1456_v56 = vld [vmem:[%s6817_s6 + $0x24f0] sm:$0xff] }
 0x341   : > { %5983 = vmatprep.subr.bf16.mxu1 %v5982_v16  ;;  %v5554_v16 = vpack.c.bf16 %v1327_v33, %v1319_v11  ;;  %v6002_v20 = vpack.c.bf16 %v1329_v50, %v1321_v30  ;;  %v1392_v33 = vld [vmem:[%s6817_s6 + $0x22f0] sm:$0xff]  ;;  %v1399_v30 = vld [vmem:[%s6817_s6 + $0x2328] sm:$0xff] }
 0x342   : > { %v1407_v50 = vld [vmem:[%s6817_s6 + $0x2368] sm:$0xff]  ;;  %v6020_v17 = vpack.c.bf16 %v1392_v33, %v1384_v10  ;;  %v1462_v10 = vld [vmem:[%s6817_s6 + $0x2520] sm:$0xff]  ;;  %v1464_v33 = vld [vmem:[%s6817_s6 + $0x2530] sm:$0xff] }
 0x343   : > { %5537 = vmatpush1.bf16.msra.mxu0 %v5536_v22  ;;  %v1335_v22 = vld [vmem:[%s6817_s6 + $0x2128] sm:$0xff]  ;;  %v5574_v18 = vpack.c.bf16 %v1407_v50, %v1399_v30  ;;  %v1472_v50 = vld [vmem:[%s6817_s6 + $0x2570] sm:$0xff] }
 0x344   : > { %5985 = vmatpush1.bf16.msra.mxu1 %v5984_v23  ;;  %5539 = vmatprep.subr.bf16.mxu0 %v5538_v24  ;;  %v1343_v23 = vld [vmem:[%s6817_s6 + $0x2168] sm:$0xff]  ;;  %v1337_v24 = vld [vmem:[%s6817_s6 + $0x2138] sm:$0xff] }
 0x345   : > { %5987 = vmatprep.subr.bf16.mxu1 %v5986_v29  ;;  %v5558_v29 = vpack.c.bf16 %v1343_v23, %v1335_v22  ;;  %v6006_v41 = vpack.c.bf16 %v1345_v27, %v1337_v24  ;;  %v1408_v23 = vld [vmem:[%s6817_s6 + $0x2370] sm:$0xff]  ;;  %v1415_v24 = vld [vmem:[%s6817_s6 + $0x23a8] sm:$0xff] }
 0x346   : > { %v1423_v27 = vld [vmem:[%s6817_s6 + $0x23e8] sm:$0xff]  ;;  %v6024_v31 = vpack.c.bf16 %v1408_v23, %v1400_v21  ;;  %v1478_v21 = vld [vmem:[%s6817_s6 + $0x25a0] sm:$0xff]  ;;  %v1480_v23 = vld [vmem:[%s6817_s6 + $0x25b0] sm:$0xff] }
 0x347   : > { %5541 = vmatpush1.bf16.msra.mxu0 %v5540_v37  ;;  %v1351_v37 = vld [vmem:[%s6817_s6 + $0x21a8] sm:$0xff]  ;;  %v5578_v34 = vpack.c.bf16 %v1423_v27, %v1415_v24  ;;  %v1488_v27 = vld [vmem:[%s6817_s6 + $0x25f0] sm:$0xff] }
 0x348   : > { %5989 = vmatpush1.bf16.msra.mxu1 %v5988_v39  ;;  %5543 = vmatprep.subr.bf16.mxu0 %v5542_v42  ;;  %v1359_v39 = vld [vmem:[%s6817_s6 + $0x21e8] sm:$0xff]  ;;  %v1361_v42 = vld [vmem:[%s6817_s6 + $0x21f8] sm:$0xff] }
 0x349   : > { %5991 = vmatprep.subr.bf16.mxu1 %v5990_v45  ;;  %v5562_v44 = vpack.c.bf16 %v1359_v39, %v1351_v37  ;;  %v1350_v45 = vld [vmem:[%s6817_s6 + $0x21a0] sm:$0xff]  ;;  %v1424_v39 = vld [vmem:[%s6817_s6 + $0x23f0] sm:$0xff] }
 0x34b   : > { %5545 = vmatpush1.bf16.msra.mxu0 %v5544_v52  ;;  %v1369_v52 = vld [vmem:[%s6817_s6 + $0x2238] sm:$0xff] }
 0x34c   : > { %5993 = vmatpush1.bf16.msra.mxu1 %v5992_v54  ;;  %5547 = vmatprep.subr.bf16.mxu0 %v5546_v57  ;;  %v1377_v54 = vld [vmem:[%s6817_s6 + $0x2278] sm:$0xff]  ;;  %v5564_v57 = vpack.c.bf16 %v1358_v47, %v1350_v45  ;;  %v6028_v45 = vpack.c.bf16 %v1424_v39, %v1416_v36  ;;  %v1494_v36 = vld [vmem:[%s6817_s6 + $0x2620] sm:$0xff]  ;;  %v1496_v39 = vld [vmem:[%s6817_s6 + $0x2630] sm:$0xff] }
 0x34d   : > { %5995 = vmatprep.subr.bf16.mxu1 %v5994_v61  ;;  %v1374_v61 = vld [vmem:[%s6817_s6 + $0x2260] sm:$0xff]  ;;  %v6014_v32 = vpack.c.bf16 %v1377_v54, %v1369_v52  ;;  %v1447_v52 = vld [vmem:[%s6817_s6 + $0x24a8] sm:$0xff] }
 0x34e   : > { %v1455_v54 = vld [vmem:[%s6817_s6 + $0x24e8] sm:$0xff] }
 0x34f   : > { %5549 = vmatpush1.bf16.msra.mxu0 %v5548_v2  ;;  %v1385_v2 = vld [vmem:[%s6817_s6 + $0x22b8] sm:$0xff] }
 0x350   : > { %5997 = vmatpush1.bf16.msra.mxu1 %v5996_v3  ;;  %5551 = vmatprep.subr.bf16.mxu0 %v5550_v4  ;;  %v1393_v3 = vld [vmem:[%s6817_s6 + $0x22f8] sm:$0xff]  ;;  %v5568_v4 = vpack.c.bf16 %v1374_v61, %v1366_v60  ;;  %v5586_v61 = vpack.c.bf16 %v1455_v54, %v1447_v52  ;;  %v1520_v54 = vld [vmem:[%s6817_s6 + $0x26f0] sm:$0xff] }
 0x351   : > { %5999 = vmatprep.subr.bf16.mxu1 %v5998_v9  ;;  %v1390_v9 = vld [vmem:[%s6817_s6 + $0x22e0] sm:$0xff]  ;;  %v6018_v11 = vpack.c.bf16 %v1393_v3, %v1385_v2  ;;  %v1463_v2 = vld [vmem:[%s6817_s6 + $0x2528] sm:$0xff] }
 0x352   : > { %3415 = vmatmul.mubr.f32.vlgmr.msra.gmra.mrb[2].mxu0 %v7291_v15  ;;  %v1471_v3 = vld [vmem:[%s6817_s6 + $0x2568] sm:$0xff] }
 0x353   : > { %5553 = vmatpush1.bf16.msra.mxu0 %v5552_v13  ;;  %3912 = vmatmul.mubr.f32.vlgmr.msra.gmra.mrb[2].mxu1 %v7291_v15  ;;  %v1353_v15 = vld [vmem:[%s6817_s6 + $0x21b8] sm:$0xff] }
 0x354   : > { %6001 = vmatpush1.bf16.msra.mxu1 %v6000_v14  ;;  %5555 = vmatprep.subr.bf16.mxu0 %v5554_v16  ;;  %v6010_v49 = vpack.c.bf16 %v1361_v42, %v1353_v15  ;;  %v1401_v13 = vld [vmem:[%s6817_s6 + $0x2338] sm:$0xff]  ;;  %v5572_v16 = vpack.c.bf16 %v1390_v9, %v1382_v8  ;;  %v1431_v15 = vld [vmem:[%s6817_s6 + $0x2428] sm:$0xff]  ;;  %v6036_v8 = vpack.c.bf16 %v1456_v56, %v1448_v1  ;;  %v1526_v1 = vld [vmem:[%s6817_s6 + $0x2720] sm:$0xff] }
 0x355   : > { %6003 = vmatprep.subr.bf16.mxu1 %v6002_v20  ;;  %3485 = vmatprep.mubr.f32.mxu0 %v7446_v5  ;;  %v1409_v14 = vld [vmem:[%s6817_s6 + $0x2378] sm:$0xff]  ;;  %v1406_v20 = vld [vmem:[%s6817_s6 + $0x2360] sm:$0xff]  ;;  %v1439_v42 = vld [vmem:[%s6817_s6 + $0x2468] sm:$0xff]  ;;  %v5590_v9 = vpack.c.bf16 %v1471_v3, %v1463_v2 }
 0x356   : > { %3982 = vmatprep.mubr.f32.mxu1 %v7446_v5  ;;  %v1375_v5 = vld [vmem:[%s6817_s6 + $0x2268] sm:$0xff]  ;;  %v6022_v22 = vpack.c.bf16 %v1409_v14, %v1401_v13  ;;  %v5582_v47 = vpack.c.bf16 %v1439_v42, %v1431_v15  ;;  %v1504_v42 = vld [vmem:[%s6817_s6 + $0x2670] sm:$0xff] }
 0x357   : > { %5557 = vmatpush1.bf16.msra.mxu0 %v5556_v28  ;;  %v5566_v59 = vpack.c.bf16 %v1375_v5, %v1367_v26  ;;  %v1417_v28 = vld [vmem:[%s6817_s6 + $0x23b8] sm:$0xff]  ;;  %v1440_v5 = vld [vmem:[%s6817_s6 + $0x2470] sm:$0xff]  ;;  %v1479_v13 = vld [vmem:[%s6817_s6 + $0x25a8] sm:$0xff] }
 0x358   : > { %6005 = vmatpush1.bf16.msra.mxu1 %v6004_v25  ;;  %5559 = vmatprep.subr.bf16.mxu0 %v5558_v29  ;;  %v1425_v25 = vld [vmem:[%s6817_s6 + $0x23f8] sm:$0xff]  ;;  %v5576_v29 = vpack.c.bf16 %v1406_v20, %v1398_v19  ;;  %v6032_v60 = vpack.c.bf16 %v1440_v5, %v1432_v51  ;;  %v1487_v14 = vld [vmem:[%s6817_s6 + $0x25e8] sm:$0xff]  ;;  %v6040_v19 = vpack.c.bf16 %v1472_v50, %v1464_v33  ;;  %v1510_v51 = vld [vmem:[%s6817_s6 + $0x26a0] sm:$0xff] }
 0x359   : > { %6007 = vmatprep.subr.bf16.mxu1 %v6006_v41  ;;  %v1422_v41 = vld [vmem:[%s6817_s6 + $0x23e0] sm:$0xff]  ;;  %v6026_v37 = vpack.c.bf16 %v1425_v25, %v1417_v28  ;;  %v5594_v20 = vpack.c.bf16 %v1487_v14, %v1479_v13  ;;  %v1495_v28 = vld [vmem:[%s6817_s6 + $0x2628] sm:$0xff]  ;;  %v1512_v5 = vld [vmem:[%s6817_s6 + $0x26b0] sm:$0xff] }
 0x35a   : > { %v1503_v25 = vld [vmem:[%s6817_s6 + $0x2668] sm:$0xff]  ;;  %v1528_v56 = vld [vmem:[%s6817_s6 + $0x2730] sm:$0xff]  ;;  %v1542_v33 = vld [vmem:[%s6817_s6 + $0x27a0] sm:$0xff] }
 0x35b   : > { %5561 = vmatpush1.bf16.msra.mxu0 %v5560_v43  ;;  %v1433_v43 = vld [vmem:[%s6817_s6 + $0x2438] sm:$0xff]  ;;  %v1536_v3 = vld [vmem:[%s6817_s6 + $0x2770] sm:$0xff] }
 0x35c   : > { %6009 = vmatpush1.bf16.msra.mxu1 %v6008_v0  ;;  %5563 = vmatprep.subr.bf16.mxu0 %v5562_v44  ;;  %v1441_v0 = vld [vmem:[%s6817_s6 + $0x2478] sm:$0xff]  ;;  %v5580_v44 = vpack.c.bf16 %v1422_v41, %v1414_v35  ;;  %v6044_v35 = vpack.c.bf16 %v1488_v27, %v1480_v23  ;;  %v5598_v41 = vpack.c.bf16 %v1503_v25, %v1495_v28  ;;  %v1544_v50 = vld [vmem:[%s6817_s6 + $0x27b0] sm:$0xff]  ;;  %v1558_v23 = vld [vmem:[%s6817_s6 + $0x2820] sm:$0xff] }
 0x35d   : > { %6011 = vmatprep.subr.bf16.mxu1 %v6010_v49  ;;  %v1438_v49 = vld [vmem:[%s6817_s6 + $0x2460] sm:$0xff]  ;;  %v6030_v26 = vpack.c.bf16 %v1441_v0, %v1433_v43  ;;  %v1511_v43 = vld [vmem:[%s6817_s6 + $0x26a8] sm:$0xff]  ;;  %v1552_v14 = vld [vmem:[%s6817_s6 + $0x27f0] sm:$0xff] }
 0x35e   : > { %v1519_v0 = vld [vmem:[%s6817_s6 + $0x26e8] sm:$0xff]  ;;  %v1560_v27 = vld [vmem:[%s6817_s6 + $0x2830] sm:$0xff] }
 0x35f   : > { %5565 = vmatpush1.bf16.msra.mxu0 %v5564_v57  ;;  %v1449_v57 = vld [vmem:[%s6817_s6 + $0x24b8] sm:$0xff]  ;;  %v1568_v25 = vld [vmem:[%s6817_s6 + $0x2870] sm:$0xff] }
 0x360   : > { %6013 = vmatpush1.bf16.msra.mxu1 %v6012_v58  ;;  %5567 = vmatprep.subr.bf16.mxu0 %v5566_v59  ;;  %v1457_v58 = vld [vmem:[%s6817_s6 + $0x24f8] sm:$0xff]  ;;  %v5584_v59 = vpack.c.bf16 %v1438_v49, %v1430_v48  ;;  %v6048_v48 = vpack.c.bf16 %v1504_v42, %v1496_v39  ;;  %v5602_v49 = vpack.c.bf16 %v1519_v0, %v1511_v43  ;;  %v1574_v39 = vld [vmem:[%s6817_s6 + $0x28a0] sm:$0xff]  ;;  %v1576_v42 = vld [vmem:[%s6817_s6 + $0x28b0] sm:$0xff] }
 0x361   : > { %6015 = vmatprep.subr.bf16.mxu1 %v6014_v32  ;;  %v1454_v32 = vld [vmem:[%s6817_s6 + $0x24e0] sm:$0xff]  ;;  %v6034_v40 = vpack.c.bf16 %v1457_v58, %v1449_v57  ;;  %v1527_v57 = vld [vmem:[%s6817_s6 + $0x2728] sm:$0xff]  ;;  %v1584_v0 = vld [vmem:[%s6817_s6 + $0x28f0] sm:$0xff] }
 0x362   : > { %v1535_v58 = vld [vmem:[%s6817_s6 + $0x2768] sm:$0xff] }
 0x363   : > { %5569 = vmatpush1.bf16.msra.mxu0 %v5568_v4  ;;  %v1465_v4 = vld [vmem:[%s6817_s6 + $0x2538] sm:$0xff] }
 0x364   : > { %6017 = vmatpush1.bf16.msra.mxu1 %v6016_v6  ;;  %5571 = vmatprep.subr.bf16.mxu0 %v5570_v7  ;;  %v1473_v6 = vld [vmem:[%s6817_s6 + $0x2578] sm:$0xff]  ;;  %v5588_v7 = vpack.c.bf16 %v1454_v32, %v1446_v62  ;;  %v6052_v62 = vpack.c.bf16 %v1520_v54, %v1512_v5  ;;  %v5606_v32 = vpack.c.bf16 %v1535_v58, %v1527_v57  ;;  %v1590_v5 = vld [vmem:[%s6817_s6 + $0x2920] sm:$0xff]  ;;  %v1592_v54 = vld [vmem:[%s6817_s6 + $0x2930] sm:$0xff] }
 0x365   : > { %6019 = vmatprep.subr.bf16.mxu1 %v6018_v11  ;;  %v1470_v11 = vld [vmem:[%s6817_s6 + $0x2560] sm:$0xff]  ;;  %v6038_v30 = vpack.c.bf16 %v1473_v6, %v1465_v4  ;;  %v1543_v4 = vld [vmem:[%s6817_s6 + $0x27a8] sm:$0xff]  ;;  %v1600_v58 = vld [vmem:[%s6817_s6 + $0x2970] sm:$0xff] }
 0x366   : > { %v1551_v6 = vld [vmem:[%s6817_s6 + $0x27e8] sm:$0xff] }
 0x367   : > { %5573 = vmatpush1.bf16.msra.mxu0 %v5572_v16  ;;  %v1481_v16 = vld [vmem:[%s6817_s6 + $0x25b8] sm:$0xff] }
 0x368   : > { %6021 = vmatpush1.bf16.msra.mxu1 %v6020_v17  ;;  %5575 = vmatprep.subr.bf16.mxu0 %v5574_v18  ;;  %v1489_v17 = vld [vmem:[%s6817_s6 + $0x25f8] sm:$0xff]  ;;  %v5592_v18 = vpack.c.bf16 %v1470_v11, %v1462_v10  ;;  %v6056_v10 = vpack.c.bf16 %v1536_v3, %v1528_v56  ;;  %v5610_v11 = vpack.c.bf16 %v1551_v6, %v1543_v4  ;;  %v1614_v56 = vld [vmem:[%s6817_s6 + $0x29e0] sm:$0xff]  ;;  %v1616_v4 = vld [vmem:[%s6817_s6 + $0x29f0] sm:$0xff] }
 0x369   : > { %6023 = vmatprep.subr.bf16.mxu1 %v6022_v22  ;;  %v1486_v22 = vld [vmem:[%s6817_s6 + $0x25e0] sm:$0xff]  ;;  %v6042_v24 = vpack.c.bf16 %v1489_v17, %v1481_v16  ;;  %v1559_v16 = vld [vmem:[%s6817_s6 + $0x2828] sm:$0xff] }
 0x36a   : > { %v1567_v17 = vld [vmem:[%s6817_s6 + $0x2868] sm:$0xff] }
 0x36b   : > { %5577 = vmatpush1.bf16.msra.mxu0 %v5576_v29  ;;  %v1497_v29 = vld [vmem:[%s6817_s6 + $0x2638] sm:$0xff]  ;;  %v1623_v6 = vld [vmem:[%s6817_s6 + $0x2a28] sm:$0xff] }
 0x36c   : > { %6025 = vmatpush1.bf16.msra.mxu1 %v6024_v31  ;;  %5579 = vmatprep.subr.bf16.mxu0 %v5578_v34  ;;  %v1505_v31 = vld [vmem:[%s6817_s6 + $0x2678] sm:$0xff]  ;;  %v5596_v34 = vpack.c.bf16 %v1486_v22, %v1478_v21  ;;  %v6060_v21 = vpack.c.bf16 %v1552_v14, %v1544_v50  ;;  %v5614_v22 = vpack.c.bf16 %v1567_v17, %v1559_v16  ;;  %v1624_v50 = vld [vmem:[%s6817_s6 + $0x2a30] sm:$0xff]  ;;  %v1639_v16 = vld [vmem:[%s6817_s6 + $0x2aa8] sm:$0xff] }
 0x36d   : > { %6027 = vmatprep.subr.bf16.mxu1 %v6026_v37  ;;  %v1502_v37 = vld [vmem:[%s6817_s6 + $0x2660] sm:$0xff]  ;;  %v6046_v15 = vpack.c.bf16 %v1505_v31, %v1497_v29  ;;  %v1575_v29 = vld [vmem:[%s6817_s6 + $0x28a8] sm:$0xff]  ;;  %v1632_v14 = vld [vmem:[%s6817_s6 + $0x2a70] sm:$0xff] }
 0x36e   : > { %v1583_v31 = vld [vmem:[%s6817_s6 + $0x28e8] sm:$0xff] }
 0x36f   : > { %5581 = vmatpush1.bf16.msra.mxu0 %v5580_v44  ;;  %v1513_v44 = vld [vmem:[%s6817_s6 + $0x26b8] sm:$0xff]  ;;  %v1647_v17 = vld [vmem:[%s6817_s6 + $0x2ae8] sm:$0xff] }
 0x370   : > { %6029 = vmatpush1.bf16.msra.mxu1 %v6028_v45  ;;  %5583 = vmatprep.subr.bf16.mxu0 %v5582_v47  ;;  %v1521_v45 = vld [vmem:[%s6817_s6 + $0x26f8] sm:$0xff]  ;;  %v5600_v47 = vpack.c.bf16 %v1502_v37, %v1494_v36  ;;  %v6064_v36 = vpack.c.bf16 %v1568_v25, %v1560_v27  ;;  %v5618_v37 = vpack.c.bf16 %v1583_v31, %v1575_v29  ;;  %v1640_v27 = vld [vmem:[%s6817_s6 + $0x2ab0] sm:$0xff]  ;;  %v1655_v29 = vld [vmem:[%s6817_s6 + $0x2b28] sm:$0xff] }
 0x371   : > { %6031 = vmatprep.subr.bf16.mxu1 %v6030_v26  ;;  %v1518_v26 = vld [vmem:[%s6817_s6 + $0x26e0] sm:$0xff]  ;;  %v6050_v52 = vpack.c.bf16 %v1521_v45, %v1513_v44  ;;  %v1591_v44 = vld [vmem:[%s6817_s6 + $0x2928] sm:$0xff]  ;;  %v1648_v25 = vld [vmem:[%s6817_s6 + $0x2af0] sm:$0xff] }
 0x372   : > { %v1599_v45 = vld [vmem:[%s6817_s6 + $0x2968] sm:$0xff] }
 0x373   : > { %5585 = vmatpush1.bf16.msra.mxu0 %v5584_v59  ;;  %v1529_v59 = vld [vmem:[%s6817_s6 + $0x2738] sm:$0xff]  ;;  %v1663_v31 = vld [vmem:[%s6817_s6 + $0x2b68] sm:$0xff] }
 0x374   : > { %6033 = vmatpush1.bf16.msra.mxu1 %v6032_v60  ;;  %5587 = vmatprep.subr.bf16.mxu0 %v5586_v61  ;;  %v1537_v60 = vld [vmem:[%s6817_s6 + $0x2778] sm:$0xff]  ;;  %v5604_v61 = vpack.c.bf16 %v1518_v26, %v1510_v51  ;;  %v6068_v51 = vpack.c.bf16 %v1584_v0, %v1576_v42  ;;  %v5622_v26 = vpack.c.bf16 %v1599_v45, %v1591_v44  ;;  %v1656_v42 = vld [vmem:[%s6817_s6 + $0x2b30] sm:$0xff]  ;;  %v1671_v44 = vld [vmem:[%s6817_s6 + $0x2ba8] sm:$0xff] }
 0x375   : > { %6035 = vmatprep.subr.bf16.mxu1 %v6034_v40  ;;  %v1534_v40 = vld [vmem:[%s6817_s6 + $0x2760] sm:$0xff]  ;;  %v6054_v2 = vpack.c.bf16 %v1537_v60, %v1529_v59  ;;  %v1607_v59 = vld [vmem:[%s6817_s6 + $0x29a8] sm:$0xff]  ;;  %v1664_v0 = vld [vmem:[%s6817_s6 + $0x2b70] sm:$0xff] }
 0x376   : > { %v1615_v60 = vld [vmem:[%s6817_s6 + $0x29e8] sm:$0xff] }
 0x377   : > { %5589 = vmatpush1.bf16.msra.mxu0 %v5588_v7  ;;  %v1545_v7 = vld [vmem:[%s6817_s6 + $0x27b8] sm:$0xff]  ;;  %v1679_v45 = vld [vmem:[%s6817_s6 + $0x2be8] sm:$0xff] }
 0x378   : > { %6037 = vmatpush1.bf16.msra.mxu1 %v6036_v8  ;;  %5591 = vmatprep.subr.bf16.mxu0 %v5590_v9  ;;  %v1553_v8 = vld [vmem:[%s6817_s6 + $0x27f8] sm:$0xff]  ;;  %v5608_v9 = vpack.c.bf16 %v1534_v40, %v1526_v1  ;;  %v5626_v1 = vpack.c.bf16 %v1615_v60, %v1607_v59  ;;  %v1606_v40 = vld [vmem:[%s6817_s6 + $0x29a0] sm:$0xff]  ;;  %v1687_v59 = vld [vmem:[%s6817_s6 + $0x2c28] sm:$0xff] }
 0x379   : > { %6039 = vmatprep.subr.bf16.mxu1 %v6038_v30  ;;  %v1550_v30 = vld [vmem:[%s6817_s6 + $0x27e0] sm:$0xff]  ;;  %v6058_v13 = vpack.c.bf16 %v1553_v8, %v1545_v7  ;;  %v1625_v7 = vld [vmem:[%s6817_s6 + $0x2a38] sm:$0xff]  ;;  %v1695_v60 = vld [vmem:[%s6817_s6 + $0x2c68] sm:$0xff] }
 0x37a   : > { %v1633_v8 = vld [vmem:[%s6817_s6 + $0x2a78] sm:$0xff] }
 0x37b   : > { %5593 = vmatpush1.bf16.msra.mxu0 %v5592_v18  ;;  %v1561_v18 = vld [vmem:[%s6817_s6 + $0x2838] sm:$0xff] }
 0x37c   : > { %6041 = vmatpush1.bf16.msra.mxu1 %v6040_v19  ;;  %5595 = vmatprep.subr.bf16.mxu0 %v5594_v20  ;;  %v1569_v19 = vld [vmem:[%s6817_s6 + $0x2878] sm:$0xff]  ;;  %v5612_v20 = vpack.c.bf16 %v1550_v30, %v1542_v33  ;;  %v1622_v33 = vld [vmem:[%s6817_s6 + $0x2a20] sm:$0xff] }
 0x37d   : > { %6043 = vmatprep.subr.bf16.mxu1 %v6042_v24  ;;  %v1566_v24 = vld [vmem:[%s6817_s6 + $0x2860] sm:$0xff]  ;;  %v6062_v28 = vpack.c.bf16 %v1569_v19, %v1561_v18  ;;  %v1641_v18 = vld [vmem:[%s6817_s6 + $0x2ab8] sm:$0xff] }
 0x37e   : > { %v1630_v30 = vld [vmem:[%s6817_s6 + $0x2a60] sm:$0xff]  ;;  %v1649_v19 = vld [vmem:[%s6817_s6 + $0x2af8] sm:$0xff] }
 0x37f   : > { %5597 = vmatpush1.bf16.msra.mxu0 %v5596_v34  ;;  %v1577_v34 = vld [vmem:[%s6817_s6 + $0x28b8] sm:$0xff] }
 0x380   : > { %6045 = vmatpush1.bf16.msra.mxu1 %v6044_v35  ;;  %5599 = vmatprep.subr.bf16.mxu0 %v5598_v41  ;;  %v1585_v35 = vld [vmem:[%s6817_s6 + $0x28f8] sm:$0xff]  ;;  %v5616_v41 = vpack.c.bf16 %v1566_v24, %v1558_v23  ;;  %v1638_v23 = vld [vmem:[%s6817_s6 + $0x2aa0] sm:$0xff] }
 0x381   : > { %6047 = vmatprep.subr.bf16.mxu1 %v6046_v15  ;;  %v1582_v15 = vld [vmem:[%s6817_s6 + $0x28e0] sm:$0xff]  ;;  %v6066_v43 = vpack.c.bf16 %v1585_v35, %v1577_v34  ;;  %v1657_v34 = vld [vmem:[%s6817_s6 + $0x2b38] sm:$0xff] }
 0x382   : > { %v1646_v24 = vld [vmem:[%s6817_s6 + $0x2ae0] sm:$0xff]  ;;  %v1665_v35 = vld [vmem:[%s6817_s6 + $0x2b78] sm:$0xff] }
 0x383   : > { %5601 = vmatpush1.bf16.msra.mxu0 %v5600_v47  ;;  %v1593_v47 = vld [vmem:[%s6817_s6 + $0x2938] sm:$0xff] }
 0x384   : > { %6049 = vmatpush1.bf16.msra.mxu1 %v6048_v48  ;;  %5603 = vmatprep.subr.bf16.mxu0 %v5602_v49  ;;  %v1601_v48 = vld [vmem:[%s6817_s6 + $0x2978] sm:$0xff]  ;;  %v5620_v49 = vpack.c.bf16 %v1582_v15, %v1574_v39  ;;  %v1654_v39 = vld [vmem:[%s6817_s6 + $0x2b20] sm:$0xff] }
 0x385   : > { %6051 = vmatprep.subr.bf16.mxu1 %v6050_v52  ;;  %v1598_v52 = vld [vmem:[%s6817_s6 + $0x2960] sm:$0xff]  ;;  %v6070_v57 = vpack.c.bf16 %v1601_v48, %v1593_v47  ;;  %v1673_v47 = vld [vmem:[%s6817_s6 + $0x2bb8] sm:$0xff] }
 0x386   : > { %v1662_v15 = vld [vmem:[%s6817_s6 + $0x2b60] sm:$0xff]  ;;  %v1681_v48 = vld [vmem:[%s6817_s6 + $0x2bf8] sm:$0xff] }
 0x387   : > { %5605 = vmatpush1.bf16.msra.mxu0 %v5604_v61  ;;  %v1617_v61 = vld [vmem:[%s6817_s6 + $0x29f8] sm:$0xff] }
 0x388   : > { %6053 = vmatpush1.bf16.msra.mxu1 %v6052_v62  ;;  %5607 = vmatprep.subr.bf16.mxu0 %v5606_v32  ;;  %v5624_v62 = vpack.c.bf16 %v1598_v52, %v1590_v5  ;;  %v6072_v32 = vpack.c.bf16 %v1600_v58, %v1592_v54  ;;  %v1670_v5 = vld [vmem:[%s6817_s6 + $0x2ba0] sm:$0xff]  ;;  %v1672_v54 = vld [vmem:[%s6817_s6 + $0x2bb0] sm:$0xff] }
 0x389   : > { %6055 = vmatprep.subr.bf16.mxu1 %v6054_v2  ;;  %v1608_v2 = vld [vmem:[%s6817_s6 + $0x29b0] sm:$0xff]  ;;  %v1678_v52 = vld [vmem:[%s6817_s6 + $0x2be0] sm:$0xff] }
 0x38a   : > { %v1680_v58 = vld [vmem:[%s6817_s6 + $0x2bf0] sm:$0xff] }
 0x38b   : > { %5609 = vmatpush1.bf16.msra.mxu0 %v5608_v9  ;;  %v5628_v9 = vpack.c.bf16 %v1614_v56, %v1606_v40  ;;  %v1686_v40 = vld [vmem:[%s6817_s6 + $0x2c20] sm:$0xff] }
 0x38c   : > { %6057 = vmatpush1.bf16.msra.mxu1 %v6056_v10  ;;  %5611 = vmatprep.subr.bf16.mxu0 %v5610_v11  ;;  %v6076_v10 = vpack.c.bf16 %v1616_v4, %v1608_v2  ;;  %v1694_v56 = vld [vmem:[%s6817_s6 + $0x2c60] sm:$0xff]  ;;  %v1688_v2 = vld [vmem:[%s6817_s6 + $0x2c30] sm:$0xff] }
 0x38d   : > { %6059 = vmatprep.subr.bf16.mxu1 %v6058_v13  ;;  %v6078_v13 = vpack.c.bf16 %v1633_v8, %v1625_v7  ;;  %v1696_v4 = vld [vmem:[%s6817_s6 + $0x2c70] sm:$0xff]  ;;  %v1705_v7 = vld [vmem:[%s6817_s6 + $0x2cb8] sm:$0xff] }
 0x38e   : > { %v1713_v8 = vld [vmem:[%s6817_s6 + $0x2cf8] sm:$0xff] }
 0x38f   : > { %5613 = vmatpush1.bf16.msra.mxu0 %v5612_v20  ;;  %v5632_v20 = vpack.c.bf16 %v1630_v30, %v1622_v33  ;;  %v1702_v33 = vld [vmem:[%s6817_s6 + $0x2ca0] sm:$0xff] }
 0x390   : > { %6061 = vmatpush1.bf16.msra.mxu1 %v6060_v21  ;;  %5615 = vmatprep.subr.bf16.mxu0 %v5614_v22  ;;  %v6080_v21 = vpack.c.bf16 %v1632_v14, %v1624_v50  ;;  %v5634_v22 = vpack.c.bf16 %v1647_v17, %v1639_v16  ;;  %v1710_v30 = vld [vmem:[%s6817_s6 + $0x2ce0] sm:$0xff]  ;;  %v1704_v50 = vld [vmem:[%s6817_s6 + $0x2cb0] sm:$0xff]  ;;  %v1719_v16 = vld [vmem:[%s6817_s6 + $0x2d28] sm:$0xff] }
 0x391   : > { %6063 = vmatprep.subr.bf16.mxu1 %v6062_v28  ;;  %v6082_v28 = vpack.c.bf16 %v1649_v19, %v1641_v18  ;;  %v1712_v14 = vld [vmem:[%s6817_s6 + $0x2cf0] sm:$0xff]  ;;  %v1727_v17 = vld [vmem:[%s6817_s6 + $0x2d68] sm:$0xff]  ;;  %v1721_v18 = vld [vmem:[%s6817_s6 + $0x2d38] sm:$0xff] }
 0x392   : > { %3486 = vmatmul.mubr.f32.vlgmr.msra.gmra.mrb[2].mxu0 %v7434_v53  ;;  %v1729_v19 = vld [vmem:[%s6817_s6 + $0x2d78] sm:$0xff] }
 0x393   : > { %5617 = vmatpush1.bf16.msra.mxu0 %v5616_v41  ;;  %3983 = vmatmul.mubr.f32.vlgmr.msra.gmra.mrb[2].mxu1 %v7434_v53  ;;  %v1609_v53 = vld [vmem:[%s6817_s6 + $0x29b8] sm:$0xff]  ;;  %v5636_v41 = vpack.c.bf16 %v1646_v24, %v1638_v23  ;;  %v1718_v23 = vld [vmem:[%s6817_s6 + $0x2d20] sm:$0xff] }
 0x394   : > { %6065 = vmatpush1.bf16.msra.mxu1 %v6064_v36  ;;  %5619 = vmatprep.subr.bf16.mxu0 %v5618_v37  ;;  %v6074_v3 = vpack.c.bf16 %v1617_v61, %v1609_v53  ;;  %v6084_v36 = vpack.c.bf16 %v1648_v25, %v1640_v27  ;;  %v5638_v37 = vpack.c.bf16 %v1663_v31, %v1655_v29  ;;  %v1689_v53 = vld [vmem:[%s6817_s6 + $0x2c38] sm:$0xff]  ;;  %v1726_v24 = vld [vmem:[%s6817_s6 + $0x2d60] sm:$0xff]  ;;  %v1720_v27 = vld [vmem:[%s6817_s6 + $0x2d30] sm:$0xff] }
 0x395   : > { %6067 = vmatprep.subr.bf16.mxu1 %v6066_v43  ;;  %3556 = vmatprep.mubr.f32.mxu0 %v7587_v55  ;;  %v6086_v43 = vpack.c.bf16 %v1665_v35, %v1657_v34  ;;  %v1697_v61 = vld [vmem:[%s6817_s6 + $0x2c78] sm:$0xff]  ;;  %v1728_v25 = vld [vmem:[%s6817_s6 + $0x2d70] sm:$0xff]  ;;  %v1735_v29 = vld [vmem:[%s6817_s6 + $0x2da8] sm:$0xff] }
 0x396   : > { %4053 = vmatprep.mubr.f32.mxu1 %v7587_v55  ;;  %v1631_v55 = vld [vmem:[%s6817_s6 + $0x2a68] sm:$0xff]  ;;  %v1737_v34 = vld [vmem:[%s6817_s6 + $0x2db8] sm:$0xff] }
 0x397   : > { %5621 = vmatpush1.bf16.msra.mxu0 %v5620_v49  ;;  %v5630_v11 = vpack.c.bf16 %v1631_v55, %v1623_v6  ;;  %v5640_v49 = vpack.c.bf16 %v1662_v15, %v1654_v39  ;;  %v1703_v6 = vld [vmem:[%s6817_s6 + $0x2ca8] sm:$0xff]  ;;  %v1745_v35 = vld [vmem:[%s6817_s6 + $0x2df8] sm:$0xff]  ;;  %v1734_v39 = vld [vmem:[%s6817_s6 + $0x2da0] sm:$0xff] }
 0x398   : > { %6069 = vmatpush1.bf16.msra.mxu1 %v6068_v51  ;;  %5623 = vmatprep.subr.bf16.mxu0 %v5622_v26  ;;  %v6088_v51 = vpack.c.bf16 %v1664_v0, %v1656_v42  ;;  %v5642_v26 = vpack.c.bf16 %v1679_v45, %v1671_v44  ;;  %v1711_v55 = vld [vmem:[%s6817_s6 + $0x2ce8] sm:$0xff]  ;;  %v1742_v15 = vld [vmem:[%s6817_s6 + $0x2de0] sm:$0xff]  ;;  %v1736_v42 = vld [vmem:[%s6817_s6 + $0x2db0] sm:$0xff] }
 0x399   : > { %6071 = vmatprep.subr.bf16.mxu1 %v6070_v57  ;;  %v6090_v57 = vpack.c.bf16 %v1681_v48, %v1673_v47  ;;  %v1743_v31 = vld [vmem:[%s6817_s6 + $0x2de8] sm:$0xff]  ;;  %v1744_v0 = vld [vmem:[%s6817_s6 + $0x2df0] sm:$0xff]  ;;  %v1753_v47 = vld [vmem:[%s6817_s6 + $0x2e38] sm:$0xff] }
 0x39a   : > { %v1751_v44 = vld [vmem:[%s6817_s6 + $0x2e28] sm:$0xff]  ;;  %v1761_v48 = vld [vmem:[%s6817_s6 + $0x2e78] sm:$0xff] }
 0x39b   : > { %5625 = vmatpush1.bf16.msra.mxu0 %v5624_v62  ;;  %v5644_v62 = vpack.c.bf16 %v1678_v52, %v1670_v5  ;;  %v1759_v45 = vld [vmem:[%s6817_s6 + $0x2e68] sm:$0xff]  ;;  %v1750_v5 = vld [vmem:[%s6817_s6 + $0x2e20] sm:$0xff] }
 0x39c   : > { %6073 = vmatpush1.bf16.msra.mxu1 %v6072_v32  ;;  %5627 = vmatprep.subr.bf16.mxu0 %v5626_v1  ;;  %v6092_v32 = vpack.c.bf16 %v1680_v58, %v1672_v54  ;;  %v5646_v1 = vpack.c.bf16 %v1695_v60, %v1687_v59  ;;  %v1758_v52 = vld [vmem:[%s6817_s6 + $0x2e60] sm:$0xff]  ;;  %v1752_v54 = vld [vmem:[%s6817_s6 + $0x2e30] sm:$0xff]  ;;  %v1767_v59 = vld [vmem:[%s6817_s6 + $0x2ea8] sm:$0xff] }
 0x39d   : > { %6075 = vmatprep.subr.bf16.mxu1 %v6074_v3  ;;  %v6094_v3 = vpack.c.bf16 %v1697_v61, %v1689_v53  ;;  %v1760_v58 = vld [vmem:[%s6817_s6 + $0x2e70] sm:$0xff]  ;;  %v1775_v60 = vld [vmem:[%s6817_s6 + $0x2ee8] sm:$0xff]  ;;  %v1769_v53 = vld [vmem:[%s6817_s6 + $0x2eb8] sm:$0xff] }
 0x39e   : > { %v1777_v61 = vld [vmem:[%s6817_s6 + $0x2ef8] sm:$0xff] }
 0x39f   : > { %5629 = vmatpush1.bf16.msra.mxu0 %v5628_v9  ;;  %v5648_v9 = vpack.c.bf16 %v1694_v56, %v1686_v40  ;;  %v1766_v40 = vld [vmem:[%s6817_s6 + $0x2ea0] sm:$0xff] }
 0x3a0   : > { %6077 = vmatpush1.bf16.msra.mxu1 %v6076_v10  ;;  %5631 = vmatprep.subr.bf16.mxu0 %v5630_v11  ;;  %v6096_v10 = vpack.c.bf16 %v1696_v4, %v1688_v2  ;;  %v5650_v11 = vpack.c.bf16 %v1711_v55, %v1703_v6  ;;  %v1774_v56 = vld [vmem:[%s6817_s6 + $0x2ee0] sm:$0xff]  ;;  %v1768_v2 = vld [vmem:[%s6817_s6 + $0x2eb0] sm:$0xff]  ;;  %v1783_v6 = vld [vmem:[%s6817_s6 + $0x2f28] sm:$0xff] }
 0x3a1   : > { %6079 = vmatprep.subr.bf16.mxu1 %v6078_v13  ;;  %v6098_v13 = vpack.c.bf16 %v1713_v8, %v1705_v7  ;;  %v1776_v4 = vld [vmem:[%s6817_s6 + $0x2ef0] sm:$0xff]  ;;  %v1791_v55 = vld [vmem:[%s6817_s6 + $0x2f68] sm:$0xff]  ;;  %v1785_v7 = vld [vmem:[%s6817_s6 + $0x2f38] sm:$0xff] }
 0x3a2   : > { %v1793_v8 = vld [vmem:[%s6817_s6 + $0x2f78] sm:$0xff] }
 0x3a3   : > { %5633 = vmatpush1.bf16.msra.mxu0 %v5632_v20  ;;  %v5652_v20 = vpack.c.bf16 %v1710_v30, %v1702_v33  ;;  %v1782_v33 = vld [vmem:[%s6817_s6 + $0x2f20] sm:$0xff] }
 0x3a4   : > { %6081 = vmatpush1.bf16.msra.mxu1 %v6080_v21  ;;  %5635 = vmatprep.subr.bf16.mxu0 %v5634_v22  ;;  %v6100_v21 = vpack.c.bf16 %v1712_v14, %v1704_v50  ;;  %v5654_v22 = vpack.c.bf16 %v1727_v17, %v1719_v16  ;;  %v1790_v30 = vld [vmem:[%s6817_s6 + $0x2f60] sm:$0xff]  ;;  %v1784_v50 = vld [vmem:[%s6817_s6 + $0x2f30] sm:$0xff]  ;;  %v1799_v16 = vld [vmem:[%s6817_s6 + $0x2fa8] sm:$0xff] }
 0x3a5   : > { %6083 = vmatprep.subr.bf16.mxu1 %v6082_v28  ;;  %v6102_v28 = vpack.c.bf16 %v1729_v19, %v1721_v18  ;;  %v1792_v14 = vld [vmem:[%s6817_s6 + $0x2f70] sm:$0xff]  ;;  %v1807_v17 = vld [vmem:[%s6817_s6 + $0x2fe8] sm:$0xff]  ;;  %v1801_v18 = vld [vmem:[%s6817_s6 + $0x2fb8] sm:$0xff] }
 0x3a6   : > { %v1809_v19 = vld [vmem:[%s6817_s6 + $0x2ff8] sm:$0xff] }
 0x3a7   : > { %5637 = vmatpush1.bf16.msra.mxu0 %v5636_v41  ;;  %v5656_v41 = vpack.c.bf16 %v1726_v24, %v1718_v23  ;;  %v1798_v23 = vld [vmem:[%s6817_s6 + $0x2fa0] sm:$0xff] }
 0x3a8   : > { %6085 = vmatpush1.bf16.msra.mxu1 %v6084_v36  ;;  %5639 = vmatprep.subr.bf16.mxu0 %v5638_v37  ;;  %v6104_v36 = vpack.c.bf16 %v1728_v25, %v1720_v27  ;;  %v5658_v37 = vpack.c.bf16 %v1743_v31, %v1735_v29  ;;  %v1806_v24 = vld [vmem:[%s6817_s6 + $0x2fe0] sm:$0xff]  ;;  %v1800_v27 = vld [vmem:[%s6817_s6 + $0x2fb0] sm:$0xff]  ;;  %v1815_v29 = vld [vmem:[%s6817_s6 + $0x3028] sm:$0xff] }
 0x3a9   : > { %6087 = vmatprep.subr.bf16.mxu1 %v6086_v43  ;;  %v6106_v43 = vpack.c.bf16 %v1745_v35, %v1737_v34  ;;  %v1808_v25 = vld [vmem:[%s6817_s6 + $0x2ff0] sm:$0xff]  ;;  %v1823_v31 = vld [vmem:[%s6817_s6 + $0x3068] sm:$0xff]  ;;  %v1817_v34 = vld [vmem:[%s6817_s6 + $0x3038] sm:$0xff] }
 0x3aa   : > { %v1825_v35 = vld [vmem:[%s6817_s6 + $0x3078] sm:$0xff] }
 0x3ab   : > { %5641 = vmatpush1.bf16.msra.mxu0 %v5640_v49  ;;  %v5660_v49 = vpack.c.bf16 %v1742_v15, %v1734_v39  ;;  %v1814_v39 = vld [vmem:[%s6817_s6 + $0x3020] sm:$0xff] }
 0x3ac   : > { %6089 = vmatpush1.bf16.msra.mxu1 %v6088_v51  ;;  %5643 = vmatprep.subr.bf16.mxu0 %v5642_v26  ;;  %v6108_v51 = vpack.c.bf16 %v1744_v0, %v1736_v42  ;;  %v5662_v26 = vpack.c.bf16 %v1759_v45, %v1751_v44  ;;  %v1822_v15 = vld [vmem:[%s6817_s6 + $0x3060] sm:$0xff]  ;;  %v1816_v42 = vld [vmem:[%s6817_s6 + $0x3030] sm:$0xff]  ;;  %v1831_v44 = vld [vmem:[%s6817_s6 + $0x30a8] sm:$0xff] }
 0x3ad   : > { %6091 = vmatprep.subr.bf16.mxu1 %v6090_v57  ;;  %v6110_v57 = vpack.c.bf16 %v1761_v48, %v1753_v47  ;;  %v1824_v0 = vld [vmem:[%s6817_s6 + $0x3070] sm:$0xff]  ;;  %v1839_v45 = vld [vmem:[%s6817_s6 + $0x30e8] sm:$0xff]  ;;  %v1833_v47 = vld [vmem:[%s6817_s6 + $0x30b8] sm:$0xff] }
 0x3ae   : > { %v1841_v48 = vld [vmem:[%s6817_s6 + $0x30f8] sm:$0xff] }
 0x3af   : > { %5645 = vmatpush1.bf16.msra.mxu0 %v5644_v62  ;;  %v5664_v62 = vpack.c.bf16 %v1758_v52, %v1750_v5  ;;  %v1830_v5 = vld [vmem:[%s6817_s6 + $0x30a0] sm:$0xff] }
 0x3b0   : > { %6093 = vmatpush1.bf16.msra.mxu1 %v6092_v32  ;;  %5647 = vmatprep.subr.bf16.mxu0 %v5646_v1  ;;  %v6112_v32 = vpack.c.bf16 %v1760_v58, %v1752_v54  ;;  %v5666_v1 = vpack.c.bf16 %v1775_v60, %v1767_v59  ;;  %v1838_v52 = vld [vmem:[%s6817_s6 + $0x30e0] sm:$0xff]  ;;  %v1832_v54 = vld [vmem:[%s6817_s6 + $0x30b0] sm:$0xff]  ;;  %v1847_v59 = vld [vmem:[%s6817_s6 + $0x3128] sm:$0xff] }
 0x3b1   : > { %6095 = vmatprep.subr.bf16.mxu1 %v6094_v3  ;;  %v6114_v3 = vpack.c.bf16 %v1777_v61, %v1769_v53  ;;  %v1840_v58 = vld [vmem:[%s6817_s6 + $0x30f0] sm:$0xff]  ;;  %v1855_v60 = vld [vmem:[%s6817_s6 + $0x3168] sm:$0xff]  ;;  %v1849_v53 = vld [vmem:[%s6817_s6 + $0x3138] sm:$0xff] }
 0x3b2   : > { %v1857_v61 = vld [vmem:[%s6817_s6 + $0x3178] sm:$0xff] }
 0x3b3   : > { %5649 = vmatpush1.bf16.msra.mxu0 %v5648_v9  ;;  %v5668_v9 = vpack.c.bf16 %v1774_v56, %v1766_v40  ;;  %v1846_v40 = vld [vmem:[%s6817_s6 + $0x3120] sm:$0xff] }
 0x3b4   : > { %6097 = vmatpush1.bf16.msra.mxu1 %v6096_v10  ;;  %5651 = vmatprep.subr.bf16.mxu0 %v5650_v11  ;;  %v6116_v10 = vpack.c.bf16 %v1776_v4, %v1768_v2  ;;  %v5670_v11 = vpack.c.bf16 %v1791_v55, %v1783_v6  ;;  %v1854_v56 = vld [vmem:[%s6817_s6 + $0x3160] sm:$0xff]  ;;  %v1848_v2 = vld [vmem:[%s6817_s6 + $0x3130] sm:$0xff]  ;;  %v1863_v6 = vld [vmem:[%s6817_s6 + $0x31a8] sm:$0xff] }
 0x3b5   : > { %6099 = vmatprep.subr.bf16.mxu1 %v6098_v13  ;;  %v6118_v13 = vpack.c.bf16 %v1793_v8, %v1785_v7  ;;  %v1856_v4 = vld [vmem:[%s6817_s6 + $0x3170] sm:$0xff]  ;;  %v1871_v55 = vld [vmem:[%s6817_s6 + $0x31e8] sm:$0xff]  ;;  %v1873_v7 = vld [vmem:[%s6817_s6 + $0x31f8] sm:$0xff]  ;;  %v5688_v8 = vpack.c.bf16 %v1854_v56, %v1846_v40 }
 0x3b6   : > { %v1928_v40 = vld [vmem:[%s6817_s6 + $0x33b0] sm:$0xff] }
 0x3b7   : > { %5653 = vmatpush1.bf16.msra.mxu0 %v5652_v20  ;;  %v5672_v20 = vpack.c.bf16 %v1790_v30, %v1782_v33  ;;  %v1870_v33 = vld [vmem:[%s6817_s6 + $0x31e0] sm:$0xff]  ;;  %v1864_v30 = vld [vmem:[%s6817_s6 + $0x31b0] sm:$0xff] }
 0x3b8   : > { %6101 = vmatpush1.bf16.msra.mxu1 %v6100_v21  ;;  %5655 = vmatprep.subr.bf16.mxu0 %v5654_v22  ;;  %v6120_v21 = vpack.c.bf16 %v1792_v14, %v1784_v50  ;;  %v5674_v22 = vpack.c.bf16 %v1807_v17, %v1799_v16  ;;  %v1879_v14 = vld [vmem:[%s6817_s6 + $0x3228] sm:$0xff]  ;;  %v1881_v16 = vld [vmem:[%s6817_s6 + $0x3238] sm:$0xff] }
 0x3b9   : > { %6103 = vmatprep.subr.bf16.mxu1 %v6102_v28  ;;  %v6122_v28 = vpack.c.bf16 %v1809_v19, %v1801_v18  ;;  %v1889_v17 = vld [vmem:[%s6817_s6 + $0x3278] sm:$0xff] }
 0x3bb   : > { %5657 = vmatpush1.bf16.msra.mxu0 %v5656_v41  ;;  %v5676_v41 = vpack.c.bf16 %v1806_v24, %v1798_v23  ;;  %v1880_v23 = vld [vmem:[%s6817_s6 + $0x3230] sm:$0xff]  ;;  %v6142_v24 = vpack.c.bf16 %v1889_v17, %v1881_v16 }
 0x3bc   : > { %6105 = vmatpush1.bf16.msra.mxu1 %v6104_v36  ;;  %5659 = vmatprep.subr.bf16.mxu0 %v5658_v37  ;;  %v6124_v36 = vpack.c.bf16 %v1808_v25, %v1800_v27  ;;  %v5678_v37 = vpack.c.bf16 %v1823_v31, %v1815_v29  ;;  %v1888_v27 = vld [vmem:[%s6817_s6 + $0x3270] sm:$0xff]  ;;  %v1903_v25 = vld [vmem:[%s6817_s6 + $0x32e8] sm:$0xff]  ;;  %v1897_v29 = vld [vmem:[%s6817_s6 + $0x32b8] sm:$0xff] }
 0x3bd   : > { %6107 = vmatprep.subr.bf16.mxu1 %v6106_v43  ;;  %v6126_v43 = vpack.c.bf16 %v1825_v35, %v1817_v34  ;;  %v1905_v31 = vld [vmem:[%s6817_s6 + $0x32f8] sm:$0xff]  ;;  %v6144_v35 = vpack.c.bf16 %v1888_v27, %v1880_v23  ;;  %v1968_v23 = vld [vmem:[%s6817_s6 + $0x34f0] sm:$0xff]  ;;  %v1983_v27 = vld [vmem:[%s6817_s6 + $0x3568] sm:$0xff] }
 0x3bf   : > { %5661 = vmatpush1.bf16.msra.mxu0 %v5660_v49  ;;  %v5680_v49 = vpack.c.bf16 %v1822_v15, %v1814_v39  ;;  %v1896_v39 = vld [vmem:[%s6817_s6 + $0x32b0] sm:$0xff]  ;;  %v6146_v15 = vpack.c.bf16 %v1905_v31, %v1897_v29 }
 0x3c0   : > { %6109 = vmatpush1.bf16.msra.mxu1 %v6108_v51  ;;  %5663 = vmatprep.subr.bf16.mxu0 %v5662_v26  ;;  %v6128_v51 = vpack.c.bf16 %v1824_v0, %v1816_v42  ;;  %v5682_v26 = vpack.c.bf16 %v1839_v45, %v1831_v44  ;;  %v1904_v42 = vld [vmem:[%s6817_s6 + $0x32f0] sm:$0xff]  ;;  %v1919_v0 = vld [vmem:[%s6817_s6 + $0x3368] sm:$0xff]  ;;  %v1913_v44 = vld [vmem:[%s6817_s6 + $0x3338] sm:$0xff] }
 0x3c1   : > { %6111 = vmatprep.subr.bf16.mxu1 %v6110_v57  ;;  %v6130_v57 = vpack.c.bf16 %v1841_v48, %v1833_v47  ;;  %v1921_v45 = vld [vmem:[%s6817_s6 + $0x3378] sm:$0xff]  ;;  %v6148_v48 = vpack.c.bf16 %v1904_v42, %v1896_v39  ;;  %v1984_v39 = vld [vmem:[%s6817_s6 + $0x3570] sm:$0xff]  ;;  %v1999_v42 = vld [vmem:[%s6817_s6 + $0x35e8] sm:$0xff] }
 0x3c3   : > { %5665 = vmatpush1.bf16.msra.mxu0 %v5664_v62  ;;  %v5684_v62 = vpack.c.bf16 %v1838_v52, %v1830_v5  ;;  %v1912_v5 = vld [vmem:[%s6817_s6 + $0x3330] sm:$0xff]  ;;  %v6150_v52 = vpack.c.bf16 %v1921_v45, %v1913_v44 }
 0x3c4   : > { %6113 = vmatpush1.bf16.msra.mxu1 %v6112_v32  ;;  %5667 = vmatprep.subr.bf16.mxu0 %v5666_v1  ;;  %v6132_v32 = vpack.c.bf16 %v1840_v58, %v1832_v54  ;;  %v5686_v1 = vpack.c.bf16 %v1855_v60, %v1847_v59  ;;  %v1920_v54 = vld [vmem:[%s6817_s6 + $0x3370] sm:$0xff]  ;;  %v1935_v58 = vld [vmem:[%s6817_s6 + $0x33e8] sm:$0xff]  ;;  %v1929_v59 = vld [vmem:[%s6817_s6 + $0x33b8] sm:$0xff] }
 0x3c5   : > { %6115 = vmatprep.subr.bf16.mxu1 %v6114_v3  ;;  %v6134_v3 = vpack.c.bf16 %v1857_v61, %v1849_v53  ;;  %v1937_v60 = vld [vmem:[%s6817_s6 + $0x33f8] sm:$0xff]  ;;  %v6152_v61 = vpack.c.bf16 %v1920_v54, %v1912_v5  ;;  %v2000_v5 = vld [vmem:[%s6817_s6 + $0x35f0] sm:$0xff]  ;;  %v2015_v54 = vld [vmem:[%s6817_s6 + $0x3668] sm:$0xff] }
 0x3c6   : > { %v6154_v56 = vpack.c.bf16 %v1937_v60, %v1929_v59 }
 0x3c7   : > { %5669 = vmatpush1.bf16.msra.mxu0 %v5668_v9  ;;  %v6136_v9 = vpack.c.bf16 %v1856_v4, %v1848_v2  ;;  %v1936_v2 = vld [vmem:[%s6817_s6 + $0x33f0] sm:$0xff]  ;;  %v1951_v4 = vld [vmem:[%s6817_s6 + $0x3468] sm:$0xff] }
 0x3c8   : > { %6117 = vmatpush1.bf16.msra.mxu1 %v6116_v10  ;;  %5671 = vmatprep.subr.bf16.mxu0 %v5670_v11  ;;  %v5690_v10 = vpack.c.bf16 %v1871_v55, %v1863_v6  ;;  %v1862_v11 = vld [vmem:[%s6817_s6 + $0x31a0] sm:$0xff]  ;;  %v1945_v6 = vld [vmem:[%s6817_s6 + $0x3438] sm:$0xff] }
 0x3c9   : > { %6119 = vmatprep.subr.bf16.mxu1 %v6118_v13  ;;  %v1872_v13 = vld [vmem:[%s6817_s6 + $0x31f0] sm:$0xff]  ;;  %v5692_v18 = vpack.c.bf16 %v1870_v33, %v1862_v11  ;;  %v1953_v55 = vld [vmem:[%s6817_s6 + $0x3478] sm:$0xff] }
 0x3ca   : > { %v6140_v19 = vpack.c.bf16 %v1872_v13, %v1864_v30  ;;  %v1944_v11 = vld [vmem:[%s6817_s6 + $0x3430] sm:$0xff]  ;;  %v6158_v33 = vpack.c.bf16 %v1953_v55, %v1945_v6  ;;  %v1967_v13 = vld [vmem:[%s6817_s6 + $0x34e8] sm:$0xff] }
 0x3cb   : > { %5673 = vmatpush1.bf16.msra.mxu0 %v5672_v20  ;;  %v1952_v30 = vld [vmem:[%s6817_s6 + $0x3470] sm:$0xff] }
 0x3cc   : > { %6121 = vmatpush1.bf16.msra.mxu1 %v6120_v21  ;;  %5675 = vmatprep.subr.bf16.mxu0 %v5674_v22  ;;  %v1878_v21 = vld [vmem:[%s6817_s6 + $0x3220] sm:$0xff]  ;;  %v6160_v17 = vpack.c.bf16 %v1952_v30, %v1944_v11  ;;  %v2032_v11 = vld [vmem:[%s6817_s6 + $0x36f0] sm:$0xff]  ;;  %v2047_v30 = vld [vmem:[%s6817_s6 + $0x3768] sm:$0xff] }
 0x3cd   : > { %6123 = vmatprep.subr.bf16.mxu1 %v6122_v28  ;;  %v1886_v22 = vld [vmem:[%s6817_s6 + $0x3260] sm:$0xff]  ;;  %v1895_v28 = vld [vmem:[%s6817_s6 + $0x32a8] sm:$0xff] }
 0x3ce   : > { %v5696_v34 = vpack.c.bf16 %v1886_v22, %v1878_v21  ;;  %v1960_v21 = vld [vmem:[%s6817_s6 + $0x34b0] sm:$0xff] }
 0x3cf   : > { %5677 = vmatpush1.bf16.msra.mxu0 %v5676_v41  ;;  %v5698_v41 = vpack.c.bf16 %v1903_v25, %v1895_v28  ;;  %v1977_v28 = vld [vmem:[%s6817_s6 + $0x3538] sm:$0xff]  ;;  %v6164_v31 = vpack.c.bf16 %v1968_v23, %v1960_v21  ;;  %v2048_v21 = vld [vmem:[%s6817_s6 + $0x3770] sm:$0xff]  ;;  %v2063_v23 = vld [vmem:[%s6817_s6 + $0x37e8] sm:$0xff] }
 0x3d0   : > { %6125 = vmatpush1.bf16.msra.mxu1 %v6124_v36  ;;  %5679 = vmatprep.subr.bf16.mxu0 %v5678_v37  ;;  %v1894_v36 = vld [vmem:[%s6817_s6 + $0x32a0] sm:$0xff]  ;;  %v1985_v25 = vld [vmem:[%s6817_s6 + $0x3578] sm:$0xff] }
 0x3d1   : > { %6127 = vmatprep.subr.bf16.mxu1 %v6126_v43  ;;  %v1902_v37 = vld [vmem:[%s6817_s6 + $0x32e0] sm:$0xff]  ;;  %v1911_v43 = vld [vmem:[%s6817_s6 + $0x3328] sm:$0xff] }
 0x3d2   : > { %3557 = vmatmul.mubr.f32.vlgmr.msra.gmra.mrb[2].mxu0 %v7575_v38  ;;  %v5700_v47 = vpack.c.bf16 %v1902_v37, %v1894_v36  ;;  %v1976_v36 = vld [vmem:[%s6817_s6 + $0x3530] sm:$0xff]  ;;  %v6166_v37 = vpack.c.bf16 %v1985_v25, %v1977_v28 }
 0x3d3   : > { %5681 = vmatpush1.bf16.msra.mxu0 %v5680_v49  ;;  %4054 = vmatmul.mubr.f32.vlgmr.msra.gmra.mrb[2].mxu1 %v7575_v38  ;;  %v1865_v38 = vld [vmem:[%s6817_s6 + $0x31b8] sm:$0xff]  ;;  %v5702_v49 = vpack.c.bf16 %v1919_v0, %v1911_v43  ;;  %v6168_v45 = vpack.c.bf16 %v1984_v39, %v1976_v36  ;;  %v2064_v36 = vld [vmem:[%s6817_s6 + $0x37f0] sm:$0xff] }
 0x3d4   : > { %6129 = vmatpush1.bf16.msra.mxu1 %v6128_v51  ;;  %5683 = vmatprep.subr.bf16.mxu0 %v5682_v26  ;;  %v6138_v50 = vpack.c.bf16 %v1873_v7, %v1865_v38  ;;  %v1910_v51 = vld [vmem:[%s6817_s6 + $0x3320] sm:$0xff]  ;;  %v6156_v7 = vpack.c.bf16 %v1936_v2, %v1928_v40  ;;  %v1993_v43 = vld [vmem:[%s6817_s6 + $0x35b8] sm:$0xff]  ;;  %v2016_v40 = vld [vmem:[%s6817_s6 + $0x3670] sm:$0xff] }
 0x3d5   : > { %6131 = vmatprep.subr.bf16.mxu1 %v6130_v57  ;;  %3627 = vmatprep.mubr.f32.mxu0 %v7726_v46  ;;  %v1918_v26 = vld [vmem:[%s6817_s6 + $0x3360] sm:$0xff]  ;;  %v1927_v57 = vld [vmem:[%s6817_s6 + $0x33a8] sm:$0xff]  ;;  %v2001_v0 = vld [vmem:[%s6817_s6 + $0x35f8] sm:$0xff] }
 0x3d6   : > { %4124 = vmatprep.mubr.f32.mxu1 %v7726_v46  ;;  %v1887_v46 = vld [vmem:[%s6817_s6 + $0x3268] sm:$0xff]  ;;  %v5704_v53 = vpack.c.bf16 %v1918_v26, %v1910_v51  ;;  %v1992_v51 = vld [vmem:[%s6817_s6 + $0x35b0] sm:$0xff]  ;;  %v6170_v26 = vpack.c.bf16 %v2001_v0, %v1993_v43 }
 0x3d7   : > { %5685 = vmatpush1.bf16.msra.mxu0 %v5684_v62  ;;  %v5694_v20 = vpack.c.bf16 %v1887_v46, %v1879_v14  ;;  %v5706_v62 = vpack.c.bf16 %v1935_v58, %v1927_v57  ;;  %v1961_v14 = vld [vmem:[%s6817_s6 + $0x34b8] sm:$0xff]  ;;  %v6172_v60 = vpack.c.bf16 %v2000_v5, %v1992_v51  ;;  %v2031_v2 = vld [vmem:[%s6817_s6 + $0x36e8] sm:$0xff]  ;;  %v273_v51 = vld [vmem:[%s6835_s27 + $0x8] sm:$0xff] }
 0x3d8   : > { %6133 = vmatpush1.bf16.msra.mxu1 %v6132_v32  ;;  %5687 = vmatprep.subr.bf16.mxu0 %v5686_v1  ;;  %v1926_v32 = vld [vmem:[%s6817_s6 + $0x33a0] sm:$0xff]  ;;  %v1969_v46 = vld [vmem:[%s6817_s6 + $0x34f8] sm:$0xff] }
 0x3d9   : > { %6135 = vmatprep.subr.bf16.mxu1 %v6134_v3  ;;  %v1934_v1 = vld [vmem:[%s6817_s6 + $0x33e0] sm:$0xff]  ;;  %v1943_v3 = vld [vmem:[%s6817_s6 + $0x3428] sm:$0xff]  ;;  %v6162_v22 = vpack.c.bf16 %v1969_v46, %v1961_v14  ;;  %v2009_v57 = vld [vmem:[%s6817_s6 + $0x3638] sm:$0xff] }
 0x3da   : > { %v5708_v38 = vpack.c.bf16 %v1934_v1, %v1926_v32  ;;  %v2017_v58 = vld [vmem:[%s6817_s6 + $0x3678] sm:$0xff]  ;;  %v2008_v32 = vld [vmem:[%s6817_s6 + $0x3630] sm:$0xff] }
 0x3db   : > { %5689 = vmatpush1.bf16.msra.mxu0 %v5688_v8  ;;  %v5710_v8 = vpack.c.bf16 %v1951_v4, %v1943_v3  ;;  %v6174_v1 = vpack.c.bf16 %v2017_v58, %v2009_v57  ;;  %v2025_v3 = vld [vmem:[%s6817_s6 + $0x36b8] sm:$0xff]  ;;  %v6176_v55 = vpack.c.bf16 %v2016_v40, %v2008_v32  ;;  %v4193_v57 = vsub.s32 (!%p4394_p0), 1, %v6927_v63 }
 0x3dc   : > { %6137 = vmatpush1.bf16.msra.mxu1 %v6136_v9  ;;  %5691 = vmatprep.subr.bf16.mxu0 %v5690_v10  ;;  %v1942_v9 = vld [vmem:[%s6817_s6 + $0x3420] sm:$0xff]  ;;  %v2033_v4 = vld [vmem:[%s6817_s6 + $0x36f8] sm:$0xff]  ;;  %v4197_v58 = vsub.s32 (!%p4394_p0), 2, %v6927_v63 }
 0x3dd   : > { %6139 = vmatprep.subr.bf16.mxu1 %v6138_v50  ;;  %v1950_v10 = vld [vmem:[%s6817_s6 + $0x3460] sm:$0xff]  ;;  %v1959_v50 = vld [vmem:[%s6817_s6 + $0x34a8] sm:$0xff] }
 0x3de   : > { %v5712_v16 = vpack.c.bf16 %v1950_v10, %v1942_v9  ;;  %v2024_v9 = vld [vmem:[%s6817_s6 + $0x36b0] sm:$0xff]  ;;  %v6178_v10 = vpack.c.bf16 %v2033_v4, %v2025_v3 }
 0x3df   : > { %5693 = vmatpush1.bf16.msra.mxu0 %v5692_v18  ;;  %v5714_v18 = vpack.c.bf16 %v1967_v13, %v1959_v50  ;;  %v2041_v50 = vld [vmem:[%s6817_s6 + $0x3738] sm:$0xff]  ;;  %v6180_v46 = vpack.c.bf16 %v2032_v11, %v2024_v9 }
 0x3e0   : > { %6141 = vmatpush1.bf16.msra.mxu1 %v6140_v19  ;;  %5695 = vmatprep.subr.bf16.mxu0 %v5694_v20  ;;  %v1958_v19 = vld [vmem:[%s6817_s6 + $0x34a0] sm:$0xff]  ;;  %v2049_v13 = vld [vmem:[%s6817_s6 + $0x3778] sm:$0xff] }
 0x3e1   : > { %6143 = vmatprep.subr.bf16.mxu1 %v6142_v24  ;;  %v1966_v20 = vld [vmem:[%s6817_s6 + $0x34e0] sm:$0xff]  ;;  %v1975_v24 = vld [vmem:[%s6817_s6 + $0x3528] sm:$0xff] }
 0x3e2   : > { %v5716_v29 = vpack.c.bf16 %v1966_v20, %v1958_v19  ;;  %v2040_v19 = vld [vmem:[%s6817_s6 + $0x3730] sm:$0xff]  ;;  %v6182_v20 = vpack.c.bf16 %v2049_v13, %v2041_v50 }
 0x3e3   : > { %5697 = vmatpush1.bf16.msra.mxu0 %v5696_v34  ;;  %v5718_v34 = vpack.c.bf16 %v1983_v27, %v1975_v24  ;;  %v2057_v24 = vld [vmem:[%s6817_s6 + $0x37b8] sm:$0xff]  ;;  %v6184_v25 = vpack.c.bf16 %v2048_v21, %v2040_v19 }
 0x3e4   : > { %6145 = vmatpush1.bf16.msra.mxu1 %v6144_v35  ;;  %5699 = vmatprep.subr.bf16.mxu0 %v5698_v41  ;;  %v1974_v35 = vld [vmem:[%s6817_s6 + $0x3520] sm:$0xff]  ;;  %v2065_v27 = vld [vmem:[%s6817_s6 + $0x37f8] sm:$0xff] }
 0x3e5   : > { %6147 = vmatprep.subr.bf16.mxu1 %v6146_v15  ;;  %v1982_v41 = vld [vmem:[%s6817_s6 + $0x3560] sm:$0xff]  ;;  %v1991_v15 = vld [vmem:[%s6817_s6 + $0x35a8] sm:$0xff] }
 0x3e6   : > { %v5720_v44 = vpack.c.bf16 %v1982_v41, %v1974_v35  ;;  %v6186_v35 = vpack.c.bf16 %v2065_v27, %v2057_v24  ;;  %v2056_v41 = vld [vmem:[%s6817_s6 + $0x37b0] sm:$0xff] }
 0x3e7   : > { %5701 = vmatpush1.bf16.msra.mxu0 %v5700_v47  ;;  %v5722_v47 = vpack.c.bf16 %v1999_v42, %v1991_v15  ;;  %v6188_v39 = vpack.c.bf16 %v2064_v36, %v2056_v41  ;;  %v6360_v15 = vld.sshfl [vmem:[%s6949_s12 + $0x18] sm:$0x33 pattern:$0x76325410] }
 0x3e8   : > { %6149 = vmatpush1.bf16.msra.mxu1 %v6148_v48  ;;  %5703 = vmatprep.subr.bf16.mxu0 %v5702_v49  ;;  %v1990_v48 = vld [vmem:[%s6817_s6 + $0x35a0] sm:$0xff] }
 0x3e9   : > { %6151 = vmatprep.subr.bf16.mxu1 %v6150_v52  ;;  %v1998_v49 = vld [vmem:[%s6817_s6 + $0x35e0] sm:$0xff]  ;;  %v2007_v52 = vld [vmem:[%s6817_s6 + $0x3628] sm:$0xff] }
 0x3ea   : > { %v5724_v59 = vpack.c.bf16 %v1998_v49, %v1990_v48 }
 0x3eb   : > { %5705 = vmatpush1.bf16.msra.mxu0 %v5704_v53  ;;  %v5726_v53 = vpack.c.bf16 %v2015_v54, %v2007_v52  ;;  %v4185_v52 = vld [vmem:[%s222_s11] sm:$0xff] (!%p4394_p0)  ;;  %v4189_v54 = vsub.s32 (!%p4394_p0), 0, %v6927_v63 }
 0x3ec   : > { %6153 = vmatpush1.bf16.msra.mxu1 %v6152_v61  ;;  %5707 = vmatprep.subr.bf16.mxu0 %v5706_v62  ;;  %v2006_v61 = vld [vmem:[%s6817_s6 + $0x3620] sm:$0xff]  ;;  %v4198_v40 = vrot.slane (!%p4394_p0), %v4185_v52, %v4197_v58 }
 0x3ed   : > { %6155 = vmatprep.subr.bf16.mxu1 %v6154_v56  ;;  %v2014_v62 = vld [vmem:[%s6817_s6 + $0x3660] sm:$0xff]  ;;  %v2023_v56 = vld [vmem:[%s6817_s6 + $0x36a8] sm:$0xff]  ;;  %v4190_v32 = vrot.slane (!%p4394_p0), %v4185_v52, %v4189_v54 }
 0x3ee   : > { %v5728_v6 = vpack.c.bf16 %v2014_v62, %v2006_v61  ;;  %v4213_v61 = vsub.s32 (!%p4394_p0), 6, %v6927_v63  ;;  %v4217_v62 = vsub.s32 (!%p4394_p0), 7, %v6927_v63 }
 0x3ef   : > { %5709 = vmatpush1.bf16.msra.mxu0 %v5708_v38  ;;  %v5730_v38 = vpack.c.bf16 %v2031_v2, %v2023_v56 }
 0x3f0   : > { %6157 = vmatpush1.bf16.msra.mxu1 %v6156_v7  ;;  %5711 = vmatprep.subr.bf16.mxu0 %v5710_v8  ;;  %v2022_v7 = vld [vmem:[%s6817_s6 + $0x36a0] sm:$0xff]  ;;  %v4214_v4 = vrot.slane (!%p4394_p0), %v4185_v52, %v4213_v61 }
 0x3f1   : > { %6159 = vmatprep.subr.bf16.mxu1 %v6158_v33  ;;  %v2030_v8 = vld [vmem:[%s6817_s6 + $0x36e0] sm:$0xff]  ;;  %v2039_v33 = vld [vmem:[%s6817_s6 + $0x3728] sm:$0xff] }
 0x3f2   : > { %v5732_v14 = vpack.c.bf16 %v2030_v8, %v2022_v7 }
 0x3f3   : > { %5713 = vmatpush1.bf16.msra.mxu0 %v5712_v16  ;;  %v5734_v16 = vpack.c.bf16 %v2047_v30, %v2039_v33 }
 0x3f4   : > { %6161 = vmatpush1.bf16.msra.mxu1 %v6160_v17  ;;  %5715 = vmatprep.subr.bf16.mxu0 %v5714_v18  ;;  %v2038_v17 = vld [vmem:[%s6817_s6 + $0x3720] sm:$0xff] }
 0x3f5   : > { %6163 = vmatprep.subr.bf16.mxu1 %v6162_v22  ;;  %v2046_v18 = vld [vmem:[%s6817_s6 + $0x3760] sm:$0xff]  ;;  %v2055_v22 = vld [vmem:[%s6817_s6 + $0x37a8] sm:$0xff] }
 0x3f6   : > { %v5736_v28 = vpack.c.bf16 %v2046_v18, %v2038_v17 }
 0x3f7   : > { %5717 = vmatpush1.bf16.msra.mxu0 %v5716_v29  ;;  %v5738_v29 = vpack.c.bf16 %v2063_v23, %v2055_v22 }
 0x3f8   : > { %6165 = vmatpush1.bf16.msra.mxu1 %v6164_v31  ;;  %5719 = vmatprep.subr.bf16.mxu0 %v5718_v34  ;;  %v2054_v31 = vld [vmem:[%s6817_s6 + $0x37a0] sm:$0xff] }
 0x3f9   : > { %6167 = vmatprep.subr.bf16.mxu1 %v6166_v37  ;;  %v2062_v34 = vld [vmem:[%s6817_s6 + $0x37e0] sm:$0xff] }
 0x3fa   : > { %v5740_v37 = vpack.c.bf16 %v2062_v34, %v2054_v31 }
 0x3fb   : > { %5721 = vmatpush1.bf16.msra.mxu0 %v5720_v44 }
 0x3fc   : > { %6169 = vmatpush1.bf16.msra.mxu1 %v6168_v45  ;;  %5723 = vmatprep.subr.bf16.mxu0 %v5722_v47 }
 0x3fd   : > { %6171 = vmatprep.subr.bf16.mxu1 %v6170_v26 }
 0x3ff   : > { %5725 = vmatpush1.bf16.msra.mxu0 %v5724_v59  ;;  %v4201_v59 = vsub.s32 (!%p4394_p0), 3, %v6927_v63 }
 0x400   : > { %6173 = vmatpush1.bf16.msra.mxu1 %v6172_v60  ;;  %5727 = vmatprep.subr.bf16.mxu0 %v5726_v53  ;;  %v4205_v60 = vsub.s32 (!%p4394_p0), 4, %v6927_v63  ;;  %v4209_v53 = vsub.s32 (!%p4394_p0), 5, %v6927_v63  ;;  %v4183_v63 = vld [vmem:[%s6835_s27] sm:$0xff] (!%p4394_p0) }
 0x401   : > { %6175 = vmatprep.subr.bf16.mxu1 %v6174_v1  ;;  %v4194_v1 = vrot.slane (!%p4394_p0), %v4185_v52, %v4193_v57  ;;  %v4202_v56 = vrot.slane (!%p4394_p0), %v4185_v52, %v4201_v59 }
 0x402   : > { %v4206_v2 = vrot.slane (!%p4394_p0), %v4185_v52, %v4205_v60  ;;  %v4210_v3 = vrot.slane (!%p4394_p0), %v4185_v52, %v4209_v53 }
 0x403   : > { %5729 = vmatpush1.bf16.msra.mxu0 %v5728_v6  ;;  %v4218_v6 = vrot.slane (!%p4394_p0), %v4185_v52, %v4217_v62 }
 0x404   : > { %6177 = vmatpush1.bf16.msra.mxu1 %v6176_v55  ;;  %5731 = vmatprep.subr.bf16.mxu0 %v5730_v38  ;;  %v4219_v55 = vcombine.low (!%p4394_p0), %v4190_v32, %v4194_v1  ;;  %v4220_v38 = vcombine.low (!%p4394_p0), %v4198_v40, %v4202_v56  ;;  %v4236_v7 = vcombine.low (!%p4394_p0), %v4206_v2, %v4210_v3 }
 0x405   : > { %6179 = vmatprep.subr.bf16.mxu1 %v6178_v10  ;;  %v4237_v8 = vcombine.low (!%p4394_p0), %v4214_v4, %v4218_v6 }
 0x406   : > { %v4227_v9 = vrot.slane (!%p4394_p0), %v4219_v55, %v6939_v12  ;;  %v4234_v10 = vrot.slane (!%p4394_p0), %v4220_v38, %v6939_v12  ;;  %v4244_v11 = vrot.slane (!%p4394_p0), %v4236_v7, %v6939_v12 }
 0x407   : > { %5733 = vmatpush1.bf16.msra.mxu0 %v5732_v14  ;;  %v4251_v33 = vrot.slane (!%p4394_p0), %v4237_v8, %v6939_v12 }
 0x408   : > { %6181 = vmatpush1.bf16.msra.mxu1 %v6180_v46  ;;  %5735 = vmatprep.subr.bf16.mxu0 %v5734_v16  ;;  %v4235_v30 = vcombine.low (!%p4394_p0), %v4227_v9, %v4234_v10 }
 0x409   : > { %6183 = vmatprep.subr.bf16.mxu1 %v6182_v20  ;;  %v4252_v13 = vcombine.low (!%p4394_p0), %v4244_v11, %v4251_v33 }
 0x40a   : > { %v4255_v14 = vadd.f32 (!%p4394_p0), %v4235_v30, %v4183_v63 }
 0x40b   : > { %5737 = vmatpush1.bf16.msra.mxu0 %v5736_v28 }
 0x40c   : > { %6185 = vmatpush1.bf16.msra.mxu1 %v6184_v25  ;;  %5739 = vmatprep.subr.bf16.mxu0 %v5738_v29  ;;  %v4257_v16 = vmax.f32 (!%p4394_p0), %v4255_v14, 0.0 }
 0x40d   : > { %6187 = vmatprep.subr.bf16.mxu1 %v6186_v35 }
 0x40e   : > { %4259 = vst [vmem:[%s6835_s27] sm:$0xff] (!%p4394_p0), %v4257_v16 }
 0x40f   : > { %5741 = vmatpush1.bf16.msra.mxu0 %v5740_v37 }
 0x410   : > { %6189 = vmatpush1.bf16.msra.mxu1 %v6188_v39 }
 0x412   : > { %3628 = vmatmul.mubr.f32.vlgmr.msra.gmra.mrb[2].mxu0 %v6360_v15 }
 0x413   : > { %4125 = vmatmul.mubr.f32.vlgmr.msra.gmra.mrb[2].mxu1 %v6360_v15 }
 0x4e5   : > { %v3629_v42 = vpop.f32.mrb[2].mxu0 }
 0x4e6   : > { %v4126_v43 = vpop.f32.mrb[2].mxu1  ;;  %v3631_v0 = vpop.f32.mrb[3].mxu0 }
 0x4e7   : > { %v4156_v44 = vcombine.low %v3629_v42, %v3631_v0  ;;  %v4128_v45 = vpop.f32.mrb[3].mxu1 }
 0x4e8   : > { %v4157_v47 = vcombine.low %v4126_v43, %v4128_v45 }
 0x4e9   : > { %v4164_v48 = vrot.slane %v4156_v44, %v6939_v12 }
 0x4ea   : > { %v4171_v49 = vrot.slane %v4157_v47, %v6939_v12  ;;  %4182 = sbr.rel (%p4394_p0) target bundleno = 1277 (0x4fd), region = 52 }
 0x4ec   : > { %v4172_v26 = vcombine.low %v4164_v48, %v4171_v49 }
 0x4ee   : > { %v4176_v5 = vadd.f32 %v4172_v26, %v273_v51 }
 0x4f0   : > { %4178 = vst [vmem:[%s6835_s27 + $0x8] sm:$0xff] %v4176_v5 }
 0x4f7   : > { %v4184_v50 = vld [vmem:[%s6835_s27 + $0x8] sm:$0xff] }
 0x4f8   : > { %v4256_v46 = vadd.f32 %v4252_v13, %v4184_v50 }
 0x4fa   : > { %v4258_v17 = vmax.f32 %v4256_v46, 0.0 }
 0x4fc   : > { %4260 = vst [vmem:[%s6835_s27 + $0x8] sm:$0xff] %v4258_v17 }
 0x4fd PF: > { %s17_s22 = sadd.s32 1, %s6547_s22   ;;  %s8861_s30 = sld [smem:[#allocation10_spill]] }
 0x4fe   : > { %p14_p2 = scmp.ge.s32.totalorder %s17_s22, 58   ;;  %s8862_s24 = sld [smem:[#allocation11_spill]] }
 0x4ff   : > { %s8863_s12 = smov %s6511_s13  ;;  %s8864_s13 = smov %s6515_s14 }
 0x500   : > { %s8865_s14 = smov %s6749_s5  ;;  %s8866_s15 = smov %s6523_s16 }
 0x501   : > { %s8867_s16 = smov %s6527_s17  ;;  %s8868_s17 = smov %s6661_s9 }
 0x502   : > { %s8869_s18 = smov %s6539_s20  ;;  %s8870_s19 = smov %s6543_s21 }
 0x503   : > { %s8871_s20 = smov %s8861_s30  ;;  %16 = sbr.rel (!%p14_p2) target bundleno = 10 (0xa), region = 97 }
 0x504   : > { %s8872_s21 = smov %s8862_s24 }
 0x50a   :  { %4283 = vsyncpa [#allocation3], 1 }
 0x50b   :  { %4285 = vsyncpa [#allocation3 + $0x1], 1 }
 0x50c   :  { %4286 = vsyncpa [#allocation5], 1 }
 0x50d   :  { %4288 = vsyncpa [#allocation5 + $0x1], 1 }

</bundles_post_ra>
